<compile_context>
chip_gen: v7x
topology: tpu7x:2x2x1
jax: 0.10.0
libtpu: 0.0.40
codegen_flags: <defaults>
</compile_context>

<pallas_src>
import functools
import numpy as np
import jax
import jax.numpy as jnp
from jax import lax
from jax.experimental import pallas as pl
from jax.experimental.pallas import tpu as pltpu

N_CLASSES = 10
BATCH_PAD = 16                       # bf16 (16,128)-tile aligned batch rows
VMEM_LIMIT = 32 * 1024 * 1024


# ---------------------------------------------------------------------------
# Pallas kernels
# ---------------------------------------------------------------------------
def _linear_kernel(x_ref, w_ref, b_ref, o_ref, *, relu):
    # x_ref: (MP, K) bf16; w_ref: (1, K, TN) bf16 (one contiguous HBM slab);
    # b_ref: (1, TN) f32; o_ref: (MP, TN) bf16 or f32.
    acc = jnp.dot(x_ref[...], w_ref[0], preferred_element_type=jnp.float32)
    acc = acc + b_ref[...]
    if relu:
        acc = jnp.maximum(acc, 0.0)
    o_ref[...] = acc.astype(o_ref.dtype)          # f32 epilogue, cast at store


def _conv_pool_kernel(x_ref, w_ref, b_ref, o_ref):
    # x_ref: (4, K, TN) bf16 -- one im2col patch matrix per 2x2 pool phase.
    # w_ref: (O, K) bf16, b_ref: (O, 1) f32, o_ref: (O, TN) f32.
    w = w_ref[...]
    m = None
    for p in range(4):                      # 4 small MXU dots + running max
        y = jnp.dot(w, x_ref[p], preferred_element_type=jnp.float32)
        m = y if m is None else jnp.maximum(m, y)
    o_ref[...] = jnp.maximum(m + b_ref[...], 0.0)


# ---------------------------------------------------------------------------
# Fully-connected layer: y = x @ W.T + b with pre-tiled (NT, K, TN) weights
# ---------------------------------------------------------------------------
def linear_pallas(x, w_tiled, b_1n, relu, out_dtype):
    """x: (MP, K) with MP % 16 == 0 (padded rows may carry garbage -- rows
    never mix in a matmul).  w_tiled: (NT, K, TN) bf16 contiguous slabs,
    b_1n: (1, NT*TN) f32.  Returns (MP, NT*TN) in out_dtype."""
    mp, k = x.shape
    nt, kw_, tn = w_tiled.shape
    assert k == kw_ and mp % 16 == 0
    n = nt * tn

    return pl.pallas_call(
        functools.partial(_linear_kernel, relu=relu),
        out_shape=jax.ShapeDtypeStruct((mp, n), out_dtype),
        grid_spec=pltpu.PrefetchScalarGridSpec(
            num_scalar_prefetch=0,
            grid=(nt,),
            in_specs=[
                pl.BlockSpec((mp, k), lambda j: (0, 0)),        # activations
                pl.BlockSpec((1, k, tn), lambda j: (j, 0, 0)),  # weight slab j
                pl.BlockSpec((1, tn), lambda j: (0, j)),        # bias tile j
            ],
            out_specs=pl.BlockSpec((mp, tn), lambda j: (0, j)),
        ),
        compiler_params=pltpu.CompilerParams(
            dimension_semantics=("parallel",),
            vmem_limit_bytes=VMEM_LIMIT),
    )(x.astype(jnp.bfloat16), w_tiled, b_1n)


# ---------------------------------------------------------------------------
# Fused Conv2d(VALID) + ReLU + MaxPool(2,2)  (channel-major in / out)
# ---------------------------------------------------------------------------
def _im2col_pool4(xc, kh, kw):
    """xc: channel-major (C, N, H, W) bf16 ->
    (4, C*kh*kw, N*(OH//2)*(OW//2)) patch matrices, one per 2x2 pool phase.
    The four members of each pool window share a column index across the
    phase matrices; K order is (C, kh, kw) to match weight.reshape(O, -1)."""
    c, n, h, w = xc.shape
    oh, ow = h - kh + 1, w - kw + 1
    ohh, owh = oh // 2, ow // 2
    mats = []
    for ph in range(2):
        for pw in range(2):
            slabs = []
            for i in range(kh):
                for j in range(kw):
                    r0, c0 = i + ph, j + pw
                    slabs.append(xc[:, :, r0:r0 + 2 * ohh:2,
                                        c0:c0 + 2 * owh:2])      # (C,N,OHh,OWh)
            p4 = jnp.stack(slabs, axis=1)           # (C, kh*kw, N, OHh, OWh)
            mats.append(p4.reshape(c * kh * kw, n * ohh * owh))
    return jnp.stack(mats, axis=0), ohh, owh        # (4, K, M4)


def conv_relu_pool_pallas(xc, wt, bias, kh, kw):
    """xc: (C, N, H, W), wt: (O, C*kh*kw) bf16, bias: (O, 1) f32.
    Returns pooled ReLU activations channel-major: (O, N, OH//2, OW//2) f32."""
    _, n, _, _ = xc.shape
    o, k = wt.shape
    patches, ohh, owh = _im2col_pool4(xc.astype(jnp.bfloat16), kh, kw)
    m4 = n * ohh * owh
    tn = 512 if m4 >= 512 else -(-m4 // 128) * 128   # lane-dense spatial tile
    mp = -(-m4 // tn) * tn
    if mp != m4:
        patches = jnp.pad(patches, ((0, 0), (0, 0), (0, mp - m4)))

    out = pl.pallas_call(
        _conv_pool_kernel,
        out_shape=jax.ShapeDtypeStruct((o, mp), jnp.float32),
        grid_spec=pltpu.PrefetchScalarGridSpec(
            num_scalar_prefetch=0,
            grid=(mp // tn,),
            in_specs=[
                pl.BlockSpec((4, k, tn), lambda m: (0, 0, m)),   # patch phases
                pl.BlockSpec((o, k), lambda m: (0, 0)),           # bf16 weights
                pl.BlockSpec((o, 1), lambda m: (0, 0)),           # f32 bias
            ],
            out_specs=pl.BlockSpec((o, tn), lambda m: (0, m)),
        ),
        compiler_params=pltpu.CompilerParams(
            dimension_semantics=("parallel",),
            vmem_limit_bytes=VMEM_LIMIT),
    )(patches, wt, bias)

    # Padded columns hold relu(bias) garbage -> slice them off before use.
    return out[:, :m4].reshape(o, n, ohh, owh)


# ---------------------------------------------------------------------------
# Parameters (deterministic, PyTorch-like uniform(+-1/sqrt(fan_in)))
# ---------------------------------------------------------------------------
def init_params(key):
    def uniform(k, shape, fan_in):
        bound = 1.0 / np.sqrt(fan_in)
        return jax.random.uniform(k, shape, jnp.float32, -bound, bound)

    ks = jax.random.split(key, 10)
    return {
        "conv1_w": uniform(ks[0], (6, 3, 3, 3), 3 * 3 * 3),
        "conv1_b": uniform(ks[1], (6,), 3 * 3 * 3),
        "conv2_w": uniform(ks[2], (16, 6, 3, 3), 6 * 3 * 3),
        "conv2_b": uniform(ks[3], (16,), 6 * 3 * 3),
        "fc1_w": uniform(ks[4], (2048, 16 * 14 * 14), 16 * 14 * 14),
        "fc1_b": uniform(ks[5], (2048,), 16 * 14 * 14),
        "fc2_w": uniform(ks[6], (1024, 2048), 2048),
        "fc2_b": uniform(ks[7], (1024,), 2048),
        "fc3_w": uniform(ks[8], (N_CLASSES, 1024), 1024),
        "fc3_b": uniform(ks[9], (N_CLASSES,), 1024),
    }


def _prep_linear(w, b, tn):
    """PyTorch (N, K) weight -> (N/tn, K, tn) bf16: one contiguous HBM slab
    per output tile (single linear DMA stream per grid step).  Output dim is
    zero-padded to a multiple of tn (only fc3: 10 -> 128)."""
    n, k = w.shape
    npad = -(-n // tn) * tn
    wt = jnp.pad(w, ((0, npad - n), (0, 0)))                      # (npad, K)
    wt = jnp.transpose(wt.reshape(npad // tn, tn, k), (0, 2, 1))  # (NT, K, tn)
    bt = jnp.pad(b, (0, npad - n)).reshape(1, npad)
    return wt.astype(jnp.bfloat16), bt.astype(jnp.float32)


def prepare_params(p):
    """One-time kernel-layout / dtype prep (outside the forward)."""
    bf = jnp.bfloat16
    fc1_w, fc1_b = _prep_linear(p["fc1_w"], p["fc1_b"], tn=1024)  # (2,3136,1024)
    fc2_w, fc2_b = _prep_linear(p["fc2_w"], p["fc2_b"], tn=512)   # (2,2048, 512)
    fc3_w, fc3_b = _prep_linear(p["fc3_w"], p["fc3_b"], tn=128)   # (1,1024, 128)
    return {
        "conv1_w": p["conv1_w"].reshape(6, -1).astype(bf),
        "conv1_b": p["conv1_b"].reshape(-1, 1).astype(jnp.float32),
        "conv2_w": p["conv2_w"].reshape(16, -1).astype(bf),
        "conv2_b": p["conv2_b"].reshape(-1, 1).astype(jnp.float32),
        "fc1_w": fc1_w, "fc1_b": fc1_b,
        "fc2_w": fc2_w, "fc2_b": fc2_b,
        "fc3_w": fc3_w, "fc3_b": fc3_b,
    }


def net_forward(x, kp):
    n = x.shape[0]
    # One tiny NCHW -> channel-major transpose at the top; the conv stages
    # then chain in the lane-dense (C, N, H, W) layout with no transposes.
    xc = jnp.transpose(x.astype(jnp.float32), (1, 0, 2, 3)).astype(jnp.bfloat16)
    h = conv_relu_pool_pallas(xc, kp["conv1_w"], kp["conv1_b"], 3, 3)  # (6,N,30,30)
    h = conv_relu_pool_pallas(h, kp["conv2_w"], kp["conv2_b"], 3, 3)   # (16,N,14,14)

    # Single transpose back to NCHW for the PyTorch-style flatten.
    flat = jnp.transpose(h, (1, 0, 2, 3)).reshape(n, -1).astype(jnp.bfloat16)
    mp = max(BATCH_PAD, -(-n // BATCH_PAD) * BATCH_PAD)
    flat = jnp.pad(flat, ((0, mp - n), (0, 0)))

    h = linear_pallas(flat, kp["fc1_w"], kp["fc1_b"], relu=True,
                      out_dtype=jnp.bfloat16)
    h = linear_pallas(h, kp["fc2_w"], kp["fc2_b"], relu=True,
                      out_dtype=jnp.bfloat16)
    h = linear_pallas(h, kp["fc3_w"], kp["fc3_b"], relu=False,
                      out_dtype=jnp.float32)
    # Padded batch rows (relu(b) garbage) and zero-padded fc3 lanes drop here.
    return h[:n, :N_CLASSES]


# ---------------------------------------------------------------------------
# Pure-JAX reference (same bf16-operand / f32-accumulate arithmetic)
# ---------------------------------------------------------------------------
def reference_forward(x, p):
    bf = jnp.bfloat16

    def conv(x, w, b):
        y = lax.conv_general_dilated(
            x.astype(bf), w.astype(bf), (1, 1), "VALID",
            dimension_numbers=("NCHW", "OIHW", "NCHW"),
            preferred_element_type=jnp.float32)
        return jnp.maximum(y + b[None, :, None, None], 0.0)

    def pool(x):
        return lax.reduce_window(x, -jnp.inf, lax.max,
                                 (1, 1, 2, 2), (1, 1, 2, 2), "VALID")

    def dense(h, w, b, relu):
        y = jnp.dot(h.astype(bf), w.T.astype(bf),
                    preferred_element_type=jnp.float32) + b
        return jnp.maximum(y, 0.0) if relu else y

    h = pool(conv(x.astype(jnp.float32), p["conv1_w"], p["conv1_b"]))
    h = pool(conv(h, p["conv2_w"], p["conv2_b"]))
    flat = h.reshape(h.shape[0], -1)
    h = dense(flat, p["fc1_w"], p["fc1_b"], True)
    h = dense(h, p["fc2_w"], p["fc2_b"], True)
    return dense(h, p["fc3_w"], p["fc3_b"], False)


if __name__ == "__main__":
    key = jax.random.PRNGKey(0)
    pkey, xkey = jax.random.split(key)
    params = init_params(pkey)
    kparams = prepare_params(params)   # one-time weight layout / bf16 prep

    # 62x62 input is what fc1's 16*14*14 flat feature size implies; batch 2.
    x = jax.random.normal(xkey, (2, 3, 62, 62), jnp.float32)

    fwd = jax.jit(net_forward)
    out = jax.block_until_ready(fwd(x, kparams))
    assert out.shape == (2, N_CLASSES), out.shape

    ref = jax.block_until_ready(jax.jit(reference_forward)(x, params))
    np.testing.assert_allclose(np.asarray(out), np.asarray(ref),
                               rtol=2e-2, atol=2e-2)

    print("KERNEL_OK")
</pallas_src>

<mosaic_0001>
module attributes {stable_mosaic.version = 11 : i64} {
  func.func @_conv_pool_kernel(%arg0: i32, %arg1: memref<4x27x512xbf16, #tpu.memory_space<vmem>>, %arg2: memref<6x27xbf16, #tpu.memory_space<vmem>>, %arg3: memref<6x1xf32, #tpu.memory_space<vmem>>, %arg4: memref<6x512xf32, #tpu.memory_space<vmem>>) attributes {dimension_semantics = [#tpu.dimension_semantics<parallel>], iteration_bounds = array<i64: 4>, scalar_prefetch = 0 : i64, scratch_operands = 0 : i64, tpu.core_type = #tpu.core_type<tc>, window_params = [{transform_indices = @transform_0, window_bounds = array<i64: 4, 27, 512>}, {pipeline_mode = #tpu.pipeline_mode<synchronous>, transform_indices = @transform_1, window_bounds = array<i64: 6, 27>}, {pipeline_mode = #tpu.pipeline_mode<synchronous>, transform_indices = @transform_2, window_bounds = array<i64: 6, 1>}, {transform_indices = @transform_3, window_bounds = array<i64: 6, 512>}]} {
    %c0 = arith.constant 0 : index
    %c0_0 = arith.constant 0 : index
    %0 = vector.load %arg2[%c0, %c0_0] : memref<6x27xbf16, #tpu.memory_space<vmem>>, vector<6x27xbf16>
    %c0_1 = arith.constant 0 : index
    %c0_2 = arith.constant 0 : index
    %c0_3 = arith.constant 0 : index
    %1 = vector.load %arg1[%c0_1, %c0_2, %c0_3] : memref<4x27x512xbf16, #tpu.memory_space<vmem>>, vector<1x27x512xbf16>
    %2 = vector.shape_cast %1 : vector<1x27x512xbf16> to vector<27x512xbf16>
    %cst = arith.constant dense<0.000000e+00> : vector<6x512xf32>
    %3 = tpu.matmul %0, %2, %cst {dimension_numbers = #tpu.dot_dimension_numbers<[1], [0], [0], [1], [0, 0, 1, 1], [], []>} : vector<6x27xbf16>, vector<27x512xbf16>, vector<6x512xf32> -> vector<6x512xf32>
    %c1 = arith.constant 1 : index
    %c0_4 = arith.constant 0 : index
    %c0_5 = arith.constant 0 : index
    %4 = vector.load %arg1[%c1, %c0_4, %c0_5] : memref<4x27x512xbf16, #tpu.memory_space<vmem>>, vector<1x27x512xbf16>
    %5 = vector.shape_cast %4 : vector<1x27x512xbf16> to vector<27x512xbf16>
    %cst_6 = arith.constant dense<0.000000e+00> : vector<6x512xf32>
    %6 = tpu.matmul %0, %5, %cst_6 {dimension_numbers = #tpu.dot_dimension_numbers<[1], [0], [0], [1], [0, 0, 1, 1], [], []>} : vector<6x27xbf16>, vector<27x512xbf16>, vector<6x512xf32> -> vector<6x512xf32>
    %7 = arith.maximumf %3, %6 : vector<6x512xf32>
    %c2 = arith.constant 2 : index
    %c0_7 = arith.constant 0 : index
    %c0_8 = arith.constant 0 : index
    %8 = vector.load %arg1[%c2, %c0_7, %c0_8] : memref<4x27x512xbf16, #tpu.memory_space<vmem>>, vector<1x27x512xbf16>
    %9 = vector.shape_cast %8 : vector<1x27x512xbf16> to vector<27x512xbf16>
    %cst_9 = arith.constant dense<0.000000e+00> : vector<6x512xf32>
    %10 = tpu.matmul %0, %9, %cst_9 {dimension_numbers = #tpu.dot_dimension_numbers<[1], [0], [0], [1], [0, 0, 1, 1], [], []>} : vector<6x27xbf16>, vector<27x512xbf16>, vector<6x512xf32> -> vector<6x512xf32>
    %11 = arith.maximumf %7, %10 : vector<6x512xf32>
    %c3 = arith.constant 3 : index
    %c0_10 = arith.constant 0 : index
    %c0_11 = arith.constant 0 : index
    %12 = vector.load %arg1[%c3, %c0_10, %c0_11] : memref<4x27x512xbf16, #tpu.memory_space<vmem>>, vector<1x27x512xbf16>
    %13 = vector.shape_cast %12 : vector<1x27x512xbf16> to vector<27x512xbf16>
    %cst_12 = arith.constant dense<0.000000e+00> : vector<6x512xf32>
    %14 = tpu.matmul %0, %13, %cst_12 {dimension_numbers = #tpu.dot_dimension_numbers<[1], [0], [0], [1], [0, 0, 1, 1], [], []>} : vector<6x27xbf16>, vector<27x512xbf16>, vector<6x512xf32> -> vector<6x512xf32>
    %15 = arith.maximumf %11, %14 : vector<6x512xf32>
    %c0_13 = arith.constant 0 : index
    %c0_14 = arith.constant 0 : index
    %16 = vector.load %arg3[%c0_13, %c0_14] : memref<6x1xf32, #tpu.memory_space<vmem>>, vector<6x1xf32>
    %17 = vector.broadcast %16 : vector<6x1xf32> to vector<6x512xf32>
    %18 = arith.addf %15, %17 : vector<6x512xf32>
    %cst_15 = arith.constant 0.000000e+00 : f32
    %19 = vector.broadcast %cst_15 : f32 to vector<6x512xf32>
    %20 = arith.maximumf %18, %19 : vector<6x512xf32>
    %c0_16 = arith.constant 0 : index
    %c0_17 = arith.constant 0 : index
    %21 = vector.load %arg4[%c0_16, %c0_17] : memref<6x512xf32, #tpu.memory_space<vmem>>, vector<6x512xf32>
    tpu.vector_store %arg4[%c0_16, %c0_17], %20 {strides = array<i32>} : memref<6x512xf32, #tpu.memory_space<vmem>>, vector<6x512xf32>,
    return
  }
  func.func @transform_0(%arg0: i32) -> (i32, i32, i32) {
    %c0_i32 = arith.constant 0 : i32
    %c0_i32_0 = arith.constant 0 : i32
    %c0_i32_1 = arith.constant 0 : i32
    return %c0_i32, %c0_i32_0, %arg0 : i32, i32, i32
  }
  func.func @transform_1(%arg0: i32) -> (i32, i32) {
    %c0_i32 = arith.constant 0 : i32
    %c0_i32_0 = arith.constant 0 : i32
    %c0_i32_1 = arith.constant 0 : i32
    return %c0_i32, %c0_i32_0 : i32, i32
  }
  func.func @transform_2(%arg0: i32) -> (i32, i32) {
    %c0_i32 = arith.constant 0 : i32
    %c0_i32_0 = arith.constant 0 : i32
    %c0_i32_1 = arith.constant 0 : i32
    return %c0_i32, %c0_i32_0 : i32, i32
  }
  func.func @transform_3(%arg0: i32) -> (i32, i32) {
    %c0_i32 = arith.constant 0 : i32
    %c0_i32_0 = arith.constant 0 : i32
    return %c0_i32, %arg0 : i32, i32
  }
}

module attributes {stable_mosaic.version = 11 : i64} {
  func.func @_conv_pool_kernel(%arg0: i32, %arg1: memref<4x54x512xbf16, #tpu.memory_space<vmem>>, %arg2: memref<16x54xbf16, #tpu.memory_space<vmem>>, %arg3: memref<16x1xf32, #tpu.memory_space<vmem>>, %arg4: memref<16x512xf32, #tpu.memory_space<vmem>>) attributes {dimension_semantics = [#tpu.dimension_semantics<parallel>], iteration_bounds = array<i64: 1>, scalar_prefetch = 0 : i64, scratch_operands = 0 : i64, tpu.core_type = #tpu.core_type<tc>, window_params = [{transform_indices = @transform_0, window_bounds = array<i64: 4, 54, 512>}, {pipeline_mode = #tpu.pipeline_mode<synchronous>, transform_indices = @transform_1, window_bounds = array<i64: 16, 54>}, {pipeline_mode = #tpu.pipeline_mode<synchronous>, transform_indices = @transform_2, window_bounds = array<i64: 16, 1>}, {transform_indices = @transform_3, window_bounds = array<i64: 16, 512>}]} {
    %c0 = arith.constant 0 : index
    %c0_0 = arith.constant 0 : index
    %0 = vector.load %arg2[%c0, %c0_0] : memref<16x54xbf16, #tpu.memory_space<vmem>>, vector<16x54xbf16>
    %c0_1 = arith.constant 0 : index
    %c0_2 = arith.constant 0 : index
    %c0_3 = arith.constant 0 : index
    %1 = vector.load %arg1[%c0_1, %c0_2, %c0_3] : memref<4x54x512xbf16, #tpu.memory_space<vmem>>, vector<1x54x512xbf16>
    %2 = vector.shape_cast %1 : vector<1x54x512xbf16> to vector<54x512xbf16>
    %cst = arith.constant dense<0.000000e+00> : vector<16x512xf32>
    %3 = tpu.matmul %0, %2, %cst {dimension_numbers = #tpu.dot_dimension_numbers<[1], [0], [0], [1], [0, 0, 1, 1], [], []>} : vector<16x54xbf16>, vector<54x512xbf16>, vector<16x512xf32> -> vector<16x512xf32>
    %c1 = arith.constant 1 : index
    %c0_4 = arith.constant 0 : index
    %c0_5 = arith.constant 0 : index
    %4 = vector.load %arg1[%c1, %c0_4, %c0_5] : memref<4x54x512xbf16, #tpu.memory_space<vmem>>, vector<1x54x512xbf16>
    %5 = vector.shape_cast %4 : vector<1x54x512xbf16> to vector<54x512xbf16>
    %cst_6 = arith.constant dense<0.000000e+00> : vector<16x512xf32>
    %6 = tpu.matmul %0, %5, %cst_6 {dimension_numbers = #tpu.dot_dimension_numbers<[1], [0], [0], [1], [0, 0, 1, 1], [], []>} : vector<16x54xbf16>, vector<54x512xbf16>, vector<16x512xf32> -> vector<16x512xf32>
    %7 = arith.maximumf %3, %6 : vector<16x512xf32>
    %c2 = arith.constant 2 : index
    %c0_7 = arith.constant 0 : index
    %c0_8 = arith.constant 0 : index
    %8 = vector.load %arg1[%c2, %c0_7, %c0_8] : memref<4x54x512xbf16, #tpu.memory_space<vmem>>, vector<1x54x512xbf16>
    %9 = vector.shape_cast %8 : vector<1x54x512xbf16> to vector<54x512xbf16>
    %cst_9 = arith.constant dense<0.000000e+00> : vector<16x512xf32>
    %10 = tpu.matmul %0, %9, %cst_9 {dimension_numbers = #tpu.dot_dimension_numbers<[1], [0], [0], [1], [0, 0, 1, 1], [], []>} : vector<16x54xbf16>, vector<54x512xbf16>, vector<16x512xf32> -> vector<16x512xf32>
    %11 = arith.maximumf %7, %10 : vector<16x512xf32>
    %c3 = arith.constant 3 : index
    %c0_10 = arith.constant 0 : index
    %c0_11 = arith.constant 0 : index
    %12 = vector.load %arg1[%c3, %c0_10, %c0_11] : memref<4x54x512xbf16, #tpu.memory_space<vmem>>, vector<1x54x512xbf16>
    %13 = vector.shape_cast %12 : vector<1x54x512xbf16> to vector<54x512xbf16>
    %cst_12 = arith.constant dense<0.000000e+00> : vector<16x512xf32>
    %14 = tpu.matmul %0, %13, %cst_12 {dimension_numbers = #tpu.dot_dimension_numbers<[1], [0], [0], [1], [0, 0, 1, 1], [], []>} : vector<16x54xbf16>, vector<54x512xbf16>, vector<16x512xf32> -> vector<16x512xf32>
    %15 = arith.maximumf %11, %14 : vector<16x512xf32>
    %c0_13 = arith.constant 0 : index
    %c0_14 = arith.constant 0 : index
    %16 = vector.load %arg3[%c0_13, %c0_14] : memref<16x1xf32, #tpu.memory_space<vmem>>, vector<16x1xf32>
    %17 = vector.broadcast %16 : vector<16x1xf32> to vector<16x512xf32>
    %18 = arith.addf %15, %17 : vector<16x512xf32>
    %cst_15 = arith.constant 0.000000e+00 : f32
    %19 = vector.broadcast %cst_15 : f32 to vector<16x512xf32>
    %20 = arith.maximumf %18, %19 : vector<16x512xf32>
    %c0_16 = arith.constant 0 : index
    %c0_17 = arith.constant 0 : index
    %21 = vector.load %arg4[%c0_16, %c0_17] : memref<16x512xf32, #tpu.memory_space<vmem>>, vector<16x512xf32>
    tpu.vector_store %arg4[%c0_16, %c0_17], %20 {strides = array<i32>} : memref<16x512xf32, #tpu.memory_space<vmem>>, vector<16x512xf32>,
    return
  }
  func.func @transform_0(%arg0: i32) -> (i32, i32, i32) {
    %c0_i32 = arith.constant 0 : i32
    %c0_i32_0 = arith.constant 0 : i32
    %c0_i32_1 = arith.constant 0 : i32
    return %c0_i32, %c0_i32_0, %arg0 : i32, i32, i32
  }
  func.func @transform_1(%arg0: i32) -> (i32, i32) {
    %c0_i32 = arith.constant 0 : i32
    %c0_i32_0 = arith.constant 0 : i32
    %c0_i32_1 = arith.constant 0 : i32
    return %c0_i32, %c0_i32_0 : i32, i32
  }
  func.func @transform_2(%arg0: i32) -> (i32, i32) {
    %c0_i32 = arith.constant 0 : i32
    %c0_i32_0 = arith.constant 0 : i32
    %c0_i32_1 = arith.constant 0 : i32
    return %c0_i32, %c0_i32_0 : i32, i32
  }
  func.func @transform_3(%arg0: i32) -> (i32, i32) {
    %c0_i32 = arith.constant 0 : i32
    %c0_i32_0 = arith.constant 0 : i32
    return %c0_i32, %arg0 : i32, i32
  }
}

module attributes {stable_mosaic.version = 11 : i64} {
  func.func @_linear_kernel(%arg0: i32, %arg1: memref<16x3136xbf16, #tpu.memory_space<vmem>>, %arg2: memref<1x3136x1024xbf16, #tpu.memory_space<vmem>>, %arg3: memref<1x1024xf32, #tpu.memory_space<vmem>>, %arg4: memref<16x1024xbf16, #tpu.memory_space<vmem>>) attributes {dimension_semantics = [#tpu.dimension_semantics<parallel>], iteration_bounds = array<i64: 2>, scalar_prefetch = 0 : i64, scratch_operands = 0 : i64, tpu.core_type = #tpu.core_type<tc>, window_params = [{pipeline_mode = #tpu.pipeline_mode<synchronous>, transform_indices = @transform_0, window_bounds = array<i64: 16, 3136>}, {transform_indices = @transform_1, window_bounds = array<i64: 1, 3136, 1024>}, {transform_indices = @transform_2, window_bounds = array<i64: 1, 1024>}, {transform_indices = @transform_3, window_bounds = array<i64: 16, 1024>}]} {
    %c0 = arith.constant 0 : index
    %c0_0 = arith.constant 0 : index
    %0 = vector.load %arg1[%c0, %c0_0] : memref<16x3136xbf16, #tpu.memory_space<vmem>>, vector<16x3136xbf16>
    %c0_1 = arith.constant 0 : index
    %c0_2 = arith.constant 0 : index
    %c0_3 = arith.constant 0 : index
    %1 = vector.load %arg2[%c0_1, %c0_2, %c0_3] : memref<1x3136x1024xbf16, #tpu.memory_space<vmem>>, vector<1x3136x1024xbf16>
    %2 = vector.shape_cast %1 : vector<1x3136x1024xbf16> to vector<3136x1024xbf16>
    %cst = arith.constant dense<0.000000e+00> : vector<16x1024xf32>
    %3 = tpu.matmul %0, %2, %cst {dimension_numbers = #tpu.dot_dimension_numbers<[1], [0], [0], [1], [0, 0, 1, 1], [], []>} : vector<16x3136xbf16>, vector<3136x1024xbf16>, vector<16x1024xf32> -> vector<16x1024xf32>
    %c0_4 = arith.constant 0 : index
    %c0_5 = arith.constant 0 : index
    %4 = vector.load %arg3[%c0_4, %c0_5] : memref<1x1024xf32, #tpu.memory_space<vmem>>, vector<1x1024xf32>
    %5 = vector.broadcast %4 : vector<1x1024xf32> to vector<16x1024xf32>
    %6 = arith.addf %3, %5 : vector<16x1024xf32>
    %cst_6 = arith.constant 0.000000e+00 : f32
    %7 = vector.broadcast %cst_6 : f32 to vector<16x1024xf32>
    %8 = arith.maximumf %6, %7 : vector<16x1024xf32>
    %9 = arith.truncf %8 : vector<16x1024xf32> to vector<16x1024xbf16>
    %c0_7 = arith.constant 0 : index
    %c0_8 = arith.constant 0 : index
    %10 = vector.load %arg4[%c0_7, %c0_8] : memref<16x1024xbf16, #tpu.memory_space<vmem>>, vector<16x1024xbf16>
    tpu.vector_store %arg4[%c0_7, %c0_8], %9 {strides = array<i32>} : memref<16x1024xbf16, #tpu.memory_space<vmem>>, vector<16x1024xbf16>,
    return
  }
  func.func @transform_0(%arg0: i32) -> (i32, i32) {
    %c0_i32 = arith.constant 0 : i32
    %c0_i32_0 = arith.constant 0 : i32
    %c0_i32_1 = arith.constant 0 : i32
    return %c0_i32, %c0_i32_0 : i32, i32
  }
  func.func @transform_1(%arg0: i32) -> (i32, i32, i32) {
    %c0_i32 = arith.constant 0 : i32
    %c0_i32_0 = arith.constant 0 : i32
    %c0_i32_1 = arith.constant 0 : i32
    return %arg0, %c0_i32, %c0_i32_0 : i32, i32, i32
  }
  func.func @transform_2(%arg0: i32) -> (i32, i32) {
    %c0_i32 = arith.constant 0 : i32
    %c0_i32_0 = arith.constant 0 : i32
    return %c0_i32, %arg0 : i32, i32
  }
  func.func @transform_3(%arg0: i32) -> (i32, i32) {
    %c0_i32 = arith.constant 0 : i32
    %c0_i32_0 = arith.constant 0 : i32
    return %c0_i32, %arg0 : i32, i32
  }
}

module attributes {stable_mosaic.version = 11 : i64} {
  func.func @_linear_kernel(%arg0: i32, %arg1: memref<16x2048xbf16, #tpu.memory_space<vmem>>, %arg2: memref<1x2048x512xbf16, #tpu.memory_space<vmem>>, %arg3: memref<1x512xf32, #tpu.memory_space<vmem>>, %arg4: memref<16x512xbf16, #tpu.memory_space<vmem>>) attributes {dimension_semantics = [#tpu.dimension_semantics<parallel>], iteration_bounds = array<i64: 2>, scalar_prefetch = 0 : i64, scratch_operands = 0 : i64, tpu.core_type = #tpu.core_type<tc>, window_params = [{pipeline_mode = #tpu.pipeline_mode<synchronous>, transform_indices = @transform_0, window_bounds = array<i64: 16, 2048>}, {transform_indices = @transform_1, window_bounds = array<i64: 1, 2048, 512>}, {transform_indices = @transform_2, window_bounds = array<i64: 1, 512>}, {transform_indices = @transform_3, window_bounds = array<i64: 16, 512>}]} {
    %c0 = arith.constant 0 : index
    %c0_0 = arith.constant 0 : index
    %0 = vector.load %arg1[%c0, %c0_0] : memref<16x2048xbf16, #tpu.memory_space<vmem>>, vector<16x2048xbf16>
    %c0_1 = arith.constant 0 : index
    %c0_2 = arith.constant 0 : index
    %c0_3 = arith.constant 0 : index
    %1 = vector.load %arg2[%c0_1, %c0_2, %c0_3] : memref<1x2048x512xbf16, #tpu.memory_space<vmem>>, vector<1x2048x512xbf16>
    %2 = vector.shape_cast %1 : vector<1x2048x512xbf16> to vector<2048x512xbf16>
    %cst = arith.constant dense<0.000000e+00> : vector<16x512xf32>
    %3 = tpu.matmul %0, %2, %cst {dimension_numbers = #tpu.dot_dimension_numbers<[1], [0], [0], [1], [0, 0, 1, 1], [], []>} : vector<16x2048xbf16>, vector<2048x512xbf16>, vector<16x512xf32> -> vector<16x512xf32>
    %c0_4 = arith.constant 0 : index
    %c0_5 = arith.constant 0 : index
    %4 = vector.load %arg3[%c0_4, %c0_5] : memref<1x512xf32, #tpu.memory_space<vmem>>, vector<1x512xf32>
    %5 = vector.broadcast %4 : vector<1x512xf32> to vector<16x512xf32>
    %6 = arith.addf %3, %5 : vector<16x512xf32>
    %cst_6 = arith.constant 0.000000e+00 : f32
    %7 = vector.broadcast %cst_6 : f32 to vector<16x512xf32>
    %8 = arith.maximumf %6, %7 : vector<16x512xf32>
    %9 = arith.truncf %8 : vector<16x512xf32> to vector<16x512xbf16>
    %c0_7 = arith.constant 0 : index
    %c0_8 = arith.constant 0 : index
    %10 = vector.load %arg4[%c0_7, %c0_8] : memref<16x512xbf16, #tpu.memory_space<vmem>>, vector<16x512xbf16>
    tpu.vector_store %arg4[%c0_7, %c0_8], %9 {strides = array<i32>} : memref<16x512xbf16, #tpu.memory_space<vmem>>, vector<16x512xbf16>,
    return
  }
  func.func @transform_0(%arg0: i32) -> (i32, i32) {
    %c0_i32 = arith.constant 0 : i32
    %c0_i32_0 = arith.constant 0 : i32
    %c0_i32_1 = arith.constant 0 : i32
    return %c0_i32, %c0_i32_0 : i32, i32
  }
  func.func @transform_1(%arg0: i32) -> (i32, i32, i32) {
    %c0_i32 = arith.constant 0 : i32
    %c0_i32_0 = arith.constant 0 : i32
    %c0_i32_1 = arith.constant 0 : i32
    return %arg0, %c0_i32, %c0_i32_0 : i32, i32, i32
  }
  func.func @transform_2(%arg0: i32) -> (i32, i32) {
    %c0_i32 = arith.constant 0 : i32
    %c0_i32_0 = arith.constant 0 : i32
    return %c0_i32, %arg0 : i32, i32
  }
  func.func @transform_3(%arg0: i32) -> (i32, i32) {
    %c0_i32 = arith.constant 0 : i32
    %c0_i32_0 = arith.constant 0 : i32
    return %c0_i32, %arg0 : i32, i32
  }
}

module attributes {stable_mosaic.version = 11 : i64} {
  func.func @_linear_kernel(%arg0: i32, %arg1: memref<16x1024xbf16, #tpu.memory_space<vmem>>, %arg2: memref<1x1024x128xbf16, #tpu.memory_space<vmem>>, %arg3: memref<1x128xf32, #tpu.memory_space<vmem>>, %arg4: memref<16x128xf32, #tpu.memory_space<vmem>>) attributes {dimension_semantics = [#tpu.dimension_semantics<parallel>], iteration_bounds = array<i64: 1>, scalar_prefetch = 0 : i64, scratch_operands = 0 : i64, tpu.core_type = #tpu.core_type<tc>, window_params = [{pipeline_mode = #tpu.pipeline_mode<synchronous>, transform_indices = @transform_0, window_bounds = array<i64: 16, 1024>}, {transform_indices = @transform_1, window_bounds = array<i64: 1, 1024, 128>}, {transform_indices = @transform_2, window_bounds = array<i64: 1, 128>}, {transform_indices = @transform_3, window_bounds = array<i64: 16, 128>}]} {
    %c0 = arith.constant 0 : index
    %c0_0 = arith.constant 0 : index
    %0 = vector.load %arg1[%c0, %c0_0] : memref<16x1024xbf16, #tpu.memory_space<vmem>>, vector<16x1024xbf16>
    %c0_1 = arith.constant 0 : index
    %c0_2 = arith.constant 0 : index
    %c0_3 = arith.constant 0 : index
    %1 = vector.load %arg2[%c0_1, %c0_2, %c0_3] : memref<1x1024x128xbf16, #tpu.memory_space<vmem>>, vector<1x1024x128xbf16>
    %2 = vector.shape_cast %1 : vector<1x1024x128xbf16> to vector<1024x128xbf16>
    %cst = arith.constant dense<0.000000e+00> : vector<16x128xf32>
    %3 = tpu.matmul %0, %2, %cst {dimension_numbers = #tpu.dot_dimension_numbers<[1], [0], [0], [1], [0, 0, 1, 1], [], []>} : vector<16x1024xbf16>, vector<1024x128xbf16>, vector<16x128xf32> -> vector<16x128xf32>
    %c0_4 = arith.constant 0 : index
    %c0_5 = arith.constant 0 : index
    %4 = vector.load %arg3[%c0_4, %c0_5] : memref<1x128xf32, #tpu.memory_space<vmem>>, vector<1x128xf32>
    %5 = vector.broadcast %4 : vector<1x128xf32> to vector<16x128xf32>
    %6 = arith.addf %3, %5 : vector<16x128xf32>
    %c0_6 = arith.constant 0 : index
    %c0_7 = arith.constant 0 : index
    %7 = vector.load %arg4[%c0_6, %c0_7] : memref<16x128xf32, #tpu.memory_space<vmem>>, vector<16x128xf32>
    tpu.vector_store %arg4[%c0_6, %c0_7], %6 {strides = array<i32>} : memref<16x128xf32, #tpu.memory_space<vmem>>, vector<16x128xf32>,
    return
  }
  func.func @transform_0(%arg0: i32) -> (i32, i32) {
    %c0_i32 = arith.constant 0 : i32
    %c0_i32_0 = arith.constant 0 : i32
    %c0_i32_1 = arith.constant 0 : i32
    return %c0_i32, %c0_i32_0 : i32, i32
  }
  func.func @transform_1(%arg0: i32) -> (i32, i32, i32) {
    %c0_i32 = arith.constant 0 : i32
    %c0_i32_0 = arith.constant 0 : i32
    %c0_i32_1 = arith.constant 0 : i32
    return %arg0, %c0_i32, %c0_i32_0 : i32, i32, i32
  }
  func.func @transform_2(%arg0: i32) -> (i32, i32) {
    %c0_i32 = arith.constant 0 : i32
    %c0_i32_0 = arith.constant 0 : i32
    return %c0_i32, %arg0 : i32, i32
  }
  func.func @transform_3(%arg0: i32) -> (i32, i32) {
    %c0_i32 = arith.constant 0 : i32
    %c0_i32_0 = arith.constant 0 : i32
    return %c0_i32, %arg0 : i32, i32
  }
}

</mosaic_0001>

<bundles_post_ra>
// kernel: net_forward.5
= control target key start
LH: loop header
LB: loop body
LE: loop exit
PB: predicated region body
PF: predicated region fallthrough
CT: control target
= control target key end

     0   :  { %8 = vsyncpa [#allocation4], 0  ;;  %s1182_s12 = smov 0   ;;  %s1184_s13 = smov 0   ;;  %s1430_s0 = inlined_call_operand.vmem [shape: bf16[4,27,2048], index: 0, kind: input, shape index: {}]   ;;  %s1431_s1 = inlined_call_operand.hbm [shape: bf16[6,27], index: 1, kind: input, shape index: {}]   ;;  %s1432_s2 = inlined_call_operand.vmem [shape: f32[6,1], index: 2, kind: input, shape index: {}]   ;;  %s1433_s3 = inlined_call_operand.vmem [shape: f32[6,2048], index: 3, kind: output, shape index: {}]  }
   0x1   :  { %s1186_s14 = smov 0  }
   0x2 LB: > { %s937_s15 = sadd.s32 4294967295, %s1157_s14   ;;  %s1199_s16 = sadd.s32 1, %s1157_s14   ;;  %s1157_s14 = sphi %s1186_s14, %s1446_s14   ;;  %s1153_s13 = sphi %s1184_s13, %s1445_s13   ;;  %s1149_s12 = sphi %s1182_s12, %s1444_s12  }
   0x3   : > { %s18_s17 = ssub.s32 %s1157_s14, %s1199_s16  ;;  %s21_s18 = sadd.s32 1, %s1153_s13 }
   0x4   : > { %p19_p0 = scmp.eq.s32.totalorder %s18_s17, 0  ;;  %p28_p1 = scmp.ne.s32.totalorder %s1153_s13, %s1149_s12 }
   0x5   : > { %p29_p2 = scmp.eq.s32.totalorder %s1157_s14, 0  ;;  %p939_p3 = scmp.ge.s32.totalorder %s1157_s14, 1 }
   0x6   : > { %s1209_s19 = scalar_select %p19_p0, %s1153_s13, %s21_s18  }
   0x7   : > { %p1211_p4 = por %p29_p2, %p28_p1  ;;  %p113_p5 = scmp.lt.s32.totalorder %s1157_s14, 5 }
   0x8   : > { %p1218_p6 = scmp.eq.s32.totalorder %s937_s15, 0  ;;  %s1159_s23 = smov [#allocation3]  }
   0x9   : > { %s1437_s20 = scalar_select %p1211_p4, 1, 0 }
   0xa   : > { %s1438_s21 = scalar_select %p1218_p6, 1, 0 }
   0xb   : > { %p1222_p7 = pnand %p939_p3, %p113_p5  ;;  %s126_s24 = sshll.u32 %s1159_s23, 4  ;;  %s127_s24 = int_to_ptr.vmem [resolvable:$true] %s126_s24 }
   0xc   : > { %s1103_s28 = scalar_lea.hbm %s1431_s1, 64 }
   0xd   : > { %s1439_s22 = scalar_select %p1222_p7, 1, 0 }
   0xe   : > { %p1021_p8 = pneg %p1222_p7  ;;  %p1104_p10 = scmp.ne.s32.totalorder %s1431_s1, %s1103_s28 }
   0xf   : > { %p1110_p0 = scmp.lt.u32.totalorder %s1103_s28, %s1431_s1 }
  0x10   : > { %p1230_p9 = pnand %p1218_p6, %p1021_p8 }
  0x12   : > { %p1105_p11 = pneg %p1230_p9 }
  0x14   : > { %p1106_p12 = pnand %p1105_p11, %p1104_p10 }
  0x16   : > { %p1107_p13 = pneg %p1106_p12 }
  0x18   : > { %p1112_p1 = pnand %p1110_p0, %p1107_p13 }
  0x1a   : > { %1115 = shalt.err (!%p1112_p1)
}
  0x1b   : > { %s1116_s6 = scalar_lea.vmem %s127_s24, 64  ;;  %p1124_p8 = scmp.lt.s32.totalorder %s127_s24, %s127_s24 }
  0x1c   : > { %p1117_p2 = scmp.ne.s32.totalorder %s127_s24, %s1116_s6  ;;  %p1125_p6 = scmp.lt.s32.totalorder %s1116_s6, %s1116_s6 }
  0x1e   : > { %p1119_p3 = pnand %p1117_p2, %p1105_p11  ;;  %p1126_p7 = por %p1125_p6, %p1124_p8 }
  0x20   : > { %p1120_p5 = pneg %p1119_p3 }
  0x22   : > { %p1127_p4 = pnand %p1126_p7, %p1120_p5 }
  0x24   : > { %1130 = shalt.err (!%p1127_p4)
}
  0x25   : > { %1024 = dma.hbm_to_vmem [thread:$0]  (!%p1230_p9), %s1431_s1, 64, %s127_s24, [#allocation4]  }
  0x26   : > { %p941_p10 = scmp.ge.s32.totalorder %s1157_s14, 4 }
  0x27   : > { %p1441_p12 = scmp.ne.s32.totalorder (!%p941_p10), %s1437_s20, 0 }
  0x28   : > { %136 = sbr.rel (%p941_p10) target bundleno = 67 (0x43), region = 24 }
  0x2f   : > { %139 = sbr.rel (!%p1441_p12) target bundleno = 67 (0x43), region = 28  ;;  %s141_s9 = sand.u32 (%p1441_p12), 1, %s1153_s13  }
  0x30   : > { %s1016_s10 = sshll.u32 (%p1441_p12), %s1157_s14, 4  ;;  %s942_s11 = sshll.u32 (%p1441_p12), %s141_s9, 8 }
  0x31   : > { %s1258_s23 = scalar_lea.vmem (%p1441_p12), %s1430_s0, %s1016_s10  ;;  %s1263_s20 = scalar_lea.vmem (%p1441_p12), [#allocation2], %s942_s11 }
  0x32   : > { %v159_v0 = vld [vmem:[%s1258_s23] sm:$0xff] (%p1441_p12)  ;;  %v161_v1 = vld [vmem:[%s1258_s23 + $0x8] sm:$0xff] (%p1441_p12) }
  0x33   : > { %v163_v2 = vld [vmem:[%s1258_s23 + $0x40] sm:$0xff] (%p1441_p12)  ;;  %160 = vst [vmem:[%s1263_s20] sm:$0xff] (%p1441_p12), %v159_v0  ;;  %162 = vst [vmem:[%s1263_s20 + $0x8] sm:$0xff] (%p1441_p12), %v161_v1  ;;  %v165_v3 = vld [vmem:[%s1258_s23 + $0x48] sm:$0xff] (%p1441_p12) }
  0x34   : > { %164 = vst [vmem:[%s1263_s20 + $0x10] sm:$0xff] (%p1441_p12), %v163_v2  ;;  %v167_v4 = vld [vmem:[%s1258_s23 + $0x80] sm:$0xff] (%p1441_p12)  ;;  %v169_v5 = vld [vmem:[%s1258_s23 + $0x88] sm:$0xff] (%p1441_p12)  ;;  %166 = vst [vmem:[%s1263_s20 + $0x18] sm:$0xff] (%p1441_p12), %v165_v3 }
  0x35   : > { %168 = vst [vmem:[%s1263_s20 + $0x20] sm:$0xff] (%p1441_p12), %v167_v4  ;;  %170 = vst [vmem:[%s1263_s20 + $0x28] sm:$0xff] (%p1441_p12), %v169_v5  ;;  %v171_v6 = vld [vmem:[%s1258_s23 + $0xc0] sm:$0xff] (%p1441_p12)  ;;  %v173_v7 = vld [vmem:[%s1258_s23 + $0xc8] sm:$0xff] (%p1441_p12) }
  0x36   : > { %v175_v8 = vld [vmem:[%s1258_s23 + $0x100] sm:$0xff]  ;;  %172 = vst [vmem:[%s1263_s20 + $0x30] sm:$0xff] %v171_v6  ;;  %174 = vst [vmem:[%s1263_s20 + $0x38] sm:$0xff] %v173_v7  ;;  %v177_v9 = vld [vmem:[%s1258_s23 + $0x108] sm:$0xff] }
  0x37   : > { %176 = vst [vmem:[%s1263_s20 + $0x40] sm:$0xff] %v175_v8  ;;  %v179_v10 = vld [vmem:[%s1258_s23 + $0x140] sm:$0xff]  ;;  %v181_v11 = vld [vmem:[%s1258_s23 + $0x148] sm:$0xff]  ;;  %178 = vst [vmem:[%s1263_s20 + $0x48] sm:$0xff] %v177_v9 }
  0x38   : > { %180 = vst [vmem:[%s1263_s20 + $0x50] sm:$0xff] %v179_v10  ;;  %182 = vst [vmem:[%s1263_s20 + $0x58] sm:$0xff] %v181_v11  ;;  %v183_v12 = vld [vmem:[%s1258_s23 + $0x180] sm:$0xff]  ;;  %v185_v13 = vld [vmem:[%s1258_s23 + $0x188] sm:$0xff] }
  0x39   : > { %v187_v14 = vld [vmem:[%s1258_s23 + $0x1c0] sm:$0xff]  ;;  %184 = vst [vmem:[%s1263_s20 + $0x60] sm:$0xff] %v183_v12  ;;  %186 = vst [vmem:[%s1263_s20 + $0x68] sm:$0xff] %v185_v13  ;;  %v189_v15 = vld [vmem:[%s1258_s23 + $0x1c8] sm:$0xff] }
  0x3a   : > { %188 = vst [vmem:[%s1263_s20 + $0x70] sm:$0xff] %v187_v14  ;;  %v191_v16 = vld [vmem:[%s1258_s23 + $0x200] sm:$0xff]  ;;  %v193_v17 = vld [vmem:[%s1258_s23 + $0x208] sm:$0xff]  ;;  %190 = vst [vmem:[%s1263_s20 + $0x78] sm:$0xff] %v189_v15 }
  0x3b   : > { %192 = vst [vmem:[%s1263_s20 + $0x80] sm:$0xff] %v191_v16  ;;  %194 = vst [vmem:[%s1263_s20 + $0x88] sm:$0xff] %v193_v17  ;;  %v195_v18 = vld [vmem:[%s1258_s23 + $0x240] sm:$0xff]  ;;  %v197_v19 = vld [vmem:[%s1258_s23 + $0x248] sm:$0xff] }
  0x3c   : > { %v199_v20 = vld [vmem:[%s1258_s23 + $0x280] sm:$0xff]  ;;  %196 = vst [vmem:[%s1263_s20 + $0x90] sm:$0xff] %v195_v18  ;;  %198 = vst [vmem:[%s1263_s20 + $0x98] sm:$0xff] %v197_v19  ;;  %v201_v21 = vld [vmem:[%s1258_s23 + $0x288] sm:$0xff] }
  0x3d   : > { %200 = vst [vmem:[%s1263_s20 + $0xa0] sm:$0xff] %v199_v20  ;;  %v203_v22 = vld [vmem:[%s1258_s23 + $0x2c0] sm:$0xff]  ;;  %v205_v23 = vld [vmem:[%s1258_s23 + $0x2c8] sm:$0xff]  ;;  %202 = vst [vmem:[%s1263_s20 + $0xa8] sm:$0xff] %v201_v21 }
  0x3e   : > { %204 = vst [vmem:[%s1263_s20 + $0xb0] sm:$0xff] %v203_v22  ;;  %206 = vst [vmem:[%s1263_s20 + $0xb8] sm:$0xff] %v205_v23  ;;  %v207_v24 = vld [vmem:[%s1258_s23 + $0x300] sm:$0xff]  ;;  %v209_v25 = vld [vmem:[%s1258_s23 + $0x308] sm:$0xff] }
  0x3f   : > { %v211_v26 = vld [vmem:[%s1258_s23 + $0x340] sm:$0xff]  ;;  %208 = vst [vmem:[%s1263_s20 + $0xc0] sm:$0xff] %v207_v24  ;;  %210 = vst [vmem:[%s1263_s20 + $0xc8] sm:$0xff] %v209_v25  ;;  %v213_v27 = vld [vmem:[%s1258_s23 + $0x348] sm:$0xff] }
  0x40   : > { %212 = vst [vmem:[%s1263_s20 + $0xd0] sm:$0xff] %v211_v26  ;;  %v215_v28 = vld [vmem:[%s1258_s23 + $0x380] sm:$0xff]  ;;  %v217_v29 = vld [vmem:[%s1258_s23 + $0x388] sm:$0xff]  ;;  %214 = vst [vmem:[%s1263_s20 + $0xd8] sm:$0xff] %v213_v27 }
  0x41   : > { %216 = vst [vmem:[%s1263_s20 + $0xe0] sm:$0xff] %v215_v28  ;;  %218 = vst [vmem:[%s1263_s20 + $0xe8] sm:$0xff] %v217_v29  ;;  %v219_v30 = vld [vmem:[%s1258_s23 + $0x3c0] sm:$0xff]  ;;  %v221_v31 = vld [vmem:[%s1258_s23 + $0x3c8] sm:$0xff] }
  0x42   : > { %220 = vst [vmem:[%s1263_s20 + $0xf0] sm:$0xff] %v219_v30  ;;  %222 = vst [vmem:[%s1263_s20 + $0xf8] sm:$0xff] %v221_v31 }
  0x43 PF: > { %p1442_p4 = scmp.ne.s32.totalorder %s1439_s22, 0 }
  0x44   : > { %s234_s24 = sand.u32 (!%p1442_p4), 1, %s1149_s12   ;;  %p1443_p6 = scmp.ne.s32.totalorder (!%p1442_p4), %s1438_s21, 0 }
  0x45   : > { %231 = sbr.rel (%p1442_p4) target bundleno = 332 (0x14c), region = 51  ;;  %s946_s25 = sshll.u32 (!%p1442_p4), %s234_s24, 8 }
  0x46   : > { %s1329_s26 = scalar_lea.vmem (!%p1442_p4), [#allocation2], %s946_s25 }
  0x4c   : > { %1144 = dma.done.wait (%p1443_p6), [#allocation4], 64  }
  0x4d   : > { %1146 = vsyncadd (%p1443_p6), [#allocation4], 4294967232  ;;  %v1160_v32 = vmov 0   ;;  %vm318_vm0 = vcmask 1044480   ;;  %vm319_vm1 = vcmask 1045504   ;;  %v1161_v33 = vmov 65535  }
  0x4e   : > { %366 = vmatprep.mubr.bf16.mxu0 %v1160_v32  ;;  %407 = vmatprep.mubr.bf16.mxu1 %v1160_v32  ;;  %v320_v34 = vsel %vm318_vm0, 4294967295, %v1161_v33  ;;  %v1055_v35 = vld [vmem:[%s1329_s26 + $0x4] ss:$16 sps:$4 sm:$0xff]   ;;  %v1057_v36 = vld [vmem:[%s1329_s26 + $0xc] ss:$16 sps:$4 sm:$0xff]   ;;  %vm314_vm2 = vcmask 220160  }
  0x4f   : > { %1054 = vset.pattern.permute.xlu0 %v1160_v32  ;;  %334 = vmatprep.subr.bf16.mxu0 %v1055_v35  ;;  %v1059_v37 = vld [vmem:[%s1329_s26] ss:$16 sps:$4 sm:$0xff]   ;;  %v1060_v38 = vld [vmem:[%s1329_s26 + $0x8] ss:$16 sps:$4 sm:$0xff]   ;;  %v1342_v39 = vsel %vm319_vm1, %v320_v34, 0  ;;  %s948_s22 = sshll.u32 %s937_s15, 2 }
  0x50   : > { %375 = vmatprep.subr.bf16.mxu1 %v1057_v36  ;;  %v1061_v40 = vld [vmem:[%s1329_s26 + $0x24] ss:$16 sps:$4 sm:$0x3f]   ;;  %335 = vmatpush1.bf16.msra.mxu0 %v1059_v37  ;;  %v1063_v41 = vld [vmem:[%s1329_s26 + $0x2c] ss:$16 sps:$4 sm:$0x3f]  }
  0x51   : > { %376 = vmatpush1.bf16.msra.mxu1 %v1060_v38  ;;  %v326_v42 = vand.u32 %v1061_v40, %v1342_v39  ;;  %v1065_v43 = vld [vmem:[%s1329_s26 + $0x20] ss:$16 sps:$4 sm:$0x3f]   ;;  %v1066_v44 = vld [vmem:[%s1329_s26 + $0x28] ss:$16 sps:$4 sm:$0x3f]   ;;  %v332_v45 = vand.u32 %v1063_v41, %v1342_v39 }
  0x52   : > { %v323_v46 = vand.u32 %v1065_v43, %v1342_v39  ;;  %v329_v47 = vand.u32 %v1066_v44, %v1342_v39  ;;  %v1352_v48 = vld [vmem:[#allocation3] sm:$0x7]  ;;  %v1069_v50 = vld [vmem:[%s1329_s26 + $0x44] ss:$16 sps:$4 sm:$0xff]   ;;  %v1070_v51 = vld [vmem:[%s1329_s26 + $0x48] ss:$16 sps:$4 sm:$0xff]  }
  0x53   : > { %336 = vmatprep.subr.bf16.mxu0 %v326_v42  ;;  %v1067_v49 = vld [vmem:[%s1329_s26 + $0x40] ss:$16 sps:$4 sm:$0xff]   ;;  %377 = vmatprep.subr.bf16.mxu1 %v332_v45  ;;  %v1072_v52 = vld [vmem:[%s1329_s26 + $0x4c] ss:$16 sps:$4 sm:$0xff]   ;;  %v1081_v61 = vld [vmem:[%s1329_s26 + $0x84] ss:$16 sps:$4 sm:$0xff]  }
  0x54   : > { %337 = vmatpush1.bf16.msra.mxu0 %v323_v46  ;;  %v1073_v53 = vld [vmem:[%s1329_s26 + $0x60] ss:$16 sps:$4 sm:$0x3f]   ;;  %v1075_v54 = vld [vmem:[%s1329_s26 + $0x64] ss:$16 sps:$4 sm:$0x3f]  }
  0x55   : > { %378 = vmatpush1.bf16.msra.mxu1 %v329_v47  ;;  %473 = vmatprep.subr.bf16.mxu0 %v1069_v50  ;;  %v1076_v55 = vld [vmem:[%s1329_s26 + $0x68] ss:$16 sps:$4 sm:$0x3f]   ;;  %v1078_v56 = vld [vmem:[%s1329_s26 + $0x6c] ss:$16 sps:$4 sm:$0x3f]   ;;  %v465_v57 = vand.u32 %v1075_v54, %v1342_v39  ;;  %v462_v59 = vand.u32 %v1073_v53, %v1342_v39 }
  0x56   : > { %514 = vmatprep.subr.bf16.mxu1 %v1072_v52  ;;  %v471_v58 = vand.u32 %v1078_v56, %v1342_v39  ;;  %v468_v60 = vand.u32 %v1076_v55, %v1342_v39  ;;  %v1084_v62 = vld [vmem:[%s1329_s26 + $0x8c] ss:$16 sps:$4 sm:$0xff]   ;;  %v1079_v63 = vld [vmem:[%s1329_s26 + $0x80] ss:$16 sps:$4 sm:$0xff]   ;;  %v1082_v0 = vld [vmem:[%s1329_s26 + $0x88] ss:$16 sps:$4 sm:$0xff]  }
  0x57   : > { %958 = vmatmul.mubr.msk.bf16.vlgmr.msra.gmra.mrb[0].mxu0 %vm314_vm2, %v1352_v48  ;;  %v1085_v1 = vld [vmem:[%s1329_s26 + $0xa0] ss:$16 sps:$4 sm:$0x3f]   ;;  %v1087_v2 = vld [vmem:[%s1329_s26 + $0xa4] ss:$16 sps:$4 sm:$0x3f]  }
  0x58   : > { %959 = vmatmul.mubr.msk.bf16.vlgmr.msra.gmra.mrb[0].mxu1 %vm314_vm2, %v1352_v48  ;;  %474 = vmatpush1.bf16.msra.mxu0 %v1067_v49  ;;  %v1088_v3 = vld [vmem:[%s1329_s26 + $0xa8] ss:$16 sps:$4 sm:$0x3f]   ;;  %v1090_v4 = vld [vmem:[%s1329_s26 + $0xac] ss:$16 sps:$4 sm:$0x3f]   ;;  %v608_v5 = vand.u32 %v1087_v2, %v1342_v39  ;;  %v605_v8 = vand.u32 %v1085_v1, %v1342_v39 }
  0x59   : > { %515 = vmatpush1.bf16.msra.mxu1 %v1070_v51  ;;  %475 = vmatprep.subr.bf16.mxu0 %v465_v57  ;;  %v614_v6 = vand.u32 %v1090_v4, %v1342_v39  ;;  %v1093_v7 = vld [vmem:[%s1329_s26 + $0xc4] ss:$16 sps:$4 sm:$0xff]   ;;  %v611_v9 = vand.u32 %v1088_v3, %v1342_v39  ;;  %v1096_v10 = vld [vmem:[%s1329_s26 + $0xcc] ss:$16 sps:$4 sm:$0xff]   ;;  %v1091_v14 = vld [vmem:[%s1329_s26 + $0xc0] ss:$16 sps:$4 sm:$0xff]  }
  0x5a   : > { %505 = vmatprep.mubr.bf16.mxu0 %v1160_v32  ;;  %516 = vmatprep.subr.bf16.mxu1 %v471_v58  ;;  %v1099_v11 = vld [vmem:[%s1329_s26 + $0xe4] ss:$16 sps:$4 sm:$0x3f]   ;;  %v1102_v12 = vld [vmem:[%s1329_s26 + $0xec] ss:$16 sps:$4 sm:$0x3f]  }
  0x5b   : > { %546 = vmatprep.mubr.bf16.mxu1 %v1160_v32  ;;  %v845_v13 = vld [vmem:[%s1432_s2] sm:$0x3f]  ;;  %v1094_v15 = vld [vmem:[%s1329_s26 + $0xc8] ss:$16 sps:$4 sm:$0xff]   ;;  %v751_v18 = vand.u32 %v1099_v11, %v1342_v39  ;;  %v757_v19 = vand.u32 %v1102_v12, %v1342_v39  ;;  %p263_p7 = scmp.lt.s32.totalorder %s948_s22, 15 }
  0x5c   : > { %476 = vmatpush1.bf16.msra.mxu0 %v462_v59  ;;  %848 = vperm.xlu0 %1054, %v845_v13   ;;  %v1097_v16 = vld [vmem:[%s1329_s26 + $0xe0] ss:$16 sps:$4 sm:$0x3f]   ;;  %v1100_v17 = vld [vmem:[%s1329_s26 + $0xe8] ss:$16 sps:$4 sm:$0x3f]  }
  0x5d   : > { %517 = vmatpush1.bf16.msra.mxu1 %v468_v60  ;;  %616 = vmatprep.subr.bf16.mxu0 %v1081_v61  ;;  %v748_v20 = vand.u32 %v1097_v16, %v1342_v39  ;;  %v754_v21 = vand.u32 %v1100_v17, %v1342_v39  ;;  %s1448_s22 = smov (!%p263_p7, %s948_s22), 15 }
  0x5e   : > { %657 = vmatprep.subr.bf16.mxu1 %v1084_v62  ;;  %s949_s14 = sshll.u32 %s1448_s22, 3 }
  0x5f   : > { %976 = vmatmul.mubr.msk.bf16.vlgmr.msra.gmra.mrb[4].mxu0 %vm314_vm2, %v1352_v48  ;;  %s266_s28 = scalar_lea.vmem %s1433_s3, %s949_s14 }
  0x60   : > { %977 = vmatmul.mubr.msk.bf16.vlgmr.msra.gmra.mrb[4].mxu1 %vm314_vm2, %v1352_v48  ;;  %617 = vmatpush1.bf16.msra.mxu0 %v1079_v63 }
  0x61   : > { %658 = vmatpush1.bf16.msra.mxu1 %v1082_v0  ;;  %618 = vmatprep.subr.bf16.mxu0 %v608_v5 }
  0x62   : > { %659 = vmatprep.subr.bf16.mxu1 %v614_v6  ;;  %648 = vmatprep.mubr.bf16.mxu0 %v1160_v32 }
  0x63   : > { %689 = vmatprep.mubr.bf16.mxu1 %v1160_v32 }
  0x64   : > { %619 = vmatpush1.bf16.msra.mxu0 %v605_v8 }
  0x65   : > { %660 = vmatpush1.bf16.msra.mxu1 %v611_v9  ;;  %759 = vmatprep.subr.bf16.mxu0 %v1093_v7 }
  0x66   : > { %800 = vmatprep.subr.bf16.mxu1 %v1096_v10 }
  0x67   : > { %994 = vmatmul.mubr.msk.bf16.vlgmr.msra.gmra.mrb[8].mxu0 %vm314_vm2, %v1352_v48 }
  0x68   : > { %995 = vmatmul.mubr.msk.bf16.vlgmr.msra.gmra.mrb[8].mxu1 %vm314_vm2, %v1352_v48  ;;  %760 = vmatpush1.bf16.msra.mxu0 %v1091_v14 }
  0x69   : > { %801 = vmatpush1.bf16.msra.mxu1 %v1094_v15  ;;  %761 = vmatprep.subr.bf16.mxu0 %v751_v18 }
  0x6a   : > { %802 = vmatprep.subr.bf16.mxu1 %v757_v19  ;;  %791 = vmatprep.mubr.bf16.mxu0 %v1160_v32 }
  0x6b   : > { %832 = vmatprep.mubr.bf16.mxu1 %v1160_v32 }
  0x6c   : > { %762 = vmatpush1.bf16.msra.mxu0 %v748_v20 }
  0x6d   : > { %803 = vmatpush1.bf16.msra.mxu1 %v754_v21 }
  0x6f   : > { %1012 = vmatmul.mubr.msk.bf16.vlgmr.msra.gmra.mrb[12].mxu0 %vm314_vm2, %v1352_v48 }
  0x70   : > { %1013 = vmatmul.mubr.msk.bf16.vlgmr.msra.gmra.mrb[12].mxu1 %vm314_vm2, %v1352_v48 }
  0xdb   : > { %v849_v54 = vpop.permute.xlu0 %848 }
 0x12a   : > { %v368_v22 = vpop.f32.mrb[0].mxu0 }
 0x12b   : > { %v409_v23 = vpop.f32.mrb[0].mxu1  ;;  %v370_v24 = vpop.f32.mrb[1].mxu0 }
 0x12c   : > { %v411_v25 = vpop.f32.mrb[1].mxu1  ;;  %v372_v26 = vpop.f32.mrb[2].mxu0 }
 0x12d   : > { %v413_v27 = vpop.f32.mrb[2].mxu1  ;;  %v373_v28 = vpop.f32.mrb[3].mxu0 }
 0x12e   : > { %v414_v29 = vpop.f32.mrb[3].mxu1 }
 0x132   : > { %v507_v30 = vpop.f32.mrb[4].mxu0 }
 0x133   : > { %v548_v31 = vpop.f32.mrb[4].mxu1  ;;  %v555_v32 = vmax.f32 %v368_v22, %v507_v30  ;;  %v509_v34 = vpop.f32.mrb[5].mxu0 }
 0x134   : > { %v557_v33 = vmax.f32 %v409_v23, %v548_v31  ;;  %v550_v35 = vpop.f32.mrb[5].mxu1  ;;  %v556_v36 = vmax.f32 %v370_v24, %v509_v34  ;;  %v511_v38 = vpop.f32.mrb[6].mxu0 }
 0x135   : > { %v558_v37 = vmax.f32 %v411_v25, %v550_v35  ;;  %v552_v39 = vpop.f32.mrb[6].mxu1  ;;  %v512_v40 = vpop.f32.mrb[7].mxu0 }
 0x136   : > { %v553_v41 = vpop.f32.mrb[7].mxu1 }
 0x13a   : > { %v650_v42 = vpop.f32.mrb[8].mxu0 }
 0x13b   : > { %v691_v43 = vpop.f32.mrb[8].mxu1  ;;  %v698_v44 = vmax.f32 %v555_v32, %v650_v42  ;;  %v652_v46 = vpop.f32.mrb[9].mxu0 }
 0x13c   : > { %v700_v45 = vmax.f32 %v557_v33, %v691_v43  ;;  %v693_v47 = vpop.f32.mrb[9].mxu1  ;;  %v699_v48 = vmax.f32 %v556_v36, %v652_v46  ;;  %v654_v50 = vpop.f32.mrb[10].mxu0 }
 0x13d   : > { %v701_v49 = vmax.f32 %v558_v37, %v693_v47  ;;  %v695_v51 = vpop.f32.mrb[10].mxu1  ;;  %v655_v52 = vpop.f32.mrb[11].mxu0 }
 0x13e   : > { %v696_v53 = vpop.f32.mrb[11].mxu1 }
 0x142   : > { %v793_v55 = vpop.f32.mrb[12].mxu0 }
 0x143   : > { %v834_v56 = vpop.f32.mrb[12].mxu1  ;;  %v841_v57 = vmax.f32 %v698_v44, %v793_v55  ;;  %v795_v59 = vpop.f32.mrb[13].mxu0 }
 0x144   : > { %v843_v58 = vmax.f32 %v700_v45, %v834_v56  ;;  %v836_v60 = vpop.f32.mrb[13].mxu1  ;;  %v842_v61 = vmax.f32 %v699_v48, %v795_v59  ;;  %v797_v63 = vpop.f32.mrb[14].mxu0 }
 0x145   : > { %v844_v62 = vmax.f32 %v701_v49, %v836_v60  ;;  %v838_v0 = vpop.f32.mrb[14].mxu1  ;;  %v851_v1 = vadd.f32 %v849_v54, %v841_v57  ;;  %v798_v3 = vpop.f32.mrb[15].mxu0 }
 0x146   : > { %v853_v2 = vadd.f32 %v849_v54, %v843_v58  ;;  %v839_v4 = vpop.f32.mrb[15].mxu1  ;;  %v852_v5 = vadd.f32 %v849_v54, %v842_v61 }
 0x147   : > { %v854_v6 = vadd.f32 %v849_v54, %v844_v62  ;;  %v855_v7 = vmax.f32 %v851_v1, 0.0 }
 0x148   : > { %v857_v8 = vmax.f32 %v853_v2, 0.0  ;;  %v856_v9 = vmax.f32 %v852_v5, 0.0 }
 0x149   : > { %v858_v10 = vmax.f32 %v854_v6, 0.0  ;;  %859 = vst [vmem:[%s266_s28] sm:$0x3f] %v855_v7 }
 0x14a   : > { %861 = vst [vmem:[%s266_s28 + $0x10] sm:$0x3f] %v857_v8  ;;  %860 = vst [vmem:[%s266_s28 + $0x8] sm:$0x3f] %v856_v9 }
 0x14b   : > { %862 = vst [vmem:[%s266_s28 + $0x18] sm:$0x3f] %v858_v10 }
 0x14c PF: > { %p11_p9 = scmp.ge.s32.totalorder %s1199_s16, 6   ;;  %s1444_s12 = smov %s1153_s13 }
 0x14d   : > { %s1445_s13 = smov %s1209_s19  ;;  %s1446_s14 = smov %s1199_s16 }
 0x14e   :  { %13 = sbr.rel (!%p11_p9) target bundleno = 2 (0x2), region = 98 }
 0x155   :  { %885 = vsyncpa [#allocation4], 1 }
 0x156   :  { %887 = vsyncpa [#allocation4 + $0x1], 1 }

// kernel: net_forward.6
= control target key start
LH: loop header
LB: loop body
LE: loop exit
PB: predicated region body
PF: predicated region fallthrough
CT: control target
= control target key end

     0   :  { %v1036_v1 = vmov 0   ;;  %vm110_vm0 = vcmask 1042432   ;;  %vm106_vm1 = vcmask 441344   ;;  %s1301_s0 = inlined_call_operand.vmem [shape: bf16[4,54,512], index: 0, kind: input, shape index: {}]   ;;  %s1302_s1 = inlined_call_operand.vmem [shape: bf16[16,54], index: 1, kind: input, shape index: {}]   ;;  %s1303_s2 = inlined_call_operand.vmem [shape: f32[16,1], index: 2, kind: input, shape index: {}]   ;;  %s1304_s3 = inlined_call_operand.vmem [shape: f32[16,512], index: 3, kind: output, shape index: {}]  }
   0x1   :  { %v947_v0 = vld [vmem:[%s1301_s0 + $0x4] ss:$16 sps:$4 sm:$0xff]   ;;  %155 = vmatprep.mubr.bf16.mxu0 %v1036_v1  ;;  %198 = vmatprep.mubr.bf16.mxu1 %v1036_v1  ;;  %v949_v2 = vld [vmem:[%s1301_s0 + $0xc] ss:$16 sps:$4 sm:$0xff]   ;;  %v951_v3 = vld [vmem:[%s1301_s0] ss:$16 sps:$4 sm:$0xff]  }
   0x2   :  { %946 = vset.pattern.permute.xlu0 %v1036_v1  ;;  %123 = vmatprep.subr.bf16.mxu0 %v947_v0  ;;  %v952_v4 = vld [vmem:[%s1301_s0 + $0x8] ss:$16 sps:$4 sm:$0xff]   ;;  %v953_v5 = vld [vmem:[%s1301_s0 + $0x24] ss:$16 sps:$4 sm:$0xff]   ;;  %v955_v6 = vld [vmem:[%s1301_s0 + $0x2c] ss:$16 sps:$4 sm:$0xff]  }
   0x3   :  { %166 = vmatprep.subr.bf16.mxu1 %v949_v2  ;;  %124 = vmatpush1.bf16.msra.mxu0 %v951_v3  ;;  %v957_v7 = vld [vmem:[%s1301_s0 + $0x20] ss:$16 sps:$4 sm:$0xff]   ;;  %v958_v8 = vld [vmem:[%s1301_s0 + $0x28] ss:$16 sps:$4 sm:$0xff]   ;;  %v959_v9 = vld [vmem:[%s1301_s0 + $0x44] ss:$16 sps:$4 sm:$0xff]  }
   0x4   :  { %167 = vmatpush1.bf16.msra.mxu1 %v952_v4  ;;  %125 = vmatprep.subr.bf16.mxu0 %v953_v5  ;;  %v961_v10 = vld [vmem:[%s1301_s0 + $0x4c] ss:$16 sps:$4 sm:$0xff]   ;;  %v963_v11 = vld [vmem:[%s1301_s0 + $0x40] ss:$16 sps:$4 sm:$0xff]   ;;  %v964_v12 = vld [vmem:[%s1301_s0 + $0x48] ss:$16 sps:$4 sm:$0xff]  }
   0x5   :  { %168 = vmatprep.subr.bf16.mxu1 %v955_v6  ;;  %v29_v13 = vld [vmem:[%s1301_s0 + $0x60] sm:$0x77]  ;;  %v30_v14 = vld [vmem:[%s1301_s0 + $0x68] sm:$0x77]  ;;  %v855_v32 = vld [vmem:[%s1301_s0 + $0xd0] sm:$0x77] }
   0x6   :  { %v836_v15 = vcombine.high %v29_v13, %v29_v13  ;;  %v838_v16 = vcombine.high %v30_v14, %v30_v14  ;;  %v835_v17 = vcombine.low %v29_v13, %v29_v13  ;;  %v837_v18 = vcombine.low %v30_v14, %v30_v14  ;;  %v972_v19 = vld [vmem:[%s1301_s0 + $0x74] ss:$16 sps:$4 sm:$0xff]   ;;  %v975_v22 = vld [vmem:[%s1301_s0 + $0x7c] ss:$16 sps:$4 sm:$0xff]   ;;  %v970_v24 = vld [vmem:[%s1301_s0 + $0x70] ss:$16 sps:$4 sm:$0xff]  }
   0x7   :  { %126 = vmatpush1.bf16.msra.mxu0 %v957_v7  ;;  %v1115_v23 = vld [vmem:[%s1302_s1] sm:$0xff]   ;;  %v973_v25 = vld [vmem:[%s1301_s0 + $0x78] ss:$16 sps:$4 sm:$0xff]   ;;  %v981_v27 = vld [vmem:[%s1301_s0 + $0x9c] ss:$16 sps:$4 sm:$0xff]   ;;  %v870_v36 = vcombine.high %v855_v32, %v855_v32  ;;  %v869_v38 = vcombine.low %v855_v32, %v855_v32 }
   0x8   :  { %169 = vmatpush1.bf16.msra.mxu1 %v958_v8  ;;  %127 = vmatprep.subr.bf16.mxu0 %v959_v9  ;;  %v112_v20 = vsel %vm110_vm0, %v835_v17, 0  ;;  %v118_v21 = vsel %vm110_vm0, %v837_v18, 0  ;;  %v978_v26 = vld [vmem:[%s1301_s0 + $0x94] ss:$16 sps:$4 sm:$0xff]   ;;  %v976_v28 = vld [vmem:[%s1301_s0 + $0x90] ss:$16 sps:$4 sm:$0xff]  }
   0x9   :  { %170 = vmatprep.subr.bf16.mxu1 %v961_v10  ;;  %v979_v29 = vld [vmem:[%s1301_s0 + $0x98] ss:$16 sps:$4 sm:$0xff]   ;;  %v984_v30 = vld [vmem:[%s1301_s0 + $0xb4] ss:$16 sps:$4 sm:$0xff]   ;;  %v987_v31 = vld [vmem:[%s1301_s0 + $0xbc] ss:$16 sps:$4 sm:$0xff]  }
   0xa   :  { %v856_v33 = vld [vmem:[%s1301_s0 + $0xd8] sm:$0x77]  ;;  %v982_v34 = vld [vmem:[%s1301_s0 + $0xb0] ss:$16 sps:$4 sm:$0xff]   ;;  %v295_v40 = vsel %vm110_vm0, %v869_v38, 0  ;;  %v783_v58 = vld [vmem:[%s1303_s2 + $0x8] sm:$0xff] }
   0xb   :  { %128 = vmatpush1.bf16.msra.mxu0 %v963_v11  ;;  %v985_v35 = vld [vmem:[%s1301_s0 + $0xb8] ss:$16 sps:$4 sm:$0xff]   ;;  %v872_v37 = vcombine.high %v856_v33, %v856_v33  ;;  %v871_v39 = vcombine.low %v856_v33, %v856_v33  ;;  %v994_v42 = vld [vmem:[%s1301_s0 + $0xe4] ss:$16 sps:$4 sm:$0xff]   ;;  %v997_v43 = vld [vmem:[%s1301_s0 + $0xec] ss:$16 sps:$4 sm:$0xff]  }
   0xc   :  { %171 = vmatpush1.bf16.msra.mxu1 %v964_v12  ;;  %839 = vmatprep.subr.msk.bf16.mxu0 %vm110_vm0, %v836_v15  ;;  %v992_v44 = vld [vmem:[%s1301_s0 + $0xe0] ss:$16 sps:$4 sm:$0xff]   ;;  %v995_v45 = vld [vmem:[%s1301_s0 + $0xe8] ss:$16 sps:$4 sm:$0xff]   ;;  %v1000_v46 = vld [vmem:[%s1301_s0 + $0x104] ss:$16 sps:$4 sm:$0xff]  }
   0xd   :  { %841 = vmatprep.subr.msk.bf16.mxu1 %vm110_vm0, %v838_v16  ;;  %v301_v41 = vsel %vm110_vm0, %v871_v39, 0  ;;  %v1003_v47 = vld [vmem:[%s1301_s0 + $0x10c] ss:$16 sps:$4 sm:$0xff]   ;;  %v998_v48 = vld [vmem:[%s1301_s0 + $0x100] ss:$16 sps:$4 sm:$0xff]  }
   0xe   :  { %v1001_v49 = vld [vmem:[%s1301_s0 + $0x108] ss:$16 sps:$4 sm:$0xff]   ;;  %v782_v50 = vld [vmem:[%s1303_s2] sm:$0xff]  ;;  %v1009_v52 = vld [vmem:[%s1301_s0 + $0x12c] ss:$16 sps:$4 sm:$0xff]  }
   0xf   :  { %130 = vmatpush1.bf16.msra.mxu0 %v112_v20  ;;  %v1006_v51 = vld [vmem:[%s1301_s0 + $0x124] ss:$16 sps:$4 sm:$0xff]   ;;  %v890_v54 = vld [vmem:[%s1301_s0 + $0x148] sm:$0x77]  ;;  %786 = vperm.xlu0 %946, %v782_v50   ;;  %v1004_v55 = vld [vmem:[%s1301_s0 + $0x120] ss:$16 sps:$4 sm:$0xff]  }
  0x10   :  { %173 = vmatpush1.bf16.msra.mxu1 %v118_v21  ;;  %306 = vmatprep.subr.bf16.mxu0 %v972_v19  ;;  %v889_v53 = vld [vmem:[%s1301_s0 + $0x140] sm:$0x77]  ;;  %v1007_v56 = vld [vmem:[%s1301_s0 + $0x128] ss:$16 sps:$4 sm:$0xff]   ;;  %v906_v59 = vcombine.high %v890_v54, %v890_v54  ;;  %v905_v61 = vcombine.low %v890_v54, %v890_v54  ;;  %v1019_v2 = vld [vmem:[%s1301_s0 + $0x15c] ss:$16 sps:$4 sm:$0xff]  }
  0x11   :  { %349 = vmatprep.subr.bf16.mxu1 %v975_v22  ;;  %v904_v57 = vcombine.high %v889_v53, %v889_v53  ;;  %v903_v60 = vcombine.low %v889_v53, %v889_v53  ;;  %v1016_v0 = vld [vmem:[%s1301_s0 + $0x154] ss:$16 sps:$4 sm:$0xff]   ;;  %v1014_v3 = vld [vmem:[%s1301_s0 + $0x150] ss:$16 sps:$4 sm:$0xff]   ;;  %v1017_v4 = vld [vmem:[%s1301_s0 + $0x158] ss:$16 sps:$4 sm:$0xff]  }
  0x12   :  { %840 = vmatmul.mubr.msk.bf16.vlgmr.msra.gmra.mrb[0].mxu0 %vm106_vm1, %v1115_v23  ;;  %v492_v63 = vsel %vm110_vm0, %v905_v61, 0  ;;  %v1022_v5 = vld [vmem:[%s1301_s0 + $0x174] ss:$16 sps:$4 sm:$0xff]   ;;  %v1025_v6 = vld [vmem:[%s1301_s0 + $0x17c] ss:$16 sps:$4 sm:$0xff]  }
  0x13   :  { %842 = vmatmul.mubr.msk.bf16.vlgmr.msra.gmra.mrb[0].mxu1 %vm106_vm1, %v1115_v23  ;;  %307 = vmatpush1.bf16.msra.mxu0 %v970_v24  ;;  %v486_v62 = vsel %vm110_vm0, %v903_v60, 0  ;;  %v1020_v7 = vld [vmem:[%s1301_s0 + $0x170] ss:$16 sps:$4 sm:$0xff]   ;;  %v1023_v8 = vld [vmem:[%s1301_s0 + $0x178] ss:$16 sps:$4 sm:$0xff]  }
  0x14   :  { %350 = vmatpush1.bf16.msra.mxu1 %v973_v25  ;;  %308 = vmatprep.subr.bf16.mxu0 %v978_v26  ;;  %v1028_v9 = vld [vmem:[%s1301_s0 + $0x194] ss:$16 sps:$4 sm:$0xff]   ;;  %v1031_v10 = vld [vmem:[%s1301_s0 + $0x19c] ss:$16 sps:$4 sm:$0xff]   ;;  %v1026_v13 = vld [vmem:[%s1301_s0 + $0x190] ss:$16 sps:$4 sm:$0xff]  }
  0x15   :  { %351 = vmatprep.subr.bf16.mxu1 %v981_v27  ;;  %338 = vmatprep.mubr.bf16.mxu0 %v1036_v1  ;;  %v923_v11 = vld [vmem:[%s1301_s0 + $0x1b0] sm:$0x77]  ;;  %v924_v12 = vld [vmem:[%s1301_s0 + $0x1b8] sm:$0x77] }
  0x16   :  { %381 = vmatprep.mubr.bf16.mxu1 %v1036_v1  ;;  %791 = vperm.xlu0 %946, %v783_v58   ;;  %v1029_v14 = vld [vmem:[%s1301_s0 + $0x198] ss:$16 sps:$4 sm:$0xff]   ;;  %v938_v15 = vcombine.high %v923_v11, %v923_v11  ;;  %v940_v16 = vcombine.high %v924_v12, %v924_v12  ;;  %v937_v17 = vcombine.low %v923_v11, %v923_v11 }
  0x17   :  { %309 = vmatpush1.bf16.msra.mxu0 %v976_v28  ;;  %v939_v18 = vcombine.low %v924_v12, %v924_v12 }
  0x18   :  { %352 = vmatpush1.bf16.msra.mxu1 %v979_v29  ;;  %310 = vmatprep.subr.bf16.mxu0 %v984_v30 }
  0x19   :  { %353 = vmatprep.subr.bf16.mxu1 %v987_v31  ;;  %v683_v19 = vsel %vm110_vm0, %v939_v18, 0 }
  0x1b   :  { %311 = vmatpush1.bf16.msra.mxu0 %v982_v34 }
  0x1c   :  { %354 = vmatpush1.bf16.msra.mxu1 %v985_v35  ;;  %873 = vmatprep.subr.msk.bf16.mxu0 %vm110_vm0, %v870_v36 }
  0x1d   :  { %875 = vmatprep.subr.msk.bf16.mxu1 %vm110_vm0, %v872_v37 }
  0x1f   :  { %313 = vmatpush1.bf16.msra.mxu0 %v295_v40 }
  0x20   :  { %356 = vmatpush1.bf16.msra.mxu1 %v301_v41  ;;  %497 = vmatprep.subr.bf16.mxu0 %v994_v42 }
  0x21   :  { %540 = vmatprep.subr.bf16.mxu1 %v997_v43 }
  0x22   :  { %874 = vmatmul.mubr.msk.bf16.vlgmr.msra.gmra.mrb[4].mxu0 %vm106_vm1, %v1115_v23 }
  0x23   :  { %876 = vmatmul.mubr.msk.bf16.vlgmr.msra.gmra.mrb[4].mxu1 %vm106_vm1, %v1115_v23  ;;  %498 = vmatpush1.bf16.msra.mxu0 %v992_v44 }
  0x24   :  { %541 = vmatpush1.bf16.msra.mxu1 %v995_v45  ;;  %499 = vmatprep.subr.bf16.mxu0 %v1000_v46 }
  0x25   :  { %542 = vmatprep.subr.bf16.mxu1 %v1003_v47  ;;  %529 = vmatprep.mubr.bf16.mxu0 %v1036_v1 }
  0x26   :  { %572 = vmatprep.mubr.bf16.mxu1 %v1036_v1 }
  0x27   :  { %500 = vmatpush1.bf16.msra.mxu0 %v998_v48 }
  0x28   :  { %543 = vmatpush1.bf16.msra.mxu1 %v1001_v49  ;;  %501 = vmatprep.subr.bf16.mxu0 %v1006_v51 }
  0x29   :  { %544 = vmatprep.subr.bf16.mxu1 %v1009_v52 }
  0x2b   :  { %502 = vmatpush1.bf16.msra.mxu0 %v1004_v55 }
  0x2c   :  { %545 = vmatpush1.bf16.msra.mxu1 %v1007_v56  ;;  %907 = vmatprep.subr.msk.bf16.mxu0 %vm110_vm0, %v904_v57 }
  0x2d   :  { %909 = vmatprep.subr.msk.bf16.mxu1 %vm110_vm0, %v906_v59 }
  0x2f   :  { %504 = vmatpush1.bf16.msra.mxu0 %v486_v62 }
  0x30   :  { %547 = vmatpush1.bf16.msra.mxu1 %v492_v63  ;;  %688 = vmatprep.subr.bf16.mxu0 %v1016_v0 }
  0x31   :  { %731 = vmatprep.subr.bf16.mxu1 %v1019_v2 }
  0x32   :  { %908 = vmatmul.mubr.msk.bf16.vlgmr.msra.gmra.mrb[8].mxu0 %vm106_vm1, %v1115_v23 }
  0x33   :  { %910 = vmatmul.mubr.msk.bf16.vlgmr.msra.gmra.mrb[8].mxu1 %vm106_vm1, %v1115_v23  ;;  %689 = vmatpush1.bf16.msra.mxu0 %v1014_v3 }
  0x34   :  { %732 = vmatpush1.bf16.msra.mxu1 %v1017_v4  ;;  %690 = vmatprep.subr.bf16.mxu0 %v1022_v5 }
  0x35   :  { %733 = vmatprep.subr.bf16.mxu1 %v1025_v6  ;;  %720 = vmatprep.mubr.bf16.mxu0 %v1036_v1 }
  0x36   :  { %763 = vmatprep.mubr.bf16.mxu1 %v1036_v1  ;;  %v677_v1 = vsel %vm110_vm0, %v937_v17, 0 }
  0x37   :  { %691 = vmatpush1.bf16.msra.mxu0 %v1020_v7 }
  0x38   :  { %734 = vmatpush1.bf16.msra.mxu1 %v1023_v8  ;;  %692 = vmatprep.subr.bf16.mxu0 %v1028_v9 }
  0x39   :  { %735 = vmatprep.subr.bf16.mxu1 %v1031_v10 }
  0x3b   :  { %693 = vmatpush1.bf16.msra.mxu0 %v1026_v13 }
  0x3c   :  { %736 = vmatpush1.bf16.msra.mxu1 %v1029_v14  ;;  %941 = vmatprep.subr.msk.bf16.mxu0 %vm110_vm0, %v938_v15 }
  0x3d   :  { %943 = vmatprep.subr.msk.bf16.mxu1 %vm110_vm0, %v940_v16 }
  0x3f   :  { %695 = vmatpush1.bf16.msra.mxu0 %v677_v1 }
  0x40   :  { %738 = vmatpush1.bf16.msra.mxu1 %v683_v19 }
  0x42   :  { %942 = vmatmul.mubr.msk.bf16.vlgmr.msra.gmra.mrb[12].mxu0 %vm106_vm1, %v1115_v23 }
  0x43   :  { %944 = vmatmul.mubr.msk.bf16.vlgmr.msra.gmra.mrb[12].mxu1 %vm106_vm1, %v1115_v23 }
  0x8e   :  { %v787_v60 = vpop.permute.xlu0 %786 }
  0x95   :  { %v792_v14 = vpop.permute.xlu0 %791 }
  0xe5   :  { %v157_v20 = vpop.f32.mrb[0].mxu0 }
  0xe6   :  { %v200_v21 = vpop.f32.mrb[0].mxu1  ;;  %v159_v22 = vpop.f32.mrb[1].mxu0 }
  0xe7   :  { %v202_v24 = vpop.f32.mrb[1].mxu1  ;;  %v161_v25 = vpop.f32.mrb[2].mxu0 }
  0xe8   :  { %v204_v26 = vpop.f32.mrb[2].mxu1  ;;  %v163_v27 = vpop.f32.mrb[3].mxu0 }
  0xe9   :  { %v206_v28 = vpop.f32.mrb[3].mxu1 }
  0xf5   :  { %v340_v29 = vpop.f32.mrb[4].mxu0 }
  0xf6   :  { %v383_v30 = vpop.f32.mrb[4].mxu1  ;;  %v392_v31 = vmax.f32 %v157_v20, %v340_v29  ;;  %v342_v33 = vpop.f32.mrb[5].mxu0 }
  0xf7   :  { %v394_v32 = vmax.f32 %v200_v21, %v383_v30  ;;  %v385_v34 = vpop.f32.mrb[5].mxu1  ;;  %v393_v35 = vmax.f32 %v159_v22, %v342_v33  ;;  %v344_v37 = vpop.f32.mrb[6].mxu0 }
  0xf8   :  { %v395_v36 = vmax.f32 %v202_v24, %v385_v34  ;;  %v387_v38 = vpop.f32.mrb[6].mxu1  ;;  %v396_v39 = vmax.f32 %v161_v25, %v344_v37  ;;  %v346_v40 = vpop.f32.mrb[7].mxu0 }
  0xf9   :  { %v398_v23 = vmax.f32 %v204_v26, %v387_v38  ;;  %v389_v41 = vpop.f32.mrb[7].mxu1  ;;  %v397_v42 = vmax.f32 %v163_v27, %v346_v40 }
  0xfa   :  { %v399_v43 = vmax.f32 %v206_v28, %v389_v41 }
 0x105   :  { %v531_v44 = vpop.f32.mrb[8].mxu0 }
 0x106   :  { %v574_v45 = vpop.f32.mrb[8].mxu1  ;;  %v583_v46 = vmax.f32 %v392_v31, %v531_v44  ;;  %v533_v48 = vpop.f32.mrb[9].mxu0 }
 0x107   :  { %v585_v47 = vmax.f32 %v394_v32, %v574_v45  ;;  %v576_v49 = vpop.f32.mrb[9].mxu1  ;;  %v584_v50 = vmax.f32 %v393_v35, %v533_v48  ;;  %v535_v52 = vpop.f32.mrb[10].mxu0 }
 0x108   :  { %v586_v51 = vmax.f32 %v395_v36, %v576_v49  ;;  %v578_v53 = vpop.f32.mrb[10].mxu1  ;;  %v587_v54 = vmax.f32 %v396_v39, %v535_v52  ;;  %v537_v56 = vpop.f32.mrb[11].mxu0 }
 0x109   :  { %v589_v55 = vmax.f32 %v398_v23, %v578_v53  ;;  %v580_v57 = vpop.f32.mrb[11].mxu1  ;;  %v588_v58 = vmax.f32 %v397_v42, %v537_v56 }
 0x10a   :  { %v590_v59 = vmax.f32 %v399_v43, %v580_v57 }
 0x115   :  { %v722_v61 = vpop.f32.mrb[12].mxu0 }
 0x116   :  { %v765_v62 = vpop.f32.mrb[12].mxu1  ;;  %v774_v63 = vmax.f32 %v583_v46, %v722_v61  ;;  %v724_v2 = vpop.f32.mrb[13].mxu0 }
 0x117   :  { %v776_v0 = vmax.f32 %v585_v47, %v765_v62  ;;  %v767_v3 = vpop.f32.mrb[13].mxu1  ;;  %v775_v4 = vmax.f32 %v584_v50, %v724_v2  ;;  %v726_v6 = vpop.f32.mrb[14].mxu0 }
 0x118   :  { %v777_v5 = vmax.f32 %v586_v51, %v767_v3  ;;  %v769_v7 = vpop.f32.mrb[14].mxu1  ;;  %v794_v8 = vadd.f32 %v787_v60, %v774_v63  ;;  %v778_v10 = vmax.f32 %v587_v54, %v726_v6  ;;  %v728_v12 = vpop.f32.mrb[15].mxu0 }
 0x119   :  { %v796_v9 = vadd.f32 %v787_v60, %v776_v0  ;;  %v780_v11 = vmax.f32 %v589_v55, %v769_v7  ;;  %v771_v13 = vpop.f32.mrb[15].mxu1  ;;  %v795_v15 = vadd.f32 %v787_v60, %v775_v4  ;;  %v779_v17 = vmax.f32 %v588_v58, %v728_v12 }
 0x11a   :  { %v797_v16 = vadd.f32 %v787_v60, %v777_v5  ;;  %v781_v18 = vmax.f32 %v590_v59, %v771_v13  ;;  %v802_v1 = vmax.f32 %v794_v8, 0.0  ;;  %v798_v20 = vadd.f32 %v792_v14, %v778_v10 }
 0x11b   :  { %v804_v19 = vmax.f32 %v796_v9, 0.0  ;;  %v800_v21 = vadd.f32 %v792_v14, %v780_v11  ;;  %v803_v22 = vmax.f32 %v795_v15, 0.0  ;;  %v799_v25 = vadd.f32 %v792_v14, %v779_v17 }
 0x11c   :  { %v805_v24 = vmax.f32 %v797_v16, 0.0  ;;  %v801_v26 = vadd.f32 %v792_v14, %v781_v18  ;;  %810 = vst [vmem:[%s1304_s3] sm:$0xff] %v802_v1  ;;  %v806_v27 = vmax.f32 %v798_v20, 0.0 }
 0x11d   :  { %812 = vst [vmem:[%s1304_s3 + $0x10] sm:$0xff] %v804_v19  ;;  %v808_v28 = vmax.f32 %v800_v21, 0.0  ;;  %811 = vst [vmem:[%s1304_s3 + $0x8] sm:$0xff] %v803_v22  ;;  %v807_v29 = vmax.f32 %v799_v25, 0.0 }
 0x11e   :  { %813 = vst [vmem:[%s1304_s3 + $0x18] sm:$0xff] %v805_v24  ;;  %v809_v30 = vmax.f32 %v801_v26, 0.0  ;;  %814 = vst [vmem:[%s1304_s3 + $0x20] sm:$0xff] %v806_v27 }
 0x11f   :  { %816 = vst [vmem:[%s1304_s3 + $0x30] sm:$0xff] %v808_v28  ;;  %815 = vst [vmem:[%s1304_s3 + $0x28] sm:$0xff] %v807_v29 }
 0x120   :  { %817 = vst [vmem:[%s1304_s3 + $0x38] sm:$0xff] %v809_v30 }

// kernel: net_forward.9
= control target key start
LH: loop header
LB: loop body
LE: loop exit
PB: predicated region body
PF: predicated region fallthrough
CT: control target
= control target key end

     0   :  { %s1222_s1 = inlined_call_operand.vmem [shape: bf16[1,1024,128], index: 1, kind: input, shape index: {}]   ;;  %s1223_s0 = inlined_call_operand.vmem [shape: bf16[16,1024], index: 0, kind: input, shape index: {}]   ;;  %s1224_s2 = inlined_call_operand.vmem [shape: f32[1,128], index: 2, kind: input, shape index: {}]   ;;  %s1225_s3 = inlined_call_operand.vmem [shape: f32[16,128], index: 3, kind: output, shape index: {}]  }
   0x1   :  { %v913_v0 = vld [vmem:[%s1222_s1 + $0x40] sm:$0xff]   ;;  %v917_v4 = vld [vmem:[%s1222_s1 + $0x48] sm:$0xff]   ;;  %v921_v8 = vld [vmem:[%s1222_s1 + $0x50] sm:$0xff]  }
   0x2   :  { %v914_v1 = vld [vmem:[%s1222_s1 + $0xc0] sm:$0xff]   ;;  %825 = vmatprep.subr.bf16.mxu0 %v913_v0  ;;  %v918_v5 = vld [vmem:[%s1222_s1 + $0xc8] sm:$0xff]   ;;  %v922_v9 = vld [vmem:[%s1222_s1 + $0xd0] sm:$0xff]  }
   0x3   :  { %v915_v2 = vld [vmem:[%s1222_s1] sm:$0xff]   ;;  %847 = vmatprep.subr.bf16.mxu1 %v914_v1  ;;  %v919_v6 = vld [vmem:[%s1222_s1 + $0x8] sm:$0xff]   ;;  %v923_v10 = vld [vmem:[%s1222_s1 + $0x10] sm:$0xff]  }
   0x4   :  { %v916_v3 = vld [vmem:[%s1222_s1 + $0x80] sm:$0xff]   ;;  %826 = vmatpush3.bf16.msra.mxu0 %v915_v2  ;;  %v920_v7 = vld [vmem:[%s1222_s1 + $0x88] sm:$0xff]   ;;  %v924_v11 = vld [vmem:[%s1222_s1 + $0x90] sm:$0xff]  }
   0x5   :  { %848 = vmatpush3.bf16.msra.mxu1 %v916_v3  ;;  %827 = vmatprep.subr.bf16.mxu0 %v917_v4  ;;  %v925_v12 = vld [vmem:[%s1222_s1 + $0x58] sm:$0xff]   ;;  %v929_v16 = vld [vmem:[%s1222_s1 + $0x60] sm:$0xff]   ;;  %v933_v20 = vld [vmem:[%s1222_s1 + $0x68] sm:$0xff]  }
   0x6   :  { %849 = vmatprep.subr.bf16.mxu1 %v918_v5  ;;  %v926_v13 = vld [vmem:[%s1222_s1 + $0xd8] sm:$0xff]   ;;  %v930_v17 = vld [vmem:[%s1222_s1 + $0xe0] sm:$0xff]   ;;  %v934_v21 = vld [vmem:[%s1222_s1 + $0xe8] sm:$0xff]  }
   0x7   :  { %v927_v14 = vld [vmem:[%s1222_s1 + $0x18] sm:$0xff]   ;;  %v931_v18 = vld [vmem:[%s1222_s1 + $0x20] sm:$0xff]   ;;  %v935_v22 = vld [vmem:[%s1222_s1 + $0x28] sm:$0xff]  }
   0x8   :  { %828 = vmatpush3.bf16.msra.mxu0 %v919_v6  ;;  %v928_v15 = vld [vmem:[%s1222_s1 + $0x98] sm:$0xff]   ;;  %v932_v19 = vld [vmem:[%s1222_s1 + $0xa0] sm:$0xff]   ;;  %v936_v23 = vld [vmem:[%s1222_s1 + $0xa8] sm:$0xff]  }
   0x9   :  { %850 = vmatpush3.bf16.msra.mxu1 %v920_v7  ;;  %829 = vmatprep.subr.bf16.mxu0 %v921_v8  ;;  %v937_v24 = vld [vmem:[%s1222_s1 + $0x70] sm:$0xff]   ;;  %v941_v28 = vld [vmem:[%s1222_s1 + $0x78] sm:$0xff]   ;;  %v15_v32 = vld [vmem:[%s1223_s0] sm:$0xff] }
   0xa   :  { %851 = vmatprep.subr.bf16.mxu1 %v922_v9  ;;  %v938_v25 = vld [vmem:[%s1222_s1 + $0xf0] sm:$0xff]   ;;  %v942_v29 = vld [vmem:[%s1222_s1 + $0xf8] sm:$0xff]   ;;  %v19_v33 = vld [vmem:[%s1223_s0 + $0x20] sm:$0xff] }
   0xb   :  { %v939_v26 = vld [vmem:[%s1222_s1 + $0x30] sm:$0xff]   ;;  %v943_v30 = vld [vmem:[%s1222_s1 + $0x38] sm:$0xff]   ;;  %v16_v34 = vld [vmem:[%s1223_s0 + $0x8] sm:$0xff]  ;;  %v753_v35 = vcombine.low %v15_v32, %v19_v33  ;;  %v754_v36 = vcombine.high %v15_v32, %v19_v33 }
   0xc   :  { %830 = vmatpush3.bf16.msra.mxu0 %v923_v10  ;;  %v940_v27 = vld [vmem:[%s1222_s1 + $0xb0] sm:$0xff]   ;;  %v944_v31 = vld [vmem:[%s1222_s1 + $0xb8] sm:$0xff]   ;;  %v20_v37 = vld [vmem:[%s1223_s0 + $0x28] sm:$0xff] }
   0xd   :  { %852 = vmatpush3.bf16.msra.mxu1 %v924_v11  ;;  %831 = vmatprep.subr.bf16.mxu0 %v925_v12  ;;  %v755_v38 = vcombine.low %v16_v34, %v20_v37  ;;  %v756_v39 = vcombine.high %v16_v34, %v20_v37  ;;  %v945_v40 = vld [vmem:[%s1222_s1 + $0x140] sm:$0xff]   ;;  %v949_v44 = vld [vmem:[%s1222_s1 + $0x148] sm:$0xff]   ;;  %v953_v48 = vld [vmem:[%s1222_s1 + $0x150] sm:$0xff]  }
   0xe   :  { %853 = vmatprep.subr.bf16.mxu1 %v926_v13  ;;  %614 = vmatprep.mubr.bf16.mxu0 %v754_v36  ;;  %v946_v41 = vld [vmem:[%s1222_s1 + $0x1c0] sm:$0xff]   ;;  %v950_v45 = vld [vmem:[%s1222_s1 + $0x1c8] sm:$0xff]   ;;  %v954_v49 = vld [vmem:[%s1222_s1 + $0x1d0] sm:$0xff]  }
   0xf   :  { %655 = vmatprep.mubr.bf16.mxu1 %v756_v39  ;;  %v947_v42 = vld [vmem:[%s1222_s1 + $0x100] sm:$0xff]   ;;  %v951_v46 = vld [vmem:[%s1222_s1 + $0x108] sm:$0xff]   ;;  %v955_v50 = vld [vmem:[%s1222_s1 + $0x110] sm:$0xff]  }
  0x10   :  { %832 = vmatpush3.bf16.msra.mxu0 %v927_v14  ;;  %v948_v43 = vld [vmem:[%s1222_s1 + $0x180] sm:$0xff]   ;;  %v952_v47 = vld [vmem:[%s1222_s1 + $0x188] sm:$0xff]   ;;  %v956_v51 = vld [vmem:[%s1222_s1 + $0x190] sm:$0xff]  }
  0x11   :  { %854 = vmatpush3.bf16.msra.mxu1 %v928_v15  ;;  %833 = vmatprep.subr.bf16.mxu0 %v929_v16  ;;  %v957_v52 = vld [vmem:[%s1222_s1 + $0x158] sm:$0xff]   ;;  %v961_v56 = vld [vmem:[%s1222_s1 + $0x160] sm:$0xff]   ;;  %v965_v60 = vld [vmem:[%s1222_s1 + $0x168] sm:$0xff]  }
  0x12   :  { %855 = vmatprep.subr.bf16.mxu1 %v930_v17  ;;  %v958_v53 = vld [vmem:[%s1222_s1 + $0x1d8] sm:$0xff]   ;;  %v962_v57 = vld [vmem:[%s1222_s1 + $0x1e0] sm:$0xff]   ;;  %v966_v61 = vld [vmem:[%s1222_s1 + $0x1e8] sm:$0xff]  }
  0x13   :  { %v959_v54 = vld [vmem:[%s1222_s1 + $0x118] sm:$0xff]   ;;  %v963_v58 = vld [vmem:[%s1222_s1 + $0x120] sm:$0xff]   ;;  %v967_v62 = vld [vmem:[%s1222_s1 + $0x128] sm:$0xff]  }
  0x14   :  { %834 = vmatpush3.bf16.msra.mxu0 %v931_v18  ;;  %v960_v55 = vld [vmem:[%s1222_s1 + $0x198] sm:$0xff]   ;;  %v964_v59 = vld [vmem:[%s1222_s1 + $0x1a0] sm:$0xff]   ;;  %v968_v63 = vld [vmem:[%s1222_s1 + $0x1a8] sm:$0xff]  }
  0x15   :  { %856 = vmatpush3.bf16.msra.mxu1 %v932_v19  ;;  %835 = vmatprep.subr.bf16.mxu0 %v933_v20  ;;  %v969_v0 = vld [vmem:[%s1222_s1 + $0x170] sm:$0xff]   ;;  %v973_v4 = vld [vmem:[%s1222_s1 + $0x178] sm:$0xff]   ;;  %v752_v18 = vld [vmem:[%s1224_s2] ss:$0 sm:$0xff] }
  0x16   :  { %857 = vmatprep.subr.bf16.mxu1 %v934_v21  ;;  %v970_v1 = vld [vmem:[%s1222_s1 + $0x1f0] sm:$0xff]   ;;  %v974_v5 = vld [vmem:[%s1222_s1 + $0x1f8] sm:$0xff]  }
  0x17   :  { %v971_v2 = vld [vmem:[%s1222_s1 + $0x130] sm:$0xff]   ;;  %v975_v6 = vld [vmem:[%s1222_s1 + $0x138] sm:$0xff]  }
  0x18   :  { %836 = vmatpush3.bf16.msra.mxu0 %v935_v22  ;;  %v972_v3 = vld [vmem:[%s1222_s1 + $0x1b0] sm:$0xff]   ;;  %v976_v7 = vld [vmem:[%s1222_s1 + $0x1b8] sm:$0xff]  }
  0x19   :  { %858 = vmatpush3.bf16.msra.mxu1 %v936_v23  ;;  %837 = vmatprep.subr.bf16.mxu0 %v937_v24  ;;  %v17_v8 = vld [vmem:[%s1223_s0 + $0x10] sm:$0xff]  ;;  %v18_v12 = vld [vmem:[%s1223_s0 + $0x18] sm:$0xff] }
  0x1a   :  { %859 = vmatprep.subr.bf16.mxu1 %v938_v25  ;;  %v21_v9 = vld [vmem:[%s1223_s0 + $0x30] sm:$0xff]  ;;  %v22_v13 = vld [vmem:[%s1223_s0 + $0x38] sm:$0xff] }
  0x1b   :  { %v757_v10 = vcombine.low %v17_v8, %v21_v9  ;;  %v758_v11 = vcombine.high %v17_v8, %v21_v9  ;;  %v759_v14 = vcombine.low %v18_v12, %v22_v13  ;;  %v760_v15 = vcombine.high %v18_v12, %v22_v13 }
  0x1c   :  { %838 = vmatpush3.bf16.msra.mxu0 %v939_v26 }
  0x1d   :  { %860 = vmatpush3.bf16.msra.mxu1 %v940_v27  ;;  %839 = vmatprep.subr.bf16.mxu0 %v941_v28 }
  0x1e   :  { %861 = vmatprep.subr.bf16.mxu1 %v942_v29 }
  0x20   :  { %840 = vmatpush3.bf16.msra.mxu0 %v943_v30 }
  0x21   :  { %862 = vmatpush3.bf16.msra.mxu1 %v944_v31  ;;  %869 = vmatprep.subr.bf16.mxu0 %v945_v40 }
  0x22   :  { %891 = vmatprep.subr.bf16.mxu1 %v946_v41 }
  0x23   :  { %615 = vmatmul.mubr.bf16.vlgmr.msra.gmra.mrb[0].mxu0 %v753_v35 }
  0x24   :  { %656 = vmatmul.mubr.bf16.vlgmr.msra.gmra.mrb[0].mxu1 %v755_v38  ;;  %870 = vmatpush3.bf16.msra.mxu0 %v947_v42 }
  0x25   :  { %892 = vmatpush3.bf16.msra.mxu1 %v948_v43  ;;  %871 = vmatprep.subr.bf16.mxu0 %v949_v44 }
  0x26   :  { %893 = vmatprep.subr.bf16.mxu1 %v950_v45  ;;  %696 = vmatprep.mubr.bf16.mxu0 %v758_v11 }
  0x27   :  { %737 = vmatprep.mubr.bf16.mxu1 %v760_v15 }
  0x28   :  { %872 = vmatpush3.bf16.msra.mxu0 %v951_v46 }
  0x29   :  { %894 = vmatpush3.bf16.msra.mxu1 %v952_v47  ;;  %873 = vmatprep.subr.bf16.mxu0 %v953_v48 }
  0x2a   :  { %895 = vmatprep.subr.bf16.mxu1 %v954_v49 }
  0x2c   :  { %874 = vmatpush3.bf16.msra.mxu0 %v955_v50 }
  0x2d   :  { %896 = vmatpush3.bf16.msra.mxu1 %v956_v51  ;;  %875 = vmatprep.subr.bf16.mxu0 %v957_v52 }
  0x2e   :  { %897 = vmatprep.subr.bf16.mxu1 %v958_v53 }
  0x30   :  { %876 = vmatpush3.bf16.msra.mxu0 %v959_v54 }
  0x31   :  { %898 = vmatpush3.bf16.msra.mxu1 %v960_v55  ;;  %877 = vmatprep.subr.bf16.mxu0 %v961_v56 }
  0x32   :  { %899 = vmatprep.subr.bf16.mxu1 %v962_v57 }
  0x34   :  { %878 = vmatpush3.bf16.msra.mxu0 %v963_v58 }
  0x35   :  { %900 = vmatpush3.bf16.msra.mxu1 %v964_v59  ;;  %879 = vmatprep.subr.bf16.mxu0 %v965_v60 }
  0x36   :  { %901 = vmatprep.subr.bf16.mxu1 %v966_v61 }
  0x38   :  { %880 = vmatpush3.bf16.msra.mxu0 %v967_v62 }
  0x39   :  { %902 = vmatpush3.bf16.msra.mxu1 %v968_v63  ;;  %881 = vmatprep.subr.bf16.mxu0 %v969_v0 }
  0x3a   :  { %903 = vmatprep.subr.bf16.mxu1 %v970_v1 }
  0x3c   :  { %882 = vmatpush3.bf16.msra.mxu0 %v971_v2 }
  0x3d   :  { %904 = vmatpush3.bf16.msra.mxu1 %v972_v3  ;;  %883 = vmatprep.subr.bf16.mxu0 %v973_v4 }
  0x3e   :  { %905 = vmatprep.subr.bf16.mxu1 %v974_v5 }
  0x40   :  { %884 = vmatpush3.bf16.msra.mxu0 %v975_v6 }
  0x41   :  { %906 = vmatpush3.bf16.msra.mxu1 %v976_v7 }
  0x43   :  { %697 = vmatmul.mubr.bf16.vlgmr.msra.gmra.mrb[4].mxu0 %v757_v10 }
  0x44   :  { %738 = vmatmul.mubr.bf16.vlgmr.msra.gmra.mrb[4].mxu1 %v759_v14 }
  0xf6   :  { %v841_v16 = vpop.f32.mrb[0].mxu0 }
  0xf7   :  { %v863_v17 = vpop.f32.mrb[0].mxu1  ;;  %v842_v19 = vpop.f32.mrb[1].mxu0 }
  0xf8   :  { %v843_v20 = vadd.f32 %v842_v19, %v841_v16  ;;  %v864_v21 = vpop.f32.mrb[1].mxu1  ;;  %v844_v22 = vpop.f32.mrb[2].mxu0 }
  0xf9   :  { %v865_v23 = vadd.f32 %v864_v21, %v863_v17  ;;  %v866_v24 = vpop.f32.mrb[2].mxu1  ;;  %v845_v25 = vpop.f32.mrb[3].mxu0 }
  0xfa   :  { %v617_v26 = vadd.f32 %v843_v20, %v752_v18  ;;  %v846_v27 = vadd.f32 %v845_v25, %v844_v22  ;;  %v867_v28 = vpop.f32.mrb[3].mxu1 }
  0xfb   :  { %v868_v29 = vadd.f32 %v867_v28, %v866_v24 }
  0xfc   :  { %v658_v30 = vadd.f32 %v865_v23, %v617_v26  ;;  %v620_v31 = vadd.f32 %v846_v27, %v752_v18 }
  0xfe   :  { %v661_v32 = vadd.f32 %v868_v29, %v620_v31 }
 0x116   :  { %v885_v33 = vpop.f32.mrb[4].mxu0 }
 0x117   :  { %v907_v34 = vpop.f32.mrb[4].mxu1  ;;  %v886_v35 = vpop.f32.mrb[5].mxu0 }
 0x118   :  { %v887_v36 = vadd.f32 %v886_v35, %v885_v33  ;;  %v908_v37 = vpop.f32.mrb[5].mxu1  ;;  %v888_v38 = vpop.f32.mrb[6].mxu0 }
 0x119   :  { %v909_v39 = vadd.f32 %v908_v37, %v907_v34  ;;  %v910_v40 = vpop.f32.mrb[6].mxu1  ;;  %v889_v41 = vpop.f32.mrb[7].mxu0 }
 0x11a   :  { %v699_v42 = vadd.f32 %v887_v36, %v658_v30  ;;  %v890_v43 = vadd.f32 %v889_v41, %v888_v38  ;;  %v911_v44 = vpop.f32.mrb[7].mxu1 }
 0x11b   :  { %v912_v45 = vadd.f32 %v911_v44, %v910_v40 }
 0x11c   :  { %v740_v46 = vadd.f32 %v909_v39, %v699_v42  ;;  %v702_v47 = vadd.f32 %v890_v43, %v661_v32 }
 0x11e   :  { %746 = vst [vmem:[%s1225_s3] sm:$0xff] %v740_v46  ;;  %v743_v48 = vadd.f32 %v912_v45, %v702_v47 }
 0x120   :  { %747 = vst [vmem:[%s1225_s3 + $0x8] sm:$0xff] %v743_v48 }

// kernel: net_forward.8
= control target key start
LH: loop header
LB: loop body
LE: loop exit
PB: predicated region body
PF: predicated region fallthrough
CT: control target
= control target key end

     0   :  { %s5643_s12 = smov 0   ;;  %s5645_s13 = smov 0   ;;  %s6320_s0 = inlined_call_operand.vmem [shape: bf16[16,2048], index: 0, kind: input, shape index: {}]   ;;  %s6321_s1 = inlined_call_operand.vmem [shape: bf16[2,2048,512], index: 1, kind: input, shape index: {}]   ;;  %s6322_s2 = inlined_call_operand.vmem [shape: f32[1,1024], index: 2, kind: input, shape index: {}]   ;;  %s6323_s3 = inlined_call_operand.vmem [shape: bf16[16,1024], index: 3, kind: output, shape index: {}]  }
   0x1   :  { %s5647_s14 = smov 0  }
   0x2 LB: > { %s5656_s15 = sadd.s32 4294967295, %s5621_s14   ;;  %s5658_s16 = sadd.s32 1, %s5621_s14   ;;  %s5621_s14 = sphi %s5647_s14, %s6327_s14   ;;  %s5617_s13 = sphi %s5645_s13, %s6326_s13   ;;  %s5613_s12 = sphi %s5643_s12, %s6325_s12  }
   0x3   : > { %s90_s17 = ssub.s32 %s5621_s14, %s5658_s16  ;;  %s93_s18 = sadd.s32 1, %s5617_s13 }
   0x4   : > { %p91_p0 = scmp.eq.s32.totalorder %s90_s17, 0  ;;  %p103_p1 = scmp.ne.s32.totalorder %s5617_s13, %s5613_s12 }
   0x5   : > { %p104_p2 = scmp.eq.s32.totalorder %s5656_s15, 1  ;;  %p4195_p3 = scmp.ge.s32.totalorder %s5621_s14, 1 }
   0x6   : > { %s5666_s19 = scalar_select %p91_p0, %s5617_s13, %s93_s18  }
   0x7   : > { %p5668_p4 = por %p104_p2, %p103_p1  ;;  %p147_p5 = scmp.lt.s32.totalorder %s5621_s14, 3 }
   0x9   : > { %p148_p6 = pnand %p4195_p3, %p147_p5 }
   0xa   : > { %p174_p7 = scmp.lt.s32.totalorder (!%p148_p6), %s5656_s15, 1  ;;  %v185_v0 = vld [vmem:[%s6320_s0] sm:$0xff] (!%p148_p6)  ;;  %s4199_s11 = sshll.u32 (!%p148_p6), %s5656_s15, 2 }
   0xb   : > { %151 = sbr.rel (%p148_p6) target bundleno = 765 (0x2fd), region = 32  ;;  %v193_v1 = vld [vmem:[%s6320_s0 + $0x40] sm:$0xff] (!%p148_p6)  ;;  %p180_p8 = scmp.lt.s32.totalorder (!%p148_p6), %s4199_s11, 7 }
   0xc   : > { %v5679_v2 = vcombine.low (!%p148_p6), %v185_v0, %v193_v1  ;;  %v4201_v3 = vcombine.high (!%p148_p6), %v185_v0, %v193_v1 }
   0xe   : > { %3407 = vmatprep.mubr.bf16.mxu0 (!%p148_p6), %v4201_v3  ;;  %3751 = vmatprep.mubr.bf16.mxu1 (!%p148_p6), %v4201_v3 }
  0x12   : > { %s175_s25 = scalar_select %p174_p7, %s5656_s15, 1 }
  0x13   : > { %s6329_s11 = smov (!%p180_p8, %s4199_s11), 7  ;;  %s4742_s22 = sshll.u32 (%p5668_p4), %s5656_s15, 4 }
  0x14   : > { %s4737_s26 = sshll.u32 %s175_s25, 12  ;;  %s182_s18 = scalar_lea.vmem %s6322_s2, %s6329_s11 }
  0x15   : > { %s5685_s29 = scalar_lea.vmem %s6321_s1, %s4737_s26  ;;  %s4108_s25 = scalar_lea.vmem (%p5668_p4), %s6323_s3, %s4742_s22 }
  0x16   : > { %v4831_v4 = vld [vmem:[%s5685_s29 + $0x4] ss:$16 sps:$4 sm:$0xff]   ;;  %v4833_v5 = vld [vmem:[%s5685_s29 + $0xc] ss:$16 sps:$4 sm:$0xff]   ;;  %v4835_v6 = vld [vmem:[%s5685_s29] ss:$16 sps:$4 sm:$0xff]  }
  0x17   : > { %3375 = vmatprep.subr.bf16.mxu0 %v4831_v4  ;;  %v4836_v7 = vld [vmem:[%s5685_s29 + $0x8] ss:$16 sps:$4 sm:$0xff]   ;;  %3719 = vmatprep.subr.bf16.mxu1 %v4833_v5  ;;  %v4837_v8 = vld [vmem:[%s5685_s29 + $0x24] ss:$16 sps:$4 sm:$0xff]   ;;  %v4839_v9 = vld [vmem:[%s5685_s29 + $0x2c] ss:$16 sps:$4 sm:$0xff]  }
  0x18   : > { %3376 = vmatpush1.bf16.msra.mxu0 %v4835_v6  ;;  %3720 = vmatpush1.bf16.msra.mxu1 %v4836_v7  ;;  %v4841_v10 = vld [vmem:[%s5685_s29 + $0x20] ss:$16 sps:$4 sm:$0xff]   ;;  %v4842_v11 = vld [vmem:[%s5685_s29 + $0x28] ss:$16 sps:$4 sm:$0xff]   ;;  %v4843_v12 = vld [vmem:[%s5685_s29 + $0x44] ss:$16 sps:$4 sm:$0xff]  }
  0x19   : > { %3377 = vmatprep.subr.bf16.mxu0 %v4837_v8  ;;  %3721 = vmatprep.subr.bf16.mxu1 %v4839_v9  ;;  %v4845_v13 = vld [vmem:[%s5685_s29 + $0x4c] ss:$16 sps:$4 sm:$0xff]   ;;  %v4847_v14 = vld [vmem:[%s5685_s29 + $0x40] ss:$16 sps:$4 sm:$0xff]   ;;  %v4848_v15 = vld [vmem:[%s5685_s29 + $0x48] ss:$16 sps:$4 sm:$0xff]  }
  0x1a   : > { %v4849_v16 = vld [vmem:[%s5685_s29 + $0x64] ss:$16 sps:$4 sm:$0xff]   ;;  %v4851_v17 = vld [vmem:[%s5685_s29 + $0x6c] ss:$16 sps:$4 sm:$0xff]   ;;  %v4853_v18 = vld [vmem:[%s5685_s29 + $0x60] ss:$16 sps:$4 sm:$0xff]  }
  0x1b   : > { %v4854_v19 = vld [vmem:[%s5685_s29 + $0x68] ss:$16 sps:$4 sm:$0xff]   ;;  %v4855_v20 = vld [vmem:[%s5685_s29 + $0x84] ss:$16 sps:$4 sm:$0xff]   ;;  %v4857_v21 = vld [vmem:[%s5685_s29 + $0x8c] ss:$16 sps:$4 sm:$0xff]  }
  0x1c   : > { %3378 = vmatpush1.bf16.msra.mxu0 %v4841_v10  ;;  %3722 = vmatpush1.bf16.msra.mxu1 %v4842_v11  ;;  %v4859_v22 = vld [vmem:[%s5685_s29 + $0x80] ss:$16 sps:$4 sm:$0xff]   ;;  %v4860_v23 = vld [vmem:[%s5685_s29 + $0x88] ss:$16 sps:$4 sm:$0xff]   ;;  %v4861_v24 = vld [vmem:[%s5685_s29 + $0xa4] ss:$16 sps:$4 sm:$0xff]  }
  0x1d   : > { %3379 = vmatprep.subr.bf16.mxu0 %v4843_v12  ;;  %3723 = vmatprep.subr.bf16.mxu1 %v4845_v13  ;;  %v4863_v25 = vld [vmem:[%s5685_s29 + $0xac] ss:$16 sps:$4 sm:$0xff]   ;;  %v4865_v26 = vld [vmem:[%s5685_s29 + $0xa0] ss:$16 sps:$4 sm:$0xff]   ;;  %v4866_v27 = vld [vmem:[%s5685_s29 + $0xa8] ss:$16 sps:$4 sm:$0xff]  }
  0x1e   : > { %v4867_v28 = vld [vmem:[%s5685_s29 + $0xc4] ss:$16 sps:$4 sm:$0xff]   ;;  %v4869_v29 = vld [vmem:[%s5685_s29 + $0xcc] ss:$16 sps:$4 sm:$0xff]   ;;  %v4871_v30 = vld [vmem:[%s5685_s29 + $0xc0] ss:$16 sps:$4 sm:$0xff]  }
  0x1f   : > { %v4872_v31 = vld [vmem:[%s5685_s29 + $0xc8] ss:$16 sps:$4 sm:$0xff]   ;;  %v4873_v32 = vld [vmem:[%s5685_s29 + $0xe4] ss:$16 sps:$4 sm:$0xff]   ;;  %v4875_v33 = vld [vmem:[%s5685_s29 + $0xec] ss:$16 sps:$4 sm:$0xff]  }
  0x20   : > { %3380 = vmatpush1.bf16.msra.mxu0 %v4847_v14  ;;  %3724 = vmatpush1.bf16.msra.mxu1 %v4848_v15  ;;  %v4877_v34 = vld [vmem:[%s5685_s29 + $0xe0] ss:$16 sps:$4 sm:$0xff]   ;;  %v4878_v35 = vld [vmem:[%s5685_s29 + $0xe8] ss:$16 sps:$4 sm:$0xff]   ;;  %v4879_v36 = vld [vmem:[%s5685_s29 + $0x104] ss:$16 sps:$4 sm:$0xff]  }
  0x21   : > { %3381 = vmatprep.subr.bf16.mxu0 %v4849_v16  ;;  %3725 = vmatprep.subr.bf16.mxu1 %v4851_v17  ;;  %v4881_v37 = vld [vmem:[%s5685_s29 + $0x10c] ss:$16 sps:$4 sm:$0xff]   ;;  %v4883_v38 = vld [vmem:[%s5685_s29 + $0x100] ss:$16 sps:$4 sm:$0xff]   ;;  %v4884_v39 = vld [vmem:[%s5685_s29 + $0x108] ss:$16 sps:$4 sm:$0xff]  }
  0x22   : > { %v4885_v40 = vld [vmem:[%s5685_s29 + $0x124] ss:$16 sps:$4 sm:$0xff]   ;;  %v4887_v41 = vld [vmem:[%s5685_s29 + $0x12c] ss:$16 sps:$4 sm:$0xff]   ;;  %v4889_v42 = vld [vmem:[%s5685_s29 + $0x120] ss:$16 sps:$4 sm:$0xff]  }
  0x23   : > { %v4890_v43 = vld [vmem:[%s5685_s29 + $0x128] ss:$16 sps:$4 sm:$0xff]   ;;  %v4891_v44 = vld [vmem:[%s5685_s29 + $0x144] ss:$16 sps:$4 sm:$0xff]   ;;  %v4893_v45 = vld [vmem:[%s5685_s29 + $0x14c] ss:$16 sps:$4 sm:$0xff]  }
  0x24   : > { %3382 = vmatpush1.bf16.msra.mxu0 %v4853_v18  ;;  %3726 = vmatpush1.bf16.msra.mxu1 %v4854_v19  ;;  %v4895_v46 = vld [vmem:[%s5685_s29 + $0x140] ss:$16 sps:$4 sm:$0xff]   ;;  %v4896_v47 = vld [vmem:[%s5685_s29 + $0x148] ss:$16 sps:$4 sm:$0xff]   ;;  %v4897_v48 = vld [vmem:[%s5685_s29 + $0x164] ss:$16 sps:$4 sm:$0xff]  }
  0x25   : > { %3383 = vmatprep.subr.bf16.mxu0 %v4855_v20  ;;  %3727 = vmatprep.subr.bf16.mxu1 %v4857_v21  ;;  %v4899_v49 = vld [vmem:[%s5685_s29 + $0x16c] ss:$16 sps:$4 sm:$0xff]   ;;  %v4901_v50 = vld [vmem:[%s5685_s29 + $0x160] ss:$16 sps:$4 sm:$0xff]   ;;  %v4902_v51 = vld [vmem:[%s5685_s29 + $0x168] ss:$16 sps:$4 sm:$0xff]  }
  0x26   : > { %v4903_v52 = vld [vmem:[%s5685_s29 + $0x184] ss:$16 sps:$4 sm:$0xff]   ;;  %v4905_v53 = vld [vmem:[%s5685_s29 + $0x18c] ss:$16 sps:$4 sm:$0xff]   ;;  %v4907_v54 = vld [vmem:[%s5685_s29 + $0x180] ss:$16 sps:$4 sm:$0xff]  }
  0x27   : > { %v4908_v55 = vld [vmem:[%s5685_s29 + $0x188] ss:$16 sps:$4 sm:$0xff]   ;;  %v4909_v56 = vld [vmem:[%s5685_s29 + $0x1a4] ss:$16 sps:$4 sm:$0xff]   ;;  %v4911_v57 = vld [vmem:[%s5685_s29 + $0x1ac] ss:$16 sps:$4 sm:$0xff]  }
  0x28   : > { %3384 = vmatpush1.bf16.msra.mxu0 %v4859_v22  ;;  %3728 = vmatpush1.bf16.msra.mxu1 %v4860_v23  ;;  %v4913_v58 = vld [vmem:[%s5685_s29 + $0x1a0] ss:$16 sps:$4 sm:$0xff]   ;;  %v4914_v59 = vld [vmem:[%s5685_s29 + $0x1a8] ss:$16 sps:$4 sm:$0xff]   ;;  %v4915_v60 = vld [vmem:[%s5685_s29 + $0x1c4] ss:$16 sps:$4 sm:$0xff]  }
  0x29   : > { %3385 = vmatprep.subr.bf16.mxu0 %v4861_v24  ;;  %3729 = vmatprep.subr.bf16.mxu1 %v4863_v25  ;;  %v4917_v61 = vld [vmem:[%s5685_s29 + $0x1cc] ss:$16 sps:$4 sm:$0xff]   ;;  %v4919_v62 = vld [vmem:[%s5685_s29 + $0x1c0] ss:$16 sps:$4 sm:$0xff]   ;;  %v4920_v63 = vld [vmem:[%s5685_s29 + $0x1c8] ss:$16 sps:$4 sm:$0xff]  }
  0x2a   : > { %v4921_v0 = vld [vmem:[%s5685_s29 + $0x1e4] ss:$16 sps:$4 sm:$0xff]   ;;  %v4923_v1 = vld [vmem:[%s5685_s29 + $0x1ec] ss:$16 sps:$4 sm:$0xff]   ;;  %v4925_v3 = vld [vmem:[%s5685_s29 + $0x1e0] ss:$16 sps:$4 sm:$0xff]  }
  0x2b   : > { %v4926_v4 = vld [vmem:[%s5685_s29 + $0x1e8] ss:$16 sps:$4 sm:$0xff]   ;;  %v4929_v5 = vld [vmem:[%s5685_s29 + $0x204] ss:$16 sps:$4 sm:$0xff]   ;;  %v4932_v6 = vld [vmem:[%s5685_s29 + $0x20c] ss:$16 sps:$4 sm:$0xff]  }
  0x2c   : > { %3386 = vmatpush1.bf16.msra.mxu0 %v4865_v26  ;;  %3730 = vmatpush1.bf16.msra.mxu1 %v4866_v27  ;;  %v4927_v7 = vld [vmem:[%s5685_s29 + $0x200] ss:$16 sps:$4 sm:$0xff]   ;;  %v4930_v8 = vld [vmem:[%s5685_s29 + $0x208] ss:$16 sps:$4 sm:$0xff]   ;;  %v4935_v9 = vld [vmem:[%s5685_s29 + $0x224] ss:$16 sps:$4 sm:$0xff]  }
  0x2d   : > { %3387 = vmatprep.subr.bf16.mxu0 %v4867_v28  ;;  %3731 = vmatprep.subr.bf16.mxu1 %v4869_v29  ;;  %v4938_v10 = vld [vmem:[%s5685_s29 + $0x22c] ss:$16 sps:$4 sm:$0xff]   ;;  %v4933_v11 = vld [vmem:[%s5685_s29 + $0x220] ss:$16 sps:$4 sm:$0xff]   ;;  %v4936_v12 = vld [vmem:[%s5685_s29 + $0x228] ss:$16 sps:$4 sm:$0xff]  }
  0x2e   : > { %v4941_v13 = vld [vmem:[%s5685_s29 + $0x244] ss:$16 sps:$4 sm:$0xff]   ;;  %v4944_v14 = vld [vmem:[%s5685_s29 + $0x24c] ss:$16 sps:$4 sm:$0xff]   ;;  %v4939_v15 = vld [vmem:[%s5685_s29 + $0x240] ss:$16 sps:$4 sm:$0xff]  }
  0x2f   : > { %v4942_v16 = vld [vmem:[%s5685_s29 + $0x248] ss:$16 sps:$4 sm:$0xff]   ;;  %v4950_v17 = vld [vmem:[%s5685_s29 + $0x26c] ss:$16 sps:$4 sm:$0xff]   ;;  %v4945_v18 = vld [vmem:[%s5685_s29 + $0x260] ss:$16 sps:$4 sm:$0xff]  }
  0x30   : > { %3388 = vmatpush1.bf16.msra.mxu0 %v4871_v30  ;;  %3732 = vmatpush1.bf16.msra.mxu1 %v4872_v31  ;;  %v4948_v19 = vld [vmem:[%s5685_s29 + $0x268] ss:$16 sps:$4 sm:$0xff]   ;;  %v4953_v20 = vld [vmem:[%s5685_s29 + $0x284] ss:$16 sps:$4 sm:$0xff]   ;;  %v4956_v21 = vld [vmem:[%s5685_s29 + $0x28c] ss:$16 sps:$4 sm:$0xff]  }
  0x31   : > { %3389 = vmatprep.subr.bf16.mxu0 %v4873_v32  ;;  %3733 = vmatprep.subr.bf16.mxu1 %v4875_v33  ;;  %v4951_v22 = vld [vmem:[%s5685_s29 + $0x280] ss:$16 sps:$4 sm:$0xff]   ;;  %v4954_v23 = vld [vmem:[%s5685_s29 + $0x288] ss:$16 sps:$4 sm:$0xff]   ;;  %v4959_v24 = vld [vmem:[%s5685_s29 + $0x2a4] ss:$16 sps:$4 sm:$0xff]  }
  0x32   : > { %v4962_v25 = vld [vmem:[%s5685_s29 + $0x2ac] ss:$16 sps:$4 sm:$0xff]   ;;  %v4957_v26 = vld [vmem:[%s5685_s29 + $0x2a0] ss:$16 sps:$4 sm:$0xff]   ;;  %v4960_v27 = vld [vmem:[%s5685_s29 + $0x2a8] ss:$16 sps:$4 sm:$0xff]  }
  0x33   : > { %v4965_v28 = vld [vmem:[%s5685_s29 + $0x2c4] ss:$16 sps:$4 sm:$0xff]   ;;  %v4968_v29 = vld [vmem:[%s5685_s29 + $0x2cc] ss:$16 sps:$4 sm:$0xff]   ;;  %v4963_v33 = vld [vmem:[%s5685_s29 + $0x2c0] ss:$16 sps:$4 sm:$0xff]  }
  0x34   : > { %3390 = vmatpush1.bf16.msra.mxu0 %v4877_v34  ;;  %3734 = vmatpush1.bf16.msra.mxu1 %v4878_v35  ;;  %v5782_v30 = vld [vmem:[%s6320_s0 + $0x8] sm:$0xff]  ;;  %v4971_v35 = vld [vmem:[%s5685_s29 + $0x2e4] ss:$16 sps:$4 sm:$0xff]  }
  0x35   : > { %3391 = vmatprep.subr.bf16.mxu0 %v4879_v36  ;;  %3735 = vmatprep.subr.bf16.mxu1 %v4881_v37  ;;  %v5787_v31 = vld [vmem:[%s6320_s0 + $0x48] sm:$0xff]  ;;  %v4969_v37 = vld [vmem:[%s5685_s29 + $0x2e0] ss:$16 sps:$4 sm:$0xff]  }
  0x36   : > { %v4203_v32 = vcombine.high %v5782_v30, %v5787_v31  ;;  %v4966_v34 = vld [vmem:[%s5685_s29 + $0x2c8] ss:$16 sps:$4 sm:$0xff]   ;;  %v4974_v36 = vld [vmem:[%s5685_s29 + $0x2ec] ss:$16 sps:$4 sm:$0xff]  }
  0x38   : > { %3392 = vmatpush1.bf16.msra.mxu0 %v4883_v38  ;;  %3736 = vmatpush1.bf16.msra.mxu1 %v4884_v39  ;;  %v4972_v38 = vld [vmem:[%s5685_s29 + $0x2e8] ss:$16 sps:$4 sm:$0xff]   ;;  %v4977_v39 = vld [vmem:[%s5685_s29 + $0x304] ss:$16 sps:$4 sm:$0xff]  }
  0x39   : > { %3393 = vmatprep.subr.bf16.mxu0 %v4885_v40  ;;  %3737 = vmatprep.subr.bf16.mxu1 %v4887_v41  ;;  %v4980_v40 = vld [vmem:[%s5685_s29 + $0x30c] ss:$16 sps:$4 sm:$0xff]   ;;  %v4975_v41 = vld [vmem:[%s5685_s29 + $0x300] ss:$16 sps:$4 sm:$0xff]  }
  0x3c   : > { %3394 = vmatpush1.bf16.msra.mxu0 %v4889_v42  ;;  %3738 = vmatpush1.bf16.msra.mxu1 %v4890_v43  ;;  %v4978_v42 = vld [vmem:[%s5685_s29 + $0x308] ss:$16 sps:$4 sm:$0xff]   ;;  %v4983_v43 = vld [vmem:[%s5685_s29 + $0x324] ss:$16 sps:$4 sm:$0xff]  }
  0x3d   : > { %3395 = vmatprep.subr.bf16.mxu0 %v4891_v44  ;;  %3739 = vmatprep.subr.bf16.mxu1 %v4893_v45  ;;  %v4986_v44 = vld [vmem:[%s5685_s29 + $0x32c] ss:$16 sps:$4 sm:$0xff]   ;;  %v4981_v45 = vld [vmem:[%s5685_s29 + $0x320] ss:$16 sps:$4 sm:$0xff]  }
  0x40   : > { %3396 = vmatpush1.bf16.msra.mxu0 %v4895_v46  ;;  %3740 = vmatpush1.bf16.msra.mxu1 %v4896_v47  ;;  %v4984_v46 = vld [vmem:[%s5685_s29 + $0x328] ss:$16 sps:$4 sm:$0xff]   ;;  %v4989_v47 = vld [vmem:[%s5685_s29 + $0x344] ss:$16 sps:$4 sm:$0xff]  }
  0x41   : > { %3397 = vmatprep.subr.bf16.mxu0 %v4897_v48  ;;  %3741 = vmatprep.subr.bf16.mxu1 %v4899_v49  ;;  %v4992_v48 = vld [vmem:[%s5685_s29 + $0x34c] ss:$16 sps:$4 sm:$0xff]   ;;  %v4987_v49 = vld [vmem:[%s5685_s29 + $0x340] ss:$16 sps:$4 sm:$0xff]  }
  0x44   : > { %3398 = vmatpush1.bf16.msra.mxu0 %v4901_v50  ;;  %3742 = vmatpush1.bf16.msra.mxu1 %v4902_v51  ;;  %v4990_v50 = vld [vmem:[%s5685_s29 + $0x348] ss:$16 sps:$4 sm:$0xff]   ;;  %v4995_v51 = vld [vmem:[%s5685_s29 + $0x364] ss:$16 sps:$4 sm:$0xff]  }
  0x45   : > { %3399 = vmatprep.subr.bf16.mxu0 %v4903_v52  ;;  %3743 = vmatprep.subr.bf16.mxu1 %v4905_v53  ;;  %v4998_v52 = vld [vmem:[%s5685_s29 + $0x36c] ss:$16 sps:$4 sm:$0xff]   ;;  %v4993_v53 = vld [vmem:[%s5685_s29 + $0x360] ss:$16 sps:$4 sm:$0xff]  }
  0x48   : > { %3400 = vmatpush1.bf16.msra.mxu0 %v4907_v54  ;;  %3744 = vmatpush1.bf16.msra.mxu1 %v4908_v55  ;;  %v4996_v54 = vld [vmem:[%s5685_s29 + $0x368] ss:$16 sps:$4 sm:$0xff]   ;;  %v5001_v55 = vld [vmem:[%s5685_s29 + $0x384] ss:$16 sps:$4 sm:$0xff]  }
  0x49   : > { %3401 = vmatprep.subr.bf16.mxu0 %v4909_v56  ;;  %3745 = vmatprep.subr.bf16.mxu1 %v4911_v57  ;;  %v5004_v56 = vld [vmem:[%s5685_s29 + $0x38c] ss:$16 sps:$4 sm:$0xff]   ;;  %v4999_v57 = vld [vmem:[%s5685_s29 + $0x380] ss:$16 sps:$4 sm:$0xff]  }
  0x4c   : > { %3402 = vmatpush1.bf16.msra.mxu0 %v4913_v58  ;;  %3746 = vmatpush1.bf16.msra.mxu1 %v4914_v59  ;;  %v5002_v58 = vld [vmem:[%s5685_s29 + $0x388] ss:$16 sps:$4 sm:$0xff]   ;;  %v5007_v59 = vld [vmem:[%s5685_s29 + $0x3a4] ss:$16 sps:$4 sm:$0xff]  }
  0x4d   : > { %3403 = vmatprep.subr.bf16.mxu0 %v4915_v60  ;;  %3747 = vmatprep.subr.bf16.mxu1 %v4917_v61  ;;  %v5010_v60 = vld [vmem:[%s5685_s29 + $0x3ac] ss:$16 sps:$4 sm:$0xff]   ;;  %v5005_v61 = vld [vmem:[%s5685_s29 + $0x3a0] ss:$16 sps:$4 sm:$0xff]  }
  0x50   : > { %3404 = vmatpush1.bf16.msra.mxu0 %v4919_v62  ;;  %3748 = vmatpush1.bf16.msra.mxu1 %v4920_v63  ;;  %v5008_v62 = vld [vmem:[%s5685_s29 + $0x3a8] ss:$16 sps:$4 sm:$0xff]   ;;  %v5013_v63 = vld [vmem:[%s5685_s29 + $0x3c4] ss:$16 sps:$4 sm:$0xff]  }
  0x51   : > { %3405 = vmatprep.subr.bf16.mxu0 %v4921_v0  ;;  %3749 = vmatprep.subr.bf16.mxu1 %v4923_v1  ;;  %v5016_v0 = vld [vmem:[%s5685_s29 + $0x3cc] ss:$16 sps:$4 sm:$0xff]   ;;  %v5011_v1 = vld [vmem:[%s5685_s29 + $0x3c0] ss:$16 sps:$4 sm:$0xff]  }
  0x54   : > { %3406 = vmatpush1.bf16.msra.mxu0 %v4925_v3  ;;  %3750 = vmatpush1.bf16.msra.mxu1 %v4926_v4  ;;  %v5014_v3 = vld [vmem:[%s5685_s29 + $0x3c8] ss:$16 sps:$4 sm:$0xff]   ;;  %v5019_v4 = vld [vmem:[%s5685_s29 + $0x3e4] ss:$16 sps:$4 sm:$0xff]  }
  0x55   : > { %3418 = vmatprep.subr.bf16.mxu0 %v4929_v5  ;;  %3762 = vmatprep.subr.bf16.mxu1 %v4932_v6  ;;  %v5022_v5 = vld [vmem:[%s5685_s29 + $0x3ec] ss:$16 sps:$4 sm:$0xff]   ;;  %v5017_v6 = vld [vmem:[%s5685_s29 + $0x3e0] ss:$16 sps:$4 sm:$0xff]  }
  0x57   : > { %3408 = vmatmul.mubr.bf16.vlgmr.msra.gmra.mrb[0].mxu0 %v5679_v2  ;;  %3752 = vmatmul.mubr.bf16.vlgmr.msra.gmra.mrb[0].mxu1 %v5679_v2  ;;  %v4947_v2 = vld [vmem:[%s5685_s29 + $0x264] ss:$16 sps:$4 sm:$0xff]  }
  0x58   : > { %3419 = vmatpush1.bf16.msra.mxu0 %v4927_v7  ;;  %3763 = vmatpush1.bf16.msra.mxu1 %v4930_v8  ;;  %v5020_v7 = vld [vmem:[%s5685_s29 + $0x3e8] ss:$16 sps:$4 sm:$0xff]   ;;  %v5025_v8 = vld [vmem:[%s5685_s29 + $0x404] ss:$16 sps:$4 sm:$0xff]  }
  0x59   : > { %3420 = vmatprep.subr.bf16.mxu0 %v4935_v9  ;;  %3764 = vmatprep.subr.bf16.mxu1 %v4938_v10  ;;  %v5028_v9 = vld [vmem:[%s5685_s29 + $0x40c] ss:$16 sps:$4 sm:$0xff]   ;;  %v5023_v10 = vld [vmem:[%s5685_s29 + $0x400] ss:$16 sps:$4 sm:$0xff]  }
  0x5a   : > { %3450 = vmatprep.mubr.bf16.mxu0 %v4203_v32  ;;  %3794 = vmatprep.mubr.bf16.mxu1 %v4203_v32  ;;  %v5058_v32 = vld [vmem:[%s5685_s29 + $0x4ac] ss:$16 sps:$4 sm:$0xff]  }
  0x5c   : > { %3421 = vmatpush1.bf16.msra.mxu0 %v4933_v11  ;;  %3765 = vmatpush1.bf16.msra.mxu1 %v4936_v12  ;;  %v4202_v11 = vcombine.low %v5782_v30, %v5787_v31  ;;  %v5026_v12 = vld [vmem:[%s5685_s29 + $0x408] ss:$16 sps:$4 sm:$0xff]   ;;  %v5055_v31 = vld [vmem:[%s5685_s29 + $0x4a4] ss:$16 sps:$4 sm:$0xff]  }
  0x5d   : > { %3422 = vmatprep.subr.bf16.mxu0 %v4941_v13  ;;  %3766 = vmatprep.subr.bf16.mxu1 %v4944_v14  ;;  %v5031_v13 = vld [vmem:[%s5685_s29 + $0x424] ss:$16 sps:$4 sm:$0xff]   ;;  %v5034_v14 = vld [vmem:[%s5685_s29 + $0x42c] ss:$16 sps:$4 sm:$0xff]   ;;  %v5050_v30 = vld [vmem:[%s5685_s29 + $0x488] ss:$16 sps:$4 sm:$0xff]  }
  0x60   : > { %3423 = vmatpush1.bf16.msra.mxu0 %v4939_v15  ;;  %3767 = vmatpush1.bf16.msra.mxu1 %v4942_v16  ;;  %v5840_v15 = vld [vmem:[%s6320_s0 + $0x10] sm:$0xff] }
  0x61   : > { %3424 = vmatprep.subr.bf16.mxu0 %v4947_v2  ;;  %3768 = vmatprep.subr.bf16.mxu1 %v4950_v17  ;;  %v5845_v16 = vld [vmem:[%s6320_s0 + $0x50] sm:$0xff] }
  0x62   : > { %v4205_v2 = vcombine.high %v5840_v15, %v5845_v16  ;;  %v5029_v17 = vld [vmem:[%s5685_s29 + $0x420] ss:$16 sps:$4 sm:$0xff]  }
  0x64   : > { %3425 = vmatpush1.bf16.msra.mxu0 %v4945_v18  ;;  %3769 = vmatpush1.bf16.msra.mxu1 %v4948_v19  ;;  %v5032_v18 = vld [vmem:[%s5685_s29 + $0x428] ss:$16 sps:$4 sm:$0xff]   ;;  %v5037_v19 = vld [vmem:[%s5685_s29 + $0x444] ss:$16 sps:$4 sm:$0xff]  }
  0x65   : > { %3426 = vmatprep.subr.bf16.mxu0 %v4953_v20  ;;  %3770 = vmatprep.subr.bf16.mxu1 %v4956_v21  ;;  %v5040_v20 = vld [vmem:[%s5685_s29 + $0x44c] ss:$16 sps:$4 sm:$0xff]   ;;  %v5035_v21 = vld [vmem:[%s5685_s29 + $0x440] ss:$16 sps:$4 sm:$0xff]  }
  0x68   : > { %3427 = vmatpush1.bf16.msra.mxu0 %v4951_v22  ;;  %3771 = vmatpush1.bf16.msra.mxu1 %v4954_v23  ;;  %v5038_v22 = vld [vmem:[%s5685_s29 + $0x448] ss:$16 sps:$4 sm:$0xff]   ;;  %v5043_v23 = vld [vmem:[%s5685_s29 + $0x464] ss:$16 sps:$4 sm:$0xff]  }
  0x69   : > { %3428 = vmatprep.subr.bf16.mxu0 %v4959_v24  ;;  %3772 = vmatprep.subr.bf16.mxu1 %v4962_v25  ;;  %v5046_v24 = vld [vmem:[%s5685_s29 + $0x46c] ss:$16 sps:$4 sm:$0xff]   ;;  %v5041_v25 = vld [vmem:[%s5685_s29 + $0x460] ss:$16 sps:$4 sm:$0xff]  }
  0x6c   : > { %3429 = vmatpush1.bf16.msra.mxu0 %v4957_v26  ;;  %3773 = vmatpush1.bf16.msra.mxu1 %v4960_v27  ;;  %v5044_v26 = vld [vmem:[%s5685_s29 + $0x468] ss:$16 sps:$4 sm:$0xff]   ;;  %v5049_v27 = vld [vmem:[%s5685_s29 + $0x484] ss:$16 sps:$4 sm:$0xff]  }
  0x6d   : > { %3430 = vmatprep.subr.bf16.mxu0 %v4965_v28  ;;  %3774 = vmatprep.subr.bf16.mxu1 %v4968_v29  ;;  %v5052_v28 = vld [vmem:[%s5685_s29 + $0x48c] ss:$16 sps:$4 sm:$0xff]   ;;  %v5047_v29 = vld [vmem:[%s5685_s29 + $0x480] ss:$16 sps:$4 sm:$0xff]  }
  0x70   : > { %3431 = vmatpush1.bf16.msra.mxu0 %v4963_v33  ;;  %3775 = vmatpush1.bf16.msra.mxu1 %v4966_v34  ;;  %v5053_v33 = vld [vmem:[%s5685_s29 + $0x4a0] ss:$16 sps:$4 sm:$0xff]   ;;  %v5056_v34 = vld [vmem:[%s5685_s29 + $0x4a8] ss:$16 sps:$4 sm:$0xff]  }
  0x71   : > { %3432 = vmatprep.subr.bf16.mxu0 %v4971_v35  ;;  %3776 = vmatprep.subr.bf16.mxu1 %v4974_v36  ;;  %v5061_v35 = vld [vmem:[%s5685_s29 + $0x4c4] ss:$16 sps:$4 sm:$0xff]   ;;  %v5064_v36 = vld [vmem:[%s5685_s29 + $0x4cc] ss:$16 sps:$4 sm:$0xff]  }
  0x74   : > { %3433 = vmatpush1.bf16.msra.mxu0 %v4969_v37  ;;  %3777 = vmatpush1.bf16.msra.mxu1 %v4972_v38  ;;  %v5059_v37 = vld [vmem:[%s5685_s29 + $0x4c0] ss:$16 sps:$4 sm:$0xff]   ;;  %v5062_v38 = vld [vmem:[%s5685_s29 + $0x4c8] ss:$16 sps:$4 sm:$0xff]  }
  0x75   : > { %3434 = vmatprep.subr.bf16.mxu0 %v4977_v39  ;;  %3778 = vmatprep.subr.bf16.mxu1 %v4980_v40  ;;  %v5067_v39 = vld [vmem:[%s5685_s29 + $0x4e4] ss:$16 sps:$4 sm:$0xff]   ;;  %v5070_v40 = vld [vmem:[%s5685_s29 + $0x4ec] ss:$16 sps:$4 sm:$0xff]  }
  0x78   : > { %3435 = vmatpush1.bf16.msra.mxu0 %v4975_v41  ;;  %3779 = vmatpush1.bf16.msra.mxu1 %v4978_v42  ;;  %v5065_v41 = vld [vmem:[%s5685_s29 + $0x4e0] ss:$16 sps:$4 sm:$0xff]   ;;  %v5068_v42 = vld [vmem:[%s5685_s29 + $0x4e8] ss:$16 sps:$4 sm:$0xff]  }
  0x79   : > { %3436 = vmatprep.subr.bf16.mxu0 %v4983_v43  ;;  %3780 = vmatprep.subr.bf16.mxu1 %v4986_v44  ;;  %v5073_v43 = vld [vmem:[%s5685_s29 + $0x504] ss:$16 sps:$4 sm:$0xff]   ;;  %v5076_v44 = vld [vmem:[%s5685_s29 + $0x50c] ss:$16 sps:$4 sm:$0xff]  }
  0x7c   : > { %3437 = vmatpush1.bf16.msra.mxu0 %v4981_v45  ;;  %3781 = vmatpush1.bf16.msra.mxu1 %v4984_v46  ;;  %v5071_v45 = vld [vmem:[%s5685_s29 + $0x500] ss:$16 sps:$4 sm:$0xff]   ;;  %v5074_v46 = vld [vmem:[%s5685_s29 + $0x508] ss:$16 sps:$4 sm:$0xff]  }
  0x7d   : > { %3438 = vmatprep.subr.bf16.mxu0 %v4989_v47  ;;  %3782 = vmatprep.subr.bf16.mxu1 %v4992_v48  ;;  %v5079_v47 = vld [vmem:[%s5685_s29 + $0x524] ss:$16 sps:$4 sm:$0xff]   ;;  %v5082_v48 = vld [vmem:[%s5685_s29 + $0x52c] ss:$16 sps:$4 sm:$0xff]  }
  0x80   : > { %3439 = vmatpush1.bf16.msra.mxu0 %v4987_v49  ;;  %3783 = vmatpush1.bf16.msra.mxu1 %v4990_v50  ;;  %v5077_v49 = vld [vmem:[%s5685_s29 + $0x520] ss:$16 sps:$4 sm:$0xff]   ;;  %v5080_v50 = vld [vmem:[%s5685_s29 + $0x528] ss:$16 sps:$4 sm:$0xff]  }
  0x81   : > { %3440 = vmatprep.subr.bf16.mxu0 %v4995_v51  ;;  %3784 = vmatprep.subr.bf16.mxu1 %v4998_v52  ;;  %v5085_v51 = vld [vmem:[%s5685_s29 + $0x544] ss:$16 sps:$4 sm:$0xff]   ;;  %v5088_v52 = vld [vmem:[%s5685_s29 + $0x54c] ss:$16 sps:$4 sm:$0xff]  }
  0x84   : > { %3441 = vmatpush1.bf16.msra.mxu0 %v4993_v53  ;;  %3785 = vmatpush1.bf16.msra.mxu1 %v4996_v54  ;;  %v5083_v53 = vld [vmem:[%s5685_s29 + $0x540] ss:$16 sps:$4 sm:$0xff]   ;;  %v5086_v54 = vld [vmem:[%s5685_s29 + $0x548] ss:$16 sps:$4 sm:$0xff]  }
  0x85   : > { %3442 = vmatprep.subr.bf16.mxu0 %v5001_v55  ;;  %3786 = vmatprep.subr.bf16.mxu1 %v5004_v56  ;;  %v5091_v55 = vld [vmem:[%s5685_s29 + $0x564] ss:$16 sps:$4 sm:$0xff]   ;;  %v5094_v56 = vld [vmem:[%s5685_s29 + $0x56c] ss:$16 sps:$4 sm:$0xff]  }
  0x88   : > { %3443 = vmatpush1.bf16.msra.mxu0 %v4999_v57  ;;  %3787 = vmatpush1.bf16.msra.mxu1 %v5002_v58  ;;  %v5089_v57 = vld [vmem:[%s5685_s29 + $0x560] ss:$16 sps:$4 sm:$0xff]   ;;  %v5092_v58 = vld [vmem:[%s5685_s29 + $0x568] ss:$16 sps:$4 sm:$0xff]  }
  0x89   : > { %3444 = vmatprep.subr.bf16.mxu0 %v5007_v59  ;;  %3788 = vmatprep.subr.bf16.mxu1 %v5010_v60  ;;  %v5097_v59 = vld [vmem:[%s5685_s29 + $0x584] ss:$16 sps:$4 sm:$0xff]   ;;  %v5100_v60 = vld [vmem:[%s5685_s29 + $0x58c] ss:$16 sps:$4 sm:$0xff]  }
  0x8c   : > { %3445 = vmatpush1.bf16.msra.mxu0 %v5005_v61  ;;  %3789 = vmatpush1.bf16.msra.mxu1 %v5008_v62  ;;  %v5095_v61 = vld [vmem:[%s5685_s29 + $0x580] ss:$16 sps:$4 sm:$0xff]   ;;  %v5098_v62 = vld [vmem:[%s5685_s29 + $0x588] ss:$16 sps:$4 sm:$0xff]  }
  0x8d   : > { %3446 = vmatprep.subr.bf16.mxu0 %v5013_v63  ;;  %3790 = vmatprep.subr.bf16.mxu1 %v5016_v0  ;;  %v5103_v63 = vld [vmem:[%s5685_s29 + $0x5a4] ss:$16 sps:$4 sm:$0xff]   ;;  %v5106_v0 = vld [vmem:[%s5685_s29 + $0x5ac] ss:$16 sps:$4 sm:$0xff]  }
  0x90   : > { %3447 = vmatpush1.bf16.msra.mxu0 %v5011_v1  ;;  %3791 = vmatpush1.bf16.msra.mxu1 %v5014_v3  ;;  %v5101_v1 = vld [vmem:[%s5685_s29 + $0x5a0] ss:$16 sps:$4 sm:$0xff]   ;;  %v5104_v3 = vld [vmem:[%s5685_s29 + $0x5a8] ss:$16 sps:$4 sm:$0xff]  }
  0x91   : > { %3448 = vmatprep.subr.bf16.mxu0 %v5019_v4  ;;  %3792 = vmatprep.subr.bf16.mxu1 %v5022_v5  ;;  %v5109_v4 = vld [vmem:[%s5685_s29 + $0x5c4] ss:$16 sps:$4 sm:$0xff]   ;;  %v5112_v5 = vld [vmem:[%s5685_s29 + $0x5cc] ss:$16 sps:$4 sm:$0xff]  }
  0x94   : > { %3449 = vmatpush1.bf16.msra.mxu0 %v5017_v6  ;;  %3793 = vmatpush1.bf16.msra.mxu1 %v5020_v7  ;;  %v5107_v6 = vld [vmem:[%s5685_s29 + $0x5c0] ss:$16 sps:$4 sm:$0xff]   ;;  %v5110_v7 = vld [vmem:[%s5685_s29 + $0x5c8] ss:$16 sps:$4 sm:$0xff]  }
  0x95   : > { %3461 = vmatprep.subr.bf16.mxu0 %v5025_v8  ;;  %3805 = vmatprep.subr.bf16.mxu1 %v5028_v9  ;;  %v5115_v8 = vld [vmem:[%s5685_s29 + $0x5e4] ss:$16 sps:$4 sm:$0xff]   ;;  %v5118_v9 = vld [vmem:[%s5685_s29 + $0x5ec] ss:$16 sps:$4 sm:$0xff]  }
  0x97   : > { %3451 = vmatmul.mubr.bf16.vlgmr.msra.gmra.mrb[0].mxu0 %v4202_v11  ;;  %3795 = vmatmul.mubr.bf16.vlgmr.msra.gmra.mrb[0].mxu1 %v4202_v11  ;;  %v5116_v11 = vld [vmem:[%s5685_s29 + $0x5e8] ss:$16 sps:$4 sm:$0xff]  }
  0x98   : > { %3462 = vmatpush1.bf16.msra.mxu0 %v5023_v10  ;;  %3806 = vmatpush1.bf16.msra.mxu1 %v5026_v12  ;;  %v5113_v10 = vld [vmem:[%s5685_s29 + $0x5e0] ss:$16 sps:$4 sm:$0xff]   ;;  %v5121_v12 = vld [vmem:[%s5685_s29 + $0x604] ss:$16 sps:$4 sm:$0xff]  }
  0x99   : > { %3463 = vmatprep.subr.bf16.mxu0 %v5031_v13  ;;  %3807 = vmatprep.subr.bf16.mxu1 %v5034_v14  ;;  %v5124_v13 = vld [vmem:[%s5685_s29 + $0x60c] ss:$16 sps:$4 sm:$0xff]  }
  0x9a   : > { %3493 = vmatprep.mubr.bf16.mxu0 %v4205_v2  ;;  %3837 = vmatprep.mubr.bf16.mxu1 %v4205_v2  ;;  %v5912_v14 = vld [vmem:[%s6320_s0 + $0x18] sm:$0xff]  ;;  %v4204_v2 = vcombine.low %v5840_v15, %v5845_v16  ;;  %v5125_v16 = vld [vmem:[%s5685_s29 + $0x620] ss:$16 sps:$4 sm:$0xff]  }
  0x9c   : > { %3464 = vmatpush1.bf16.msra.mxu0 %v5029_v17  ;;  %3808 = vmatpush1.bf16.msra.mxu1 %v5032_v18  ;;  %v5919_v17 = vld [vmem:[%s6320_s0 + $0x58] sm:$0xff]  ;;  %v5119_v18 = vld [vmem:[%s5685_s29 + $0x600] ss:$16 sps:$4 sm:$0xff]  }
  0x9d   : > { %3465 = vmatprep.subr.bf16.mxu0 %v5037_v19  ;;  %3809 = vmatprep.subr.bf16.mxu1 %v5040_v20  ;;  %v5122_v19 = vld [vmem:[%s5685_s29 + $0x608] ss:$16 sps:$4 sm:$0xff]   ;;  %v5127_v20 = vld [vmem:[%s5685_s29 + $0x624] ss:$16 sps:$4 sm:$0xff]   ;;  %v4207_v15 = vcombine.high %v5912_v14, %v5919_v17 }
  0xa0   : > { %3466 = vmatpush1.bf16.msra.mxu0 %v5035_v21  ;;  %3810 = vmatpush1.bf16.msra.mxu1 %v5038_v22  ;;  %v5130_v21 = vld [vmem:[%s5685_s29 + $0x62c] ss:$16 sps:$4 sm:$0xff]   ;;  %v5128_v22 = vld [vmem:[%s5685_s29 + $0x628] ss:$16 sps:$4 sm:$0xff]  }
  0xa1   : > { %3467 = vmatprep.subr.bf16.mxu0 %v5043_v23  ;;  %3811 = vmatprep.subr.bf16.mxu1 %v5046_v24  ;;  %v5133_v23 = vld [vmem:[%s5685_s29 + $0x644] ss:$16 sps:$4 sm:$0xff]   ;;  %v5136_v24 = vld [vmem:[%s5685_s29 + $0x64c] ss:$16 sps:$4 sm:$0xff]  }
  0xa4   : > { %3468 = vmatpush1.bf16.msra.mxu0 %v5041_v25  ;;  %3812 = vmatpush1.bf16.msra.mxu1 %v5044_v26  ;;  %v5131_v25 = vld [vmem:[%s5685_s29 + $0x640] ss:$16 sps:$4 sm:$0xff]   ;;  %v5134_v26 = vld [vmem:[%s5685_s29 + $0x648] ss:$16 sps:$4 sm:$0xff]  }
  0xa5   : > { %3469 = vmatprep.subr.bf16.mxu0 %v5049_v27  ;;  %3813 = vmatprep.subr.bf16.mxu1 %v5052_v28  ;;  %v5139_v27 = vld [vmem:[%s5685_s29 + $0x664] ss:$16 sps:$4 sm:$0xff]   ;;  %v5142_v28 = vld [vmem:[%s5685_s29 + $0x66c] ss:$16 sps:$4 sm:$0xff]  }
  0xa8   : > { %3470 = vmatpush1.bf16.msra.mxu0 %v5047_v29  ;;  %3814 = vmatpush1.bf16.msra.mxu1 %v5050_v30  ;;  %v5137_v29 = vld [vmem:[%s5685_s29 + $0x660] ss:$16 sps:$4 sm:$0xff]   ;;  %v5140_v30 = vld [vmem:[%s5685_s29 + $0x668] ss:$16 sps:$4 sm:$0xff]  }
  0xa9   : > { %3471 = vmatprep.subr.bf16.mxu0 %v5055_v31  ;;  %3815 = vmatprep.subr.bf16.mxu1 %v5058_v32  ;;  %v5145_v31 = vld [vmem:[%s5685_s29 + $0x684] ss:$16 sps:$4 sm:$0xff]   ;;  %v5148_v32 = vld [vmem:[%s5685_s29 + $0x68c] ss:$16 sps:$4 sm:$0xff]  }
  0xac   : > { %3472 = vmatpush1.bf16.msra.mxu0 %v5053_v33  ;;  %3816 = vmatpush1.bf16.msra.mxu1 %v5056_v34  ;;  %v5143_v33 = vld [vmem:[%s5685_s29 + $0x680] ss:$16 sps:$4 sm:$0xff]   ;;  %v5146_v34 = vld [vmem:[%s5685_s29 + $0x688] ss:$16 sps:$4 sm:$0xff]  }
  0xad   : > { %3473 = vmatprep.subr.bf16.mxu0 %v5061_v35  ;;  %3817 = vmatprep.subr.bf16.mxu1 %v5064_v36  ;;  %v5151_v35 = vld [vmem:[%s5685_s29 + $0x6a4] ss:$16 sps:$4 sm:$0xff]   ;;  %v5154_v36 = vld [vmem:[%s5685_s29 + $0x6ac] ss:$16 sps:$4 sm:$0xff]  }
  0xb0   : > { %3474 = vmatpush1.bf16.msra.mxu0 %v5059_v37  ;;  %3818 = vmatpush1.bf16.msra.mxu1 %v5062_v38  ;;  %v5149_v37 = vld [vmem:[%s5685_s29 + $0x6a0] ss:$16 sps:$4 sm:$0xff]   ;;  %v5152_v38 = vld [vmem:[%s5685_s29 + $0x6a8] ss:$16 sps:$4 sm:$0xff]  }
  0xb1   : > { %3475 = vmatprep.subr.bf16.mxu0 %v5067_v39  ;;  %3819 = vmatprep.subr.bf16.mxu1 %v5070_v40  ;;  %v5157_v39 = vld [vmem:[%s5685_s29 + $0x6c4] ss:$16 sps:$4 sm:$0xff]   ;;  %v5160_v40 = vld [vmem:[%s5685_s29 + $0x6cc] ss:$16 sps:$4 sm:$0xff]  }
  0xb4   : > { %3476 = vmatpush1.bf16.msra.mxu0 %v5065_v41  ;;  %3820 = vmatpush1.bf16.msra.mxu1 %v5068_v42  ;;  %v5155_v41 = vld [vmem:[%s5685_s29 + $0x6c0] ss:$16 sps:$4 sm:$0xff]   ;;  %v5158_v42 = vld [vmem:[%s5685_s29 + $0x6c8] ss:$16 sps:$4 sm:$0xff]  }
  0xb5   : > { %3477 = vmatprep.subr.bf16.mxu0 %v5073_v43  ;;  %3821 = vmatprep.subr.bf16.mxu1 %v5076_v44  ;;  %v5163_v43 = vld [vmem:[%s5685_s29 + $0x6e4] ss:$16 sps:$4 sm:$0xff]   ;;  %v5166_v44 = vld [vmem:[%s5685_s29 + $0x6ec] ss:$16 sps:$4 sm:$0xff]  }
  0xb8   : > { %3478 = vmatpush1.bf16.msra.mxu0 %v5071_v45  ;;  %3822 = vmatpush1.bf16.msra.mxu1 %v5074_v46  ;;  %v5161_v45 = vld [vmem:[%s5685_s29 + $0x6e0] ss:$16 sps:$4 sm:$0xff]   ;;  %v5164_v46 = vld [vmem:[%s5685_s29 + $0x6e8] ss:$16 sps:$4 sm:$0xff]  }
  0xb9   : > { %3479 = vmatprep.subr.bf16.mxu0 %v5079_v47  ;;  %3823 = vmatprep.subr.bf16.mxu1 %v5082_v48  ;;  %v5169_v47 = vld [vmem:[%s5685_s29 + $0x704] ss:$16 sps:$4 sm:$0xff]   ;;  %v5172_v48 = vld [vmem:[%s5685_s29 + $0x70c] ss:$16 sps:$4 sm:$0xff]  }
  0xbc   : > { %3480 = vmatpush1.bf16.msra.mxu0 %v5077_v49  ;;  %3824 = vmatpush1.bf16.msra.mxu1 %v5080_v50  ;;  %v5167_v49 = vld [vmem:[%s5685_s29 + $0x700] ss:$16 sps:$4 sm:$0xff]   ;;  %v5170_v50 = vld [vmem:[%s5685_s29 + $0x708] ss:$16 sps:$4 sm:$0xff]  }
  0xbd   : > { %3481 = vmatprep.subr.bf16.mxu0 %v5085_v51  ;;  %3825 = vmatprep.subr.bf16.mxu1 %v5088_v52  ;;  %v5175_v51 = vld [vmem:[%s5685_s29 + $0x724] ss:$16 sps:$4 sm:$0xff]   ;;  %v5178_v52 = vld [vmem:[%s5685_s29 + $0x72c] ss:$16 sps:$4 sm:$0xff]  }
  0xc0   : > { %3482 = vmatpush1.bf16.msra.mxu0 %v5083_v53  ;;  %3826 = vmatpush1.bf16.msra.mxu1 %v5086_v54  ;;  %v5173_v53 = vld [vmem:[%s5685_s29 + $0x720] ss:$16 sps:$4 sm:$0xff]   ;;  %v5176_v54 = vld [vmem:[%s5685_s29 + $0x728] ss:$16 sps:$4 sm:$0xff]  }
  0xc1   : > { %3483 = vmatprep.subr.bf16.mxu0 %v5091_v55  ;;  %3827 = vmatprep.subr.bf16.mxu1 %v5094_v56  ;;  %v5181_v55 = vld [vmem:[%s5685_s29 + $0x744] ss:$16 sps:$4 sm:$0xff]   ;;  %v5184_v56 = vld [vmem:[%s5685_s29 + $0x74c] ss:$16 sps:$4 sm:$0xff]  }
  0xc4   : > { %3484 = vmatpush1.bf16.msra.mxu0 %v5089_v57  ;;  %3828 = vmatpush1.bf16.msra.mxu1 %v5092_v58  ;;  %v5179_v57 = vld [vmem:[%s5685_s29 + $0x740] ss:$16 sps:$4 sm:$0xff]   ;;  %v5182_v58 = vld [vmem:[%s5685_s29 + $0x748] ss:$16 sps:$4 sm:$0xff]  }
  0xc5   : > { %3485 = vmatprep.subr.bf16.mxu0 %v5097_v59  ;;  %3829 = vmatprep.subr.bf16.mxu1 %v5100_v60  ;;  %v5187_v59 = vld [vmem:[%s5685_s29 + $0x764] ss:$16 sps:$4 sm:$0xff]   ;;  %v5190_v60 = vld [vmem:[%s5685_s29 + $0x76c] ss:$16 sps:$4 sm:$0xff]  }
  0xc8   : > { %3486 = vmatpush1.bf16.msra.mxu0 %v5095_v61  ;;  %3830 = vmatpush1.bf16.msra.mxu1 %v5098_v62  ;;  %v5185_v61 = vld [vmem:[%s5685_s29 + $0x760] ss:$16 sps:$4 sm:$0xff]   ;;  %v5188_v62 = vld [vmem:[%s5685_s29 + $0x768] ss:$16 sps:$4 sm:$0xff]  }
  0xc9   : > { %3487 = vmatprep.subr.bf16.mxu0 %v5103_v63  ;;  %3831 = vmatprep.subr.bf16.mxu1 %v5106_v0  ;;  %v5193_v63 = vld [vmem:[%s5685_s29 + $0x784] ss:$16 sps:$4 sm:$0xff]   ;;  %v5196_v0 = vld [vmem:[%s5685_s29 + $0x78c] ss:$16 sps:$4 sm:$0xff]  }
  0xcc   : > { %3488 = vmatpush1.bf16.msra.mxu0 %v5101_v1  ;;  %3832 = vmatpush1.bf16.msra.mxu1 %v5104_v3  ;;  %v5191_v1 = vld [vmem:[%s5685_s29 + $0x780] ss:$16 sps:$4 sm:$0xff]   ;;  %v5194_v3 = vld [vmem:[%s5685_s29 + $0x788] ss:$16 sps:$4 sm:$0xff]  }
  0xcd   : > { %3489 = vmatprep.subr.bf16.mxu0 %v5109_v4  ;;  %3833 = vmatprep.subr.bf16.mxu1 %v5112_v5  ;;  %v5199_v4 = vld [vmem:[%s5685_s29 + $0x7a4] ss:$16 sps:$4 sm:$0xff]   ;;  %v5202_v5 = vld [vmem:[%s5685_s29 + $0x7ac] ss:$16 sps:$4 sm:$0xff]  }
  0xd0   : > { %3490 = vmatpush1.bf16.msra.mxu0 %v5107_v6  ;;  %3834 = vmatpush1.bf16.msra.mxu1 %v5110_v7  ;;  %v5197_v6 = vld [vmem:[%s5685_s29 + $0x7a0] ss:$16 sps:$4 sm:$0xff]   ;;  %v5200_v7 = vld [vmem:[%s5685_s29 + $0x7a8] ss:$16 sps:$4 sm:$0xff]  }
  0xd1   : > { %3491 = vmatprep.subr.bf16.mxu0 %v5115_v8  ;;  %3835 = vmatprep.subr.bf16.mxu1 %v5118_v9  ;;  %v5205_v8 = vld [vmem:[%s5685_s29 + $0x7c4] ss:$16 sps:$4 sm:$0xff]   ;;  %v5208_v9 = vld [vmem:[%s5685_s29 + $0x7cc] ss:$16 sps:$4 sm:$0xff]  }
  0xd4   : > { %3492 = vmatpush1.bf16.msra.mxu0 %v5113_v10  ;;  %3836 = vmatpush1.bf16.msra.mxu1 %v5116_v11  ;;  %v5203_v10 = vld [vmem:[%s5685_s29 + $0x7c0] ss:$16 sps:$4 sm:$0xff]   ;;  %v5206_v11 = vld [vmem:[%s5685_s29 + $0x7c8] ss:$16 sps:$4 sm:$0xff]  }
  0xd5   : > { %3504 = vmatprep.subr.bf16.mxu0 %v5121_v12  ;;  %3848 = vmatprep.subr.bf16.mxu1 %v5124_v13  ;;  %v5211_v12 = vld [vmem:[%s5685_s29 + $0x7e4] ss:$16 sps:$4 sm:$0xff]   ;;  %v5214_v13 = vld [vmem:[%s5685_s29 + $0x7ec] ss:$16 sps:$4 sm:$0xff]  }
  0xd7   : > { %3494 = vmatmul.mubr.bf16.vlgmr.msra.gmra.mrb[0].mxu0 %v4204_v2  ;;  %3838 = vmatmul.mubr.bf16.vlgmr.msra.gmra.mrb[0].mxu1 %v4204_v2  ;;  %v5209_v2 = vld [vmem:[%s5685_s29 + $0x7e0] ss:$16 sps:$4 sm:$0xff]  }
  0xd8   : > { %3505 = vmatpush1.bf16.msra.mxu0 %v5119_v18  ;;  %3849 = vmatpush1.bf16.msra.mxu1 %v5122_v19  ;;  %v5212_v18 = vld [vmem:[%s5685_s29 + $0x7e8] ss:$16 sps:$4 sm:$0xff]   ;;  %v5217_v19 = vld [vmem:[%s5685_s29 + $0x804] ss:$16 sps:$4 sm:$0xff]  }
  0xd9   : > { %3506 = vmatprep.subr.bf16.mxu0 %v5127_v20  ;;  %3850 = vmatprep.subr.bf16.mxu1 %v5130_v21  ;;  %v5220_v20 = vld [vmem:[%s5685_s29 + $0x80c] ss:$16 sps:$4 sm:$0xff]   ;;  %v5215_v21 = vld [vmem:[%s5685_s29 + $0x800] ss:$16 sps:$4 sm:$0xff]  }
  0xda   : > { %3536 = vmatprep.mubr.bf16.mxu0 %v4207_v15  ;;  %3880 = vmatprep.mubr.bf16.mxu1 %v4207_v15  ;;  %v5218_v15 = vld [vmem:[%s5685_s29 + $0x808] ss:$16 sps:$4 sm:$0xff]  }
  0xdc   : > { %3507 = vmatpush1.bf16.msra.mxu0 %v5125_v16  ;;  %3851 = vmatpush1.bf16.msra.mxu1 %v5128_v22  ;;  %v4206_v16 = vcombine.low %v5912_v14, %v5919_v17  ;;  %v5994_v22 = vld [vmem:[%s6320_s0 + $0x20] sm:$0xff] }
  0xdd   : > { %3508 = vmatprep.subr.bf16.mxu0 %v5133_v23  ;;  %3852 = vmatprep.subr.bf16.mxu1 %v5136_v24  ;;  %v5999_v23 = vld [vmem:[%s6320_s0 + $0x60] sm:$0xff] }
  0xde   : > { %v5223_v24 = vld [vmem:[%s5685_s29 + $0x824] ss:$16 sps:$4 sm:$0xff]   ;;  %v4209_v14 = vcombine.high %v5994_v22, %v5999_v23  ;;  %v5221_v17 = vld [vmem:[%s5685_s29 + $0x820] ss:$16 sps:$4 sm:$0xff]  }
  0xe0   : > { %3509 = vmatpush1.bf16.msra.mxu0 %v5131_v25  ;;  %3853 = vmatpush1.bf16.msra.mxu1 %v5134_v26  ;;  %v5226_v25 = vld [vmem:[%s5685_s29 + $0x82c] ss:$16 sps:$4 sm:$0xff]   ;;  %v5224_v26 = vld [vmem:[%s5685_s29 + $0x828] ss:$16 sps:$4 sm:$0xff]  }
  0xe1   : > { %3510 = vmatprep.subr.bf16.mxu0 %v5139_v27  ;;  %3854 = vmatprep.subr.bf16.mxu1 %v5142_v28  ;;  %v5229_v27 = vld [vmem:[%s5685_s29 + $0x844] ss:$16 sps:$4 sm:$0xff]   ;;  %v5232_v28 = vld [vmem:[%s5685_s29 + $0x84c] ss:$16 sps:$4 sm:$0xff]  }
  0xe4   : > { %3511 = vmatpush1.bf16.msra.mxu0 %v5137_v29  ;;  %3855 = vmatpush1.bf16.msra.mxu1 %v5140_v30  ;;  %v5227_v29 = vld [vmem:[%s5685_s29 + $0x840] ss:$16 sps:$4 sm:$0xff]   ;;  %v5230_v30 = vld [vmem:[%s5685_s29 + $0x848] ss:$16 sps:$4 sm:$0xff]  }
  0xe5   : > { %3512 = vmatprep.subr.bf16.mxu0 %v5145_v31  ;;  %3856 = vmatprep.subr.bf16.mxu1 %v5148_v32  ;;  %v5235_v31 = vld [vmem:[%s5685_s29 + $0x864] ss:$16 sps:$4 sm:$0xff]   ;;  %v5238_v32 = vld [vmem:[%s5685_s29 + $0x86c] ss:$16 sps:$4 sm:$0xff]  }
  0xe8   : > { %3513 = vmatpush1.bf16.msra.mxu0 %v5143_v33  ;;  %3857 = vmatpush1.bf16.msra.mxu1 %v5146_v34  ;;  %v5233_v33 = vld [vmem:[%s5685_s29 + $0x860] ss:$16 sps:$4 sm:$0xff]   ;;  %v5236_v34 = vld [vmem:[%s5685_s29 + $0x868] ss:$16 sps:$4 sm:$0xff]  }
  0xe9   : > { %3514 = vmatprep.subr.bf16.mxu0 %v5151_v35  ;;  %3858 = vmatprep.subr.bf16.mxu1 %v5154_v36  ;;  %v5241_v35 = vld [vmem:[%s5685_s29 + $0x884] ss:$16 sps:$4 sm:$0xff]   ;;  %v5244_v36 = vld [vmem:[%s5685_s29 + $0x88c] ss:$16 sps:$4 sm:$0xff]  }
  0xec   : > { %3515 = vmatpush1.bf16.msra.mxu0 %v5149_v37  ;;  %3859 = vmatpush1.bf16.msra.mxu1 %v5152_v38  ;;  %v5239_v37 = vld [vmem:[%s5685_s29 + $0x880] ss:$16 sps:$4 sm:$0xff]   ;;  %v5242_v38 = vld [vmem:[%s5685_s29 + $0x888] ss:$16 sps:$4 sm:$0xff]  }
  0xed   : > { %3516 = vmatprep.subr.bf16.mxu0 %v5157_v39  ;;  %3860 = vmatprep.subr.bf16.mxu1 %v5160_v40  ;;  %v5247_v39 = vld [vmem:[%s5685_s29 + $0x8a4] ss:$16 sps:$4 sm:$0xff]   ;;  %v5250_v40 = vld [vmem:[%s5685_s29 + $0x8ac] ss:$16 sps:$4 sm:$0xff]  }
  0xf0   : > { %3517 = vmatpush1.bf16.msra.mxu0 %v5155_v41  ;;  %3861 = vmatpush1.bf16.msra.mxu1 %v5158_v42  ;;  %v5245_v41 = vld [vmem:[%s5685_s29 + $0x8a0] ss:$16 sps:$4 sm:$0xff]   ;;  %v5248_v42 = vld [vmem:[%s5685_s29 + $0x8a8] ss:$16 sps:$4 sm:$0xff]  }
  0xf1   : > { %3518 = vmatprep.subr.bf16.mxu0 %v5163_v43  ;;  %3862 = vmatprep.subr.bf16.mxu1 %v5166_v44  ;;  %v5253_v43 = vld [vmem:[%s5685_s29 + $0x8c4] ss:$16 sps:$4 sm:$0xff]   ;;  %v5256_v44 = vld [vmem:[%s5685_s29 + $0x8cc] ss:$16 sps:$4 sm:$0xff]  }
  0xf4   : > { %3519 = vmatpush1.bf16.msra.mxu0 %v5161_v45  ;;  %3863 = vmatpush1.bf16.msra.mxu1 %v5164_v46  ;;  %v5251_v45 = vld [vmem:[%s5685_s29 + $0x8c0] ss:$16 sps:$4 sm:$0xff]   ;;  %v5254_v46 = vld [vmem:[%s5685_s29 + $0x8c8] ss:$16 sps:$4 sm:$0xff]  }
  0xf5   : > { %3520 = vmatprep.subr.bf16.mxu0 %v5169_v47  ;;  %3864 = vmatprep.subr.bf16.mxu1 %v5172_v48  ;;  %v5259_v47 = vld [vmem:[%s5685_s29 + $0x8e4] ss:$16 sps:$4 sm:$0xff]   ;;  %v5262_v48 = vld [vmem:[%s5685_s29 + $0x8ec] ss:$16 sps:$4 sm:$0xff]  }
  0xf8   : > { %3521 = vmatpush1.bf16.msra.mxu0 %v5167_v49  ;;  %3865 = vmatpush1.bf16.msra.mxu1 %v5170_v50  ;;  %v5257_v49 = vld [vmem:[%s5685_s29 + $0x8e0] ss:$16 sps:$4 sm:$0xff]   ;;  %v5260_v50 = vld [vmem:[%s5685_s29 + $0x8e8] ss:$16 sps:$4 sm:$0xff]  }
  0xf9   : > { %3522 = vmatprep.subr.bf16.mxu0 %v5175_v51  ;;  %3866 = vmatprep.subr.bf16.mxu1 %v5178_v52  ;;  %v5265_v51 = vld [vmem:[%s5685_s29 + $0x904] ss:$16 sps:$4 sm:$0xff]   ;;  %v5268_v52 = vld [vmem:[%s5685_s29 + $0x90c] ss:$16 sps:$4 sm:$0xff]  }
  0xfc   : > { %3523 = vmatpush1.bf16.msra.mxu0 %v5173_v53  ;;  %3867 = vmatpush1.bf16.msra.mxu1 %v5176_v54  ;;  %v5263_v53 = vld [vmem:[%s5685_s29 + $0x900] ss:$16 sps:$4 sm:$0xff]   ;;  %v5266_v54 = vld [vmem:[%s5685_s29 + $0x908] ss:$16 sps:$4 sm:$0xff]  }
  0xfd   : > { %3524 = vmatprep.subr.bf16.mxu0 %v5181_v55  ;;  %3868 = vmatprep.subr.bf16.mxu1 %v5184_v56  ;;  %v5271_v55 = vld [vmem:[%s5685_s29 + $0x924] ss:$16 sps:$4 sm:$0xff]   ;;  %v5274_v56 = vld [vmem:[%s5685_s29 + $0x92c] ss:$16 sps:$4 sm:$0xff]  }
 0x100   : > { %3525 = vmatpush1.bf16.msra.mxu0 %v5179_v57  ;;  %3869 = vmatpush1.bf16.msra.mxu1 %v5182_v58  ;;  %v5269_v57 = vld [vmem:[%s5685_s29 + $0x920] ss:$16 sps:$4 sm:$0xff]   ;;  %v5272_v58 = vld [vmem:[%s5685_s29 + $0x928] ss:$16 sps:$4 sm:$0xff]  }
 0x101   : > { %3526 = vmatprep.subr.bf16.mxu0 %v5187_v59  ;;  %3870 = vmatprep.subr.bf16.mxu1 %v5190_v60  ;;  %v5277_v59 = vld [vmem:[%s5685_s29 + $0x944] ss:$16 sps:$4 sm:$0xff]   ;;  %v5280_v60 = vld [vmem:[%s5685_s29 + $0x94c] ss:$16 sps:$4 sm:$0xff]  }
 0x104   : > { %3527 = vmatpush1.bf16.msra.mxu0 %v5185_v61  ;;  %3871 = vmatpush1.bf16.msra.mxu1 %v5188_v62  ;;  %v5275_v61 = vld [vmem:[%s5685_s29 + $0x940] ss:$16 sps:$4 sm:$0xff]   ;;  %v5278_v62 = vld [vmem:[%s5685_s29 + $0x948] ss:$16 sps:$4 sm:$0xff]  }
 0x105   : > { %3528 = vmatprep.subr.bf16.mxu0 %v5193_v63  ;;  %3872 = vmatprep.subr.bf16.mxu1 %v5196_v0  ;;  %v5283_v63 = vld [vmem:[%s5685_s29 + $0x964] ss:$16 sps:$4 sm:$0xff]   ;;  %v5286_v0 = vld [vmem:[%s5685_s29 + $0x96c] ss:$16 sps:$4 sm:$0xff]  }
 0x108   : > { %3529 = vmatpush1.bf16.msra.mxu0 %v5191_v1  ;;  %3873 = vmatpush1.bf16.msra.mxu1 %v5194_v3  ;;  %v5281_v1 = vld [vmem:[%s5685_s29 + $0x960] ss:$16 sps:$4 sm:$0xff]   ;;  %v5284_v3 = vld [vmem:[%s5685_s29 + $0x968] ss:$16 sps:$4 sm:$0xff]  }
 0x109   : > { %3530 = vmatprep.subr.bf16.mxu0 %v5199_v4  ;;  %3874 = vmatprep.subr.bf16.mxu1 %v5202_v5  ;;  %v5289_v4 = vld [vmem:[%s5685_s29 + $0x984] ss:$16 sps:$4 sm:$0xff]   ;;  %v5292_v5 = vld [vmem:[%s5685_s29 + $0x98c] ss:$16 sps:$4 sm:$0xff]  }
 0x10c   : > { %3531 = vmatpush1.bf16.msra.mxu0 %v5197_v6  ;;  %3875 = vmatpush1.bf16.msra.mxu1 %v5200_v7  ;;  %v5287_v6 = vld [vmem:[%s5685_s29 + $0x980] ss:$16 sps:$4 sm:$0xff]   ;;  %v5290_v7 = vld [vmem:[%s5685_s29 + $0x988] ss:$16 sps:$4 sm:$0xff]  }
 0x10d   : > { %3532 = vmatprep.subr.bf16.mxu0 %v5205_v8  ;;  %3876 = vmatprep.subr.bf16.mxu1 %v5208_v9  ;;  %v5295_v8 = vld [vmem:[%s5685_s29 + $0x9a4] ss:$16 sps:$4 sm:$0xff]   ;;  %v5298_v9 = vld [vmem:[%s5685_s29 + $0x9ac] ss:$16 sps:$4 sm:$0xff]  }
 0x110   : > { %3533 = vmatpush1.bf16.msra.mxu0 %v5203_v10  ;;  %3877 = vmatpush1.bf16.msra.mxu1 %v5206_v11  ;;  %v5293_v10 = vld [vmem:[%s5685_s29 + $0x9a0] ss:$16 sps:$4 sm:$0xff]   ;;  %v5296_v11 = vld [vmem:[%s5685_s29 + $0x9a8] ss:$16 sps:$4 sm:$0xff]  }
 0x111   : > { %3534 = vmatprep.subr.bf16.mxu0 %v5211_v12  ;;  %3878 = vmatprep.subr.bf16.mxu1 %v5214_v13  ;;  %v5301_v12 = vld [vmem:[%s5685_s29 + $0x9c4] ss:$16 sps:$4 sm:$0xff]   ;;  %v5304_v13 = vld [vmem:[%s5685_s29 + $0x9cc] ss:$16 sps:$4 sm:$0xff]  }
 0x114   : > { %3535 = vmatpush1.bf16.msra.mxu0 %v5209_v2  ;;  %3879 = vmatpush1.bf16.msra.mxu1 %v5212_v18  ;;  %v5299_v2 = vld [vmem:[%s5685_s29 + $0x9c0] ss:$16 sps:$4 sm:$0xff]   ;;  %v5302_v18 = vld [vmem:[%s5685_s29 + $0x9c8] ss:$16 sps:$4 sm:$0xff]  }
 0x115   : > { %3547 = vmatprep.subr.bf16.mxu0 %v5217_v19  ;;  %3891 = vmatprep.subr.bf16.mxu1 %v5220_v20  ;;  %v5307_v19 = vld [vmem:[%s5685_s29 + $0x9e4] ss:$16 sps:$4 sm:$0xff]   ;;  %v5310_v20 = vld [vmem:[%s5685_s29 + $0x9ec] ss:$16 sps:$4 sm:$0xff]  }
 0x117   : > { %3537 = vmatmul.mubr.bf16.vlgmr.msra.gmra.mrb[0].mxu0 %v4206_v16  ;;  %3881 = vmatmul.mubr.bf16.vlgmr.msra.gmra.mrb[0].mxu1 %v4206_v16  ;;  %v5313_v16 = vld [vmem:[%s5685_s29 + $0xa04] ss:$16 sps:$4 sm:$0xff]  }
 0x118   : > { %3548 = vmatpush1.bf16.msra.mxu0 %v5215_v21  ;;  %3892 = vmatpush1.bf16.msra.mxu1 %v5218_v15  ;;  %v5305_v21 = vld [vmem:[%s5685_s29 + $0x9e0] ss:$16 sps:$4 sm:$0xff]   ;;  %v5308_v15 = vld [vmem:[%s5685_s29 + $0x9e8] ss:$16 sps:$4 sm:$0xff]  }
 0x119   : > { %3549 = vmatprep.subr.bf16.mxu0 %v5223_v24  ;;  %3893 = vmatprep.subr.bf16.mxu1 %v5226_v25  ;;  %v5316_v24 = vld [vmem:[%s5685_s29 + $0xa0c] ss:$16 sps:$4 sm:$0xff]  }
 0x11a   : > { %3579 = vmatprep.mubr.bf16.mxu0 %v4209_v14  ;;  %3923 = vmatprep.mubr.bf16.mxu1 %v4209_v14  ;;  %v6068_v25 = vld [vmem:[%s6320_s0 + $0x28] sm:$0xff] }
 0x11b   : > { %v6073_v14 = vld [vmem:[%s6320_s0 + $0x68] sm:$0xff] }
 0x11c   : > { %3550 = vmatpush1.bf16.msra.mxu0 %v5221_v17  ;;  %3894 = vmatpush1.bf16.msra.mxu1 %v5224_v26  ;;  %v4208_v17 = vcombine.low %v5994_v22, %v5999_v23  ;;  %v5311_v26 = vld [vmem:[%s5685_s29 + $0xa00] ss:$16 sps:$4 sm:$0xff]   ;;  %v5320_v23 = vld [vmem:[%s5685_s29 + $0xa28] ss:$16 sps:$4 sm:$0xff]  }
 0x11d   : > { %3551 = vmatprep.subr.bf16.mxu0 %v5229_v27  ;;  %3895 = vmatprep.subr.bf16.mxu1 %v5232_v28  ;;  %v5314_v27 = vld [vmem:[%s5685_s29 + $0xa08] ss:$16 sps:$4 sm:$0xff]   ;;  %v5319_v28 = vld [vmem:[%s5685_s29 + $0xa24] ss:$16 sps:$4 sm:$0xff]   ;;  %v5317_v22 = vld [vmem:[%s5685_s29 + $0xa20] ss:$16 sps:$4 sm:$0xff]  }
 0x120   : > { %3552 = vmatpush1.bf16.msra.mxu0 %v5227_v29  ;;  %3896 = vmatpush1.bf16.msra.mxu1 %v5230_v30  ;;  %v5322_v29 = vld [vmem:[%s5685_s29 + $0xa2c] ss:$16 sps:$4 sm:$0xff]   ;;  %v4211_v30 = vcombine.high %v6068_v25, %v6073_v14 }
 0x121   : > { %3553 = vmatprep.subr.bf16.mxu0 %v5235_v31  ;;  %3897 = vmatprep.subr.bf16.mxu1 %v5238_v32  ;;  %v5325_v31 = vld [vmem:[%s5685_s29 + $0xa44] ss:$16 sps:$4 sm:$0xff]   ;;  %v5328_v32 = vld [vmem:[%s5685_s29 + $0xa4c] ss:$16 sps:$4 sm:$0xff]  }
 0x124   : > { %3554 = vmatpush1.bf16.msra.mxu0 %v5233_v33  ;;  %3898 = vmatpush1.bf16.msra.mxu1 %v5236_v34  ;;  %v5323_v33 = vld [vmem:[%s5685_s29 + $0xa40] ss:$16 sps:$4 sm:$0xff]   ;;  %v5326_v34 = vld [vmem:[%s5685_s29 + $0xa48] ss:$16 sps:$4 sm:$0xff]  }
 0x125   : > { %3555 = vmatprep.subr.bf16.mxu0 %v5241_v35  ;;  %3899 = vmatprep.subr.bf16.mxu1 %v5244_v36  ;;  %v5331_v35 = vld [vmem:[%s5685_s29 + $0xa64] ss:$16 sps:$4 sm:$0xff]   ;;  %v5334_v36 = vld [vmem:[%s5685_s29 + $0xa6c] ss:$16 sps:$4 sm:$0xff]  }
 0x128   : > { %3556 = vmatpush1.bf16.msra.mxu0 %v5239_v37  ;;  %3900 = vmatpush1.bf16.msra.mxu1 %v5242_v38  ;;  %v5329_v37 = vld [vmem:[%s5685_s29 + $0xa60] ss:$16 sps:$4 sm:$0xff]   ;;  %v5332_v38 = vld [vmem:[%s5685_s29 + $0xa68] ss:$16 sps:$4 sm:$0xff]  }
 0x129   : > { %3557 = vmatprep.subr.bf16.mxu0 %v5247_v39  ;;  %3901 = vmatprep.subr.bf16.mxu1 %v5250_v40  ;;  %v5337_v39 = vld [vmem:[%s5685_s29 + $0xa84] ss:$16 sps:$4 sm:$0xff]   ;;  %v5340_v40 = vld [vmem:[%s5685_s29 + $0xa8c] ss:$16 sps:$4 sm:$0xff]  }
 0x12c   : > { %3558 = vmatpush1.bf16.msra.mxu0 %v5245_v41  ;;  %3902 = vmatpush1.bf16.msra.mxu1 %v5248_v42  ;;  %v5335_v41 = vld [vmem:[%s5685_s29 + $0xa80] ss:$16 sps:$4 sm:$0xff]   ;;  %v5338_v42 = vld [vmem:[%s5685_s29 + $0xa88] ss:$16 sps:$4 sm:$0xff]  }
 0x12d   : > { %3559 = vmatprep.subr.bf16.mxu0 %v5253_v43  ;;  %3903 = vmatprep.subr.bf16.mxu1 %v5256_v44  ;;  %v5343_v43 = vld [vmem:[%s5685_s29 + $0xaa4] ss:$16 sps:$4 sm:$0xff]   ;;  %v5346_v44 = vld [vmem:[%s5685_s29 + $0xaac] ss:$16 sps:$4 sm:$0xff]  }
 0x130   : > { %3560 = vmatpush1.bf16.msra.mxu0 %v5251_v45  ;;  %3904 = vmatpush1.bf16.msra.mxu1 %v5254_v46  ;;  %v5341_v45 = vld [vmem:[%s5685_s29 + $0xaa0] ss:$16 sps:$4 sm:$0xff]   ;;  %v5344_v46 = vld [vmem:[%s5685_s29 + $0xaa8] ss:$16 sps:$4 sm:$0xff]  }
 0x131   : > { %3561 = vmatprep.subr.bf16.mxu0 %v5259_v47  ;;  %3905 = vmatprep.subr.bf16.mxu1 %v5262_v48  ;;  %v5349_v47 = vld [vmem:[%s5685_s29 + $0xac4] ss:$16 sps:$4 sm:$0xff]   ;;  %v5352_v48 = vld [vmem:[%s5685_s29 + $0xacc] ss:$16 sps:$4 sm:$0xff]  }
 0x134   : > { %3562 = vmatpush1.bf16.msra.mxu0 %v5257_v49  ;;  %3906 = vmatpush1.bf16.msra.mxu1 %v5260_v50  ;;  %v5347_v49 = vld [vmem:[%s5685_s29 + $0xac0] ss:$16 sps:$4 sm:$0xff]   ;;  %v5350_v50 = vld [vmem:[%s5685_s29 + $0xac8] ss:$16 sps:$4 sm:$0xff]  }
 0x135   : > { %3563 = vmatprep.subr.bf16.mxu0 %v5265_v51  ;;  %3907 = vmatprep.subr.bf16.mxu1 %v5268_v52  ;;  %v5355_v51 = vld [vmem:[%s5685_s29 + $0xae4] ss:$16 sps:$4 sm:$0xff]   ;;  %v5358_v52 = vld [vmem:[%s5685_s29 + $0xaec] ss:$16 sps:$4 sm:$0xff]  }
 0x138   : > { %3564 = vmatpush1.bf16.msra.mxu0 %v5263_v53  ;;  %3908 = vmatpush1.bf16.msra.mxu1 %v5266_v54  ;;  %v5353_v53 = vld [vmem:[%s5685_s29 + $0xae0] ss:$16 sps:$4 sm:$0xff]   ;;  %v5356_v54 = vld [vmem:[%s5685_s29 + $0xae8] ss:$16 sps:$4 sm:$0xff]  }
 0x139   : > { %3565 = vmatprep.subr.bf16.mxu0 %v5271_v55  ;;  %3909 = vmatprep.subr.bf16.mxu1 %v5274_v56  ;;  %v5361_v55 = vld [vmem:[%s5685_s29 + $0xb04] ss:$16 sps:$4 sm:$0xff]   ;;  %v5364_v56 = vld [vmem:[%s5685_s29 + $0xb0c] ss:$16 sps:$4 sm:$0xff]  }
 0x13c   : > { %3566 = vmatpush1.bf16.msra.mxu0 %v5269_v57  ;;  %3910 = vmatpush1.bf16.msra.mxu1 %v5272_v58  ;;  %v5359_v57 = vld [vmem:[%s5685_s29 + $0xb00] ss:$16 sps:$4 sm:$0xff]   ;;  %v5362_v58 = vld [vmem:[%s5685_s29 + $0xb08] ss:$16 sps:$4 sm:$0xff]  }
 0x13d   : > { %3567 = vmatprep.subr.bf16.mxu0 %v5277_v59  ;;  %3911 = vmatprep.subr.bf16.mxu1 %v5280_v60  ;;  %v5367_v59 = vld [vmem:[%s5685_s29 + $0xb24] ss:$16 sps:$4 sm:$0xff]   ;;  %v5370_v60 = vld [vmem:[%s5685_s29 + $0xb2c] ss:$16 sps:$4 sm:$0xff]  }
 0x140   : > { %3568 = vmatpush1.bf16.msra.mxu0 %v5275_v61  ;;  %3912 = vmatpush1.bf16.msra.mxu1 %v5278_v62  ;;  %v5365_v61 = vld [vmem:[%s5685_s29 + $0xb20] ss:$16 sps:$4 sm:$0xff]   ;;  %v5368_v62 = vld [vmem:[%s5685_s29 + $0xb28] ss:$16 sps:$4 sm:$0xff]  }
 0x141   : > { %3569 = vmatprep.subr.bf16.mxu0 %v5283_v63  ;;  %3913 = vmatprep.subr.bf16.mxu1 %v5286_v0  ;;  %v5373_v63 = vld [vmem:[%s5685_s29 + $0xb44] ss:$16 sps:$4 sm:$0xff]   ;;  %v5376_v0 = vld [vmem:[%s5685_s29 + $0xb4c] ss:$16 sps:$4 sm:$0xff]  }
 0x144   : > { %3570 = vmatpush1.bf16.msra.mxu0 %v5281_v1  ;;  %3914 = vmatpush1.bf16.msra.mxu1 %v5284_v3  ;;  %v5371_v1 = vld [vmem:[%s5685_s29 + $0xb40] ss:$16 sps:$4 sm:$0xff]   ;;  %v5374_v3 = vld [vmem:[%s5685_s29 + $0xb48] ss:$16 sps:$4 sm:$0xff]  }
 0x145   : > { %3571 = vmatprep.subr.bf16.mxu0 %v5289_v4  ;;  %3915 = vmatprep.subr.bf16.mxu1 %v5292_v5  ;;  %v5379_v4 = vld [vmem:[%s5685_s29 + $0xb64] ss:$16 sps:$4 sm:$0xff]   ;;  %v5382_v5 = vld [vmem:[%s5685_s29 + $0xb6c] ss:$16 sps:$4 sm:$0xff]  }
 0x148   : > { %3572 = vmatpush1.bf16.msra.mxu0 %v5287_v6  ;;  %3916 = vmatpush1.bf16.msra.mxu1 %v5290_v7  ;;  %v5377_v6 = vld [vmem:[%s5685_s29 + $0xb60] ss:$16 sps:$4 sm:$0xff]   ;;  %v5380_v7 = vld [vmem:[%s5685_s29 + $0xb68] ss:$16 sps:$4 sm:$0xff]  }
 0x149   : > { %3573 = vmatprep.subr.bf16.mxu0 %v5295_v8  ;;  %3917 = vmatprep.subr.bf16.mxu1 %v5298_v9  ;;  %v5385_v8 = vld [vmem:[%s5685_s29 + $0xb84] ss:$16 sps:$4 sm:$0xff]   ;;  %v5388_v9 = vld [vmem:[%s5685_s29 + $0xb8c] ss:$16 sps:$4 sm:$0xff]  }
 0x14c   : > { %3574 = vmatpush1.bf16.msra.mxu0 %v5293_v10  ;;  %3918 = vmatpush1.bf16.msra.mxu1 %v5296_v11  ;;  %v5383_v10 = vld [vmem:[%s5685_s29 + $0xb80] ss:$16 sps:$4 sm:$0xff]   ;;  %v5386_v11 = vld [vmem:[%s5685_s29 + $0xb88] ss:$16 sps:$4 sm:$0xff]  }
 0x14d   : > { %3575 = vmatprep.subr.bf16.mxu0 %v5301_v12  ;;  %3919 = vmatprep.subr.bf16.mxu1 %v5304_v13  ;;  %v5391_v12 = vld [vmem:[%s5685_s29 + $0xba4] ss:$16 sps:$4 sm:$0xff]   ;;  %v5394_v13 = vld [vmem:[%s5685_s29 + $0xbac] ss:$16 sps:$4 sm:$0xff]  }
 0x150   : > { %3576 = vmatpush1.bf16.msra.mxu0 %v5299_v2  ;;  %3920 = vmatpush1.bf16.msra.mxu1 %v5302_v18  ;;  %v5389_v2 = vld [vmem:[%s5685_s29 + $0xba0] ss:$16 sps:$4 sm:$0xff]   ;;  %v5392_v18 = vld [vmem:[%s5685_s29 + $0xba8] ss:$16 sps:$4 sm:$0xff]  }
 0x151   : > { %3577 = vmatprep.subr.bf16.mxu0 %v5307_v19  ;;  %3921 = vmatprep.subr.bf16.mxu1 %v5310_v20  ;;  %v5397_v19 = vld [vmem:[%s5685_s29 + $0xbc4] ss:$16 sps:$4 sm:$0xff]   ;;  %v5400_v20 = vld [vmem:[%s5685_s29 + $0xbcc] ss:$16 sps:$4 sm:$0xff]  }
 0x154   : > { %3578 = vmatpush1.bf16.msra.mxu0 %v5305_v21  ;;  %3922 = vmatpush1.bf16.msra.mxu1 %v5308_v15  ;;  %v5395_v21 = vld [vmem:[%s5685_s29 + $0xbc0] ss:$16 sps:$4 sm:$0xff]   ;;  %v5398_v15 = vld [vmem:[%s5685_s29 + $0xbc8] ss:$16 sps:$4 sm:$0xff]  }
 0x155   : > { %3590 = vmatprep.subr.bf16.mxu0 %v5313_v16  ;;  %3934 = vmatprep.subr.bf16.mxu1 %v5316_v24  ;;  %v5403_v16 = vld [vmem:[%s5685_s29 + $0xbe4] ss:$16 sps:$4 sm:$0xff]   ;;  %v5406_v24 = vld [vmem:[%s5685_s29 + $0xbec] ss:$16 sps:$4 sm:$0xff]  }
 0x157   : > { %3580 = vmatmul.mubr.bf16.vlgmr.msra.gmra.mrb[0].mxu0 %v4208_v17  ;;  %3924 = vmatmul.mubr.bf16.vlgmr.msra.gmra.mrb[0].mxu1 %v4208_v17  ;;  %v5401_v17 = vld [vmem:[%s5685_s29 + $0xbe0] ss:$16 sps:$4 sm:$0xff]  }
 0x158   : > { %3591 = vmatpush1.bf16.msra.mxu0 %v5311_v26  ;;  %3935 = vmatpush1.bf16.msra.mxu1 %v5314_v27  ;;  %v5404_v26 = vld [vmem:[%s5685_s29 + $0xbe8] ss:$16 sps:$4 sm:$0xff]   ;;  %v5409_v27 = vld [vmem:[%s5685_s29 + $0xc04] ss:$16 sps:$4 sm:$0xff]  }
 0x159   : > { %3592 = vmatprep.subr.bf16.mxu0 %v5319_v28  ;;  %3936 = vmatprep.subr.bf16.mxu1 %v5322_v29  ;;  %v5412_v28 = vld [vmem:[%s5685_s29 + $0xc0c] ss:$16 sps:$4 sm:$0xff]   ;;  %v4210_v29 = vcombine.low %v6068_v25, %v6073_v14  ;;  %v5415_v25 = vld [vmem:[%s5685_s29 + $0xc24] ss:$16 sps:$4 sm:$0xff]  }
 0x15a   : > { %3622 = vmatprep.mubr.bf16.mxu0 %v4211_v30  ;;  %3966 = vmatprep.mubr.bf16.mxu1 %v4211_v30  ;;  %v6148_v30 = vld [vmem:[%s6320_s0 + $0x30] sm:$0xff]  ;;  %v5418_v14 = vld [vmem:[%s5685_s29 + $0xc2c] ss:$16 sps:$4 sm:$0xff]  }
 0x15c   : > { %3593 = vmatpush1.bf16.msra.mxu0 %v5317_v22  ;;  %3937 = vmatpush1.bf16.msra.mxu1 %v5320_v23  ;;  %v6153_v22 = vld [vmem:[%s6320_s0 + $0x70] sm:$0xff] }
 0x15d   : > { %3594 = vmatprep.subr.bf16.mxu0 %v5325_v31  ;;  %3938 = vmatprep.subr.bf16.mxu1 %v5328_v32  ;;  %v5407_v23 = vld [vmem:[%s5685_s29 + $0xc00] ss:$16 sps:$4 sm:$0xff]   ;;  %v5410_v31 = vld [vmem:[%s5685_s29 + $0xc08] ss:$16 sps:$4 sm:$0xff]   ;;  %v4213_v32 = vcombine.high %v6148_v30, %v6153_v22 }
 0x160   : > { %3595 = vmatpush1.bf16.msra.mxu0 %v5323_v33  ;;  %3939 = vmatpush1.bf16.msra.mxu1 %v5326_v34  ;;  %v5413_v33 = vld [vmem:[%s5685_s29 + $0xc20] ss:$16 sps:$4 sm:$0xff]   ;;  %v5416_v34 = vld [vmem:[%s5685_s29 + $0xc28] ss:$16 sps:$4 sm:$0xff]  }
 0x161   : > { %3596 = vmatprep.subr.bf16.mxu0 %v5331_v35  ;;  %3940 = vmatprep.subr.bf16.mxu1 %v5334_v36  ;;  %v5421_v35 = vld [vmem:[%s5685_s29 + $0xc44] ss:$16 sps:$4 sm:$0xff]   ;;  %v5424_v36 = vld [vmem:[%s5685_s29 + $0xc4c] ss:$16 sps:$4 sm:$0xff]  }
 0x164   : > { %3597 = vmatpush1.bf16.msra.mxu0 %v5329_v37  ;;  %3941 = vmatpush1.bf16.msra.mxu1 %v5332_v38  ;;  %v5419_v37 = vld [vmem:[%s5685_s29 + $0xc40] ss:$16 sps:$4 sm:$0xff]   ;;  %v5422_v38 = vld [vmem:[%s5685_s29 + $0xc48] ss:$16 sps:$4 sm:$0xff]  }
 0x165   : > { %3598 = vmatprep.subr.bf16.mxu0 %v5337_v39  ;;  %3942 = vmatprep.subr.bf16.mxu1 %v5340_v40  ;;  %v5427_v39 = vld [vmem:[%s5685_s29 + $0xc64] ss:$16 sps:$4 sm:$0xff]   ;;  %v5430_v40 = vld [vmem:[%s5685_s29 + $0xc6c] ss:$16 sps:$4 sm:$0xff]  }
 0x168   : > { %3599 = vmatpush1.bf16.msra.mxu0 %v5335_v41  ;;  %3943 = vmatpush1.bf16.msra.mxu1 %v5338_v42  ;;  %v5425_v41 = vld [vmem:[%s5685_s29 + $0xc60] ss:$16 sps:$4 sm:$0xff]   ;;  %v5428_v42 = vld [vmem:[%s5685_s29 + $0xc68] ss:$16 sps:$4 sm:$0xff]  }
 0x169   : > { %3600 = vmatprep.subr.bf16.mxu0 %v5343_v43  ;;  %3944 = vmatprep.subr.bf16.mxu1 %v5346_v44  ;;  %v5433_v43 = vld [vmem:[%s5685_s29 + $0xc84] ss:$16 sps:$4 sm:$0xff]   ;;  %v5436_v44 = vld [vmem:[%s5685_s29 + $0xc8c] ss:$16 sps:$4 sm:$0xff]  }
 0x16c   : > { %3601 = vmatpush1.bf16.msra.mxu0 %v5341_v45  ;;  %3945 = vmatpush1.bf16.msra.mxu1 %v5344_v46  ;;  %v5431_v45 = vld [vmem:[%s5685_s29 + $0xc80] ss:$16 sps:$4 sm:$0xff]   ;;  %v5434_v46 = vld [vmem:[%s5685_s29 + $0xc88] ss:$16 sps:$4 sm:$0xff]  }
 0x16d   : > { %3602 = vmatprep.subr.bf16.mxu0 %v5349_v47  ;;  %3946 = vmatprep.subr.bf16.mxu1 %v5352_v48  ;;  %v5439_v47 = vld [vmem:[%s5685_s29 + $0xca4] ss:$16 sps:$4 sm:$0xff]   ;;  %v5442_v48 = vld [vmem:[%s5685_s29 + $0xcac] ss:$16 sps:$4 sm:$0xff]  }
 0x170   : > { %3603 = vmatpush1.bf16.msra.mxu0 %v5347_v49  ;;  %3947 = vmatpush1.bf16.msra.mxu1 %v5350_v50  ;;  %v5437_v49 = vld [vmem:[%s5685_s29 + $0xca0] ss:$16 sps:$4 sm:$0xff]   ;;  %v5440_v50 = vld [vmem:[%s5685_s29 + $0xca8] ss:$16 sps:$4 sm:$0xff]  }
 0x171   : > { %3604 = vmatprep.subr.bf16.mxu0 %v5355_v51  ;;  %3948 = vmatprep.subr.bf16.mxu1 %v5358_v52  ;;  %v5445_v51 = vld [vmem:[%s5685_s29 + $0xcc4] ss:$16 sps:$4 sm:$0xff]   ;;  %v5448_v52 = vld [vmem:[%s5685_s29 + $0xccc] ss:$16 sps:$4 sm:$0xff]  }
 0x174   : > { %3605 = vmatpush1.bf16.msra.mxu0 %v5353_v53  ;;  %3949 = vmatpush1.bf16.msra.mxu1 %v5356_v54  ;;  %v5443_v53 = vld [vmem:[%s5685_s29 + $0xcc0] ss:$16 sps:$4 sm:$0xff]   ;;  %v5446_v54 = vld [vmem:[%s5685_s29 + $0xcc8] ss:$16 sps:$4 sm:$0xff]  }
 0x175   : > { %3606 = vmatprep.subr.bf16.mxu0 %v5361_v55  ;;  %3950 = vmatprep.subr.bf16.mxu1 %v5364_v56  ;;  %v5451_v55 = vld [vmem:[%s5685_s29 + $0xce4] ss:$16 sps:$4 sm:$0xff]   ;;  %v5454_v56 = vld [vmem:[%s5685_s29 + $0xcec] ss:$16 sps:$4 sm:$0xff]  }
 0x178   : > { %3607 = vmatpush1.bf16.msra.mxu0 %v5359_v57  ;;  %3951 = vmatpush1.bf16.msra.mxu1 %v5362_v58  ;;  %v5449_v57 = vld [vmem:[%s5685_s29 + $0xce0] ss:$16 sps:$4 sm:$0xff]   ;;  %v5452_v58 = vld [vmem:[%s5685_s29 + $0xce8] ss:$16 sps:$4 sm:$0xff]  }
 0x179   : > { %3608 = vmatprep.subr.bf16.mxu0 %v5367_v59  ;;  %3952 = vmatprep.subr.bf16.mxu1 %v5370_v60  ;;  %v5457_v59 = vld [vmem:[%s5685_s29 + $0xd04] ss:$16 sps:$4 sm:$0xff]   ;;  %v5460_v60 = vld [vmem:[%s5685_s29 + $0xd0c] ss:$16 sps:$4 sm:$0xff]  }
 0x17c   : > { %3609 = vmatpush1.bf16.msra.mxu0 %v5365_v61  ;;  %3953 = vmatpush1.bf16.msra.mxu1 %v5368_v62  ;;  %v5455_v61 = vld [vmem:[%s5685_s29 + $0xd00] ss:$16 sps:$4 sm:$0xff]   ;;  %v5458_v62 = vld [vmem:[%s5685_s29 + $0xd08] ss:$16 sps:$4 sm:$0xff]  }
 0x17d   : > { %3610 = vmatprep.subr.bf16.mxu0 %v5373_v63  ;;  %3954 = vmatprep.subr.bf16.mxu1 %v5376_v0  ;;  %v5463_v63 = vld [vmem:[%s5685_s29 + $0xd24] ss:$16 sps:$4 sm:$0xff]   ;;  %v5466_v0 = vld [vmem:[%s5685_s29 + $0xd2c] ss:$16 sps:$4 sm:$0xff]  }
 0x180   : > { %3611 = vmatpush1.bf16.msra.mxu0 %v5371_v1  ;;  %3955 = vmatpush1.bf16.msra.mxu1 %v5374_v3  ;;  %v5461_v1 = vld [vmem:[%s5685_s29 + $0xd20] ss:$16 sps:$4 sm:$0xff]   ;;  %v5464_v3 = vld [vmem:[%s5685_s29 + $0xd28] ss:$16 sps:$4 sm:$0xff]  }
 0x181   : > { %3612 = vmatprep.subr.bf16.mxu0 %v5379_v4  ;;  %3956 = vmatprep.subr.bf16.mxu1 %v5382_v5  ;;  %v5469_v4 = vld [vmem:[%s5685_s29 + $0xd44] ss:$16 sps:$4 sm:$0xff]   ;;  %v5472_v5 = vld [vmem:[%s5685_s29 + $0xd4c] ss:$16 sps:$4 sm:$0xff]  }
 0x184   : > { %3613 = vmatpush1.bf16.msra.mxu0 %v5377_v6  ;;  %3957 = vmatpush1.bf16.msra.mxu1 %v5380_v7  ;;  %v5467_v6 = vld [vmem:[%s5685_s29 + $0xd40] ss:$16 sps:$4 sm:$0xff]   ;;  %v5470_v7 = vld [vmem:[%s5685_s29 + $0xd48] ss:$16 sps:$4 sm:$0xff]  }
 0x185   : > { %3614 = vmatprep.subr.bf16.mxu0 %v5385_v8  ;;  %3958 = vmatprep.subr.bf16.mxu1 %v5388_v9  ;;  %v5475_v8 = vld [vmem:[%s5685_s29 + $0xd64] ss:$16 sps:$4 sm:$0xff]   ;;  %v5478_v9 = vld [vmem:[%s5685_s29 + $0xd6c] ss:$16 sps:$4 sm:$0xff]  }
 0x188   : > { %3615 = vmatpush1.bf16.msra.mxu0 %v5383_v10  ;;  %3959 = vmatpush1.bf16.msra.mxu1 %v5386_v11  ;;  %v5473_v10 = vld [vmem:[%s5685_s29 + $0xd60] ss:$16 sps:$4 sm:$0xff]   ;;  %v5476_v11 = vld [vmem:[%s5685_s29 + $0xd68] ss:$16 sps:$4 sm:$0xff]  }
 0x189   : > { %3616 = vmatprep.subr.bf16.mxu0 %v5391_v12  ;;  %3960 = vmatprep.subr.bf16.mxu1 %v5394_v13  ;;  %v5481_v12 = vld [vmem:[%s5685_s29 + $0xd84] ss:$16 sps:$4 sm:$0xff]   ;;  %v5484_v13 = vld [vmem:[%s5685_s29 + $0xd8c] ss:$16 sps:$4 sm:$0xff]  }
 0x18c   : > { %3617 = vmatpush1.bf16.msra.mxu0 %v5389_v2  ;;  %3961 = vmatpush1.bf16.msra.mxu1 %v5392_v18  ;;  %v5479_v2 = vld [vmem:[%s5685_s29 + $0xd80] ss:$16 sps:$4 sm:$0xff]   ;;  %v5482_v18 = vld [vmem:[%s5685_s29 + $0xd88] ss:$16 sps:$4 sm:$0xff]  }
 0x18d   : > { %3618 = vmatprep.subr.bf16.mxu0 %v5397_v19  ;;  %3962 = vmatprep.subr.bf16.mxu1 %v5400_v20  ;;  %v5487_v19 = vld [vmem:[%s5685_s29 + $0xda4] ss:$16 sps:$4 sm:$0xff]   ;;  %v5490_v20 = vld [vmem:[%s5685_s29 + $0xdac] ss:$16 sps:$4 sm:$0xff]  }
 0x190   : > { %3619 = vmatpush1.bf16.msra.mxu0 %v5395_v21  ;;  %3963 = vmatpush1.bf16.msra.mxu1 %v5398_v15  ;;  %v5485_v21 = vld [vmem:[%s5685_s29 + $0xda0] ss:$16 sps:$4 sm:$0xff]   ;;  %v5488_v15 = vld [vmem:[%s5685_s29 + $0xda8] ss:$16 sps:$4 sm:$0xff]  }
 0x191   : > { %3620 = vmatprep.subr.bf16.mxu0 %v5403_v16  ;;  %3964 = vmatprep.subr.bf16.mxu1 %v5406_v24  ;;  %v5493_v16 = vld [vmem:[%s5685_s29 + $0xdc4] ss:$16 sps:$4 sm:$0xff]   ;;  %v5496_v24 = vld [vmem:[%s5685_s29 + $0xdcc] ss:$16 sps:$4 sm:$0xff]  }
 0x194   : > { %3621 = vmatpush1.bf16.msra.mxu0 %v5401_v17  ;;  %3965 = vmatpush1.bf16.msra.mxu1 %v5404_v26  ;;  %v5491_v17 = vld [vmem:[%s5685_s29 + $0xdc0] ss:$16 sps:$4 sm:$0xff]   ;;  %v5494_v26 = vld [vmem:[%s5685_s29 + $0xdc8] ss:$16 sps:$4 sm:$0xff]  }
 0x195   : > { %3633 = vmatprep.subr.bf16.mxu0 %v5409_v27  ;;  %3977 = vmatprep.subr.bf16.mxu1 %v5412_v28  ;;  %v5499_v27 = vld [vmem:[%s5685_s29 + $0xde4] ss:$16 sps:$4 sm:$0xff]   ;;  %v5502_v28 = vld [vmem:[%s5685_s29 + $0xdec] ss:$16 sps:$4 sm:$0xff]  }
 0x197   : > { %3623 = vmatmul.mubr.bf16.vlgmr.msra.gmra.mrb[0].mxu0 %v4210_v29  ;;  %3967 = vmatmul.mubr.bf16.vlgmr.msra.gmra.mrb[0].mxu1 %v4210_v29  ;;  %v5497_v29 = vld [vmem:[%s5685_s29 + $0xde0] ss:$16 sps:$4 sm:$0xff]  }
 0x198   : > { %3634 = vmatpush1.bf16.msra.mxu0 %v5407_v23  ;;  %3978 = vmatpush1.bf16.msra.mxu1 %v5410_v31  ;;  %v5500_v23 = vld [vmem:[%s5685_s29 + $0xde8] ss:$16 sps:$4 sm:$0xff]   ;;  %v5505_v31 = vld [vmem:[%s5685_s29 + $0xe04] ss:$16 sps:$4 sm:$0xff]  }
 0x199   : > { %3635 = vmatprep.subr.bf16.mxu0 %v5415_v25  ;;  %3979 = vmatprep.subr.bf16.mxu1 %v5418_v14  ;;  %v5508_v25 = vld [vmem:[%s5685_s29 + $0xe0c] ss:$16 sps:$4 sm:$0xff]   ;;  %v4212_v14 = vcombine.low %v6148_v30, %v6153_v22  ;;  %v5511_v30 = vld [vmem:[%s5685_s29 + $0xe24] ss:$16 sps:$4 sm:$0xff]  }
 0x19a   : > { %3665 = vmatprep.mubr.bf16.mxu0 %v4213_v32  ;;  %4009 = vmatprep.mubr.bf16.mxu1 %v4213_v32  ;;  %v6226_v32 = vld [vmem:[%s6320_s0 + $0x38] sm:$0xff] }
 0x19b   : > { %v5514_v22 = vld [vmem:[%s5685_s29 + $0xe2c] ss:$16 sps:$4 sm:$0xff]  }
 0x19c   : > { %3636 = vmatpush1.bf16.msra.mxu0 %v5413_v33  ;;  %3980 = vmatpush1.bf16.msra.mxu1 %v5416_v34  ;;  %v6231_v33 = vld [vmem:[%s6320_s0 + $0x78] sm:$0xff]  ;;  %v5503_v34 = vld [vmem:[%s5685_s29 + $0xe00] ss:$16 sps:$4 sm:$0xff]  }
 0x19d   : > { %3637 = vmatprep.subr.bf16.mxu0 %v5421_v35  ;;  %3981 = vmatprep.subr.bf16.mxu1 %v5424_v36  ;;  %v5506_v35 = vld [vmem:[%s5685_s29 + $0xe08] ss:$16 sps:$4 sm:$0xff]   ;;  %v4215_v36 = vcombine.high %v6226_v32, %v6231_v33 }
 0x1a0   : > { %3638 = vmatpush1.bf16.msra.mxu0 %v5419_v37  ;;  %3982 = vmatpush1.bf16.msra.mxu1 %v5422_v38  ;;  %v5509_v37 = vld [vmem:[%s5685_s29 + $0xe20] ss:$16 sps:$4 sm:$0xff]   ;;  %v5512_v38 = vld [vmem:[%s5685_s29 + $0xe28] ss:$16 sps:$4 sm:$0xff]  }
 0x1a1   : > { %3639 = vmatprep.subr.bf16.mxu0 %v5427_v39  ;;  %3983 = vmatprep.subr.bf16.mxu1 %v5430_v40  ;;  %v5517_v39 = vld [vmem:[%s5685_s29 + $0xe44] ss:$16 sps:$4 sm:$0xff]   ;;  %v5520_v40 = vld [vmem:[%s5685_s29 + $0xe4c] ss:$16 sps:$4 sm:$0xff]  }
 0x1a4   : > { %3640 = vmatpush1.bf16.msra.mxu0 %v5425_v41  ;;  %3984 = vmatpush1.bf16.msra.mxu1 %v5428_v42  ;;  %v5515_v41 = vld [vmem:[%s5685_s29 + $0xe40] ss:$16 sps:$4 sm:$0xff]   ;;  %v5518_v42 = vld [vmem:[%s5685_s29 + $0xe48] ss:$16 sps:$4 sm:$0xff]  }
 0x1a5   : > { %3641 = vmatprep.subr.bf16.mxu0 %v5433_v43  ;;  %3985 = vmatprep.subr.bf16.mxu1 %v5436_v44  ;;  %v5523_v43 = vld [vmem:[%s5685_s29 + $0xe64] ss:$16 sps:$4 sm:$0xff]   ;;  %v5526_v44 = vld [vmem:[%s5685_s29 + $0xe6c] ss:$16 sps:$4 sm:$0xff]  }
 0x1a8   : > { %3642 = vmatpush1.bf16.msra.mxu0 %v5431_v45  ;;  %3986 = vmatpush1.bf16.msra.mxu1 %v5434_v46  ;;  %v5521_v45 = vld [vmem:[%s5685_s29 + $0xe60] ss:$16 sps:$4 sm:$0xff]   ;;  %v5524_v46 = vld [vmem:[%s5685_s29 + $0xe68] ss:$16 sps:$4 sm:$0xff]  }
 0x1a9   : > { %3643 = vmatprep.subr.bf16.mxu0 %v5439_v47  ;;  %3987 = vmatprep.subr.bf16.mxu1 %v5442_v48  ;;  %v5529_v47 = vld [vmem:[%s5685_s29 + $0xe84] ss:$16 sps:$4 sm:$0xff]   ;;  %v5532_v48 = vld [vmem:[%s5685_s29 + $0xe8c] ss:$16 sps:$4 sm:$0xff]  }
 0x1ac   : > { %3644 = vmatpush1.bf16.msra.mxu0 %v5437_v49  ;;  %3988 = vmatpush1.bf16.msra.mxu1 %v5440_v50  ;;  %v5527_v49 = vld [vmem:[%s5685_s29 + $0xe80] ss:$16 sps:$4 sm:$0xff]   ;;  %v5530_v50 = vld [vmem:[%s5685_s29 + $0xe88] ss:$16 sps:$4 sm:$0xff]  }
 0x1ad   : > { %3645 = vmatprep.subr.bf16.mxu0 %v5445_v51  ;;  %3989 = vmatprep.subr.bf16.mxu1 %v5448_v52  ;;  %v5535_v51 = vld [vmem:[%s5685_s29 + $0xea4] ss:$16 sps:$4 sm:$0xff]   ;;  %v5538_v52 = vld [vmem:[%s5685_s29 + $0xeac] ss:$16 sps:$4 sm:$0xff]  }
 0x1b0   : > { %3646 = vmatpush1.bf16.msra.mxu0 %v5443_v53  ;;  %3990 = vmatpush1.bf16.msra.mxu1 %v5446_v54  ;;  %v5533_v53 = vld [vmem:[%s5685_s29 + $0xea0] ss:$16 sps:$4 sm:$0xff]   ;;  %v5536_v54 = vld [vmem:[%s5685_s29 + $0xea8] ss:$16 sps:$4 sm:$0xff]  }
 0x1b1   : > { %3647 = vmatprep.subr.bf16.mxu0 %v5451_v55  ;;  %3991 = vmatprep.subr.bf16.mxu1 %v5454_v56  ;;  %v5541_v55 = vld [vmem:[%s5685_s29 + $0xec4] ss:$16 sps:$4 sm:$0xff]   ;;  %v5544_v56 = vld [vmem:[%s5685_s29 + $0xecc] ss:$16 sps:$4 sm:$0xff]  }
 0x1b4   : > { %3648 = vmatpush1.bf16.msra.mxu0 %v5449_v57  ;;  %3992 = vmatpush1.bf16.msra.mxu1 %v5452_v58  ;;  %v5539_v57 = vld [vmem:[%s5685_s29 + $0xec0] ss:$16 sps:$4 sm:$0xff]   ;;  %v5542_v58 = vld [vmem:[%s5685_s29 + $0xec8] ss:$16 sps:$4 sm:$0xff]  }
 0x1b5   : > { %3649 = vmatprep.subr.bf16.mxu0 %v5457_v59  ;;  %3993 = vmatprep.subr.bf16.mxu1 %v5460_v60  ;;  %v5547_v59 = vld [vmem:[%s5685_s29 + $0xee4] ss:$16 sps:$4 sm:$0xff]   ;;  %v5550_v60 = vld [vmem:[%s5685_s29 + $0xeec] ss:$16 sps:$4 sm:$0xff]  }
 0x1b8   : > { %3650 = vmatpush1.bf16.msra.mxu0 %v5455_v61  ;;  %3994 = vmatpush1.bf16.msra.mxu1 %v5458_v62  ;;  %v5545_v61 = vld [vmem:[%s5685_s29 + $0xee0] ss:$16 sps:$4 sm:$0xff]   ;;  %v5548_v62 = vld [vmem:[%s5685_s29 + $0xee8] ss:$16 sps:$4 sm:$0xff]  }
 0x1b9   : > { %3651 = vmatprep.subr.bf16.mxu0 %v5463_v63  ;;  %3995 = vmatprep.subr.bf16.mxu1 %v5466_v0  ;;  %v5553_v63 = vld [vmem:[%s5685_s29 + $0xf04] ss:$16 sps:$4 sm:$0xff]   ;;  %v5556_v0 = vld [vmem:[%s5685_s29 + $0xf0c] ss:$16 sps:$4 sm:$0xff]  }
 0x1bc   : > { %3652 = vmatpush1.bf16.msra.mxu0 %v5461_v1  ;;  %3996 = vmatpush1.bf16.msra.mxu1 %v5464_v3  ;;  %v5551_v1 = vld [vmem:[%s5685_s29 + $0xf00] ss:$16 sps:$4 sm:$0xff]   ;;  %v5554_v3 = vld [vmem:[%s5685_s29 + $0xf08] ss:$16 sps:$4 sm:$0xff]  }
 0x1bd   : > { %3653 = vmatprep.subr.bf16.mxu0 %v5469_v4  ;;  %3997 = vmatprep.subr.bf16.mxu1 %v5472_v5  ;;  %v5559_v4 = vld [vmem:[%s5685_s29 + $0xf24] ss:$16 sps:$4 sm:$0xff]   ;;  %v5562_v5 = vld [vmem:[%s5685_s29 + $0xf2c] ss:$16 sps:$4 sm:$0xff]  }
 0x1c0   : > { %3654 = vmatpush1.bf16.msra.mxu0 %v5467_v6  ;;  %3998 = vmatpush1.bf16.msra.mxu1 %v5470_v7  ;;  %v5557_v6 = vld [vmem:[%s5685_s29 + $0xf20] ss:$16 sps:$4 sm:$0xff]   ;;  %v5560_v7 = vld [vmem:[%s5685_s29 + $0xf28] ss:$16 sps:$4 sm:$0xff]  }
 0x1c1   : > { %3655 = vmatprep.subr.bf16.mxu0 %v5475_v8  ;;  %3999 = vmatprep.subr.bf16.mxu1 %v5478_v9  ;;  %v5565_v8 = vld [vmem:[%s5685_s29 + $0xf44] ss:$16 sps:$4 sm:$0xff]   ;;  %v5568_v9 = vld [vmem:[%s5685_s29 + $0xf4c] ss:$16 sps:$4 sm:$0xff]  }
 0x1c4   : > { %3656 = vmatpush1.bf16.msra.mxu0 %v5473_v10  ;;  %4000 = vmatpush1.bf16.msra.mxu1 %v5476_v11  ;;  %v5563_v10 = vld [vmem:[%s5685_s29 + $0xf40] ss:$16 sps:$4 sm:$0xff]   ;;  %v5566_v11 = vld [vmem:[%s5685_s29 + $0xf48] ss:$16 sps:$4 sm:$0xff]  }
 0x1c5   : > { %3657 = vmatprep.subr.bf16.mxu0 %v5481_v12  ;;  %4001 = vmatprep.subr.bf16.mxu1 %v5484_v13  ;;  %v5571_v12 = vld [vmem:[%s5685_s29 + $0xf64] ss:$16 sps:$4 sm:$0xff]   ;;  %v5574_v13 = vld [vmem:[%s5685_s29 + $0xf6c] ss:$16 sps:$4 sm:$0xff]  }
 0x1c8   : > { %3658 = vmatpush1.bf16.msra.mxu0 %v5479_v2  ;;  %4002 = vmatpush1.bf16.msra.mxu1 %v5482_v18  ;;  %v5569_v2 = vld [vmem:[%s5685_s29 + $0xf60] ss:$16 sps:$4 sm:$0xff]   ;;  %v5572_v18 = vld [vmem:[%s5685_s29 + $0xf68] ss:$16 sps:$4 sm:$0xff]  }
 0x1c9   : > { %3659 = vmatprep.subr.bf16.mxu0 %v5487_v19  ;;  %4003 = vmatprep.subr.bf16.mxu1 %v5490_v20  ;;  %v5577_v19 = vld [vmem:[%s5685_s29 + $0xf84] ss:$16 sps:$4 sm:$0xff]   ;;  %v5580_v20 = vld [vmem:[%s5685_s29 + $0xf8c] ss:$16 sps:$4 sm:$0xff]  }
 0x1cc   : > { %3660 = vmatpush1.bf16.msra.mxu0 %v5485_v21  ;;  %4004 = vmatpush1.bf16.msra.mxu1 %v5488_v15  ;;  %v5575_v21 = vld [vmem:[%s5685_s29 + $0xf80] ss:$16 sps:$4 sm:$0xff]   ;;  %v5578_v15 = vld [vmem:[%s5685_s29 + $0xf88] ss:$16 sps:$4 sm:$0xff]  }
 0x1cd   : > { %3661 = vmatprep.subr.bf16.mxu0 %v5493_v16  ;;  %4005 = vmatprep.subr.bf16.mxu1 %v5496_v24  ;;  %v5583_v16 = vld [vmem:[%s5685_s29 + $0xfa4] ss:$16 sps:$4 sm:$0xff]   ;;  %v5586_v24 = vld [vmem:[%s5685_s29 + $0xfac] ss:$16 sps:$4 sm:$0xff]  }
 0x1d0   : > { %3662 = vmatpush1.bf16.msra.mxu0 %v5491_v17  ;;  %4006 = vmatpush1.bf16.msra.mxu1 %v5494_v26  ;;  %v5581_v17 = vld [vmem:[%s5685_s29 + $0xfa0] ss:$16 sps:$4 sm:$0xff]   ;;  %v5584_v26 = vld [vmem:[%s5685_s29 + $0xfa8] ss:$16 sps:$4 sm:$0xff]  }
 0x1d1   : > { %3663 = vmatprep.subr.bf16.mxu0 %v5499_v27  ;;  %4007 = vmatprep.subr.bf16.mxu1 %v5502_v28  ;;  %v5589_v27 = vld [vmem:[%s5685_s29 + $0xfc4] ss:$16 sps:$4 sm:$0xff]   ;;  %v5592_v28 = vld [vmem:[%s5685_s29 + $0xfcc] ss:$16 sps:$4 sm:$0xff]  }
 0x1d4   : > { %3664 = vmatpush1.bf16.msra.mxu0 %v5497_v29  ;;  %4008 = vmatpush1.bf16.msra.mxu1 %v5500_v23  ;;  %v5587_v29 = vld [vmem:[%s5685_s29 + $0xfc0] ss:$16 sps:$4 sm:$0xff]   ;;  %v5590_v23 = vld [vmem:[%s5685_s29 + $0xfc8] ss:$16 sps:$4 sm:$0xff]  }
 0x1d5   : > { %3676 = vmatprep.subr.bf16.mxu0 %v5505_v31  ;;  %4020 = vmatprep.subr.bf16.mxu1 %v5508_v25  ;;  %v5595_v31 = vld [vmem:[%s5685_s29 + $0xfe4] ss:$16 sps:$4 sm:$0xff]   ;;  %v5598_v25 = vld [vmem:[%s5685_s29 + $0xfec] ss:$16 sps:$4 sm:$0xff]  }
 0x1d7   : > { %3666 = vmatmul.mubr.bf16.vlgmr.msra.gmra.mrb[0].mxu0 %v4212_v14  ;;  %4010 = vmatmul.mubr.bf16.vlgmr.msra.gmra.mrb[0].mxu1 %v4212_v14  ;;  %v5593_v14 = vld [vmem:[%s5685_s29 + $0xfe0] ss:$16 sps:$4 sm:$0xff]  }
 0x1d8   : > { %3677 = vmatpush1.bf16.msra.mxu0 %v5503_v34  ;;  %4021 = vmatpush1.bf16.msra.mxu1 %v5506_v35  ;;  %v5596_v34 = vld [vmem:[%s5685_s29 + $0xfe8] ss:$16 sps:$4 sm:$0xff]   ;;  %v4214_v35 = vcombine.low %v6226_v32, %v6231_v33  ;;  %s171_s29 = sand.u32 1, %s5613_s12  }
 0x1d9   : > { %3678 = vmatprep.subr.bf16.mxu0 %v5511_v30  ;;  %4022 = vmatprep.subr.bf16.mxu1 %v5514_v22  ;;  %v715_v30 = vlaneseq  ;;  %s4196_s21 = sshll.u32 %s171_s29, 5 }
 0x1da   : > { %3708 = vmatprep.mubr.bf16.mxu0 %v4215_v36  ;;  %4052 = vmatprep.mubr.bf16.mxu1 %v4215_v36  ;;  %s173_s12 = scalar_lea.vmem [#allocation2], %s4196_s21 }
 0x1db   : > { %v716_v22 = vshrl.u32 %v715_v30, 7 }
 0x1dc   : > { %3679 = vmatpush1.bf16.msra.mxu0 %v5509_v37  ;;  %4023 = vmatpush1.bf16.msra.mxu1 %v5512_v38  ;;  %v713_v38 = vld [vmem:[%s182_s18] sm:$0xf] }
 0x1dd   : > { %3680 = vmatprep.subr.bf16.mxu0 %v5517_v39  ;;  %4024 = vmatprep.subr.bf16.mxu1 %v5520_v40  ;;  %v717_v36 = vsub.s32 0, %v716_v22  ;;  %v725_v37 = vsub.s32 2, %v716_v22  ;;  %v721_v39 = vsub.s32 1, %v716_v22  ;;  %v729_v40 = vsub.s32 3, %v716_v22 }
 0x1df   : > { %v718_v32 = vrot.slane %v713_v38, %v717_v36  ;;  %v726_v33 = vrot.slane %v713_v38, %v725_v37 }
 0x1e0   : > { %3681 = vmatpush1.bf16.msra.mxu0 %v5515_v41  ;;  %4025 = vmatpush1.bf16.msra.mxu1 %v5518_v42  ;;  %v722_v41 = vrot.slane %v713_v38, %v721_v39  ;;  %v730_v42 = vrot.slane %v713_v38, %v729_v40 }
 0x1e1   : > { %3682 = vmatprep.subr.bf16.mxu0 %v5523_v43  ;;  %4026 = vmatprep.subr.bf16.mxu1 %v5526_v44 }
 0x1e4   : > { %3683 = vmatpush1.bf16.msra.mxu0 %v5521_v45  ;;  %4027 = vmatpush1.bf16.msra.mxu1 %v5524_v46 }
 0x1e5   : > { %3684 = vmatprep.subr.bf16.mxu0 %v5529_v47  ;;  %4028 = vmatprep.subr.bf16.mxu1 %v5532_v48 }
 0x1e8   : > { %3685 = vmatpush1.bf16.msra.mxu0 %v5527_v49  ;;  %4029 = vmatpush1.bf16.msra.mxu1 %v5530_v50 }
 0x1e9   : > { %3686 = vmatprep.subr.bf16.mxu0 %v5535_v51  ;;  %4030 = vmatprep.subr.bf16.mxu1 %v5538_v52 }
 0x1ec   : > { %3687 = vmatpush1.bf16.msra.mxu0 %v5533_v53  ;;  %4031 = vmatpush1.bf16.msra.mxu1 %v5536_v54 }
 0x1ed   : > { %3688 = vmatprep.subr.bf16.mxu0 %v5541_v55  ;;  %4032 = vmatprep.subr.bf16.mxu1 %v5544_v56 }
 0x1f0   : > { %3689 = vmatpush1.bf16.msra.mxu0 %v5539_v57  ;;  %4033 = vmatpush1.bf16.msra.mxu1 %v5542_v58 }
 0x1f1   : > { %3690 = vmatprep.subr.bf16.mxu0 %v5547_v59  ;;  %4034 = vmatprep.subr.bf16.mxu1 %v5550_v60 }
 0x1f4   : > { %3691 = vmatpush1.bf16.msra.mxu0 %v5545_v61  ;;  %4035 = vmatpush1.bf16.msra.mxu1 %v5548_v62 }
 0x1f5   : > { %3692 = vmatprep.subr.bf16.mxu0 %v5553_v63  ;;  %4036 = vmatprep.subr.bf16.mxu1 %v5556_v0 }
 0x1f8   : > { %3693 = vmatpush1.bf16.msra.mxu0 %v5551_v1  ;;  %4037 = vmatpush1.bf16.msra.mxu1 %v5554_v3 }
 0x1f9   : > { %3694 = vmatprep.subr.bf16.mxu0 %v5559_v4  ;;  %4038 = vmatprep.subr.bf16.mxu1 %v5562_v5 }
 0x1fc   : > { %3695 = vmatpush1.bf16.msra.mxu0 %v5557_v6  ;;  %4039 = vmatpush1.bf16.msra.mxu1 %v5560_v7 }
 0x1fd   : > { %3696 = vmatprep.subr.bf16.mxu0 %v5565_v8  ;;  %4040 = vmatprep.subr.bf16.mxu1 %v5568_v9 }
 0x200   : > { %3697 = vmatpush1.bf16.msra.mxu0 %v5563_v10  ;;  %4041 = vmatpush1.bf16.msra.mxu1 %v5566_v11 }
 0x201   : > { %3698 = vmatprep.subr.bf16.mxu0 %v5571_v12  ;;  %4042 = vmatprep.subr.bf16.mxu1 %v5574_v13 }
 0x204   : > { %3699 = vmatpush1.bf16.msra.mxu0 %v5569_v2  ;;  %4043 = vmatpush1.bf16.msra.mxu1 %v5572_v18 }
 0x205   : > { %3700 = vmatprep.subr.bf16.mxu0 %v5577_v19  ;;  %4044 = vmatprep.subr.bf16.mxu1 %v5580_v20 }
 0x208   : > { %3701 = vmatpush1.bf16.msra.mxu0 %v5575_v21  ;;  %4045 = vmatpush1.bf16.msra.mxu1 %v5578_v15 }
 0x209   : > { %3702 = vmatprep.subr.bf16.mxu0 %v5583_v16  ;;  %4046 = vmatprep.subr.bf16.mxu1 %v5586_v24 }
 0x20c   : > { %3703 = vmatpush1.bf16.msra.mxu0 %v5581_v17  ;;  %4047 = vmatpush1.bf16.msra.mxu1 %v5584_v26 }
 0x20d   : > { %3704 = vmatprep.subr.bf16.mxu0 %v5589_v27  ;;  %4048 = vmatprep.subr.bf16.mxu1 %v5592_v28 }
 0x210   : > { %3705 = vmatpush1.bf16.msra.mxu0 %v5587_v29  ;;  %4049 = vmatpush1.bf16.msra.mxu1 %v5590_v23 }
 0x211   : > { %3706 = vmatprep.subr.bf16.mxu0 %v5595_v31  ;;  %4050 = vmatprep.subr.bf16.mxu1 %v5598_v25 }
 0x214   : > { %3707 = vmatpush1.bf16.msra.mxu0 %v5593_v14  ;;  %4051 = vmatpush1.bf16.msra.mxu1 %v5596_v34 }
 0x217   : > { %3709 = vmatmul.mubr.bf16.vlgmr.msra.gmra.mrb[0].mxu0 %v4214_v35  ;;  %4053 = vmatmul.mubr.bf16.vlgmr.msra.gmra.mrb[0].mxu1 %v4214_v35 }
 0x2ea   : > { %v3710_v43 = vpop.f32.mrb[0].mxu0  ;;  %v4054_v44 = vpop.f32.mrb[0].mxu1 }
 0x2eb   : > { %v4743_v45 = vadd.f32 %v3710_v43, %v718_v32  ;;  %v4747_v46 = vadd.f32 %v4054_v44, %v726_v33  ;;  %v3712_v47 = vpop.f32.mrb[1].mxu0  ;;  %v4056_v48 = vpop.f32.mrb[1].mxu1 }
 0x2ec   : > { %v4744_v49 = vadd.f32 %v3712_v47, %v722_v41  ;;  %v4748_v50 = vadd.f32 %v4056_v48, %v730_v42  ;;  %v3714_v51 = vpop.f32.mrb[2].mxu0  ;;  %v4058_v52 = vpop.f32.mrb[2].mxu1 }
 0x2ed   : > { %v4063_v53 = vmax.f32 %v4743_v45, 0.0  ;;  %v4065_v54 = vmax.f32 %v4747_v46, 0.0  ;;  %v4745_v55 = vadd.f32 %v3714_v51, %v718_v32  ;;  %v4749_v56 = vadd.f32 %v4058_v52, %v726_v33  ;;  %v3716_v57 = vpop.f32.mrb[3].mxu0  ;;  %v4060_v58 = vpop.f32.mrb[3].mxu1 }
 0x2ee   : > { %v4064_v59 = vmax.f32 %v4744_v49, 0.0  ;;  %v4066_v60 = vmax.f32 %v4748_v50, 0.0  ;;  %v4746_v61 = vadd.f32 %v3716_v57, %v722_v41  ;;  %v4750_v62 = vadd.f32 %v4060_v58, %v730_v42  ;;  %4105 = sbr.rel (!%p5668_p4) target bundleno = 765 (0x2fd), region = 36 }
 0x2ef   : > { %v4067_v63 = vmax.f32 %v4745_v55, 0.0  ;;  %v4069_v0 = vmax.f32 %v4749_v56, 0.0 }
 0x2f0   : > { %v4738_v1 = vpack.c.bf16 %v4064_v59, %v4063_v53  ;;  %v4739_v3 = vpack.c.bf16 %v4066_v60, %v4065_v54  ;;  %v4068_v4 = vmax.f32 %v4746_v61, 0.0  ;;  %v4070_v5 = vmax.f32 %v4750_v62, 0.0 }
 0x2f2   : > { %4095 = vst [vmem:[%s173_s12] sm:$0xff] %v4738_v1  ;;  %4096 = vst [vmem:[%s173_s12 + $0x8] sm:$0xff] %v4739_v3  ;;  %v4740_v6 = vpack.c.bf16 %v4068_v4, %v4067_v63  ;;  %v4741_v7 = vpack.c.bf16 %v4070_v5, %v4069_v0 }
 0x2f4   : > { %4097 = vst [vmem:[%s173_s12 + $0x10] sm:$0xff] %v4740_v6  ;;  %4098 = vst [vmem:[%s173_s12 + $0x18] sm:$0xff] %v4741_v7 }
 0x2f9   : > { %v4121_v8 = vld [vmem:[%s173_s12] sm:$0xff]  ;;  %v4123_v9 = vld [vmem:[%s173_s12 + $0x8] sm:$0xff] }
 0x2fa   : > { %4122 = vst [vmem:[%s4108_s25] sm:$0xff] %v4121_v8  ;;  %4124 = vst [vmem:[%s4108_s25 + $0x8] sm:$0xff] %v4123_v9 }
 0x2fb   : > { %v4125_v10 = vld [vmem:[%s173_s12 + $0x10] sm:$0xff]  ;;  %v4127_v11 = vld [vmem:[%s173_s12 + $0x18] sm:$0xff] }
 0x2fc   : > { %4126 = vst [vmem:[%s4108_s25 + $0x20] sm:$0xff] %v4125_v10  ;;  %4128 = vst [vmem:[%s4108_s25 + $0x28] sm:$0xff] %v4127_v11 }
 0x2fd PF: > { %p10_p9 = scmp.ge.s32.totalorder %s5658_s16, 4   ;;  %s6325_s12 = smov %s5617_s13 }
 0x2fe   : > { %s6326_s13 = smov %s5666_s19  ;;  %s6327_s14 = smov %s5658_s16 }
 0x2ff   :  { %12 = sbr.rel (!%p10_p9) target bundleno = 2 (0x2), region = 88 }

// kernel: net_forward.7
= control target key start
LH: loop header
LB: loop body
LE: loop exit
PB: predicated region body
PF: predicated region fallthrough
CT: control target
= control target key end

     0   :  { %s14168_s12 = smov 0   ;;  %s14170_s13 = smov 0   ;;  %s15996_s0 = inlined_call_operand.vmem [shape: bf16[16,3136], index: 0, kind: input, shape index: {}]   ;;  %s15997_s1 = inlined_call_operand.vmem [shape: bf16[2,3136,1024], index: 1, kind: input, shape index: {}]   ;;  %s15998_s2 = inlined_call_operand.vmem [shape: f32[1,2048], index: 2, kind: input, shape index: {}]   ;;  %s15999_s3 = inlined_call_operand.vmem [shape: bf16[16,2048], index: 3, kind: output, shape index: {}]  }
   0x1   :  { %s14172_s14 = smov 0  }
   0x2 LB: > { %s14181_s15 = sadd.s32 4294967295, %s14145_s14   ;;  %s14183_s16 = sadd.s32 1, %s14145_s14   ;;  %s14145_s14 = sphi %s14172_s14, %s16004_s14   ;;  %s14141_s13 = sphi %s14170_s13, %s16003_s13   ;;  %s14137_s12 = sphi %s14168_s12, %s16002_s12  }
   0x3   : > { %s90_s17 = ssub.s32 %s14145_s14, %s14183_s16  ;;  %s93_s18 = sadd.s32 1, %s14141_s13 }
   0x4   : > { %p91_p0 = scmp.eq.s32.totalorder %s90_s17, 0  ;;  %p103_p1 = scmp.ne.s32.totalorder %s14141_s13, %s14137_s12 }
   0x5   : > { %p104_p2 = scmp.eq.s32.totalorder %s14181_s15, 1  ;;  %p12203_p3 = scmp.ge.s32.totalorder %s14145_s14, 1 }
   0x6   : > { %s14191_s19 = scalar_select %p91_p0, %s14141_s13, %s93_s18  }
   0x7   : > { %p14193_p4 = por %p104_p2, %p103_p1  ;;  %p147_p5 = scmp.lt.s32.totalorder %s14145_s14, 3 }
   0x9   : > { %p148_p6 = pnand %p12203_p3, %p147_p5 }
   0xa   : > { %p174_p7 = scmp.lt.s32.totalorder (!%p148_p6), %s14181_s15, 1  ;;  %v14060_v0 = vld [vmem:[%s15996_s0 + $0x4] ss:$100 sps:$4 sm:$0xff] (!%p148_p6)   ;;  %vm9787_vm0 = vcmask (!%p148_p6), 523264   ;;  %s12206_s25 = sshll.u32 (!%p148_p6), %s14181_s15, 3 }
   0xb   : > { %151 = sbr.rel (%p148_p6) target bundleno = 1825 (0x721), region = 32  ;;  %9823 = vmatprep.mubr.bf16.mxu0 (!%p148_p6), %v14060_v0  ;;  %10382 = vmatprep.mubr.bf16.mxu1 (!%p148_p6), %v14060_v0  ;;  %p15290_p8 = scmp.lt.s32.totalorder (!%p148_p6), %s12206_s25, 15 }
   0xc   : > { %s171_s8 = sand.u32 (!%p148_p6), 1, %s14137_s12  }
   0xd   : > { %s15334_s9 = sshll.u32 (!%p148_p6), %s171_s8, 6 }
   0xe   : > { %s15343_s12 = scalar_lea.vmem (!%p148_p6), [#allocation2], %s15334_s9 }
  0x12   : > { %s175_s23 = scalar_select %p174_p7, %s14181_s15, 1 }
  0x13   : > { %s16006_s25 = smov (!%p15290_p8, %s12206_s25), 15 }
  0x14   : > { %s14034_s24 = smul.u32 12544, %s175_s23  ;;  %s15312_s7 = scalar_lea.vmem %s15998_s2, %s16006_s25 }
  0x16   : > { %s14205_s27 = scalar_lea.vmem %s15997_s1, %s14034_s24 }
  0x17   : > { %v212_v1 = vld [vmem:[%s14205_s27] sm:$0xff]  ;;  %v213_v3 = vld [vmem:[%s14205_s27 + $0x8] sm:$0xff] }
  0x18   : > { %v216_v2 = vld [vmem:[%s14205_s27 + $0x20] sm:$0xff]  ;;  %v217_v5 = vld [vmem:[%s14205_s27 + $0x28] sm:$0xff] }
  0x19   : > { %v12233_v4 = vcombine.high %v212_v1, %v216_v2  ;;  %v12232_v6 = vcombine.low %v212_v1, %v216_v2  ;;  %v220_v7 = vld [vmem:[%s14205_s27 + $0x40] sm:$0xff]  ;;  %v12235_v9 = vcombine.high %v213_v3, %v217_v5  ;;  %v12234_v10 = vcombine.low %v213_v3, %v217_v5  ;;  %v221_v12 = vld [vmem:[%s14205_s27 + $0x48] sm:$0xff] }
  0x1a   : > { %v224_v8 = vld [vmem:[%s14205_s27 + $0x60] sm:$0xff]  ;;  %v225_v13 = vld [vmem:[%s14205_s27 + $0x68] sm:$0xff] }
  0x1b   : > { %v12241_v11 = vcombine.high %v220_v7, %v224_v8  ;;  %v228_v14 = vld [vmem:[%s14205_s27 + $0x80] sm:$0xff]  ;;  %9791 = vmatprep.subr.bf16.mxu0 %v12233_v4  ;;  %v12243_v15 = vcombine.high %v221_v12, %v225_v13  ;;  %v229_v17 = vld [vmem:[%s14205_s27 + $0x88] sm:$0xff]  ;;  %10350 = vmatprep.subr.bf16.mxu1 %v12235_v9  ;;  %v12240_v19 = vcombine.low %v220_v7, %v224_v8 }
  0x1c   : > { %v232_v16 = vld [vmem:[%s14205_s27 + $0xa0] sm:$0xff]  ;;  %v233_v18 = vld [vmem:[%s14205_s27 + $0xa8] sm:$0xff]  ;;  %9792 = vmatpush1.bf16.msra.mxu0 %v12232_v6  ;;  %10351 = vmatpush1.bf16.msra.mxu1 %v12234_v10  ;;  %v12242_v20 = vcombine.low %v221_v12, %v225_v13 }
  0x1d   : > { %9793 = vmatprep.subr.bf16.mxu0 %v12241_v11  ;;  %v12249_v21 = vcombine.high %v228_v14, %v232_v16  ;;  %10352 = vmatprep.subr.bf16.mxu1 %v12243_v15  ;;  %v12251_v22 = vcombine.high %v229_v17, %v233_v18  ;;  %v236_v23 = vld [vmem:[%s14205_s27 + $0xc0] sm:$0xff]  ;;  %v237_v25 = vld [vmem:[%s14205_s27 + $0xc8] sm:$0xff]  ;;  %v12248_v27 = vcombine.low %v228_v14, %v232_v16 }
  0x1e   : > { %v240_v24 = vld [vmem:[%s14205_s27 + $0xe0] sm:$0xff]  ;;  %v241_v26 = vld [vmem:[%s14205_s27 + $0xe8] sm:$0xff]  ;;  %v12250_v28 = vcombine.low %v229_v17, %v233_v18 }
  0x1f   : > { %v12257_v29 = vcombine.high %v236_v23, %v240_v24  ;;  %v12259_v30 = vcombine.high %v237_v25, %v241_v26  ;;  %v244_v31 = vld [vmem:[%s14205_s27 + $0x100] sm:$0xff]  ;;  %v245_v33 = vld [vmem:[%s14205_s27 + $0x108] sm:$0xff]  ;;  %v12256_v35 = vcombine.low %v236_v23, %v240_v24  ;;  %v12258_v36 = vcombine.low %v237_v25, %v241_v26 }
  0x20   : > { %9794 = vmatpush1.bf16.msra.mxu0 %v12240_v19  ;;  %10353 = vmatpush1.bf16.msra.mxu1 %v12242_v20  ;;  %v248_v32 = vld [vmem:[%s14205_s27 + $0x120] sm:$0xff]  ;;  %v249_v34 = vld [vmem:[%s14205_s27 + $0x128] sm:$0xff] }
  0x21   : > { %9795 = vmatprep.subr.bf16.mxu0 %v12249_v21  ;;  %10354 = vmatprep.subr.bf16.mxu1 %v12251_v22  ;;  %v12265_v37 = vcombine.high %v244_v31, %v248_v32  ;;  %v12267_v38 = vcombine.high %v245_v33, %v249_v34  ;;  %v252_v39 = vld [vmem:[%s14205_s27 + $0x140] sm:$0xff]  ;;  %v253_v41 = vld [vmem:[%s14205_s27 + $0x148] sm:$0xff]  ;;  %v12264_v43 = vcombine.low %v244_v31, %v248_v32 }
  0x22   : > { %v256_v40 = vld [vmem:[%s14205_s27 + $0x160] sm:$0xff]  ;;  %v257_v42 = vld [vmem:[%s14205_s27 + $0x168] sm:$0xff]  ;;  %v12266_v44 = vcombine.low %v245_v33, %v249_v34 }
  0x23   : > { %v12273_v45 = vcombine.high %v252_v39, %v256_v40  ;;  %v12275_v46 = vcombine.high %v253_v41, %v257_v42  ;;  %v260_v47 = vld [vmem:[%s14205_s27 + $0x180] sm:$0xff]  ;;  %v261_v49 = vld [vmem:[%s14205_s27 + $0x188] sm:$0xff]  ;;  %v12272_v51 = vcombine.low %v252_v39, %v256_v40  ;;  %v12274_v52 = vcombine.low %v253_v41, %v257_v42 }
  0x24   : > { %9796 = vmatpush1.bf16.msra.mxu0 %v12248_v27  ;;  %10355 = vmatpush1.bf16.msra.mxu1 %v12250_v28  ;;  %v264_v48 = vld [vmem:[%s14205_s27 + $0x1a0] sm:$0xff]  ;;  %v265_v50 = vld [vmem:[%s14205_s27 + $0x1a8] sm:$0xff] }
  0x25   : > { %9797 = vmatprep.subr.bf16.mxu0 %v12257_v29  ;;  %10356 = vmatprep.subr.bf16.mxu1 %v12259_v30  ;;  %v12281_v53 = vcombine.high %v260_v47, %v264_v48  ;;  %v12283_v54 = vcombine.high %v261_v49, %v265_v50  ;;  %v268_v55 = vld [vmem:[%s14205_s27 + $0x1c0] sm:$0xff]  ;;  %v269_v57 = vld [vmem:[%s14205_s27 + $0x1c8] sm:$0xff]  ;;  %v12280_v59 = vcombine.low %v260_v47, %v264_v48 }
  0x26   : > { %v272_v56 = vld [vmem:[%s14205_s27 + $0x1e0] sm:$0xff]  ;;  %v273_v58 = vld [vmem:[%s14205_s27 + $0x1e8] sm:$0xff]  ;;  %v12282_v60 = vcombine.low %v261_v49, %v265_v50 }
  0x27   : > { %v12289_v61 = vcombine.high %v268_v55, %v272_v56  ;;  %v12291_v62 = vcombine.high %v269_v57, %v273_v58  ;;  %v276_v63 = vld [vmem:[%s14205_s27 + $0x200] sm:$0xff]  ;;  %v277_v1 = vld [vmem:[%s14205_s27 + $0x208] sm:$0xff]  ;;  %v12288_v3 = vcombine.low %v268_v55, %v272_v56  ;;  %v12290_v4 = vcombine.low %v269_v57, %v273_v58 }
  0x28   : > { %9798 = vmatpush1.bf16.msra.mxu0 %v12256_v35  ;;  %10357 = vmatpush1.bf16.msra.mxu1 %v12258_v36  ;;  %v280_v0 = vld [vmem:[%s14205_s27 + $0x220] sm:$0xff]  ;;  %v281_v2 = vld [vmem:[%s14205_s27 + $0x228] sm:$0xff] }
  0x29   : > { %9799 = vmatprep.subr.bf16.mxu0 %v12265_v37  ;;  %10358 = vmatprep.subr.bf16.mxu1 %v12267_v38  ;;  %v12297_v5 = vcombine.high %v276_v63, %v280_v0  ;;  %v12299_v6 = vcombine.high %v277_v1, %v281_v2  ;;  %v284_v7 = vld [vmem:[%s14205_s27 + $0x240] sm:$0xff]  ;;  %v285_v9 = vld [vmem:[%s14205_s27 + $0x248] sm:$0xff]  ;;  %v12296_v11 = vcombine.low %v276_v63, %v280_v0 }
  0x2a   : > { %v288_v8 = vld [vmem:[%s14205_s27 + $0x260] sm:$0xff]  ;;  %v289_v10 = vld [vmem:[%s14205_s27 + $0x268] sm:$0xff]  ;;  %v12298_v12 = vcombine.low %v277_v1, %v281_v2 }
  0x2b   : > { %v12305_v13 = vcombine.high %v284_v7, %v288_v8  ;;  %v12307_v14 = vcombine.high %v285_v9, %v289_v10  ;;  %v292_v15 = vld [vmem:[%s14205_s27 + $0x280] sm:$0xff]  ;;  %v293_v17 = vld [vmem:[%s14205_s27 + $0x288] sm:$0xff]  ;;  %v12304_v19 = vcombine.low %v284_v7, %v288_v8  ;;  %v12306_v20 = vcombine.low %v285_v9, %v289_v10 }
  0x2c   : > { %9800 = vmatpush1.bf16.msra.mxu0 %v12264_v43  ;;  %10359 = vmatpush1.bf16.msra.mxu1 %v12266_v44  ;;  %v296_v16 = vld [vmem:[%s14205_s27 + $0x2a0] sm:$0xff]  ;;  %v297_v18 = vld [vmem:[%s14205_s27 + $0x2a8] sm:$0xff] }
  0x2d   : > { %9801 = vmatprep.subr.bf16.mxu0 %v12273_v45  ;;  %10360 = vmatprep.subr.bf16.mxu1 %v12275_v46  ;;  %v12313_v21 = vcombine.high %v292_v15, %v296_v16  ;;  %v12315_v22 = vcombine.high %v293_v17, %v297_v18  ;;  %v300_v23 = vld [vmem:[%s14205_s27 + $0x2c0] sm:$0xff]  ;;  %v301_v25 = vld [vmem:[%s14205_s27 + $0x2c8] sm:$0xff]  ;;  %v12312_v27 = vcombine.low %v292_v15, %v296_v16 }
  0x2e   : > { %v304_v24 = vld [vmem:[%s14205_s27 + $0x2e0] sm:$0xff]  ;;  %v305_v26 = vld [vmem:[%s14205_s27 + $0x2e8] sm:$0xff]  ;;  %v12314_v28 = vcombine.low %v293_v17, %v297_v18 }
  0x2f   : > { %v12321_v29 = vcombine.high %v300_v23, %v304_v24  ;;  %v12323_v30 = vcombine.high %v301_v25, %v305_v26  ;;  %v308_v31 = vld [vmem:[%s14205_s27 + $0x300] sm:$0xff]  ;;  %v309_v33 = vld [vmem:[%s14205_s27 + $0x308] sm:$0xff]  ;;  %v12320_v35 = vcombine.low %v300_v23, %v304_v24  ;;  %v12322_v36 = vcombine.low %v301_v25, %v305_v26 }
  0x30   : > { %9802 = vmatpush1.bf16.msra.mxu0 %v12272_v51  ;;  %10361 = vmatpush1.bf16.msra.mxu1 %v12274_v52  ;;  %v312_v32 = vld [vmem:[%s14205_s27 + $0x320] sm:$0xff]  ;;  %v313_v34 = vld [vmem:[%s14205_s27 + $0x328] sm:$0xff] }
  0x31   : > { %9803 = vmatprep.subr.bf16.mxu0 %v12281_v53  ;;  %10362 = vmatprep.subr.bf16.mxu1 %v12283_v54  ;;  %v12329_v37 = vcombine.high %v308_v31, %v312_v32  ;;  %v12331_v38 = vcombine.high %v309_v33, %v313_v34  ;;  %v316_v39 = vld [vmem:[%s14205_s27 + $0x340] sm:$0xff]  ;;  %v317_v41 = vld [vmem:[%s14205_s27 + $0x348] sm:$0xff]  ;;  %v12328_v43 = vcombine.low %v308_v31, %v312_v32 }
  0x32   : > { %v320_v40 = vld [vmem:[%s14205_s27 + $0x360] sm:$0xff]  ;;  %v321_v42 = vld [vmem:[%s14205_s27 + $0x368] sm:$0xff]  ;;  %v12330_v44 = vcombine.low %v309_v33, %v313_v34 }
  0x33   : > { %v12337_v45 = vcombine.high %v316_v39, %v320_v40  ;;  %v12339_v46 = vcombine.high %v317_v41, %v321_v42  ;;  %v324_v47 = vld [vmem:[%s14205_s27 + $0x380] sm:$0xff]  ;;  %v325_v49 = vld [vmem:[%s14205_s27 + $0x388] sm:$0xff]  ;;  %v12336_v51 = vcombine.low %v316_v39, %v320_v40  ;;  %v12338_v52 = vcombine.low %v317_v41, %v321_v42 }
  0x34   : > { %9804 = vmatpush1.bf16.msra.mxu0 %v12280_v59  ;;  %10363 = vmatpush1.bf16.msra.mxu1 %v12282_v60  ;;  %v328_v48 = vld [vmem:[%s14205_s27 + $0x3a0] sm:$0xff]  ;;  %v329_v50 = vld [vmem:[%s14205_s27 + $0x3a8] sm:$0xff] }
  0x35   : > { %9805 = vmatprep.subr.bf16.mxu0 %v12289_v61  ;;  %10364 = vmatprep.subr.bf16.mxu1 %v12291_v62  ;;  %v12345_v53 = vcombine.high %v324_v47, %v328_v48  ;;  %v12347_v54 = vcombine.high %v325_v49, %v329_v50  ;;  %v332_v55 = vld [vmem:[%s14205_s27 + $0x3c0] sm:$0xff]  ;;  %v333_v57 = vld [vmem:[%s14205_s27 + $0x3c8] sm:$0xff]  ;;  %v12344_v59 = vcombine.low %v324_v47, %v328_v48 }
  0x36   : > { %v336_v56 = vld [vmem:[%s14205_s27 + $0x3e0] sm:$0xff]  ;;  %v337_v58 = vld [vmem:[%s14205_s27 + $0x3e8] sm:$0xff]  ;;  %v12346_v60 = vcombine.low %v325_v49, %v329_v50 }
  0x37   : > { %v12353_v61 = vcombine.high %v332_v55, %v336_v56  ;;  %v12355_v62 = vcombine.high %v333_v57, %v337_v58  ;;  %v340_v63 = vld [vmem:[%s14205_s27 + $0x400] sm:$0xff]  ;;  %v341_v1 = vld [vmem:[%s14205_s27 + $0x408] sm:$0xff] }
  0x38   : > { %9806 = vmatpush1.bf16.msra.mxu0 %v12288_v3  ;;  %10365 = vmatpush1.bf16.msra.mxu1 %v12290_v4  ;;  %v344_v0 = vld [vmem:[%s14205_s27 + $0x420] sm:$0xff]  ;;  %v345_v2 = vld [vmem:[%s14205_s27 + $0x428] sm:$0xff]  ;;  %v12352_v3 = vcombine.low %v332_v55, %v336_v56  ;;  %v12354_v4 = vcombine.low %v333_v57, %v337_v58 }
  0x39   : > { %9807 = vmatprep.subr.bf16.mxu0 %v12297_v5  ;;  %10366 = vmatprep.subr.bf16.mxu1 %v12299_v6  ;;  %v12361_v5 = vcombine.high %v340_v63, %v344_v0  ;;  %v12363_v6 = vcombine.high %v341_v1, %v345_v2  ;;  %v348_v7 = vld [vmem:[%s14205_s27 + $0x440] sm:$0xff]  ;;  %v349_v10 = vld [vmem:[%s14205_s27 + $0x448] sm:$0xff] }
  0x3a   : > { %v352_v8 = vld [vmem:[%s14205_s27 + $0x460] sm:$0xff]  ;;  %v357_v18 = vld [vmem:[%s14205_s27 + $0x488] sm:$0xff] }
  0x3b   : > { %v14062_v9 = vld [vmem:[%s15996_s0] ss:$100 sps:$4 sm:$0xff]  }
  0x3c   : > { %9808 = vmatpush1.bf16.msra.mxu0 %v12296_v11  ;;  %10367 = vmatpush1.bf16.msra.mxu1 %v12298_v12  ;;  %v353_v11 = vld [vmem:[%s14205_s27 + $0x468] sm:$0xff]  ;;  %v12360_v12 = vcombine.low %v340_v63, %v344_v0  ;;  %v356_v15 = vld [vmem:[%s14205_s27 + $0x480] sm:$0xff] }
  0x3d   : > { %9809 = vmatprep.subr.bf16.mxu0 %v12305_v13  ;;  %10368 = vmatprep.subr.bf16.mxu1 %v12307_v14  ;;  %v12362_v13 = vcombine.low %v341_v1, %v345_v2  ;;  %v12369_v14 = vcombine.high %v348_v7, %v352_v8  ;;  %v360_v16 = vld [vmem:[%s14205_s27 + $0x4a0] sm:$0xff]  ;;  %v12371_v17 = vcombine.high %v349_v10, %v353_v11 }
  0x3e   : > { %v12377_v23 = vcombine.high %v356_v15, %v360_v16  ;;  %v364_v25 = vld [vmem:[%s14205_s27 + $0x4c0] sm:$0xff] }
  0x3f   : > { %v368_v26 = vld [vmem:[%s14205_s27 + $0x4e0] sm:$0xff] }
  0x40   : > { %9810 = vmatpush1.bf16.msra.mxu0 %v12304_v19  ;;  %10369 = vmatpush1.bf16.msra.mxu1 %v12306_v20  ;;  %v361_v19 = vld [vmem:[%s14205_s27 + $0x4a8] sm:$0xff]  ;;  %v12385_v31 = vcombine.high %v364_v25, %v368_v26  ;;  %v372_v33 = vld [vmem:[%s14205_s27 + $0x500] sm:$0xff] }
  0x41   : > { %9811 = vmatprep.subr.bf16.mxu0 %v12313_v21  ;;  %10370 = vmatprep.subr.bf16.mxu1 %v12315_v22  ;;  %v14063_v20 = vld [vmem:[%s15996_s0 + $0xc] ss:$100 sps:$4 sm:$0xff]   ;;  %v12368_v21 = vcombine.low %v348_v7, %v352_v8  ;;  %v12370_v22 = vcombine.low %v349_v10, %v353_v11  ;;  %v12379_v24 = vcombine.high %v357_v18, %v361_v19  ;;  %v376_v34 = vld [vmem:[%s14205_s27 + $0x520] sm:$0xff] }
  0x42   : > { %v12393_v39 = vcombine.high %v372_v33, %v376_v34  ;;  %v380_v41 = vld [vmem:[%s14205_s27 + $0x540] sm:$0xff]  ;;  %v413_v11 = vld [vmem:[%s14205_s27 + $0x648] sm:$0xff] }
  0x43   : > { %v384_v42 = vld [vmem:[%s14205_s27 + $0x560] sm:$0xff] }
  0x44   : > { %9812 = vmatpush1.bf16.msra.mxu0 %v12312_v27  ;;  %10371 = vmatpush1.bf16.msra.mxu1 %v12314_v28  ;;  %v365_v27 = vld [vmem:[%s14205_s27 + $0x4c8] sm:$0xff]  ;;  %v12401_v47 = vcombine.high %v380_v41, %v384_v42  ;;  %v388_v49 = vld [vmem:[%s14205_s27 + $0x580] sm:$0xff] }
  0x45   : > { %9813 = vmatprep.subr.bf16.mxu0 %v12321_v29  ;;  %10372 = vmatprep.subr.bf16.mxu1 %v12323_v30  ;;  %v369_v28 = vld [vmem:[%s14205_s27 + $0x4e8] sm:$0xff]  ;;  %v12376_v29 = vcombine.low %v356_v15, %v360_v16  ;;  %v12378_v30 = vcombine.low %v357_v18, %v361_v19  ;;  %v392_v50 = vld [vmem:[%s14205_s27 + $0x5a0] sm:$0xff] }
  0x46   : > { %v12387_v32 = vcombine.high %v365_v27, %v369_v28  ;;  %v12409_v55 = vcombine.high %v388_v49, %v392_v50  ;;  %v396_v57 = vld [vmem:[%s14205_s27 + $0x5c0] sm:$0xff]  ;;  %v421_v19 = vld [vmem:[%s14205_s27 + $0x688] sm:$0xff] }
  0x47   : > { %v400_v58 = vld [vmem:[%s14205_s27 + $0x5e0] sm:$0xff] }
  0x48   : > { %9814 = vmatpush1.bf16.msra.mxu0 %v12320_v35  ;;  %10373 = vmatpush1.bf16.msra.mxu1 %v12322_v36  ;;  %v373_v35 = vld [vmem:[%s14205_s27 + $0x508] sm:$0xff]  ;;  %v12417_v63 = vcombine.high %v396_v57, %v400_v58  ;;  %v404_v1 = vld [vmem:[%s14205_s27 + $0x600] sm:$0xff] }
  0x49   : > { %9815 = vmatprep.subr.bf16.mxu0 %v12329_v37  ;;  %10374 = vmatprep.subr.bf16.mxu1 %v12331_v38  ;;  %v377_v36 = vld [vmem:[%s14205_s27 + $0x528] sm:$0xff]  ;;  %v12384_v37 = vcombine.low %v364_v25, %v368_v26  ;;  %v12386_v38 = vcombine.low %v365_v27, %v369_v28  ;;  %v408_v2 = vld [vmem:[%s14205_s27 + $0x620] sm:$0xff] }
  0x4a   : > { %v12395_v40 = vcombine.high %v373_v35, %v377_v36  ;;  %v12425_v7 = vcombine.high %v404_v1, %v408_v2  ;;  %v416_v10 = vld [vmem:[%s14205_s27 + $0x660] sm:$0xff]  ;;  %v429_v27 = vld [vmem:[%s14205_s27 + $0x6c8] sm:$0xff] }
  0x4b   : > { %v424_v18 = vld [vmem:[%s14205_s27 + $0x6a0] sm:$0xff]  ;;  %v433_v28 = vld [vmem:[%s14205_s27 + $0x6e8] sm:$0xff] }
  0x4c   : > { %9816 = vmatpush1.bf16.msra.mxu0 %v12328_v43  ;;  %10375 = vmatpush1.bf16.msra.mxu1 %v12330_v44  ;;  %v381_v43 = vld [vmem:[%s14205_s27 + $0x548] sm:$0xff]  ;;  %v428_v25 = vld [vmem:[%s14205_s27 + $0x6c0] sm:$0xff] }
  0x4d   : > { %9817 = vmatprep.subr.bf16.mxu0 %v12337_v45  ;;  %10376 = vmatprep.subr.bf16.mxu1 %v12339_v46  ;;  %v385_v44 = vld [vmem:[%s14205_s27 + $0x568] sm:$0xff]  ;;  %v12392_v45 = vcombine.low %v372_v33, %v376_v34  ;;  %v12394_v46 = vcombine.low %v373_v35, %v377_v36  ;;  %v432_v26 = vld [vmem:[%s14205_s27 + $0x6e0] sm:$0xff] }
  0x4e   : > { %v12403_v48 = vcombine.high %v381_v43, %v385_v44  ;;  %v436_v33 = vld [vmem:[%s14205_s27 + $0x700] sm:$0xff]  ;;  %v437_v35 = vld [vmem:[%s14205_s27 + $0x708] sm:$0xff] }
  0x4f   : > { %v440_v34 = vld [vmem:[%s14205_s27 + $0x720] sm:$0xff]  ;;  %v441_v36 = vld [vmem:[%s14205_s27 + $0x728] sm:$0xff] }
  0x50   : > { %9818 = vmatpush1.bf16.msra.mxu0 %v12336_v51  ;;  %10377 = vmatpush1.bf16.msra.mxu1 %v12338_v52  ;;  %v389_v51 = vld [vmem:[%s14205_s27 + $0x588] sm:$0xff] }
  0x51   : > { %9819 = vmatprep.subr.bf16.mxu0 %v12345_v53  ;;  %10378 = vmatprep.subr.bf16.mxu1 %v12347_v54  ;;  %v393_v52 = vld [vmem:[%s14205_s27 + $0x5a8] sm:$0xff]  ;;  %v12400_v53 = vcombine.low %v380_v41, %v384_v42  ;;  %v12402_v54 = vcombine.low %v381_v43, %v385_v44  ;;  %v444_v41 = vld [vmem:[%s14205_s27 + $0x740] sm:$0xff] }
  0x52   : > { %v12411_v56 = vcombine.high %v389_v51, %v393_v52  ;;  %v448_v42 = vld [vmem:[%s14205_s27 + $0x760] sm:$0xff]  ;;  %v445_v43 = vld [vmem:[%s14205_s27 + $0x748] sm:$0xff] }
  0x53   : > { %v449_v44 = vld [vmem:[%s14205_s27 + $0x768] sm:$0xff] }
  0x54   : > { %9820 = vmatpush1.bf16.msra.mxu0 %v12344_v59  ;;  %10379 = vmatpush1.bf16.msra.mxu1 %v12346_v60  ;;  %v397_v59 = vld [vmem:[%s14205_s27 + $0x5c8] sm:$0xff] }
  0x55   : > { %9821 = vmatprep.subr.bf16.mxu0 %v12353_v61  ;;  %10380 = vmatprep.subr.bf16.mxu1 %v12355_v62  ;;  %v401_v60 = vld [vmem:[%s14205_s27 + $0x5e8] sm:$0xff]  ;;  %v12408_v61 = vcombine.low %v388_v49, %v392_v50  ;;  %v12410_v62 = vcombine.low %v389_v51, %v393_v52  ;;  %v452_v49 = vld [vmem:[%s14205_s27 + $0x780] sm:$0xff] }
  0x56   : > { %v12419_v0 = vcombine.high %v397_v59, %v401_v60  ;;  %v456_v50 = vld [vmem:[%s14205_s27 + $0x7a0] sm:$0xff]  ;;  %v453_v51 = vld [vmem:[%s14205_s27 + $0x788] sm:$0xff] }
  0x57   : > { %v457_v52 = vld [vmem:[%s14205_s27 + $0x7a8] sm:$0xff] }
  0x58   : > { %9822 = vmatpush1.bf16.msra.mxu0 %v12352_v3  ;;  %10381 = vmatpush1.bf16.msra.mxu1 %v12354_v4  ;;  %v405_v3 = vld [vmem:[%s14205_s27 + $0x608] sm:$0xff] }
  0x59   : > { %9834 = vmatprep.subr.bf16.mxu0 %v12361_v5  ;;  %10393 = vmatprep.subr.bf16.mxu1 %v12363_v6  ;;  %v409_v4 = vld [vmem:[%s14205_s27 + $0x628] sm:$0xff]  ;;  %v12416_v5 = vcombine.low %v396_v57, %v400_v58  ;;  %v12418_v6 = vcombine.low %v397_v59, %v401_v60  ;;  %v460_v57 = vld [vmem:[%s14205_s27 + $0x7c0] sm:$0xff] }
  0x5a   : > { %v12427_v8 = vcombine.high %v405_v3, %v409_v4  ;;  %v464_v58 = vld [vmem:[%s14205_s27 + $0x7e0] sm:$0xff]  ;;  %v461_v59 = vld [vmem:[%s14205_s27 + $0x7c8] sm:$0xff] }
  0x5b   : > { %9824 = vmatmul.mubr.bf16.vlgmr.msra.gmra.mrb[0].mxu0 %v14062_v9  ;;  %10383 = vmatmul.mubr.bf16.vlgmr.msra.gmra.mrb[0].mxu1 %v14062_v9  ;;  %v412_v9 = vld [vmem:[%s14205_s27 + $0x640] sm:$0xff]  ;;  %v465_v60 = vld [vmem:[%s14205_s27 + $0x7e8] sm:$0xff] }
  0x5c   : > { %9835 = vmatpush1.bf16.msra.mxu0 %v12360_v12  ;;  %10394 = vmatpush1.bf16.msra.mxu1 %v12362_v13  ;;  %v417_v12 = vld [vmem:[%s14205_s27 + $0x668] sm:$0xff]  ;;  %v12424_v13 = vcombine.low %v404_v1, %v408_v2  ;;  %v12433_v15 = vcombine.high %v412_v9, %v416_v10  ;;  %v468_v1 = vld [vmem:[%s14205_s27 + $0x800] sm:$0xff] }
  0x5d   : > { %9836 = vmatprep.subr.bf16.mxu0 %v12369_v14  ;;  %10395 = vmatprep.subr.bf16.mxu1 %v12371_v17  ;;  %v12426_v14 = vcombine.low %v405_v3, %v409_v4  ;;  %v12435_v16 = vcombine.high %v413_v11, %v417_v12  ;;  %v420_v17 = vld [vmem:[%s14205_s27 + $0x680] sm:$0xff]  ;;  %v469_v3 = vld [vmem:[%s14205_s27 + $0x808] sm:$0xff] }
  0x5e   : > { %9866 = vmatprep.mubr.bf16.mxu0 %v14063_v20  ;;  %10425 = vmatprep.mubr.bf16.mxu1 %v14063_v20  ;;  %v425_v20 = vld [vmem:[%s14205_s27 + $0x6a8] sm:$0xff]  ;;  %v472_v2 = vld [vmem:[%s14205_s27 + $0x820] sm:$0xff] }
  0x5f   : > { %v473_v4 = vld [vmem:[%s14205_s27 + $0x828] sm:$0xff] }
  0x60   : > { %9837 = vmatpush1.bf16.msra.mxu0 %v12368_v21  ;;  %10396 = vmatpush1.bf16.msra.mxu1 %v12370_v22  ;;  %v12432_v21 = vcombine.low %v412_v9, %v416_v10  ;;  %v12434_v22 = vcombine.low %v413_v11, %v417_v12  ;;  %v476_v9 = vld [vmem:[%s14205_s27 + $0x840] sm:$0xff]  ;;  %v14065_v11 = vld [vmem:[%s15996_s0 + $0x8] ss:$100 sps:$4 sm:$0xff]  }
  0x61   : > { %9838 = vmatprep.subr.bf16.mxu0 %v12377_v23  ;;  %10397 = vmatprep.subr.bf16.mxu1 %v12379_v24  ;;  %v12441_v23 = vcombine.high %v420_v17, %v424_v18  ;;  %v12443_v24 = vcombine.high %v421_v19, %v425_v20  ;;  %v480_v10 = vld [vmem:[%s14205_s27 + $0x860] sm:$0xff]  ;;  %v477_v12 = vld [vmem:[%s14205_s27 + $0x848] sm:$0xff] }
  0x64   : > { %9839 = vmatpush1.bf16.msra.mxu0 %v12376_v29  ;;  %10398 = vmatpush1.bf16.msra.mxu1 %v12378_v30  ;;  %v12440_v29 = vcombine.low %v420_v17, %v424_v18  ;;  %v12442_v30 = vcombine.low %v421_v19, %v425_v20  ;;  %v484_v18 = vld [vmem:[%s14205_s27 + $0x880] sm:$0xff]  ;;  %v14066_v20 = vld [vmem:[%s15996_s0 + $0x14] ss:$100 sps:$4 sm:$0xff]  }
  0x65   : > { %9840 = vmatprep.subr.bf16.mxu0 %v12385_v31  ;;  %10399 = vmatprep.subr.bf16.mxu1 %v12387_v32  ;;  %v12449_v31 = vcombine.high %v428_v25, %v432_v26  ;;  %v12451_v32 = vcombine.high %v429_v27, %v433_v28  ;;  %v488_v19 = vld [vmem:[%s14205_s27 + $0x8a0] sm:$0xff] }
  0x68   : > { %9841 = vmatpush1.bf16.msra.mxu0 %v12384_v37  ;;  %10400 = vmatpush1.bf16.msra.mxu1 %v12386_v38  ;;  %v12448_v37 = vcombine.low %v428_v25, %v432_v26  ;;  %v12450_v38 = vcombine.low %v429_v27, %v433_v28  ;;  %v12505_v25 = vcombine.high %v484_v18, %v488_v19  ;;  %v492_v27 = vld [vmem:[%s14205_s27 + $0x8c0] sm:$0xff] }
  0x69   : > { %9842 = vmatprep.subr.bf16.mxu0 %v12393_v39  ;;  %10401 = vmatprep.subr.bf16.mxu1 %v12395_v40  ;;  %v12457_v39 = vcombine.high %v436_v33, %v440_v34  ;;  %v12459_v40 = vcombine.high %v437_v35, %v441_v36  ;;  %v496_v28 = vld [vmem:[%s14205_s27 + $0x8e0] sm:$0xff] }
  0x6c   : > { %9843 = vmatpush1.bf16.msra.mxu0 %v12392_v45  ;;  %10402 = vmatpush1.bf16.msra.mxu1 %v12394_v46  ;;  %v12456_v45 = vcombine.low %v436_v33, %v440_v34  ;;  %v12458_v46 = vcombine.low %v437_v35, %v441_v36  ;;  %v12513_v33 = vcombine.high %v492_v27, %v496_v28  ;;  %v500_v35 = vld [vmem:[%s14205_s27 + $0x900] sm:$0xff] }
  0x6d   : > { %9844 = vmatprep.subr.bf16.mxu0 %v12401_v47  ;;  %10403 = vmatprep.subr.bf16.mxu1 %v12403_v48  ;;  %v12465_v47 = vcombine.high %v444_v41, %v448_v42  ;;  %v12467_v48 = vcombine.high %v445_v43, %v449_v44  ;;  %v504_v36 = vld [vmem:[%s14205_s27 + $0x920] sm:$0xff] }
  0x70   : > { %9845 = vmatpush1.bf16.msra.mxu0 %v12400_v53  ;;  %10404 = vmatpush1.bf16.msra.mxu1 %v12402_v54  ;;  %v12464_v53 = vcombine.low %v444_v41, %v448_v42  ;;  %v12466_v54 = vcombine.low %v445_v43, %v449_v44  ;;  %v12521_v41 = vcombine.high %v500_v35, %v504_v36  ;;  %v508_v43 = vld [vmem:[%s14205_s27 + $0x940] sm:$0xff] }
  0x71   : > { %9846 = vmatprep.subr.bf16.mxu0 %v12409_v55  ;;  %10405 = vmatprep.subr.bf16.mxu1 %v12411_v56  ;;  %v12473_v55 = vcombine.high %v452_v49, %v456_v50  ;;  %v12475_v56 = vcombine.high %v453_v51, %v457_v52  ;;  %v512_v44 = vld [vmem:[%s14205_s27 + $0x960] sm:$0xff] }
  0x74   : > { %9847 = vmatpush1.bf16.msra.mxu0 %v12408_v61  ;;  %10406 = vmatpush1.bf16.msra.mxu1 %v12410_v62  ;;  %v12472_v61 = vcombine.low %v452_v49, %v456_v50  ;;  %v12474_v62 = vcombine.low %v453_v51, %v457_v52  ;;  %v12529_v49 = vcombine.high %v508_v43, %v512_v44  ;;  %v516_v51 = vld [vmem:[%s14205_s27 + $0x980] sm:$0xff] }
  0x75   : > { %9848 = vmatprep.subr.bf16.mxu0 %v12417_v63  ;;  %10407 = vmatprep.subr.bf16.mxu1 %v12419_v0  ;;  %v12481_v63 = vcombine.high %v460_v57, %v464_v58  ;;  %v12483_v0 = vcombine.high %v461_v59, %v465_v60  ;;  %v520_v52 = vld [vmem:[%s14205_s27 + $0x9a0] sm:$0xff] }
  0x78   : > { %9849 = vmatpush1.bf16.msra.mxu0 %v12416_v5  ;;  %10408 = vmatpush1.bf16.msra.mxu1 %v12418_v6  ;;  %v12480_v5 = vcombine.low %v460_v57, %v464_v58  ;;  %v12482_v6 = vcombine.low %v461_v59, %v465_v60  ;;  %v12537_v57 = vcombine.high %v516_v51, %v520_v52  ;;  %v524_v59 = vld [vmem:[%s14205_s27 + $0x9c0] sm:$0xff] }
  0x79   : > { %9850 = vmatprep.subr.bf16.mxu0 %v12425_v7  ;;  %10409 = vmatprep.subr.bf16.mxu1 %v12427_v8  ;;  %v12489_v7 = vcombine.high %v468_v1, %v472_v2  ;;  %v12491_v8 = vcombine.high %v469_v3, %v473_v4  ;;  %v528_v60 = vld [vmem:[%s14205_s27 + $0x9e0] sm:$0xff] }
  0x7c   : > { %9851 = vmatpush1.bf16.msra.mxu0 %v12424_v13  ;;  %10410 = vmatpush1.bf16.msra.mxu1 %v12426_v14  ;;  %v481_v13 = vld [vmem:[%s14205_s27 + $0x868] sm:$0xff]  ;;  %v12488_v14 = vcombine.low %v468_v1, %v472_v2  ;;  %v12545_v1 = vcombine.high %v524_v59, %v528_v60 }
  0x7d   : > { %9852 = vmatprep.subr.bf16.mxu0 %v12433_v15  ;;  %10411 = vmatprep.subr.bf16.mxu1 %v12435_v16  ;;  %v12490_v15 = vcombine.low %v469_v3, %v473_v4  ;;  %v12497_v16 = vcombine.high %v476_v9, %v480_v10  ;;  %v12499_v17 = vcombine.high %v477_v12, %v481_v13  ;;  %v532_v3 = vld [vmem:[%s14205_s27 + $0xa00] sm:$0xff] }
  0x7e   : > { %v536_v4 = vld [vmem:[%s14205_s27 + $0xa20] sm:$0xff] }
  0x80   : > { %9853 = vmatpush1.bf16.msra.mxu0 %v12432_v21  ;;  %10412 = vmatpush1.bf16.msra.mxu1 %v12434_v22  ;;  %v485_v21 = vld [vmem:[%s14205_s27 + $0x888] sm:$0xff] }
  0x81   : > { %9854 = vmatprep.subr.bf16.mxu0 %v12441_v23  ;;  %10413 = vmatprep.subr.bf16.mxu1 %v12443_v24  ;;  %v489_v22 = vld [vmem:[%s14205_s27 + $0x8a8] sm:$0xff]  ;;  %v12496_v23 = vcombine.low %v476_v9, %v480_v10  ;;  %v12498_v24 = vcombine.low %v477_v12, %v481_v13  ;;  %v12553_v9 = vcombine.high %v532_v3, %v536_v4  ;;  %v544_v12 = vld [vmem:[%s14205_s27 + $0xa60] sm:$0xff] }
  0x82   : > { %v12507_v26 = vcombine.high %v485_v21, %v489_v22  ;;  %v541_v13 = vld [vmem:[%s14205_s27 + $0xa48] sm:$0xff] }
  0x84   : > { %9855 = vmatpush1.bf16.msra.mxu0 %v12440_v29  ;;  %10414 = vmatpush1.bf16.msra.mxu1 %v12442_v30  ;;  %v493_v29 = vld [vmem:[%s14205_s27 + $0x8c8] sm:$0xff] }
  0x85   : > { %9856 = vmatprep.subr.bf16.mxu0 %v12449_v31  ;;  %10415 = vmatprep.subr.bf16.mxu1 %v12451_v32  ;;  %v497_v30 = vld [vmem:[%s14205_s27 + $0x8e8] sm:$0xff]  ;;  %v12504_v31 = vcombine.low %v484_v18, %v488_v19  ;;  %v12506_v32 = vcombine.low %v485_v21, %v489_v22  ;;  %v548_v19 = vld [vmem:[%s14205_s27 + $0xa80] sm:$0xff] }
  0x86   : > { %v12515_v34 = vcombine.high %v493_v29, %v497_v30  ;;  %v549_v21 = vld [vmem:[%s14205_s27 + $0xa88] sm:$0xff] }
  0x87   : > { %v553_v22 = vld [vmem:[%s14205_s27 + $0xaa8] sm:$0xff] }
  0x88   : > { %9857 = vmatpush1.bf16.msra.mxu0 %v12448_v37  ;;  %10416 = vmatpush1.bf16.msra.mxu1 %v12450_v38  ;;  %v501_v37 = vld [vmem:[%s14205_s27 + $0x908] sm:$0xff] }
  0x89   : > { %9858 = vmatprep.subr.bf16.mxu0 %v12457_v39  ;;  %10417 = vmatprep.subr.bf16.mxu1 %v12459_v40  ;;  %v505_v38 = vld [vmem:[%s14205_s27 + $0x928] sm:$0xff]  ;;  %v12512_v39 = vcombine.low %v492_v27, %v496_v28  ;;  %v12514_v40 = vcombine.low %v493_v29, %v497_v30  ;;  %v556_v27 = vld [vmem:[%s14205_s27 + $0xac0] sm:$0xff] }
  0x8a   : > { %v12523_v42 = vcombine.high %v501_v37, %v505_v38  ;;  %v560_v28 = vld [vmem:[%s14205_s27 + $0xae0] sm:$0xff]  ;;  %v557_v29 = vld [vmem:[%s14205_s27 + $0xac8] sm:$0xff] }
  0x8b   : > { %v561_v30 = vld [vmem:[%s14205_s27 + $0xae8] sm:$0xff] }
  0x8c   : > { %9859 = vmatpush1.bf16.msra.mxu0 %v12456_v45  ;;  %10418 = vmatpush1.bf16.msra.mxu1 %v12458_v46  ;;  %v509_v45 = vld [vmem:[%s14205_s27 + $0x948] sm:$0xff] }
  0x8d   : > { %9860 = vmatprep.subr.bf16.mxu0 %v12465_v47  ;;  %10419 = vmatprep.subr.bf16.mxu1 %v12467_v48  ;;  %v513_v46 = vld [vmem:[%s14205_s27 + $0x968] sm:$0xff]  ;;  %v12520_v47 = vcombine.low %v500_v35, %v504_v36  ;;  %v12522_v48 = vcombine.low %v501_v37, %v505_v38  ;;  %v564_v35 = vld [vmem:[%s14205_s27 + $0xb00] sm:$0xff] }
  0x8e   : > { %v12531_v50 = vcombine.high %v509_v45, %v513_v46  ;;  %v568_v36 = vld [vmem:[%s14205_s27 + $0xb20] sm:$0xff]  ;;  %v565_v37 = vld [vmem:[%s14205_s27 + $0xb08] sm:$0xff] }
  0x8f   : > { %v569_v38 = vld [vmem:[%s14205_s27 + $0xb28] sm:$0xff] }
  0x90   : > { %9861 = vmatpush1.bf16.msra.mxu0 %v12464_v53  ;;  %10420 = vmatpush1.bf16.msra.mxu1 %v12466_v54  ;;  %v517_v53 = vld [vmem:[%s14205_s27 + $0x988] sm:$0xff] }
  0x91   : > { %9862 = vmatprep.subr.bf16.mxu0 %v12473_v55  ;;  %10421 = vmatprep.subr.bf16.mxu1 %v12475_v56  ;;  %v521_v54 = vld [vmem:[%s14205_s27 + $0x9a8] sm:$0xff]  ;;  %v12528_v55 = vcombine.low %v508_v43, %v512_v44  ;;  %v12530_v56 = vcombine.low %v509_v45, %v513_v46  ;;  %v572_v43 = vld [vmem:[%s14205_s27 + $0xb40] sm:$0xff] }
  0x92   : > { %v12539_v58 = vcombine.high %v517_v53, %v521_v54  ;;  %v576_v44 = vld [vmem:[%s14205_s27 + $0xb60] sm:$0xff]  ;;  %v573_v45 = vld [vmem:[%s14205_s27 + $0xb48] sm:$0xff] }
  0x93   : > { %v577_v46 = vld [vmem:[%s14205_s27 + $0xb68] sm:$0xff] }
  0x94   : > { %9863 = vmatpush1.bf16.msra.mxu0 %v12472_v61  ;;  %10422 = vmatpush1.bf16.msra.mxu1 %v12474_v62  ;;  %v525_v61 = vld [vmem:[%s14205_s27 + $0x9c8] sm:$0xff] }
  0x95   : > { %9864 = vmatprep.subr.bf16.mxu0 %v12481_v63  ;;  %10423 = vmatprep.subr.bf16.mxu1 %v12483_v0  ;;  %v529_v62 = vld [vmem:[%s14205_s27 + $0x9e8] sm:$0xff]  ;;  %v12536_v63 = vcombine.low %v516_v51, %v520_v52  ;;  %v12538_v0 = vcombine.low %v517_v53, %v521_v54  ;;  %v580_v51 = vld [vmem:[%s14205_s27 + $0xb80] sm:$0xff] }
  0x96   : > { %v12547_v2 = vcombine.high %v525_v61, %v529_v62  ;;  %v584_v52 = vld [vmem:[%s14205_s27 + $0xba0] sm:$0xff]  ;;  %v581_v53 = vld [vmem:[%s14205_s27 + $0xb88] sm:$0xff] }
  0x97   : > { %v585_v54 = vld [vmem:[%s14205_s27 + $0xba8] sm:$0xff] }
  0x98   : > { %9865 = vmatpush1.bf16.msra.mxu0 %v12480_v5  ;;  %10424 = vmatpush1.bf16.msra.mxu1 %v12482_v6  ;;  %v533_v5 = vld [vmem:[%s14205_s27 + $0xa08] sm:$0xff] }
  0x99   : > { %9877 = vmatprep.subr.bf16.mxu0 %v12489_v7  ;;  %10436 = vmatprep.subr.bf16.mxu1 %v12491_v8  ;;  %v537_v6 = vld [vmem:[%s14205_s27 + $0xa28] sm:$0xff]  ;;  %v12544_v7 = vcombine.low %v524_v59, %v528_v60  ;;  %v12546_v8 = vcombine.low %v525_v61, %v529_v62  ;;  %v588_v59 = vld [vmem:[%s14205_s27 + $0xbc0] sm:$0xff] }
  0x9a   : > { %v12555_v10 = vcombine.high %v533_v5, %v537_v6  ;;  %v592_v60 = vld [vmem:[%s14205_s27 + $0xbe0] sm:$0xff]  ;;  %v589_v61 = vld [vmem:[%s14205_s27 + $0xbc8] sm:$0xff] }
  0x9b   : > { %9867 = vmatmul.mubr.bf16.vlgmr.msra.gmra.mrb[0].mxu0 %v14065_v11  ;;  %10426 = vmatmul.mubr.bf16.vlgmr.msra.gmra.mrb[0].mxu1 %v14065_v11  ;;  %v540_v11 = vld [vmem:[%s14205_s27 + $0xa40] sm:$0xff]  ;;  %v593_v62 = vld [vmem:[%s14205_s27 + $0xbe8] sm:$0xff] }
  0x9c   : > { %9878 = vmatpush1.bf16.msra.mxu0 %v12488_v14  ;;  %10437 = vmatpush1.bf16.msra.mxu1 %v12490_v15  ;;  %v545_v14 = vld [vmem:[%s14205_s27 + $0xa68] sm:$0xff]  ;;  %v12552_v15 = vcombine.low %v532_v3, %v536_v4  ;;  %v596_v3 = vld [vmem:[%s14205_s27 + $0xc00] sm:$0xff] }
  0x9d   : > { %9879 = vmatprep.subr.bf16.mxu0 %v12497_v16  ;;  %10438 = vmatprep.subr.bf16.mxu1 %v12499_v17  ;;  %v12554_v16 = vcombine.low %v533_v5, %v537_v6  ;;  %v12561_v17 = vcombine.high %v540_v11, %v544_v12  ;;  %v12563_v18 = vcombine.high %v541_v13, %v545_v14  ;;  %v600_v4 = vld [vmem:[%s14205_s27 + $0xc20] sm:$0xff]  ;;  %v597_v5 = vld [vmem:[%s14205_s27 + $0xc08] sm:$0xff] }
  0x9e   : > { %9909 = vmatprep.mubr.bf16.mxu0 %v14066_v20  ;;  %10468 = vmatprep.mubr.bf16.mxu1 %v14066_v20  ;;  %v552_v20 = vld [vmem:[%s14205_s27 + $0xaa0] sm:$0xff]  ;;  %v601_v6 = vld [vmem:[%s14205_s27 + $0xc28] sm:$0xff] }
  0xa0   : > { %9880 = vmatpush1.bf16.msra.mxu0 %v12496_v23  ;;  %10439 = vmatpush1.bf16.msra.mxu1 %v12498_v24  ;;  %v12560_v23 = vcombine.low %v540_v11, %v544_v12  ;;  %v12562_v24 = vcombine.low %v541_v13, %v545_v14  ;;  %v604_v11 = vld [vmem:[%s14205_s27 + $0xc40] sm:$0xff]  ;;  %v14068_v13 = vld [vmem:[%s15996_s0 + $0x10] ss:$100 sps:$4 sm:$0xff]   ;;  %v605_v14 = vld [vmem:[%s14205_s27 + $0xc48] sm:$0xff] }
  0xa1   : > { %9881 = vmatprep.subr.bf16.mxu0 %v12505_v25  ;;  %10440 = vmatprep.subr.bf16.mxu1 %v12507_v26  ;;  %v12569_v25 = vcombine.high %v548_v19, %v552_v20  ;;  %v12571_v26 = vcombine.high %v549_v21, %v553_v22  ;;  %v608_v12 = vld [vmem:[%s14205_s27 + $0xc60] sm:$0xff] }
  0xa4   : > { %9882 = vmatpush1.bf16.msra.mxu0 %v12504_v31  ;;  %10441 = vmatpush1.bf16.msra.mxu1 %v12506_v32  ;;  %v12568_v31 = vcombine.low %v548_v19, %v552_v20  ;;  %v12570_v32 = vcombine.low %v549_v21, %v553_v22  ;;  %v612_v20 = vld [vmem:[%s14205_s27 + $0xc80] sm:$0xff] }
  0xa5   : > { %9883 = vmatprep.subr.bf16.mxu0 %v12513_v33  ;;  %10442 = vmatprep.subr.bf16.mxu1 %v12515_v34  ;;  %v12577_v33 = vcombine.high %v556_v27, %v560_v28  ;;  %v12579_v34 = vcombine.high %v557_v29, %v561_v30  ;;  %v616_v21 = vld [vmem:[%s14205_s27 + $0xca0] sm:$0xff] }
  0xa6   : > { %v14069_v22 = vld [vmem:[%s15996_s0 + $0x1c] ss:$100 sps:$4 sm:$0xff]  }
  0xa8   : > { %9884 = vmatpush1.bf16.msra.mxu0 %v12512_v39  ;;  %10443 = vmatpush1.bf16.msra.mxu1 %v12514_v40  ;;  %v12576_v39 = vcombine.low %v556_v27, %v560_v28  ;;  %v12578_v40 = vcombine.low %v557_v29, %v561_v30  ;;  %v12633_v27 = vcombine.high %v612_v20, %v616_v21  ;;  %v620_v29 = vld [vmem:[%s14205_s27 + $0xcc0] sm:$0xff] }
  0xa9   : > { %9885 = vmatprep.subr.bf16.mxu0 %v12521_v41  ;;  %10444 = vmatprep.subr.bf16.mxu1 %v12523_v42  ;;  %v12585_v41 = vcombine.high %v564_v35, %v568_v36  ;;  %v12587_v42 = vcombine.high %v565_v37, %v569_v38  ;;  %v624_v30 = vld [vmem:[%s14205_s27 + $0xce0] sm:$0xff] }
  0xac   : > { %9886 = vmatpush1.bf16.msra.mxu0 %v12520_v47  ;;  %10445 = vmatpush1.bf16.msra.mxu1 %v12522_v48  ;;  %v12584_v47 = vcombine.low %v564_v35, %v568_v36  ;;  %v12586_v48 = vcombine.low %v565_v37, %v569_v38  ;;  %v12641_v35 = vcombine.high %v620_v29, %v624_v30  ;;  %v628_v37 = vld [vmem:[%s14205_s27 + $0xd00] sm:$0xff] }
  0xad   : > { %9887 = vmatprep.subr.bf16.mxu0 %v12529_v49  ;;  %10446 = vmatprep.subr.bf16.mxu1 %v12531_v50  ;;  %v12593_v49 = vcombine.high %v572_v43, %v576_v44  ;;  %v12595_v50 = vcombine.high %v573_v45, %v577_v46  ;;  %v632_v38 = vld [vmem:[%s14205_s27 + $0xd20] sm:$0xff] }
  0xb0   : > { %9888 = vmatpush1.bf16.msra.mxu0 %v12528_v55  ;;  %10447 = vmatpush1.bf16.msra.mxu1 %v12530_v56  ;;  %v12592_v55 = vcombine.low %v572_v43, %v576_v44  ;;  %v12594_v56 = vcombine.low %v573_v45, %v577_v46  ;;  %v12649_v43 = vcombine.high %v628_v37, %v632_v38  ;;  %v636_v45 = vld [vmem:[%s14205_s27 + $0xd40] sm:$0xff] }
  0xb1   : > { %9889 = vmatprep.subr.bf16.mxu0 %v12537_v57  ;;  %10448 = vmatprep.subr.bf16.mxu1 %v12539_v58  ;;  %v12601_v57 = vcombine.high %v580_v51, %v584_v52  ;;  %v12603_v58 = vcombine.high %v581_v53, %v585_v54  ;;  %v640_v46 = vld [vmem:[%s14205_s27 + $0xd60] sm:$0xff] }
  0xb4   : > { %9890 = vmatpush1.bf16.msra.mxu0 %v12536_v63  ;;  %10449 = vmatpush1.bf16.msra.mxu1 %v12538_v0  ;;  %v12600_v63 = vcombine.low %v580_v51, %v584_v52  ;;  %v12602_v0 = vcombine.low %v581_v53, %v585_v54  ;;  %v12657_v51 = vcombine.high %v636_v45, %v640_v46  ;;  %v644_v53 = vld [vmem:[%s14205_s27 + $0xd80] sm:$0xff] }
  0xb5   : > { %9891 = vmatprep.subr.bf16.mxu0 %v12545_v1  ;;  %10450 = vmatprep.subr.bf16.mxu1 %v12547_v2  ;;  %v12609_v1 = vcombine.high %v588_v59, %v592_v60  ;;  %v12611_v2 = vcombine.high %v589_v61, %v593_v62  ;;  %v648_v54 = vld [vmem:[%s14205_s27 + $0xda0] sm:$0xff] }
  0xb8   : > { %9892 = vmatpush1.bf16.msra.mxu0 %v12544_v7  ;;  %10451 = vmatpush1.bf16.msra.mxu1 %v12546_v8  ;;  %v12608_v7 = vcombine.low %v588_v59, %v592_v60  ;;  %v12610_v8 = vcombine.low %v589_v61, %v593_v62  ;;  %v12665_v59 = vcombine.high %v644_v53, %v648_v54  ;;  %v652_v61 = vld [vmem:[%s14205_s27 + $0xdc0] sm:$0xff] }
  0xb9   : > { %9893 = vmatprep.subr.bf16.mxu0 %v12553_v9  ;;  %10452 = vmatprep.subr.bf16.mxu1 %v12555_v10  ;;  %v12617_v9 = vcombine.high %v596_v3, %v600_v4  ;;  %v12619_v10 = vcombine.high %v597_v5, %v601_v6  ;;  %v656_v62 = vld [vmem:[%s14205_s27 + $0xde0] sm:$0xff] }
  0xbc   : > { %9894 = vmatpush1.bf16.msra.mxu0 %v12552_v15  ;;  %10453 = vmatpush1.bf16.msra.mxu1 %v12554_v16  ;;  %v609_v15 = vld [vmem:[%s14205_s27 + $0xc68] sm:$0xff]  ;;  %v12616_v16 = vcombine.low %v596_v3, %v600_v4  ;;  %v12673_v3 = vcombine.high %v652_v61, %v656_v62 }
  0xbd   : > { %9895 = vmatprep.subr.bf16.mxu0 %v12561_v17  ;;  %10454 = vmatprep.subr.bf16.mxu1 %v12563_v18  ;;  %v12618_v17 = vcombine.low %v597_v5, %v601_v6  ;;  %v12625_v18 = vcombine.high %v604_v11, %v608_v12  ;;  %v12627_v19 = vcombine.high %v605_v14, %v609_v15  ;;  %v660_v5 = vld [vmem:[%s14205_s27 + $0xe00] sm:$0xff] }
  0xbe   : > { %v664_v6 = vld [vmem:[%s14205_s27 + $0xe20] sm:$0xff] }
  0xc0   : > { %9896 = vmatpush1.bf16.msra.mxu0 %v12560_v23  ;;  %10455 = vmatpush1.bf16.msra.mxu1 %v12562_v24  ;;  %v613_v23 = vld [vmem:[%s14205_s27 + $0xc88] sm:$0xff] }
  0xc1   : > { %9897 = vmatprep.subr.bf16.mxu0 %v12569_v25  ;;  %10456 = vmatprep.subr.bf16.mxu1 %v12571_v26  ;;  %v617_v24 = vld [vmem:[%s14205_s27 + $0xca8] sm:$0xff]  ;;  %v12624_v25 = vcombine.low %v604_v11, %v608_v12  ;;  %v12626_v26 = vcombine.low %v605_v14, %v609_v15  ;;  %v12681_v11 = vcombine.high %v660_v5, %v664_v6  ;;  %v672_v14 = vld [vmem:[%s14205_s27 + $0xe60] sm:$0xff] }
  0xc2   : > { %v12635_v28 = vcombine.high %v613_v23, %v617_v24  ;;  %v669_v15 = vld [vmem:[%s14205_s27 + $0xe48] sm:$0xff] }
  0xc4   : > { %9898 = vmatpush1.bf16.msra.mxu0 %v12568_v31  ;;  %10457 = vmatpush1.bf16.msra.mxu1 %v12570_v32  ;;  %v621_v31 = vld [vmem:[%s14205_s27 + $0xcc8] sm:$0xff] }
  0xc5   : > { %9899 = vmatprep.subr.bf16.mxu0 %v12577_v33  ;;  %10458 = vmatprep.subr.bf16.mxu1 %v12579_v34  ;;  %v625_v32 = vld [vmem:[%s14205_s27 + $0xce8] sm:$0xff]  ;;  %v12632_v33 = vcombine.low %v612_v20, %v616_v21  ;;  %v12634_v34 = vcombine.low %v613_v23, %v617_v24  ;;  %v676_v21 = vld [vmem:[%s14205_s27 + $0xe80] sm:$0xff] }
  0xc6   : > { %v12643_v36 = vcombine.high %v621_v31, %v625_v32  ;;  %v677_v23 = vld [vmem:[%s14205_s27 + $0xe88] sm:$0xff] }
  0xc7   : > { %v681_v24 = vld [vmem:[%s14205_s27 + $0xea8] sm:$0xff] }
  0xc8   : > { %9900 = vmatpush1.bf16.msra.mxu0 %v12576_v39  ;;  %10459 = vmatpush1.bf16.msra.mxu1 %v12578_v40  ;;  %v629_v39 = vld [vmem:[%s14205_s27 + $0xd08] sm:$0xff] }
  0xc9   : > { %9901 = vmatprep.subr.bf16.mxu0 %v12585_v41  ;;  %10460 = vmatprep.subr.bf16.mxu1 %v12587_v42  ;;  %v633_v40 = vld [vmem:[%s14205_s27 + $0xd28] sm:$0xff]  ;;  %v12640_v41 = vcombine.low %v620_v29, %v624_v30  ;;  %v12642_v42 = vcombine.low %v621_v31, %v625_v32  ;;  %v684_v29 = vld [vmem:[%s14205_s27 + $0xec0] sm:$0xff] }
  0xca   : > { %v12651_v44 = vcombine.high %v629_v39, %v633_v40  ;;  %v688_v30 = vld [vmem:[%s14205_s27 + $0xee0] sm:$0xff]  ;;  %v685_v31 = vld [vmem:[%s14205_s27 + $0xec8] sm:$0xff] }
  0xcb   : > { %v689_v32 = vld [vmem:[%s14205_s27 + $0xee8] sm:$0xff] }
  0xcc   : > { %9902 = vmatpush1.bf16.msra.mxu0 %v12584_v47  ;;  %10461 = vmatpush1.bf16.msra.mxu1 %v12586_v48  ;;  %v637_v47 = vld [vmem:[%s14205_s27 + $0xd48] sm:$0xff] }
  0xcd   : > { %9903 = vmatprep.subr.bf16.mxu0 %v12593_v49  ;;  %10462 = vmatprep.subr.bf16.mxu1 %v12595_v50  ;;  %v641_v48 = vld [vmem:[%s14205_s27 + $0xd68] sm:$0xff]  ;;  %v12648_v49 = vcombine.low %v628_v37, %v632_v38  ;;  %v12650_v50 = vcombine.low %v629_v39, %v633_v40  ;;  %v692_v37 = vld [vmem:[%s14205_s27 + $0xf00] sm:$0xff] }
  0xce   : > { %v12659_v52 = vcombine.high %v637_v47, %v641_v48  ;;  %v696_v38 = vld [vmem:[%s14205_s27 + $0xf20] sm:$0xff]  ;;  %v693_v39 = vld [vmem:[%s14205_s27 + $0xf08] sm:$0xff] }
  0xcf   : > { %v697_v40 = vld [vmem:[%s14205_s27 + $0xf28] sm:$0xff] }
  0xd0   : > { %9904 = vmatpush1.bf16.msra.mxu0 %v12592_v55  ;;  %10463 = vmatpush1.bf16.msra.mxu1 %v12594_v56  ;;  %v645_v55 = vld [vmem:[%s14205_s27 + $0xd88] sm:$0xff] }
  0xd1   : > { %9905 = vmatprep.subr.bf16.mxu0 %v12601_v57  ;;  %10464 = vmatprep.subr.bf16.mxu1 %v12603_v58  ;;  %v649_v56 = vld [vmem:[%s14205_s27 + $0xda8] sm:$0xff]  ;;  %v12656_v57 = vcombine.low %v636_v45, %v640_v46  ;;  %v12658_v58 = vcombine.low %v637_v47, %v641_v48  ;;  %v700_v45 = vld [vmem:[%s14205_s27 + $0xf40] sm:$0xff] }
  0xd2   : > { %v12667_v60 = vcombine.high %v645_v55, %v649_v56  ;;  %v704_v46 = vld [vmem:[%s14205_s27 + $0xf60] sm:$0xff]  ;;  %v701_v47 = vld [vmem:[%s14205_s27 + $0xf48] sm:$0xff] }
  0xd3   : > { %v705_v48 = vld [vmem:[%s14205_s27 + $0xf68] sm:$0xff] }
  0xd4   : > { %9906 = vmatpush1.bf16.msra.mxu0 %v12600_v63  ;;  %10465 = vmatpush1.bf16.msra.mxu1 %v12602_v0  ;;  %v653_v63 = vld [vmem:[%s14205_s27 + $0xdc8] sm:$0xff] }
  0xd5   : > { %9907 = vmatprep.subr.bf16.mxu0 %v12609_v1  ;;  %10466 = vmatprep.subr.bf16.mxu1 %v12611_v2  ;;  %v657_v0 = vld [vmem:[%s14205_s27 + $0xde8] sm:$0xff]  ;;  %v12664_v1 = vcombine.low %v644_v53, %v648_v54  ;;  %v12666_v2 = vcombine.low %v645_v55, %v649_v56  ;;  %v708_v53 = vld [vmem:[%s14205_s27 + $0xf80] sm:$0xff] }
  0xd6   : > { %v12675_v4 = vcombine.high %v653_v63, %v657_v0  ;;  %v712_v54 = vld [vmem:[%s14205_s27 + $0xfa0] sm:$0xff]  ;;  %v709_v55 = vld [vmem:[%s14205_s27 + $0xf88] sm:$0xff] }
  0xd7   : > { %v713_v56 = vld [vmem:[%s14205_s27 + $0xfa8] sm:$0xff] }
  0xd8   : > { %9908 = vmatpush1.bf16.msra.mxu0 %v12608_v7  ;;  %10467 = vmatpush1.bf16.msra.mxu1 %v12610_v8  ;;  %v661_v7 = vld [vmem:[%s14205_s27 + $0xe08] sm:$0xff] }
  0xd9   : > { %9920 = vmatprep.subr.bf16.mxu0 %v12617_v9  ;;  %10479 = vmatprep.subr.bf16.mxu1 %v12619_v10  ;;  %v665_v8 = vld [vmem:[%s14205_s27 + $0xe28] sm:$0xff]  ;;  %v12672_v9 = vcombine.low %v652_v61, %v656_v62  ;;  %v12674_v10 = vcombine.low %v653_v63, %v657_v0  ;;  %v716_v61 = vld [vmem:[%s14205_s27 + $0xfc0] sm:$0xff] }
  0xda   : > { %v12683_v12 = vcombine.high %v661_v7, %v665_v8  ;;  %v720_v62 = vld [vmem:[%s14205_s27 + $0xfe0] sm:$0xff]  ;;  %v717_v63 = vld [vmem:[%s14205_s27 + $0xfc8] sm:$0xff] }
  0xdb   : > { %9910 = vmatmul.mubr.bf16.vlgmr.msra.gmra.mrb[0].mxu0 %v14068_v13  ;;  %10469 = vmatmul.mubr.bf16.vlgmr.msra.gmra.mrb[0].mxu1 %v14068_v13  ;;  %v668_v13 = vld [vmem:[%s14205_s27 + $0xe40] sm:$0xff]  ;;  %v721_v0 = vld [vmem:[%s14205_s27 + $0xfe8] sm:$0xff] }
  0xdc   : > { %9921 = vmatpush1.bf16.msra.mxu0 %v12616_v16  ;;  %10480 = vmatpush1.bf16.msra.mxu1 %v12618_v17  ;;  %v673_v16 = vld [vmem:[%s14205_s27 + $0xe68] sm:$0xff]  ;;  %v12680_v17 = vcombine.low %v660_v5, %v664_v6  ;;  %v724_v5 = vld [vmem:[%s14205_s27 + $0x1000] sm:$0xff] }
  0xdd   : > { %9922 = vmatprep.subr.bf16.mxu0 %v12625_v18  ;;  %10481 = vmatprep.subr.bf16.mxu1 %v12627_v19  ;;  %v12682_v18 = vcombine.low %v661_v7, %v665_v8  ;;  %v12689_v19 = vcombine.high %v668_v13, %v672_v14  ;;  %v12691_v20 = vcombine.high %v669_v15, %v673_v16  ;;  %v728_v6 = vld [vmem:[%s14205_s27 + $0x1020] sm:$0xff]  ;;  %v725_v7 = vld [vmem:[%s14205_s27 + $0x1008] sm:$0xff] }
  0xde   : > { %9952 = vmatprep.mubr.bf16.mxu0 %v14069_v22  ;;  %10511 = vmatprep.mubr.bf16.mxu1 %v14069_v22  ;;  %v680_v22 = vld [vmem:[%s14205_s27 + $0xea0] sm:$0xff]  ;;  %v729_v8 = vld [vmem:[%s14205_s27 + $0x1028] sm:$0xff] }
  0xe0   : > { %9923 = vmatpush1.bf16.msra.mxu0 %v12624_v25  ;;  %10482 = vmatpush1.bf16.msra.mxu1 %v12626_v26  ;;  %v12688_v25 = vcombine.low %v668_v13, %v672_v14  ;;  %v12690_v26 = vcombine.low %v669_v15, %v673_v16  ;;  %v732_v13 = vld [vmem:[%s14205_s27 + $0x1040] sm:$0xff]  ;;  %v14071_v15 = vld [vmem:[%s15996_s0 + $0x18] ss:$100 sps:$4 sm:$0xff]   ;;  %v733_v16 = vld [vmem:[%s14205_s27 + $0x1048] sm:$0xff] }
  0xe1   : > { %9924 = vmatprep.subr.bf16.mxu0 %v12633_v27  ;;  %10483 = vmatprep.subr.bf16.mxu1 %v12635_v28  ;;  %v12697_v27 = vcombine.high %v676_v21, %v680_v22  ;;  %v12699_v28 = vcombine.high %v677_v23, %v681_v24  ;;  %v736_v14 = vld [vmem:[%s14205_s27 + $0x1060] sm:$0xff] }
  0xe4   : > { %9925 = vmatpush1.bf16.msra.mxu0 %v12632_v33  ;;  %10484 = vmatpush1.bf16.msra.mxu1 %v12634_v34  ;;  %v12696_v33 = vcombine.low %v676_v21, %v680_v22  ;;  %v12698_v34 = vcombine.low %v677_v23, %v681_v24  ;;  %v740_v22 = vld [vmem:[%s14205_s27 + $0x1080] sm:$0xff] }
  0xe5   : > { %9926 = vmatprep.subr.bf16.mxu0 %v12641_v35  ;;  %10485 = vmatprep.subr.bf16.mxu1 %v12643_v36  ;;  %v12705_v35 = vcombine.high %v684_v29, %v688_v30  ;;  %v12707_v36 = vcombine.high %v685_v31, %v689_v32  ;;  %v744_v23 = vld [vmem:[%s14205_s27 + $0x10a0] sm:$0xff] }
  0xe6   : > { %v14072_v24 = vld [vmem:[%s15996_s0 + $0x24] ss:$100 sps:$4 sm:$0xff]  }
  0xe8   : > { %9927 = vmatpush1.bf16.msra.mxu0 %v12640_v41  ;;  %10486 = vmatpush1.bf16.msra.mxu1 %v12642_v42  ;;  %v12704_v41 = vcombine.low %v684_v29, %v688_v30  ;;  %v12706_v42 = vcombine.low %v685_v31, %v689_v32  ;;  %v12761_v29 = vcombine.high %v740_v22, %v744_v23  ;;  %v748_v31 = vld [vmem:[%s14205_s27 + $0x10c0] sm:$0xff] }
  0xe9   : > { %9928 = vmatprep.subr.bf16.mxu0 %v12649_v43  ;;  %10487 = vmatprep.subr.bf16.mxu1 %v12651_v44  ;;  %v12713_v43 = vcombine.high %v692_v37, %v696_v38  ;;  %v12715_v44 = vcombine.high %v693_v39, %v697_v40  ;;  %v752_v32 = vld [vmem:[%s14205_s27 + $0x10e0] sm:$0xff] }
  0xec   : > { %9929 = vmatpush1.bf16.msra.mxu0 %v12648_v49  ;;  %10488 = vmatpush1.bf16.msra.mxu1 %v12650_v50  ;;  %v12712_v49 = vcombine.low %v692_v37, %v696_v38  ;;  %v12714_v50 = vcombine.low %v693_v39, %v697_v40  ;;  %v12769_v37 = vcombine.high %v748_v31, %v752_v32  ;;  %v756_v39 = vld [vmem:[%s14205_s27 + $0x1100] sm:$0xff] }
  0xed   : > { %9930 = vmatprep.subr.bf16.mxu0 %v12657_v51  ;;  %10489 = vmatprep.subr.bf16.mxu1 %v12659_v52  ;;  %v12721_v51 = vcombine.high %v700_v45, %v704_v46  ;;  %v12723_v52 = vcombine.high %v701_v47, %v705_v48  ;;  %v760_v40 = vld [vmem:[%s14205_s27 + $0x1120] sm:$0xff] }
  0xf0   : > { %9931 = vmatpush1.bf16.msra.mxu0 %v12656_v57  ;;  %10490 = vmatpush1.bf16.msra.mxu1 %v12658_v58  ;;  %v12720_v57 = vcombine.low %v700_v45, %v704_v46  ;;  %v12722_v58 = vcombine.low %v701_v47, %v705_v48  ;;  %v12777_v45 = vcombine.high %v756_v39, %v760_v40  ;;  %v764_v47 = vld [vmem:[%s14205_s27 + $0x1140] sm:$0xff] }
  0xf1   : > { %9932 = vmatprep.subr.bf16.mxu0 %v12665_v59  ;;  %10491 = vmatprep.subr.bf16.mxu1 %v12667_v60  ;;  %v12729_v59 = vcombine.high %v708_v53, %v712_v54  ;;  %v12731_v60 = vcombine.high %v709_v55, %v713_v56  ;;  %v768_v48 = vld [vmem:[%s14205_s27 + $0x1160] sm:$0xff] }
  0xf4   : > { %9933 = vmatpush1.bf16.msra.mxu0 %v12664_v1  ;;  %10492 = vmatpush1.bf16.msra.mxu1 %v12666_v2  ;;  %v12728_v1 = vcombine.low %v708_v53, %v712_v54  ;;  %v12730_v2 = vcombine.low %v709_v55, %v713_v56  ;;  %v12785_v53 = vcombine.high %v764_v47, %v768_v48  ;;  %v772_v55 = vld [vmem:[%s14205_s27 + $0x1180] sm:$0xff] }
  0xf5   : > { %9934 = vmatprep.subr.bf16.mxu0 %v12673_v3  ;;  %10493 = vmatprep.subr.bf16.mxu1 %v12675_v4  ;;  %v12737_v3 = vcombine.high %v716_v61, %v720_v62  ;;  %v12739_v4 = vcombine.high %v717_v63, %v721_v0  ;;  %v776_v56 = vld [vmem:[%s14205_s27 + $0x11a0] sm:$0xff] }
  0xf8   : > { %9935 = vmatpush1.bf16.msra.mxu0 %v12672_v9  ;;  %10494 = vmatpush1.bf16.msra.mxu1 %v12674_v10  ;;  %v12736_v9 = vcombine.low %v716_v61, %v720_v62  ;;  %v12738_v10 = vcombine.low %v717_v63, %v721_v0  ;;  %v12793_v61 = vcombine.high %v772_v55, %v776_v56  ;;  %v780_v63 = vld [vmem:[%s14205_s27 + $0x11c0] sm:$0xff] }
  0xf9   : > { %9936 = vmatprep.subr.bf16.mxu0 %v12681_v11  ;;  %10495 = vmatprep.subr.bf16.mxu1 %v12683_v12  ;;  %v12745_v11 = vcombine.high %v724_v5, %v728_v6  ;;  %v12747_v12 = vcombine.high %v725_v7, %v729_v8  ;;  %v784_v0 = vld [vmem:[%s14205_s27 + $0x11e0] sm:$0xff] }
  0xfc   : > { %9937 = vmatpush1.bf16.msra.mxu0 %v12680_v17  ;;  %10496 = vmatpush1.bf16.msra.mxu1 %v12682_v18  ;;  %v737_v17 = vld [vmem:[%s14205_s27 + $0x1068] sm:$0xff]  ;;  %v12744_v18 = vcombine.low %v724_v5, %v728_v6  ;;  %v12801_v5 = vcombine.high %v780_v63, %v784_v0 }
  0xfd   : > { %9938 = vmatprep.subr.bf16.mxu0 %v12689_v19  ;;  %10497 = vmatprep.subr.bf16.mxu1 %v12691_v20  ;;  %v12746_v19 = vcombine.low %v725_v7, %v729_v8  ;;  %v12753_v20 = vcombine.high %v732_v13, %v736_v14  ;;  %v12755_v21 = vcombine.high %v733_v16, %v737_v17  ;;  %v788_v7 = vld [vmem:[%s14205_s27 + $0x1200] sm:$0xff] }
  0xfe   : > { %v792_v8 = vld [vmem:[%s14205_s27 + $0x1220] sm:$0xff] }
 0x100   : > { %9939 = vmatpush1.bf16.msra.mxu0 %v12688_v25  ;;  %10498 = vmatpush1.bf16.msra.mxu1 %v12690_v26  ;;  %v741_v25 = vld [vmem:[%s14205_s27 + $0x1088] sm:$0xff] }
 0x101   : > { %9940 = vmatprep.subr.bf16.mxu0 %v12697_v27  ;;  %10499 = vmatprep.subr.bf16.mxu1 %v12699_v28  ;;  %v745_v26 = vld [vmem:[%s14205_s27 + $0x10a8] sm:$0xff]  ;;  %v12752_v27 = vcombine.low %v732_v13, %v736_v14  ;;  %v12754_v28 = vcombine.low %v733_v16, %v737_v17  ;;  %v12809_v13 = vcombine.high %v788_v7, %v792_v8  ;;  %v800_v16 = vld [vmem:[%s14205_s27 + $0x1260] sm:$0xff] }
 0x102   : > { %v12763_v30 = vcombine.high %v741_v25, %v745_v26  ;;  %v797_v17 = vld [vmem:[%s14205_s27 + $0x1248] sm:$0xff] }
 0x104   : > { %9941 = vmatpush1.bf16.msra.mxu0 %v12696_v33  ;;  %10500 = vmatpush1.bf16.msra.mxu1 %v12698_v34  ;;  %v749_v33 = vld [vmem:[%s14205_s27 + $0x10c8] sm:$0xff] }
 0x105   : > { %9942 = vmatprep.subr.bf16.mxu0 %v12705_v35  ;;  %10501 = vmatprep.subr.bf16.mxu1 %v12707_v36  ;;  %v753_v34 = vld [vmem:[%s14205_s27 + $0x10e8] sm:$0xff]  ;;  %v12760_v35 = vcombine.low %v740_v22, %v744_v23  ;;  %v12762_v36 = vcombine.low %v741_v25, %v745_v26  ;;  %v804_v23 = vld [vmem:[%s14205_s27 + $0x1280] sm:$0xff] }
 0x106   : > { %v12771_v38 = vcombine.high %v749_v33, %v753_v34  ;;  %v805_v25 = vld [vmem:[%s14205_s27 + $0x1288] sm:$0xff] }
 0x107   : > { %v809_v26 = vld [vmem:[%s14205_s27 + $0x12a8] sm:$0xff] }
 0x108   : > { %9943 = vmatpush1.bf16.msra.mxu0 %v12704_v41  ;;  %10502 = vmatpush1.bf16.msra.mxu1 %v12706_v42  ;;  %v757_v41 = vld [vmem:[%s14205_s27 + $0x1108] sm:$0xff] }
 0x109   : > { %9944 = vmatprep.subr.bf16.mxu0 %v12713_v43  ;;  %10503 = vmatprep.subr.bf16.mxu1 %v12715_v44  ;;  %v761_v42 = vld [vmem:[%s14205_s27 + $0x1128] sm:$0xff]  ;;  %v12768_v43 = vcombine.low %v748_v31, %v752_v32  ;;  %v12770_v44 = vcombine.low %v749_v33, %v753_v34  ;;  %v812_v31 = vld [vmem:[%s14205_s27 + $0x12c0] sm:$0xff] }
 0x10a   : > { %v12779_v46 = vcombine.high %v757_v41, %v761_v42  ;;  %v816_v32 = vld [vmem:[%s14205_s27 + $0x12e0] sm:$0xff]  ;;  %v813_v33 = vld [vmem:[%s14205_s27 + $0x12c8] sm:$0xff] }
 0x10b   : > { %v817_v34 = vld [vmem:[%s14205_s27 + $0x12e8] sm:$0xff] }
 0x10c   : > { %9945 = vmatpush1.bf16.msra.mxu0 %v12712_v49  ;;  %10504 = vmatpush1.bf16.msra.mxu1 %v12714_v50  ;;  %v765_v49 = vld [vmem:[%s14205_s27 + $0x1148] sm:$0xff] }
 0x10d   : > { %9946 = vmatprep.subr.bf16.mxu0 %v12721_v51  ;;  %10505 = vmatprep.subr.bf16.mxu1 %v12723_v52  ;;  %v769_v50 = vld [vmem:[%s14205_s27 + $0x1168] sm:$0xff]  ;;  %v12776_v51 = vcombine.low %v756_v39, %v760_v40  ;;  %v12778_v52 = vcombine.low %v757_v41, %v761_v42  ;;  %v820_v39 = vld [vmem:[%s14205_s27 + $0x1300] sm:$0xff] }
 0x10e   : > { %v12787_v54 = vcombine.high %v765_v49, %v769_v50  ;;  %v824_v40 = vld [vmem:[%s14205_s27 + $0x1320] sm:$0xff]  ;;  %v821_v41 = vld [vmem:[%s14205_s27 + $0x1308] sm:$0xff] }
 0x10f   : > { %v825_v42 = vld [vmem:[%s14205_s27 + $0x1328] sm:$0xff] }
 0x110   : > { %9947 = vmatpush1.bf16.msra.mxu0 %v12720_v57  ;;  %10506 = vmatpush1.bf16.msra.mxu1 %v12722_v58  ;;  %v773_v57 = vld [vmem:[%s14205_s27 + $0x1188] sm:$0xff] }
 0x111   : > { %9948 = vmatprep.subr.bf16.mxu0 %v12729_v59  ;;  %10507 = vmatprep.subr.bf16.mxu1 %v12731_v60  ;;  %v777_v58 = vld [vmem:[%s14205_s27 + $0x11a8] sm:$0xff]  ;;  %v12784_v59 = vcombine.low %v764_v47, %v768_v48  ;;  %v12786_v60 = vcombine.low %v765_v49, %v769_v50  ;;  %v828_v47 = vld [vmem:[%s14205_s27 + $0x1340] sm:$0xff] }
 0x112   : > { %v12795_v62 = vcombine.high %v773_v57, %v777_v58  ;;  %v832_v48 = vld [vmem:[%s14205_s27 + $0x1360] sm:$0xff]  ;;  %v829_v49 = vld [vmem:[%s14205_s27 + $0x1348] sm:$0xff] }
 0x113   : > { %v833_v50 = vld [vmem:[%s14205_s27 + $0x1368] sm:$0xff] }
 0x114   : > { %9949 = vmatpush1.bf16.msra.mxu0 %v12728_v1  ;;  %10508 = vmatpush1.bf16.msra.mxu1 %v12730_v2  ;;  %v781_v1 = vld [vmem:[%s14205_s27 + $0x11c8] sm:$0xff] }
 0x115   : > { %9950 = vmatprep.subr.bf16.mxu0 %v12737_v3  ;;  %10509 = vmatprep.subr.bf16.mxu1 %v12739_v4  ;;  %v785_v2 = vld [vmem:[%s14205_s27 + $0x11e8] sm:$0xff]  ;;  %v12792_v3 = vcombine.low %v772_v55, %v776_v56  ;;  %v12794_v4 = vcombine.low %v773_v57, %v777_v58  ;;  %v836_v55 = vld [vmem:[%s14205_s27 + $0x1380] sm:$0xff] }
 0x116   : > { %v12803_v6 = vcombine.high %v781_v1, %v785_v2  ;;  %v840_v56 = vld [vmem:[%s14205_s27 + $0x13a0] sm:$0xff]  ;;  %v837_v57 = vld [vmem:[%s14205_s27 + $0x1388] sm:$0xff] }
 0x117   : > { %v841_v58 = vld [vmem:[%s14205_s27 + $0x13a8] sm:$0xff] }
 0x118   : > { %9951 = vmatpush1.bf16.msra.mxu0 %v12736_v9  ;;  %10510 = vmatpush1.bf16.msra.mxu1 %v12738_v10  ;;  %v789_v9 = vld [vmem:[%s14205_s27 + $0x1208] sm:$0xff] }
 0x119   : > { %9963 = vmatprep.subr.bf16.mxu0 %v12745_v11  ;;  %10522 = vmatprep.subr.bf16.mxu1 %v12747_v12  ;;  %v793_v10 = vld [vmem:[%s14205_s27 + $0x1228] sm:$0xff]  ;;  %v12800_v11 = vcombine.low %v780_v63, %v784_v0  ;;  %v12802_v12 = vcombine.low %v781_v1, %v785_v2  ;;  %v844_v63 = vld [vmem:[%s14205_s27 + $0x13c0] sm:$0xff] }
 0x11a   : > { %v12811_v14 = vcombine.high %v789_v9, %v793_v10  ;;  %v848_v0 = vld [vmem:[%s14205_s27 + $0x13e0] sm:$0xff]  ;;  %v845_v1 = vld [vmem:[%s14205_s27 + $0x13c8] sm:$0xff] }
 0x11b   : > { %9953 = vmatmul.mubr.bf16.vlgmr.msra.gmra.mrb[0].mxu0 %v14071_v15  ;;  %10512 = vmatmul.mubr.bf16.vlgmr.msra.gmra.mrb[0].mxu1 %v14071_v15  ;;  %v796_v15 = vld [vmem:[%s14205_s27 + $0x1240] sm:$0xff]  ;;  %v849_v2 = vld [vmem:[%s14205_s27 + $0x13e8] sm:$0xff] }
 0x11c   : > { %9964 = vmatpush1.bf16.msra.mxu0 %v12744_v18  ;;  %10523 = vmatpush1.bf16.msra.mxu1 %v12746_v19  ;;  %v801_v18 = vld [vmem:[%s14205_s27 + $0x1268] sm:$0xff]  ;;  %v12808_v19 = vcombine.low %v788_v7, %v792_v8  ;;  %v852_v7 = vld [vmem:[%s14205_s27 + $0x1400] sm:$0xff] }
 0x11d   : > { %9965 = vmatprep.subr.bf16.mxu0 %v12753_v20  ;;  %10524 = vmatprep.subr.bf16.mxu1 %v12755_v21  ;;  %v12810_v20 = vcombine.low %v789_v9, %v793_v10  ;;  %v12817_v21 = vcombine.high %v796_v15, %v800_v16  ;;  %v12819_v22 = vcombine.high %v797_v17, %v801_v18  ;;  %v856_v8 = vld [vmem:[%s14205_s27 + $0x1420] sm:$0xff]  ;;  %v853_v9 = vld [vmem:[%s14205_s27 + $0x1408] sm:$0xff] }
 0x11e   : > { %9995 = vmatprep.mubr.bf16.mxu0 %v14072_v24  ;;  %10554 = vmatprep.mubr.bf16.mxu1 %v14072_v24  ;;  %v808_v24 = vld [vmem:[%s14205_s27 + $0x12a0] sm:$0xff]  ;;  %v857_v10 = vld [vmem:[%s14205_s27 + $0x1428] sm:$0xff] }
 0x120   : > { %9966 = vmatpush1.bf16.msra.mxu0 %v12752_v27  ;;  %10525 = vmatpush1.bf16.msra.mxu1 %v12754_v28  ;;  %v12816_v27 = vcombine.low %v796_v15, %v800_v16  ;;  %v12818_v28 = vcombine.low %v797_v17, %v801_v18  ;;  %v860_v15 = vld [vmem:[%s14205_s27 + $0x1440] sm:$0xff]  ;;  %v861_v18 = vld [vmem:[%s14205_s27 + $0x1448] sm:$0xff] }
 0x121   : > { %9967 = vmatprep.subr.bf16.mxu0 %v12761_v29  ;;  %10526 = vmatprep.subr.bf16.mxu1 %v12763_v30  ;;  %v12825_v29 = vcombine.high %v804_v23, %v808_v24  ;;  %v12827_v30 = vcombine.high %v805_v25, %v809_v26  ;;  %v864_v16 = vld [vmem:[%s14205_s27 + $0x1460] sm:$0xff] }
 0x122   : > { %v14074_v17 = vld [vmem:[%s15996_s0 + $0x20] ss:$100 sps:$4 sm:$0xff]  }
 0x124   : > { %9968 = vmatpush1.bf16.msra.mxu0 %v12760_v35  ;;  %10527 = vmatpush1.bf16.msra.mxu1 %v12762_v36  ;;  %v12824_v35 = vcombine.low %v804_v23, %v808_v24  ;;  %v12826_v36 = vcombine.low %v805_v25, %v809_v26  ;;  %v868_v24 = vld [vmem:[%s14205_s27 + $0x1480] sm:$0xff]  ;;  %v14075_v26 = vld [vmem:[%s15996_s0 + $0x2c] ss:$100 sps:$4 sm:$0xff]  }
 0x125   : > { %9969 = vmatprep.subr.bf16.mxu0 %v12769_v37  ;;  %10528 = vmatprep.subr.bf16.mxu1 %v12771_v38  ;;  %v12833_v37 = vcombine.high %v812_v31, %v816_v32  ;;  %v12835_v38 = vcombine.high %v813_v33, %v817_v34  ;;  %v872_v25 = vld [vmem:[%s14205_s27 + $0x14a0] sm:$0xff] }
 0x128   : > { %9970 = vmatpush1.bf16.msra.mxu0 %v12768_v43  ;;  %10529 = vmatpush1.bf16.msra.mxu1 %v12770_v44  ;;  %v12832_v43 = vcombine.low %v812_v31, %v816_v32  ;;  %v12834_v44 = vcombine.low %v813_v33, %v817_v34  ;;  %v12889_v31 = vcombine.high %v868_v24, %v872_v25  ;;  %v876_v33 = vld [vmem:[%s14205_s27 + $0x14c0] sm:$0xff] }
 0x129   : > { %9971 = vmatprep.subr.bf16.mxu0 %v12777_v45  ;;  %10530 = vmatprep.subr.bf16.mxu1 %v12779_v46  ;;  %v12841_v45 = vcombine.high %v820_v39, %v824_v40  ;;  %v12843_v46 = vcombine.high %v821_v41, %v825_v42  ;;  %v880_v34 = vld [vmem:[%s14205_s27 + $0x14e0] sm:$0xff] }
 0x12c   : > { %9972 = vmatpush1.bf16.msra.mxu0 %v12776_v51  ;;  %10531 = vmatpush1.bf16.msra.mxu1 %v12778_v52  ;;  %v12840_v51 = vcombine.low %v820_v39, %v824_v40  ;;  %v12842_v52 = vcombine.low %v821_v41, %v825_v42  ;;  %v12897_v39 = vcombine.high %v876_v33, %v880_v34  ;;  %v884_v41 = vld [vmem:[%s14205_s27 + $0x1500] sm:$0xff] }
 0x12d   : > { %9973 = vmatprep.subr.bf16.mxu0 %v12785_v53  ;;  %10532 = vmatprep.subr.bf16.mxu1 %v12787_v54  ;;  %v12849_v53 = vcombine.high %v828_v47, %v832_v48  ;;  %v12851_v54 = vcombine.high %v829_v49, %v833_v50  ;;  %v888_v42 = vld [vmem:[%s14205_s27 + $0x1520] sm:$0xff] }
 0x130   : > { %9974 = vmatpush1.bf16.msra.mxu0 %v12784_v59  ;;  %10533 = vmatpush1.bf16.msra.mxu1 %v12786_v60  ;;  %v12848_v59 = vcombine.low %v828_v47, %v832_v48  ;;  %v12850_v60 = vcombine.low %v829_v49, %v833_v50  ;;  %v12905_v47 = vcombine.high %v884_v41, %v888_v42  ;;  %v892_v49 = vld [vmem:[%s14205_s27 + $0x1540] sm:$0xff] }
 0x131   : > { %9975 = vmatprep.subr.bf16.mxu0 %v12793_v61  ;;  %10534 = vmatprep.subr.bf16.mxu1 %v12795_v62  ;;  %v12857_v61 = vcombine.high %v836_v55, %v840_v56  ;;  %v12859_v62 = vcombine.high %v837_v57, %v841_v58  ;;  %v896_v50 = vld [vmem:[%s14205_s27 + $0x1560] sm:$0xff] }
 0x134   : > { %9976 = vmatpush1.bf16.msra.mxu0 %v12792_v3  ;;  %10535 = vmatpush1.bf16.msra.mxu1 %v12794_v4  ;;  %v12856_v3 = vcombine.low %v836_v55, %v840_v56  ;;  %v12858_v4 = vcombine.low %v837_v57, %v841_v58  ;;  %v12913_v55 = vcombine.high %v892_v49, %v896_v50  ;;  %v900_v57 = vld [vmem:[%s14205_s27 + $0x1580] sm:$0xff] }
 0x135   : > { %9977 = vmatprep.subr.bf16.mxu0 %v12801_v5  ;;  %10536 = vmatprep.subr.bf16.mxu1 %v12803_v6  ;;  %v12865_v5 = vcombine.high %v844_v63, %v848_v0  ;;  %v12867_v6 = vcombine.high %v845_v1, %v849_v2  ;;  %v904_v58 = vld [vmem:[%s14205_s27 + $0x15a0] sm:$0xff] }
 0x138   : > { %9978 = vmatpush1.bf16.msra.mxu0 %v12800_v11  ;;  %10537 = vmatpush1.bf16.msra.mxu1 %v12802_v12  ;;  %v12864_v11 = vcombine.low %v844_v63, %v848_v0  ;;  %v12866_v12 = vcombine.low %v845_v1, %v849_v2  ;;  %v12921_v63 = vcombine.high %v900_v57, %v904_v58  ;;  %v908_v1 = vld [vmem:[%s14205_s27 + $0x15c0] sm:$0xff] }
 0x139   : > { %9979 = vmatprep.subr.bf16.mxu0 %v12809_v13  ;;  %10538 = vmatprep.subr.bf16.mxu1 %v12811_v14  ;;  %v12873_v13 = vcombine.high %v852_v7, %v856_v8  ;;  %v12875_v14 = vcombine.high %v853_v9, %v857_v10  ;;  %v912_v2 = vld [vmem:[%s14205_s27 + $0x15e0] sm:$0xff] }
 0x13c   : > { %9980 = vmatpush1.bf16.msra.mxu0 %v12808_v19  ;;  %10539 = vmatpush1.bf16.msra.mxu1 %v12810_v20  ;;  %v865_v19 = vld [vmem:[%s14205_s27 + $0x1468] sm:$0xff]  ;;  %v12872_v20 = vcombine.low %v852_v7, %v856_v8  ;;  %v12929_v7 = vcombine.high %v908_v1, %v912_v2 }
 0x13d   : > { %9981 = vmatprep.subr.bf16.mxu0 %v12817_v21  ;;  %10540 = vmatprep.subr.bf16.mxu1 %v12819_v22  ;;  %v12874_v21 = vcombine.low %v853_v9, %v857_v10  ;;  %v12881_v22 = vcombine.high %v860_v15, %v864_v16  ;;  %v12883_v23 = vcombine.high %v861_v18, %v865_v19  ;;  %v916_v9 = vld [vmem:[%s14205_s27 + $0x1600] sm:$0xff] }
 0x13e   : > { %v920_v10 = vld [vmem:[%s14205_s27 + $0x1620] sm:$0xff] }
 0x140   : > { %9982 = vmatpush1.bf16.msra.mxu0 %v12816_v27  ;;  %10541 = vmatpush1.bf16.msra.mxu1 %v12818_v28  ;;  %v869_v27 = vld [vmem:[%s14205_s27 + $0x1488] sm:$0xff] }
 0x141   : > { %9983 = vmatprep.subr.bf16.mxu0 %v12825_v29  ;;  %10542 = vmatprep.subr.bf16.mxu1 %v12827_v30  ;;  %v873_v28 = vld [vmem:[%s14205_s27 + $0x14a8] sm:$0xff]  ;;  %v12880_v29 = vcombine.low %v860_v15, %v864_v16  ;;  %v12882_v30 = vcombine.low %v861_v18, %v865_v19  ;;  %v12937_v15 = vcombine.high %v916_v9, %v920_v10  ;;  %v928_v18 = vld [vmem:[%s14205_s27 + $0x1660] sm:$0xff] }
 0x142   : > { %v12891_v32 = vcombine.high %v869_v27, %v873_v28  ;;  %v925_v19 = vld [vmem:[%s14205_s27 + $0x1648] sm:$0xff] }
 0x144   : > { %9984 = vmatpush1.bf16.msra.mxu0 %v12824_v35  ;;  %10543 = vmatpush1.bf16.msra.mxu1 %v12826_v36  ;;  %v877_v35 = vld [vmem:[%s14205_s27 + $0x14c8] sm:$0xff] }
 0x145   : > { %9985 = vmatprep.subr.bf16.mxu0 %v12833_v37  ;;  %10544 = vmatprep.subr.bf16.mxu1 %v12835_v38  ;;  %v881_v36 = vld [vmem:[%s14205_s27 + $0x14e8] sm:$0xff]  ;;  %v12888_v37 = vcombine.low %v868_v24, %v872_v25  ;;  %v12890_v38 = vcombine.low %v869_v27, %v873_v28  ;;  %v932_v25 = vld [vmem:[%s14205_s27 + $0x1680] sm:$0xff] }
 0x146   : > { %v12899_v40 = vcombine.high %v877_v35, %v881_v36  ;;  %v933_v27 = vld [vmem:[%s14205_s27 + $0x1688] sm:$0xff] }
 0x147   : > { %v937_v28 = vld [vmem:[%s14205_s27 + $0x16a8] sm:$0xff] }
 0x148   : > { %9986 = vmatpush1.bf16.msra.mxu0 %v12832_v43  ;;  %10545 = vmatpush1.bf16.msra.mxu1 %v12834_v44  ;;  %v885_v43 = vld [vmem:[%s14205_s27 + $0x1508] sm:$0xff] }
 0x149   : > { %9987 = vmatprep.subr.bf16.mxu0 %v12841_v45  ;;  %10546 = vmatprep.subr.bf16.mxu1 %v12843_v46  ;;  %v889_v44 = vld [vmem:[%s14205_s27 + $0x1528] sm:$0xff]  ;;  %v12896_v45 = vcombine.low %v876_v33, %v880_v34  ;;  %v12898_v46 = vcombine.low %v877_v35, %v881_v36  ;;  %v940_v33 = vld [vmem:[%s14205_s27 + $0x16c0] sm:$0xff] }
 0x14a   : > { %v12907_v48 = vcombine.high %v885_v43, %v889_v44  ;;  %v944_v34 = vld [vmem:[%s14205_s27 + $0x16e0] sm:$0xff]  ;;  %v941_v35 = vld [vmem:[%s14205_s27 + $0x16c8] sm:$0xff] }
 0x14b   : > { %v945_v36 = vld [vmem:[%s14205_s27 + $0x16e8] sm:$0xff] }
 0x14c   : > { %9988 = vmatpush1.bf16.msra.mxu0 %v12840_v51  ;;  %10547 = vmatpush1.bf16.msra.mxu1 %v12842_v52  ;;  %v893_v51 = vld [vmem:[%s14205_s27 + $0x1548] sm:$0xff] }
 0x14d   : > { %9989 = vmatprep.subr.bf16.mxu0 %v12849_v53  ;;  %10548 = vmatprep.subr.bf16.mxu1 %v12851_v54  ;;  %v897_v52 = vld [vmem:[%s14205_s27 + $0x1568] sm:$0xff]  ;;  %v12904_v53 = vcombine.low %v884_v41, %v888_v42  ;;  %v12906_v54 = vcombine.low %v885_v43, %v889_v44  ;;  %v948_v41 = vld [vmem:[%s14205_s27 + $0x1700] sm:$0xff] }
 0x14e   : > { %v12915_v56 = vcombine.high %v893_v51, %v897_v52  ;;  %v952_v42 = vld [vmem:[%s14205_s27 + $0x1720] sm:$0xff]  ;;  %v949_v43 = vld [vmem:[%s14205_s27 + $0x1708] sm:$0xff] }
 0x14f   : > { %v953_v44 = vld [vmem:[%s14205_s27 + $0x1728] sm:$0xff] }
 0x150   : > { %9990 = vmatpush1.bf16.msra.mxu0 %v12848_v59  ;;  %10549 = vmatpush1.bf16.msra.mxu1 %v12850_v60  ;;  %v901_v59 = vld [vmem:[%s14205_s27 + $0x1588] sm:$0xff] }
 0x151   : > { %9991 = vmatprep.subr.bf16.mxu0 %v12857_v61  ;;  %10550 = vmatprep.subr.bf16.mxu1 %v12859_v62  ;;  %v905_v60 = vld [vmem:[%s14205_s27 + $0x15a8] sm:$0xff]  ;;  %v12912_v61 = vcombine.low %v892_v49, %v896_v50  ;;  %v12914_v62 = vcombine.low %v893_v51, %v897_v52  ;;  %v956_v49 = vld [vmem:[%s14205_s27 + $0x1740] sm:$0xff] }
 0x152   : > { %v12923_v0 = vcombine.high %v901_v59, %v905_v60  ;;  %v960_v50 = vld [vmem:[%s14205_s27 + $0x1760] sm:$0xff]  ;;  %v957_v51 = vld [vmem:[%s14205_s27 + $0x1748] sm:$0xff] }
 0x153   : > { %v961_v52 = vld [vmem:[%s14205_s27 + $0x1768] sm:$0xff] }
 0x154   : > { %9992 = vmatpush1.bf16.msra.mxu0 %v12856_v3  ;;  %10551 = vmatpush1.bf16.msra.mxu1 %v12858_v4  ;;  %v909_v3 = vld [vmem:[%s14205_s27 + $0x15c8] sm:$0xff] }
 0x155   : > { %9993 = vmatprep.subr.bf16.mxu0 %v12865_v5  ;;  %10552 = vmatprep.subr.bf16.mxu1 %v12867_v6  ;;  %v913_v4 = vld [vmem:[%s14205_s27 + $0x15e8] sm:$0xff]  ;;  %v12920_v5 = vcombine.low %v900_v57, %v904_v58  ;;  %v12922_v6 = vcombine.low %v901_v59, %v905_v60  ;;  %v964_v57 = vld [vmem:[%s14205_s27 + $0x1780] sm:$0xff] }
 0x156   : > { %v12931_v8 = vcombine.high %v909_v3, %v913_v4  ;;  %v968_v58 = vld [vmem:[%s14205_s27 + $0x17a0] sm:$0xff]  ;;  %v965_v59 = vld [vmem:[%s14205_s27 + $0x1788] sm:$0xff] }
 0x157   : > { %v969_v60 = vld [vmem:[%s14205_s27 + $0x17a8] sm:$0xff] }
 0x158   : > { %9994 = vmatpush1.bf16.msra.mxu0 %v12864_v11  ;;  %10553 = vmatpush1.bf16.msra.mxu1 %v12866_v12  ;;  %v917_v11 = vld [vmem:[%s14205_s27 + $0x1608] sm:$0xff] }
 0x159   : > { %10006 = vmatprep.subr.bf16.mxu0 %v12873_v13  ;;  %10565 = vmatprep.subr.bf16.mxu1 %v12875_v14  ;;  %v921_v12 = vld [vmem:[%s14205_s27 + $0x1628] sm:$0xff]  ;;  %v12928_v13 = vcombine.low %v908_v1, %v912_v2  ;;  %v12930_v14 = vcombine.low %v909_v3, %v913_v4  ;;  %v972_v1 = vld [vmem:[%s14205_s27 + $0x17c0] sm:$0xff] }
 0x15a   : > { %v12939_v16 = vcombine.high %v917_v11, %v921_v12  ;;  %v976_v2 = vld [vmem:[%s14205_s27 + $0x17e0] sm:$0xff]  ;;  %v973_v3 = vld [vmem:[%s14205_s27 + $0x17c8] sm:$0xff] }
 0x15b   : > { %9996 = vmatmul.mubr.bf16.vlgmr.msra.gmra.mrb[0].mxu0 %v14074_v17  ;;  %10555 = vmatmul.mubr.bf16.vlgmr.msra.gmra.mrb[0].mxu1 %v14074_v17  ;;  %v924_v17 = vld [vmem:[%s14205_s27 + $0x1640] sm:$0xff]  ;;  %v977_v4 = vld [vmem:[%s14205_s27 + $0x17e8] sm:$0xff] }
 0x15c   : > { %10007 = vmatpush1.bf16.msra.mxu0 %v12872_v20  ;;  %10566 = vmatpush1.bf16.msra.mxu1 %v12874_v21  ;;  %v929_v20 = vld [vmem:[%s14205_s27 + $0x1668] sm:$0xff]  ;;  %v12936_v21 = vcombine.low %v916_v9, %v920_v10  ;;  %v980_v9 = vld [vmem:[%s14205_s27 + $0x1800] sm:$0xff] }
 0x15d   : > { %10008 = vmatprep.subr.bf16.mxu0 %v12881_v22  ;;  %10567 = vmatprep.subr.bf16.mxu1 %v12883_v23  ;;  %v12938_v22 = vcombine.low %v917_v11, %v921_v12  ;;  %v12945_v23 = vcombine.high %v924_v17, %v928_v18  ;;  %v12947_v24 = vcombine.high %v925_v19, %v929_v20  ;;  %v984_v10 = vld [vmem:[%s14205_s27 + $0x1820] sm:$0xff]  ;;  %v981_v11 = vld [vmem:[%s14205_s27 + $0x1808] sm:$0xff] }
 0x15e   : > { %10038 = vmatprep.mubr.bf16.mxu0 %v14075_v26  ;;  %10597 = vmatprep.mubr.bf16.mxu1 %v14075_v26  ;;  %v936_v26 = vld [vmem:[%s14205_s27 + $0x16a0] sm:$0xff]  ;;  %v985_v12 = vld [vmem:[%s14205_s27 + $0x1828] sm:$0xff] }
 0x160   : > { %10009 = vmatpush1.bf16.msra.mxu0 %v12880_v29  ;;  %10568 = vmatpush1.bf16.msra.mxu1 %v12882_v30  ;;  %v12944_v29 = vcombine.low %v924_v17, %v928_v18  ;;  %v12946_v30 = vcombine.low %v925_v19, %v929_v20  ;;  %v988_v17 = vld [vmem:[%s14205_s27 + $0x1840] sm:$0xff]  ;;  %v14077_v19 = vld [vmem:[%s15996_s0 + $0x28] ss:$100 sps:$4 sm:$0xff]  }
 0x161   : > { %10010 = vmatprep.subr.bf16.mxu0 %v12889_v31  ;;  %10569 = vmatprep.subr.bf16.mxu1 %v12891_v32  ;;  %v12953_v31 = vcombine.high %v932_v25, %v936_v26  ;;  %v12955_v32 = vcombine.high %v933_v27, %v937_v28  ;;  %v992_v18 = vld [vmem:[%s14205_s27 + $0x1860] sm:$0xff]  ;;  %v989_v20 = vld [vmem:[%s14205_s27 + $0x1848] sm:$0xff] }
 0x164   : > { %10011 = vmatpush1.bf16.msra.mxu0 %v12888_v37  ;;  %10570 = vmatpush1.bf16.msra.mxu1 %v12890_v38  ;;  %v12952_v37 = vcombine.low %v932_v25, %v936_v26  ;;  %v12954_v38 = vcombine.low %v933_v27, %v937_v28  ;;  %v996_v26 = vld [vmem:[%s14205_s27 + $0x1880] sm:$0xff]  ;;  %v14078_v28 = vld [vmem:[%s15996_s0 + $0x34] ss:$100 sps:$4 sm:$0xff]  }
 0x165   : > { %10012 = vmatprep.subr.bf16.mxu0 %v12897_v39  ;;  %10571 = vmatprep.subr.bf16.mxu1 %v12899_v40  ;;  %v12961_v39 = vcombine.high %v940_v33, %v944_v34  ;;  %v12963_v40 = vcombine.high %v941_v35, %v945_v36  ;;  %v1000_v27 = vld [vmem:[%s14205_s27 + $0x18a0] sm:$0xff] }
 0x168   : > { %10013 = vmatpush1.bf16.msra.mxu0 %v12896_v45  ;;  %10572 = vmatpush1.bf16.msra.mxu1 %v12898_v46  ;;  %v12960_v45 = vcombine.low %v940_v33, %v944_v34  ;;  %v12962_v46 = vcombine.low %v941_v35, %v945_v36  ;;  %v13017_v33 = vcombine.high %v996_v26, %v1000_v27  ;;  %v1004_v35 = vld [vmem:[%s14205_s27 + $0x18c0] sm:$0xff] }
 0x169   : > { %10014 = vmatprep.subr.bf16.mxu0 %v12905_v47  ;;  %10573 = vmatprep.subr.bf16.mxu1 %v12907_v48  ;;  %v12969_v47 = vcombine.high %v948_v41, %v952_v42  ;;  %v12971_v48 = vcombine.high %v949_v43, %v953_v44  ;;  %v1008_v36 = vld [vmem:[%s14205_s27 + $0x18e0] sm:$0xff] }
 0x16c   : > { %10015 = vmatpush1.bf16.msra.mxu0 %v12904_v53  ;;  %10574 = vmatpush1.bf16.msra.mxu1 %v12906_v54  ;;  %v12968_v53 = vcombine.low %v948_v41, %v952_v42  ;;  %v12970_v54 = vcombine.low %v949_v43, %v953_v44  ;;  %v13025_v41 = vcombine.high %v1004_v35, %v1008_v36  ;;  %v1012_v43 = vld [vmem:[%s14205_s27 + $0x1900] sm:$0xff] }
 0x16d   : > { %10016 = vmatprep.subr.bf16.mxu0 %v12913_v55  ;;  %10575 = vmatprep.subr.bf16.mxu1 %v12915_v56  ;;  %v12977_v55 = vcombine.high %v956_v49, %v960_v50  ;;  %v12979_v56 = vcombine.high %v957_v51, %v961_v52  ;;  %v1016_v44 = vld [vmem:[%s14205_s27 + $0x1920] sm:$0xff] }
 0x170   : > { %10017 = vmatpush1.bf16.msra.mxu0 %v12912_v61  ;;  %10576 = vmatpush1.bf16.msra.mxu1 %v12914_v62  ;;  %v12976_v61 = vcombine.low %v956_v49, %v960_v50  ;;  %v12978_v62 = vcombine.low %v957_v51, %v961_v52  ;;  %v13033_v49 = vcombine.high %v1012_v43, %v1016_v44  ;;  %v1020_v51 = vld [vmem:[%s14205_s27 + $0x1940] sm:$0xff] }
 0x171   : > { %10018 = vmatprep.subr.bf16.mxu0 %v12921_v63  ;;  %10577 = vmatprep.subr.bf16.mxu1 %v12923_v0  ;;  %v12985_v63 = vcombine.high %v964_v57, %v968_v58  ;;  %v12987_v0 = vcombine.high %v965_v59, %v969_v60  ;;  %v1024_v52 = vld [vmem:[%s14205_s27 + $0x1960] sm:$0xff] }
 0x174   : > { %10019 = vmatpush1.bf16.msra.mxu0 %v12920_v5  ;;  %10578 = vmatpush1.bf16.msra.mxu1 %v12922_v6  ;;  %v12984_v5 = vcombine.low %v964_v57, %v968_v58  ;;  %v12986_v6 = vcombine.low %v965_v59, %v969_v60  ;;  %v13041_v57 = vcombine.high %v1020_v51, %v1024_v52  ;;  %v1028_v59 = vld [vmem:[%s14205_s27 + $0x1980] sm:$0xff] }
 0x175   : > { %10020 = vmatprep.subr.bf16.mxu0 %v12929_v7  ;;  %10579 = vmatprep.subr.bf16.mxu1 %v12931_v8  ;;  %v12993_v7 = vcombine.high %v972_v1, %v976_v2  ;;  %v12995_v8 = vcombine.high %v973_v3, %v977_v4  ;;  %v1032_v60 = vld [vmem:[%s14205_s27 + $0x19a0] sm:$0xff] }
 0x178   : > { %10021 = vmatpush1.bf16.msra.mxu0 %v12928_v13  ;;  %10580 = vmatpush1.bf16.msra.mxu1 %v12930_v14  ;;  %v12992_v13 = vcombine.low %v972_v1, %v976_v2  ;;  %v12994_v14 = vcombine.low %v973_v3, %v977_v4  ;;  %v13049_v1 = vcombine.high %v1028_v59, %v1032_v60  ;;  %v1036_v3 = vld [vmem:[%s14205_s27 + $0x19c0] sm:$0xff] }
 0x179   : > { %10022 = vmatprep.subr.bf16.mxu0 %v12937_v15  ;;  %10581 = vmatprep.subr.bf16.mxu1 %v12939_v16  ;;  %v13001_v15 = vcombine.high %v980_v9, %v984_v10  ;;  %v13003_v16 = vcombine.high %v981_v11, %v985_v12  ;;  %v1040_v4 = vld [vmem:[%s14205_s27 + $0x19e0] sm:$0xff] }
 0x17c   : > { %10023 = vmatpush1.bf16.msra.mxu0 %v12936_v21  ;;  %10582 = vmatpush1.bf16.msra.mxu1 %v12938_v22  ;;  %v993_v21 = vld [vmem:[%s14205_s27 + $0x1868] sm:$0xff]  ;;  %v13000_v22 = vcombine.low %v980_v9, %v984_v10  ;;  %v13057_v9 = vcombine.high %v1036_v3, %v1040_v4 }
 0x17d   : > { %10024 = vmatprep.subr.bf16.mxu0 %v12945_v23  ;;  %10583 = vmatprep.subr.bf16.mxu1 %v12947_v24  ;;  %v13002_v23 = vcombine.low %v981_v11, %v985_v12  ;;  %v13009_v24 = vcombine.high %v988_v17, %v992_v18  ;;  %v13011_v25 = vcombine.high %v989_v20, %v993_v21  ;;  %v1044_v11 = vld [vmem:[%s14205_s27 + $0x1a00] sm:$0xff] }
 0x17e   : > { %v1048_v12 = vld [vmem:[%s14205_s27 + $0x1a20] sm:$0xff] }
 0x180   : > { %10025 = vmatpush1.bf16.msra.mxu0 %v12944_v29  ;;  %10584 = vmatpush1.bf16.msra.mxu1 %v12946_v30  ;;  %v997_v29 = vld [vmem:[%s14205_s27 + $0x1888] sm:$0xff] }
 0x181   : > { %10026 = vmatprep.subr.bf16.mxu0 %v12953_v31  ;;  %10585 = vmatprep.subr.bf16.mxu1 %v12955_v32  ;;  %v1001_v30 = vld [vmem:[%s14205_s27 + $0x18a8] sm:$0xff]  ;;  %v13008_v31 = vcombine.low %v988_v17, %v992_v18  ;;  %v13010_v32 = vcombine.low %v989_v20, %v993_v21  ;;  %v13065_v17 = vcombine.high %v1044_v11, %v1048_v12  ;;  %v1056_v20 = vld [vmem:[%s14205_s27 + $0x1a60] sm:$0xff] }
 0x182   : > { %v13019_v34 = vcombine.high %v997_v29, %v1001_v30  ;;  %v1053_v21 = vld [vmem:[%s14205_s27 + $0x1a48] sm:$0xff] }
 0x184   : > { %10027 = vmatpush1.bf16.msra.mxu0 %v12952_v37  ;;  %10586 = vmatpush1.bf16.msra.mxu1 %v12954_v38  ;;  %v1005_v37 = vld [vmem:[%s14205_s27 + $0x18c8] sm:$0xff] }
 0x185   : > { %10028 = vmatprep.subr.bf16.mxu0 %v12961_v39  ;;  %10587 = vmatprep.subr.bf16.mxu1 %v12963_v40  ;;  %v1009_v38 = vld [vmem:[%s14205_s27 + $0x18e8] sm:$0xff]  ;;  %v13016_v39 = vcombine.low %v996_v26, %v1000_v27  ;;  %v13018_v40 = vcombine.low %v997_v29, %v1001_v30  ;;  %v1060_v27 = vld [vmem:[%s14205_s27 + $0x1a80] sm:$0xff] }
 0x186   : > { %v13027_v42 = vcombine.high %v1005_v37, %v1009_v38  ;;  %v1061_v29 = vld [vmem:[%s14205_s27 + $0x1a88] sm:$0xff] }
 0x187   : > { %v1065_v30 = vld [vmem:[%s14205_s27 + $0x1aa8] sm:$0xff] }
 0x188   : > { %10029 = vmatpush1.bf16.msra.mxu0 %v12960_v45  ;;  %10588 = vmatpush1.bf16.msra.mxu1 %v12962_v46  ;;  %v1013_v45 = vld [vmem:[%s14205_s27 + $0x1908] sm:$0xff] }
 0x189   : > { %10030 = vmatprep.subr.bf16.mxu0 %v12969_v47  ;;  %10589 = vmatprep.subr.bf16.mxu1 %v12971_v48  ;;  %v1017_v46 = vld [vmem:[%s14205_s27 + $0x1928] sm:$0xff]  ;;  %v13024_v47 = vcombine.low %v1004_v35, %v1008_v36  ;;  %v13026_v48 = vcombine.low %v1005_v37, %v1009_v38  ;;  %v1068_v35 = vld [vmem:[%s14205_s27 + $0x1ac0] sm:$0xff] }
 0x18a   : > { %v13035_v50 = vcombine.high %v1013_v45, %v1017_v46  ;;  %v1072_v36 = vld [vmem:[%s14205_s27 + $0x1ae0] sm:$0xff]  ;;  %v1069_v37 = vld [vmem:[%s14205_s27 + $0x1ac8] sm:$0xff] }
 0x18b   : > { %v1073_v38 = vld [vmem:[%s14205_s27 + $0x1ae8] sm:$0xff] }
 0x18c   : > { %10031 = vmatpush1.bf16.msra.mxu0 %v12968_v53  ;;  %10590 = vmatpush1.bf16.msra.mxu1 %v12970_v54  ;;  %v1021_v53 = vld [vmem:[%s14205_s27 + $0x1948] sm:$0xff] }
 0x18d   : > { %10032 = vmatprep.subr.bf16.mxu0 %v12977_v55  ;;  %10591 = vmatprep.subr.bf16.mxu1 %v12979_v56  ;;  %v1025_v54 = vld [vmem:[%s14205_s27 + $0x1968] sm:$0xff]  ;;  %v13032_v55 = vcombine.low %v1012_v43, %v1016_v44  ;;  %v13034_v56 = vcombine.low %v1013_v45, %v1017_v46  ;;  %v1076_v43 = vld [vmem:[%s14205_s27 + $0x1b00] sm:$0xff] }
 0x18e   : > { %v13043_v58 = vcombine.high %v1021_v53, %v1025_v54  ;;  %v1080_v44 = vld [vmem:[%s14205_s27 + $0x1b20] sm:$0xff]  ;;  %v1077_v45 = vld [vmem:[%s14205_s27 + $0x1b08] sm:$0xff] }
 0x18f   : > { %v1081_v46 = vld [vmem:[%s14205_s27 + $0x1b28] sm:$0xff] }
 0x190   : > { %10033 = vmatpush1.bf16.msra.mxu0 %v12976_v61  ;;  %10592 = vmatpush1.bf16.msra.mxu1 %v12978_v62  ;;  %v1029_v61 = vld [vmem:[%s14205_s27 + $0x1988] sm:$0xff] }
 0x191   : > { %10034 = vmatprep.subr.bf16.mxu0 %v12985_v63  ;;  %10593 = vmatprep.subr.bf16.mxu1 %v12987_v0  ;;  %v1033_v62 = vld [vmem:[%s14205_s27 + $0x19a8] sm:$0xff]  ;;  %v13040_v63 = vcombine.low %v1020_v51, %v1024_v52  ;;  %v13042_v0 = vcombine.low %v1021_v53, %v1025_v54  ;;  %v1084_v51 = vld [vmem:[%s14205_s27 + $0x1b40] sm:$0xff] }
 0x192   : > { %v13051_v2 = vcombine.high %v1029_v61, %v1033_v62  ;;  %v1088_v52 = vld [vmem:[%s14205_s27 + $0x1b60] sm:$0xff]  ;;  %v1085_v53 = vld [vmem:[%s14205_s27 + $0x1b48] sm:$0xff] }
 0x193   : > { %v1089_v54 = vld [vmem:[%s14205_s27 + $0x1b68] sm:$0xff] }
 0x194   : > { %10035 = vmatpush1.bf16.msra.mxu0 %v12984_v5  ;;  %10594 = vmatpush1.bf16.msra.mxu1 %v12986_v6  ;;  %v1037_v5 = vld [vmem:[%s14205_s27 + $0x19c8] sm:$0xff] }
 0x195   : > { %10036 = vmatprep.subr.bf16.mxu0 %v12993_v7  ;;  %10595 = vmatprep.subr.bf16.mxu1 %v12995_v8  ;;  %v1041_v6 = vld [vmem:[%s14205_s27 + $0x19e8] sm:$0xff]  ;;  %v13048_v7 = vcombine.low %v1028_v59, %v1032_v60  ;;  %v13050_v8 = vcombine.low %v1029_v61, %v1033_v62  ;;  %v1092_v59 = vld [vmem:[%s14205_s27 + $0x1b80] sm:$0xff] }
 0x196   : > { %v13059_v10 = vcombine.high %v1037_v5, %v1041_v6  ;;  %v1096_v60 = vld [vmem:[%s14205_s27 + $0x1ba0] sm:$0xff]  ;;  %v1093_v61 = vld [vmem:[%s14205_s27 + $0x1b88] sm:$0xff] }
 0x197   : > { %v1097_v62 = vld [vmem:[%s14205_s27 + $0x1ba8] sm:$0xff] }
 0x198   : > { %10037 = vmatpush1.bf16.msra.mxu0 %v12992_v13  ;;  %10596 = vmatpush1.bf16.msra.mxu1 %v12994_v14  ;;  %v1045_v13 = vld [vmem:[%s14205_s27 + $0x1a08] sm:$0xff] }
 0x199   : > { %10049 = vmatprep.subr.bf16.mxu0 %v13001_v15  ;;  %10608 = vmatprep.subr.bf16.mxu1 %v13003_v16  ;;  %v1049_v14 = vld [vmem:[%s14205_s27 + $0x1a28] sm:$0xff]  ;;  %v13056_v15 = vcombine.low %v1036_v3, %v1040_v4  ;;  %v13058_v16 = vcombine.low %v1037_v5, %v1041_v6  ;;  %v1100_v3 = vld [vmem:[%s14205_s27 + $0x1bc0] sm:$0xff] }
 0x19a   : > { %v13067_v18 = vcombine.high %v1045_v13, %v1049_v14  ;;  %v1104_v4 = vld [vmem:[%s14205_s27 + $0x1be0] sm:$0xff]  ;;  %v1101_v5 = vld [vmem:[%s14205_s27 + $0x1bc8] sm:$0xff] }
 0x19b   : > { %10039 = vmatmul.mubr.bf16.vlgmr.msra.gmra.mrb[0].mxu0 %v14077_v19  ;;  %10598 = vmatmul.mubr.bf16.vlgmr.msra.gmra.mrb[0].mxu1 %v14077_v19  ;;  %v1052_v19 = vld [vmem:[%s14205_s27 + $0x1a40] sm:$0xff]  ;;  %v1105_v6 = vld [vmem:[%s14205_s27 + $0x1be8] sm:$0xff] }
 0x19c   : > { %10050 = vmatpush1.bf16.msra.mxu0 %v13000_v22  ;;  %10609 = vmatpush1.bf16.msra.mxu1 %v13002_v23  ;;  %v1057_v22 = vld [vmem:[%s14205_s27 + $0x1a68] sm:$0xff]  ;;  %v13064_v23 = vcombine.low %v1044_v11, %v1048_v12  ;;  %v1108_v11 = vld [vmem:[%s14205_s27 + $0x1c00] sm:$0xff] }
 0x19d   : > { %10051 = vmatprep.subr.bf16.mxu0 %v13009_v24  ;;  %10610 = vmatprep.subr.bf16.mxu1 %v13011_v25  ;;  %v13066_v24 = vcombine.low %v1045_v13, %v1049_v14  ;;  %v13073_v25 = vcombine.high %v1052_v19, %v1056_v20  ;;  %v13075_v26 = vcombine.high %v1053_v21, %v1057_v22  ;;  %v1112_v12 = vld [vmem:[%s14205_s27 + $0x1c20] sm:$0xff]  ;;  %v1109_v13 = vld [vmem:[%s14205_s27 + $0x1c08] sm:$0xff] }
 0x19e   : > { %10081 = vmatprep.mubr.bf16.mxu0 %v14078_v28  ;;  %10640 = vmatprep.mubr.bf16.mxu1 %v14078_v28  ;;  %v1064_v28 = vld [vmem:[%s14205_s27 + $0x1aa0] sm:$0xff]  ;;  %v1113_v14 = vld [vmem:[%s14205_s27 + $0x1c28] sm:$0xff] }
 0x1a0   : > { %10052 = vmatpush1.bf16.msra.mxu0 %v13008_v31  ;;  %10611 = vmatpush1.bf16.msra.mxu1 %v13010_v32  ;;  %v13072_v31 = vcombine.low %v1052_v19, %v1056_v20  ;;  %v13074_v32 = vcombine.low %v1053_v21, %v1057_v22  ;;  %v1116_v19 = vld [vmem:[%s14205_s27 + $0x1c40] sm:$0xff]  ;;  %v14080_v21 = vld [vmem:[%s15996_s0 + $0x30] ss:$100 sps:$4 sm:$0xff]   ;;  %v1117_v22 = vld [vmem:[%s14205_s27 + $0x1c48] sm:$0xff] }
 0x1a1   : > { %10053 = vmatprep.subr.bf16.mxu0 %v13017_v33  ;;  %10612 = vmatprep.subr.bf16.mxu1 %v13019_v34  ;;  %v13081_v33 = vcombine.high %v1060_v27, %v1064_v28  ;;  %v13083_v34 = vcombine.high %v1061_v29, %v1065_v30  ;;  %v1120_v20 = vld [vmem:[%s14205_s27 + $0x1c60] sm:$0xff] }
 0x1a4   : > { %10054 = vmatpush1.bf16.msra.mxu0 %v13016_v39  ;;  %10613 = vmatpush1.bf16.msra.mxu1 %v13018_v40  ;;  %v13080_v39 = vcombine.low %v1060_v27, %v1064_v28  ;;  %v13082_v40 = vcombine.low %v1061_v29, %v1065_v30  ;;  %v1124_v28 = vld [vmem:[%s14205_s27 + $0x1c80] sm:$0xff] }
 0x1a5   : > { %10055 = vmatprep.subr.bf16.mxu0 %v13025_v41  ;;  %10614 = vmatprep.subr.bf16.mxu1 %v13027_v42  ;;  %v13089_v41 = vcombine.high %v1068_v35, %v1072_v36  ;;  %v13091_v42 = vcombine.high %v1069_v37, %v1073_v38  ;;  %v1128_v29 = vld [vmem:[%s14205_s27 + $0x1ca0] sm:$0xff] }
 0x1a6   : > { %v14081_v30 = vld [vmem:[%s15996_s0 + $0x3c] ss:$100 sps:$4 sm:$0xff]  }
 0x1a8   : > { %10056 = vmatpush1.bf16.msra.mxu0 %v13024_v47  ;;  %10615 = vmatpush1.bf16.msra.mxu1 %v13026_v48  ;;  %v13088_v47 = vcombine.low %v1068_v35, %v1072_v36  ;;  %v13090_v48 = vcombine.low %v1069_v37, %v1073_v38  ;;  %v13145_v35 = vcombine.high %v1124_v28, %v1128_v29  ;;  %v1132_v37 = vld [vmem:[%s14205_s27 + $0x1cc0] sm:$0xff] }
 0x1a9   : > { %10057 = vmatprep.subr.bf16.mxu0 %v13033_v49  ;;  %10616 = vmatprep.subr.bf16.mxu1 %v13035_v50  ;;  %v13097_v49 = vcombine.high %v1076_v43, %v1080_v44  ;;  %v13099_v50 = vcombine.high %v1077_v45, %v1081_v46  ;;  %v1136_v38 = vld [vmem:[%s14205_s27 + $0x1ce0] sm:$0xff] }
 0x1ac   : > { %10058 = vmatpush1.bf16.msra.mxu0 %v13032_v55  ;;  %10617 = vmatpush1.bf16.msra.mxu1 %v13034_v56  ;;  %v13096_v55 = vcombine.low %v1076_v43, %v1080_v44  ;;  %v13098_v56 = vcombine.low %v1077_v45, %v1081_v46  ;;  %v13153_v43 = vcombine.high %v1132_v37, %v1136_v38  ;;  %v1140_v45 = vld [vmem:[%s14205_s27 + $0x1d00] sm:$0xff] }
 0x1ad   : > { %10059 = vmatprep.subr.bf16.mxu0 %v13041_v57  ;;  %10618 = vmatprep.subr.bf16.mxu1 %v13043_v58  ;;  %v13105_v57 = vcombine.high %v1084_v51, %v1088_v52  ;;  %v13107_v58 = vcombine.high %v1085_v53, %v1089_v54  ;;  %v1144_v46 = vld [vmem:[%s14205_s27 + $0x1d20] sm:$0xff] }
 0x1b0   : > { %10060 = vmatpush1.bf16.msra.mxu0 %v13040_v63  ;;  %10619 = vmatpush1.bf16.msra.mxu1 %v13042_v0  ;;  %v13104_v63 = vcombine.low %v1084_v51, %v1088_v52  ;;  %v13106_v0 = vcombine.low %v1085_v53, %v1089_v54  ;;  %v13161_v51 = vcombine.high %v1140_v45, %v1144_v46  ;;  %v1148_v53 = vld [vmem:[%s14205_s27 + $0x1d40] sm:$0xff] }
 0x1b1   : > { %10061 = vmatprep.subr.bf16.mxu0 %v13049_v1  ;;  %10620 = vmatprep.subr.bf16.mxu1 %v13051_v2  ;;  %v13113_v1 = vcombine.high %v1092_v59, %v1096_v60  ;;  %v13115_v2 = vcombine.high %v1093_v61, %v1097_v62  ;;  %v1152_v54 = vld [vmem:[%s14205_s27 + $0x1d60] sm:$0xff] }
 0x1b4   : > { %10062 = vmatpush1.bf16.msra.mxu0 %v13048_v7  ;;  %10621 = vmatpush1.bf16.msra.mxu1 %v13050_v8  ;;  %v13112_v7 = vcombine.low %v1092_v59, %v1096_v60  ;;  %v13114_v8 = vcombine.low %v1093_v61, %v1097_v62  ;;  %v13169_v59 = vcombine.high %v1148_v53, %v1152_v54  ;;  %v1156_v61 = vld [vmem:[%s14205_s27 + $0x1d80] sm:$0xff] }
 0x1b5   : > { %10063 = vmatprep.subr.bf16.mxu0 %v13057_v9  ;;  %10622 = vmatprep.subr.bf16.mxu1 %v13059_v10  ;;  %v13121_v9 = vcombine.high %v1100_v3, %v1104_v4  ;;  %v13123_v10 = vcombine.high %v1101_v5, %v1105_v6  ;;  %v1160_v62 = vld [vmem:[%s14205_s27 + $0x1da0] sm:$0xff] }
 0x1b8   : > { %10064 = vmatpush1.bf16.msra.mxu0 %v13056_v15  ;;  %10623 = vmatpush1.bf16.msra.mxu1 %v13058_v16  ;;  %v13120_v15 = vcombine.low %v1100_v3, %v1104_v4  ;;  %v13122_v16 = vcombine.low %v1101_v5, %v1105_v6  ;;  %v13177_v3 = vcombine.high %v1156_v61, %v1160_v62  ;;  %v1164_v5 = vld [vmem:[%s14205_s27 + $0x1dc0] sm:$0xff] }
 0x1b9   : > { %10065 = vmatprep.subr.bf16.mxu0 %v13065_v17  ;;  %10624 = vmatprep.subr.bf16.mxu1 %v13067_v18  ;;  %v13129_v17 = vcombine.high %v1108_v11, %v1112_v12  ;;  %v13131_v18 = vcombine.high %v1109_v13, %v1113_v14  ;;  %v1168_v6 = vld [vmem:[%s14205_s27 + $0x1de0] sm:$0xff] }
 0x1bc   : > { %10066 = vmatpush1.bf16.msra.mxu0 %v13064_v23  ;;  %10625 = vmatpush1.bf16.msra.mxu1 %v13066_v24  ;;  %v1121_v23 = vld [vmem:[%s14205_s27 + $0x1c68] sm:$0xff]  ;;  %v13128_v24 = vcombine.low %v1108_v11, %v1112_v12  ;;  %v13185_v11 = vcombine.high %v1164_v5, %v1168_v6 }
 0x1bd   : > { %10067 = vmatprep.subr.bf16.mxu0 %v13073_v25  ;;  %10626 = vmatprep.subr.bf16.mxu1 %v13075_v26  ;;  %v13130_v25 = vcombine.low %v1109_v13, %v1113_v14  ;;  %v13137_v26 = vcombine.high %v1116_v19, %v1120_v20  ;;  %v13139_v27 = vcombine.high %v1117_v22, %v1121_v23  ;;  %v1172_v13 = vld [vmem:[%s14205_s27 + $0x1e00] sm:$0xff] }
 0x1be   : > { %v1176_v14 = vld [vmem:[%s14205_s27 + $0x1e20] sm:$0xff] }
 0x1c0   : > { %10068 = vmatpush1.bf16.msra.mxu0 %v13072_v31  ;;  %10627 = vmatpush1.bf16.msra.mxu1 %v13074_v32  ;;  %v1125_v31 = vld [vmem:[%s14205_s27 + $0x1c88] sm:$0xff] }
 0x1c1   : > { %10069 = vmatprep.subr.bf16.mxu0 %v13081_v33  ;;  %10628 = vmatprep.subr.bf16.mxu1 %v13083_v34  ;;  %v1129_v32 = vld [vmem:[%s14205_s27 + $0x1ca8] sm:$0xff]  ;;  %v13136_v33 = vcombine.low %v1116_v19, %v1120_v20  ;;  %v13138_v34 = vcombine.low %v1117_v22, %v1121_v23  ;;  %v13193_v19 = vcombine.high %v1172_v13, %v1176_v14  ;;  %v1184_v22 = vld [vmem:[%s14205_s27 + $0x1e60] sm:$0xff] }
 0x1c2   : > { %v13147_v36 = vcombine.high %v1125_v31, %v1129_v32  ;;  %v1181_v23 = vld [vmem:[%s14205_s27 + $0x1e48] sm:$0xff] }
 0x1c4   : > { %10070 = vmatpush1.bf16.msra.mxu0 %v13080_v39  ;;  %10629 = vmatpush1.bf16.msra.mxu1 %v13082_v40  ;;  %v1133_v39 = vld [vmem:[%s14205_s27 + $0x1cc8] sm:$0xff] }
 0x1c5   : > { %10071 = vmatprep.subr.bf16.mxu0 %v13089_v41  ;;  %10630 = vmatprep.subr.bf16.mxu1 %v13091_v42  ;;  %v1137_v40 = vld [vmem:[%s14205_s27 + $0x1ce8] sm:$0xff]  ;;  %v13144_v41 = vcombine.low %v1124_v28, %v1128_v29  ;;  %v13146_v42 = vcombine.low %v1125_v31, %v1129_v32  ;;  %v1188_v29 = vld [vmem:[%s14205_s27 + $0x1e80] sm:$0xff] }
 0x1c6   : > { %v13155_v44 = vcombine.high %v1133_v39, %v1137_v40  ;;  %v1189_v31 = vld [vmem:[%s14205_s27 + $0x1e88] sm:$0xff] }
 0x1c7   : > { %v1193_v32 = vld [vmem:[%s14205_s27 + $0x1ea8] sm:$0xff] }
 0x1c8   : > { %10072 = vmatpush1.bf16.msra.mxu0 %v13088_v47  ;;  %10631 = vmatpush1.bf16.msra.mxu1 %v13090_v48  ;;  %v1141_v47 = vld [vmem:[%s14205_s27 + $0x1d08] sm:$0xff] }
 0x1c9   : > { %10073 = vmatprep.subr.bf16.mxu0 %v13097_v49  ;;  %10632 = vmatprep.subr.bf16.mxu1 %v13099_v50  ;;  %v1145_v48 = vld [vmem:[%s14205_s27 + $0x1d28] sm:$0xff]  ;;  %v13152_v49 = vcombine.low %v1132_v37, %v1136_v38  ;;  %v13154_v50 = vcombine.low %v1133_v39, %v1137_v40  ;;  %v1196_v37 = vld [vmem:[%s14205_s27 + $0x1ec0] sm:$0xff] }
 0x1ca   : > { %v13163_v52 = vcombine.high %v1141_v47, %v1145_v48  ;;  %v1200_v38 = vld [vmem:[%s14205_s27 + $0x1ee0] sm:$0xff]  ;;  %v1197_v39 = vld [vmem:[%s14205_s27 + $0x1ec8] sm:$0xff] }
 0x1cb   : > { %v1201_v40 = vld [vmem:[%s14205_s27 + $0x1ee8] sm:$0xff] }
 0x1cc   : > { %10074 = vmatpush1.bf16.msra.mxu0 %v13096_v55  ;;  %10633 = vmatpush1.bf16.msra.mxu1 %v13098_v56  ;;  %v1149_v55 = vld [vmem:[%s14205_s27 + $0x1d48] sm:$0xff] }
 0x1cd   : > { %10075 = vmatprep.subr.bf16.mxu0 %v13105_v57  ;;  %10634 = vmatprep.subr.bf16.mxu1 %v13107_v58  ;;  %v1153_v56 = vld [vmem:[%s14205_s27 + $0x1d68] sm:$0xff]  ;;  %v13160_v57 = vcombine.low %v1140_v45, %v1144_v46  ;;  %v13162_v58 = vcombine.low %v1141_v47, %v1145_v48  ;;  %v1204_v45 = vld [vmem:[%s14205_s27 + $0x1f00] sm:$0xff] }
 0x1ce   : > { %v13171_v60 = vcombine.high %v1149_v55, %v1153_v56  ;;  %v1208_v46 = vld [vmem:[%s14205_s27 + $0x1f20] sm:$0xff]  ;;  %v1205_v47 = vld [vmem:[%s14205_s27 + $0x1f08] sm:$0xff] }
 0x1cf   : > { %v1209_v48 = vld [vmem:[%s14205_s27 + $0x1f28] sm:$0xff] }
 0x1d0   : > { %10076 = vmatpush1.bf16.msra.mxu0 %v13104_v63  ;;  %10635 = vmatpush1.bf16.msra.mxu1 %v13106_v0  ;;  %v1157_v63 = vld [vmem:[%s14205_s27 + $0x1d88] sm:$0xff] }
 0x1d1   : > { %10077 = vmatprep.subr.bf16.mxu0 %v13113_v1  ;;  %10636 = vmatprep.subr.bf16.mxu1 %v13115_v2  ;;  %v1161_v0 = vld [vmem:[%s14205_s27 + $0x1da8] sm:$0xff]  ;;  %v13168_v1 = vcombine.low %v1148_v53, %v1152_v54  ;;  %v13170_v2 = vcombine.low %v1149_v55, %v1153_v56  ;;  %v1212_v53 = vld [vmem:[%s14205_s27 + $0x1f40] sm:$0xff] }
 0x1d2   : > { %v13179_v4 = vcombine.high %v1157_v63, %v1161_v0  ;;  %v1216_v54 = vld [vmem:[%s14205_s27 + $0x1f60] sm:$0xff]  ;;  %v1213_v55 = vld [vmem:[%s14205_s27 + $0x1f48] sm:$0xff] }
 0x1d3   : > { %v1217_v56 = vld [vmem:[%s14205_s27 + $0x1f68] sm:$0xff] }
 0x1d4   : > { %10078 = vmatpush1.bf16.msra.mxu0 %v13112_v7  ;;  %10637 = vmatpush1.bf16.msra.mxu1 %v13114_v8  ;;  %v1165_v7 = vld [vmem:[%s14205_s27 + $0x1dc8] sm:$0xff] }
 0x1d5   : > { %10079 = vmatprep.subr.bf16.mxu0 %v13121_v9  ;;  %10638 = vmatprep.subr.bf16.mxu1 %v13123_v10  ;;  %v1169_v8 = vld [vmem:[%s14205_s27 + $0x1de8] sm:$0xff]  ;;  %v13176_v9 = vcombine.low %v1156_v61, %v1160_v62  ;;  %v13178_v10 = vcombine.low %v1157_v63, %v1161_v0  ;;  %v1220_v61 = vld [vmem:[%s14205_s27 + $0x1f80] sm:$0xff] }
 0x1d6   : > { %v13187_v12 = vcombine.high %v1165_v7, %v1169_v8  ;;  %v1224_v62 = vld [vmem:[%s14205_s27 + $0x1fa0] sm:$0xff]  ;;  %v1221_v63 = vld [vmem:[%s14205_s27 + $0x1f88] sm:$0xff] }
 0x1d7   : > { %v1225_v0 = vld [vmem:[%s14205_s27 + $0x1fa8] sm:$0xff] }
 0x1d8   : > { %10080 = vmatpush1.bf16.msra.mxu0 %v13120_v15  ;;  %10639 = vmatpush1.bf16.msra.mxu1 %v13122_v16  ;;  %v1173_v15 = vld [vmem:[%s14205_s27 + $0x1e08] sm:$0xff] }
 0x1d9   : > { %10092 = vmatprep.subr.bf16.mxu0 %v13129_v17  ;;  %10651 = vmatprep.subr.bf16.mxu1 %v13131_v18  ;;  %v1177_v16 = vld [vmem:[%s14205_s27 + $0x1e28] sm:$0xff]  ;;  %v13184_v17 = vcombine.low %v1164_v5, %v1168_v6  ;;  %v13186_v18 = vcombine.low %v1165_v7, %v1169_v8  ;;  %v1228_v5 = vld [vmem:[%s14205_s27 + $0x1fc0] sm:$0xff] }
 0x1da   : > { %v13195_v20 = vcombine.high %v1173_v15, %v1177_v16  ;;  %v1232_v6 = vld [vmem:[%s14205_s27 + $0x1fe0] sm:$0xff]  ;;  %v1229_v7 = vld [vmem:[%s14205_s27 + $0x1fc8] sm:$0xff] }
 0x1db   : > { %10082 = vmatmul.mubr.bf16.vlgmr.msra.gmra.mrb[0].mxu0 %v14080_v21  ;;  %10641 = vmatmul.mubr.bf16.vlgmr.msra.gmra.mrb[0].mxu1 %v14080_v21  ;;  %v1180_v21 = vld [vmem:[%s14205_s27 + $0x1e40] sm:$0xff]  ;;  %v1233_v8 = vld [vmem:[%s14205_s27 + $0x1fe8] sm:$0xff] }
 0x1dc   : > { %10093 = vmatpush1.bf16.msra.mxu0 %v13128_v24  ;;  %10652 = vmatpush1.bf16.msra.mxu1 %v13130_v25  ;;  %v1185_v24 = vld [vmem:[%s14205_s27 + $0x1e68] sm:$0xff]  ;;  %v13192_v25 = vcombine.low %v1172_v13, %v1176_v14  ;;  %v1236_v13 = vld [vmem:[%s14205_s27 + $0x2000] sm:$0xff] }
 0x1dd   : > { %10094 = vmatprep.subr.bf16.mxu0 %v13137_v26  ;;  %10653 = vmatprep.subr.bf16.mxu1 %v13139_v27  ;;  %v13194_v26 = vcombine.low %v1173_v15, %v1177_v16  ;;  %v13201_v27 = vcombine.high %v1180_v21, %v1184_v22  ;;  %v13203_v28 = vcombine.high %v1181_v23, %v1185_v24  ;;  %v1240_v14 = vld [vmem:[%s14205_s27 + $0x2020] sm:$0xff]  ;;  %v1237_v15 = vld [vmem:[%s14205_s27 + $0x2008] sm:$0xff] }
 0x1de   : > { %10124 = vmatprep.mubr.bf16.mxu0 %v14081_v30  ;;  %10683 = vmatprep.mubr.bf16.mxu1 %v14081_v30  ;;  %v1192_v30 = vld [vmem:[%s14205_s27 + $0x1ea0] sm:$0xff]  ;;  %v1241_v16 = vld [vmem:[%s14205_s27 + $0x2028] sm:$0xff] }
 0x1e0   : > { %10095 = vmatpush1.bf16.msra.mxu0 %v13136_v33  ;;  %10654 = vmatpush1.bf16.msra.mxu1 %v13138_v34  ;;  %v13200_v33 = vcombine.low %v1180_v21, %v1184_v22  ;;  %v13202_v34 = vcombine.low %v1181_v23, %v1185_v24  ;;  %v1244_v21 = vld [vmem:[%s14205_s27 + $0x2040] sm:$0xff]  ;;  %v14083_v23 = vld [vmem:[%s15996_s0 + $0x38] ss:$100 sps:$4 sm:$0xff]   ;;  %v1245_v24 = vld [vmem:[%s14205_s27 + $0x2048] sm:$0xff] }
 0x1e1   : > { %10096 = vmatprep.subr.bf16.mxu0 %v13145_v35  ;;  %10655 = vmatprep.subr.bf16.mxu1 %v13147_v36  ;;  %v13209_v35 = vcombine.high %v1188_v29, %v1192_v30  ;;  %v13211_v36 = vcombine.high %v1189_v31, %v1193_v32  ;;  %v1248_v22 = vld [vmem:[%s14205_s27 + $0x2060] sm:$0xff] }
 0x1e4   : > { %10097 = vmatpush1.bf16.msra.mxu0 %v13144_v41  ;;  %10656 = vmatpush1.bf16.msra.mxu1 %v13146_v42  ;;  %v13208_v41 = vcombine.low %v1188_v29, %v1192_v30  ;;  %v13210_v42 = vcombine.low %v1189_v31, %v1193_v32  ;;  %v1252_v30 = vld [vmem:[%s14205_s27 + $0x2080] sm:$0xff] }
 0x1e5   : > { %10098 = vmatprep.subr.bf16.mxu0 %v13153_v43  ;;  %10657 = vmatprep.subr.bf16.mxu1 %v13155_v44  ;;  %v13217_v43 = vcombine.high %v1196_v37, %v1200_v38  ;;  %v13219_v44 = vcombine.high %v1197_v39, %v1201_v40  ;;  %v1256_v31 = vld [vmem:[%s14205_s27 + $0x20a0] sm:$0xff] }
 0x1e6   : > { %v14084_v32 = vld [vmem:[%s15996_s0 + $0x44] ss:$100 sps:$4 sm:$0xff]  }
 0x1e8   : > { %10099 = vmatpush1.bf16.msra.mxu0 %v13152_v49  ;;  %10658 = vmatpush1.bf16.msra.mxu1 %v13154_v50  ;;  %v13216_v49 = vcombine.low %v1196_v37, %v1200_v38  ;;  %v13218_v50 = vcombine.low %v1197_v39, %v1201_v40  ;;  %v13273_v37 = vcombine.high %v1252_v30, %v1256_v31  ;;  %v1260_v39 = vld [vmem:[%s14205_s27 + $0x20c0] sm:$0xff] }
 0x1e9   : > { %10100 = vmatprep.subr.bf16.mxu0 %v13161_v51  ;;  %10659 = vmatprep.subr.bf16.mxu1 %v13163_v52  ;;  %v13225_v51 = vcombine.high %v1204_v45, %v1208_v46  ;;  %v13227_v52 = vcombine.high %v1205_v47, %v1209_v48  ;;  %v1264_v40 = vld [vmem:[%s14205_s27 + $0x20e0] sm:$0xff] }
 0x1ec   : > { %10101 = vmatpush1.bf16.msra.mxu0 %v13160_v57  ;;  %10660 = vmatpush1.bf16.msra.mxu1 %v13162_v58  ;;  %v13224_v57 = vcombine.low %v1204_v45, %v1208_v46  ;;  %v13226_v58 = vcombine.low %v1205_v47, %v1209_v48  ;;  %v13281_v45 = vcombine.high %v1260_v39, %v1264_v40  ;;  %v1268_v47 = vld [vmem:[%s14205_s27 + $0x2100] sm:$0xff] }
 0x1ed   : > { %10102 = vmatprep.subr.bf16.mxu0 %v13169_v59  ;;  %10661 = vmatprep.subr.bf16.mxu1 %v13171_v60  ;;  %v13233_v59 = vcombine.high %v1212_v53, %v1216_v54  ;;  %v13235_v60 = vcombine.high %v1213_v55, %v1217_v56  ;;  %v1272_v48 = vld [vmem:[%s14205_s27 + $0x2120] sm:$0xff] }
 0x1f0   : > { %10103 = vmatpush1.bf16.msra.mxu0 %v13168_v1  ;;  %10662 = vmatpush1.bf16.msra.mxu1 %v13170_v2  ;;  %v13232_v1 = vcombine.low %v1212_v53, %v1216_v54  ;;  %v13234_v2 = vcombine.low %v1213_v55, %v1217_v56  ;;  %v13289_v53 = vcombine.high %v1268_v47, %v1272_v48  ;;  %v1276_v55 = vld [vmem:[%s14205_s27 + $0x2140] sm:$0xff] }
 0x1f1   : > { %10104 = vmatprep.subr.bf16.mxu0 %v13177_v3  ;;  %10663 = vmatprep.subr.bf16.mxu1 %v13179_v4  ;;  %v13241_v3 = vcombine.high %v1220_v61, %v1224_v62  ;;  %v13243_v4 = vcombine.high %v1221_v63, %v1225_v0  ;;  %v1280_v56 = vld [vmem:[%s14205_s27 + $0x2160] sm:$0xff] }
 0x1f4   : > { %10105 = vmatpush1.bf16.msra.mxu0 %v13176_v9  ;;  %10664 = vmatpush1.bf16.msra.mxu1 %v13178_v10  ;;  %v13240_v9 = vcombine.low %v1220_v61, %v1224_v62  ;;  %v13242_v10 = vcombine.low %v1221_v63, %v1225_v0  ;;  %v13297_v61 = vcombine.high %v1276_v55, %v1280_v56  ;;  %v1284_v63 = vld [vmem:[%s14205_s27 + $0x2180] sm:$0xff] }
 0x1f5   : > { %10106 = vmatprep.subr.bf16.mxu0 %v13185_v11  ;;  %10665 = vmatprep.subr.bf16.mxu1 %v13187_v12  ;;  %v13249_v11 = vcombine.high %v1228_v5, %v1232_v6  ;;  %v13251_v12 = vcombine.high %v1229_v7, %v1233_v8  ;;  %v1288_v0 = vld [vmem:[%s14205_s27 + $0x21a0] sm:$0xff] }
 0x1f8   : > { %10107 = vmatpush1.bf16.msra.mxu0 %v13184_v17  ;;  %10666 = vmatpush1.bf16.msra.mxu1 %v13186_v18  ;;  %v13248_v17 = vcombine.low %v1228_v5, %v1232_v6  ;;  %v13250_v18 = vcombine.low %v1229_v7, %v1233_v8  ;;  %v13305_v5 = vcombine.high %v1284_v63, %v1288_v0  ;;  %v1292_v7 = vld [vmem:[%s14205_s27 + $0x21c0] sm:$0xff] }
 0x1f9   : > { %10108 = vmatprep.subr.bf16.mxu0 %v13193_v19  ;;  %10667 = vmatprep.subr.bf16.mxu1 %v13195_v20  ;;  %v13257_v19 = vcombine.high %v1236_v13, %v1240_v14  ;;  %v13259_v20 = vcombine.high %v1237_v15, %v1241_v16  ;;  %v1296_v8 = vld [vmem:[%s14205_s27 + $0x21e0] sm:$0xff] }
 0x1fc   : > { %10109 = vmatpush1.bf16.msra.mxu0 %v13192_v25  ;;  %10668 = vmatpush1.bf16.msra.mxu1 %v13194_v26  ;;  %v1249_v25 = vld [vmem:[%s14205_s27 + $0x2068] sm:$0xff]  ;;  %v13256_v26 = vcombine.low %v1236_v13, %v1240_v14  ;;  %v13313_v13 = vcombine.high %v1292_v7, %v1296_v8 }
 0x1fd   : > { %10110 = vmatprep.subr.bf16.mxu0 %v13201_v27  ;;  %10669 = vmatprep.subr.bf16.mxu1 %v13203_v28  ;;  %v13258_v27 = vcombine.low %v1237_v15, %v1241_v16  ;;  %v13265_v28 = vcombine.high %v1244_v21, %v1248_v22  ;;  %v13267_v29 = vcombine.high %v1245_v24, %v1249_v25  ;;  %v1300_v15 = vld [vmem:[%s14205_s27 + $0x2200] sm:$0xff] }
 0x1fe   : > { %v1304_v16 = vld [vmem:[%s14205_s27 + $0x2220] sm:$0xff] }
 0x200   : > { %10111 = vmatpush1.bf16.msra.mxu0 %v13200_v33  ;;  %10670 = vmatpush1.bf16.msra.mxu1 %v13202_v34  ;;  %v1253_v33 = vld [vmem:[%s14205_s27 + $0x2088] sm:$0xff] }
 0x201   : > { %10112 = vmatprep.subr.bf16.mxu0 %v13209_v35  ;;  %10671 = vmatprep.subr.bf16.mxu1 %v13211_v36  ;;  %v1257_v34 = vld [vmem:[%s14205_s27 + $0x20a8] sm:$0xff]  ;;  %v13264_v35 = vcombine.low %v1244_v21, %v1248_v22  ;;  %v13266_v36 = vcombine.low %v1245_v24, %v1249_v25  ;;  %v13321_v21 = vcombine.high %v1300_v15, %v1304_v16  ;;  %v1312_v24 = vld [vmem:[%s14205_s27 + $0x2260] sm:$0xff] }
 0x202   : > { %v13275_v38 = vcombine.high %v1253_v33, %v1257_v34  ;;  %v1309_v25 = vld [vmem:[%s14205_s27 + $0x2248] sm:$0xff] }
 0x204   : > { %10113 = vmatpush1.bf16.msra.mxu0 %v13208_v41  ;;  %10672 = vmatpush1.bf16.msra.mxu1 %v13210_v42  ;;  %v1261_v41 = vld [vmem:[%s14205_s27 + $0x20c8] sm:$0xff] }
 0x205   : > { %10114 = vmatprep.subr.bf16.mxu0 %v13217_v43  ;;  %10673 = vmatprep.subr.bf16.mxu1 %v13219_v44  ;;  %v1265_v42 = vld [vmem:[%s14205_s27 + $0x20e8] sm:$0xff]  ;;  %v13272_v43 = vcombine.low %v1252_v30, %v1256_v31  ;;  %v13274_v44 = vcombine.low %v1253_v33, %v1257_v34  ;;  %v1316_v31 = vld [vmem:[%s14205_s27 + $0x2280] sm:$0xff] }
 0x206   : > { %v13283_v46 = vcombine.high %v1261_v41, %v1265_v42  ;;  %v1317_v33 = vld [vmem:[%s14205_s27 + $0x2288] sm:$0xff] }
 0x207   : > { %v1321_v34 = vld [vmem:[%s14205_s27 + $0x22a8] sm:$0xff] }
 0x208   : > { %10115 = vmatpush1.bf16.msra.mxu0 %v13216_v49  ;;  %10674 = vmatpush1.bf16.msra.mxu1 %v13218_v50  ;;  %v1269_v49 = vld [vmem:[%s14205_s27 + $0x2108] sm:$0xff] }
 0x209   : > { %10116 = vmatprep.subr.bf16.mxu0 %v13225_v51  ;;  %10675 = vmatprep.subr.bf16.mxu1 %v13227_v52  ;;  %v1273_v50 = vld [vmem:[%s14205_s27 + $0x2128] sm:$0xff]  ;;  %v13280_v51 = vcombine.low %v1260_v39, %v1264_v40  ;;  %v13282_v52 = vcombine.low %v1261_v41, %v1265_v42  ;;  %v1324_v39 = vld [vmem:[%s14205_s27 + $0x22c0] sm:$0xff] }
 0x20a   : > { %v13291_v54 = vcombine.high %v1269_v49, %v1273_v50  ;;  %v1328_v40 = vld [vmem:[%s14205_s27 + $0x22e0] sm:$0xff]  ;;  %v1325_v41 = vld [vmem:[%s14205_s27 + $0x22c8] sm:$0xff] }
 0x20b   : > { %v1329_v42 = vld [vmem:[%s14205_s27 + $0x22e8] sm:$0xff] }
 0x20c   : > { %10117 = vmatpush1.bf16.msra.mxu0 %v13224_v57  ;;  %10676 = vmatpush1.bf16.msra.mxu1 %v13226_v58  ;;  %v1277_v57 = vld [vmem:[%s14205_s27 + $0x2148] sm:$0xff] }
 0x20d   : > { %10118 = vmatprep.subr.bf16.mxu0 %v13233_v59  ;;  %10677 = vmatprep.subr.bf16.mxu1 %v13235_v60  ;;  %v1281_v58 = vld [vmem:[%s14205_s27 + $0x2168] sm:$0xff]  ;;  %v13288_v59 = vcombine.low %v1268_v47, %v1272_v48  ;;  %v13290_v60 = vcombine.low %v1269_v49, %v1273_v50  ;;  %v1332_v47 = vld [vmem:[%s14205_s27 + $0x2300] sm:$0xff] }
 0x20e   : > { %v13299_v62 = vcombine.high %v1277_v57, %v1281_v58  ;;  %v1336_v48 = vld [vmem:[%s14205_s27 + $0x2320] sm:$0xff]  ;;  %v1333_v49 = vld [vmem:[%s14205_s27 + $0x2308] sm:$0xff] }
 0x20f   : > { %v1337_v50 = vld [vmem:[%s14205_s27 + $0x2328] sm:$0xff] }
 0x210   : > { %10119 = vmatpush1.bf16.msra.mxu0 %v13232_v1  ;;  %10678 = vmatpush1.bf16.msra.mxu1 %v13234_v2  ;;  %v1285_v1 = vld [vmem:[%s14205_s27 + $0x2188] sm:$0xff] }
 0x211   : > { %10120 = vmatprep.subr.bf16.mxu0 %v13241_v3  ;;  %10679 = vmatprep.subr.bf16.mxu1 %v13243_v4  ;;  %v1289_v2 = vld [vmem:[%s14205_s27 + $0x21a8] sm:$0xff]  ;;  %v13296_v3 = vcombine.low %v1276_v55, %v1280_v56  ;;  %v13298_v4 = vcombine.low %v1277_v57, %v1281_v58  ;;  %v1340_v55 = vld [vmem:[%s14205_s27 + $0x2340] sm:$0xff] }
 0x212   : > { %v13307_v6 = vcombine.high %v1285_v1, %v1289_v2  ;;  %v1344_v56 = vld [vmem:[%s14205_s27 + $0x2360] sm:$0xff]  ;;  %v1341_v57 = vld [vmem:[%s14205_s27 + $0x2348] sm:$0xff] }
 0x213   : > { %v1345_v58 = vld [vmem:[%s14205_s27 + $0x2368] sm:$0xff] }
 0x214   : > { %10121 = vmatpush1.bf16.msra.mxu0 %v13240_v9  ;;  %10680 = vmatpush1.bf16.msra.mxu1 %v13242_v10  ;;  %v1293_v9 = vld [vmem:[%s14205_s27 + $0x21c8] sm:$0xff] }
 0x215   : > { %10122 = vmatprep.subr.bf16.mxu0 %v13249_v11  ;;  %10681 = vmatprep.subr.bf16.mxu1 %v13251_v12  ;;  %v1297_v10 = vld [vmem:[%s14205_s27 + $0x21e8] sm:$0xff]  ;;  %v13304_v11 = vcombine.low %v1284_v63, %v1288_v0  ;;  %v13306_v12 = vcombine.low %v1285_v1, %v1289_v2  ;;  %v1348_v63 = vld [vmem:[%s14205_s27 + $0x2380] sm:$0xff] }
 0x216   : > { %v13315_v14 = vcombine.high %v1293_v9, %v1297_v10  ;;  %v1352_v0 = vld [vmem:[%s14205_s27 + $0x23a0] sm:$0xff]  ;;  %v1349_v1 = vld [vmem:[%s14205_s27 + $0x2388] sm:$0xff] }
 0x217   : > { %v1353_v2 = vld [vmem:[%s14205_s27 + $0x23a8] sm:$0xff] }
 0x218   : > { %10123 = vmatpush1.bf16.msra.mxu0 %v13248_v17  ;;  %10682 = vmatpush1.bf16.msra.mxu1 %v13250_v18  ;;  %v1301_v17 = vld [vmem:[%s14205_s27 + $0x2208] sm:$0xff] }
 0x219   : > { %10135 = vmatprep.subr.bf16.mxu0 %v13257_v19  ;;  %10694 = vmatprep.subr.bf16.mxu1 %v13259_v20  ;;  %v1305_v18 = vld [vmem:[%s14205_s27 + $0x2228] sm:$0xff]  ;;  %v13312_v19 = vcombine.low %v1292_v7, %v1296_v8  ;;  %v13314_v20 = vcombine.low %v1293_v9, %v1297_v10  ;;  %v1356_v7 = vld [vmem:[%s14205_s27 + $0x23c0] sm:$0xff] }
 0x21a   : > { %v13323_v22 = vcombine.high %v1301_v17, %v1305_v18  ;;  %v1360_v8 = vld [vmem:[%s14205_s27 + $0x23e0] sm:$0xff]  ;;  %v1357_v9 = vld [vmem:[%s14205_s27 + $0x23c8] sm:$0xff] }
 0x21b   : > { %10125 = vmatmul.mubr.bf16.vlgmr.msra.gmra.mrb[0].mxu0 %v14083_v23  ;;  %10684 = vmatmul.mubr.bf16.vlgmr.msra.gmra.mrb[0].mxu1 %v14083_v23  ;;  %v1308_v23 = vld [vmem:[%s14205_s27 + $0x2240] sm:$0xff]  ;;  %v1361_v10 = vld [vmem:[%s14205_s27 + $0x23e8] sm:$0xff] }
 0x21c   : > { %10136 = vmatpush1.bf16.msra.mxu0 %v13256_v26  ;;  %10695 = vmatpush1.bf16.msra.mxu1 %v13258_v27  ;;  %v1313_v26 = vld [vmem:[%s14205_s27 + $0x2268] sm:$0xff]  ;;  %v13320_v27 = vcombine.low %v1300_v15, %v1304_v16  ;;  %v1364_v15 = vld [vmem:[%s14205_s27 + $0x2400] sm:$0xff] }
 0x21d   : > { %10137 = vmatprep.subr.bf16.mxu0 %v13265_v28  ;;  %10696 = vmatprep.subr.bf16.mxu1 %v13267_v29  ;;  %v13322_v28 = vcombine.low %v1301_v17, %v1305_v18  ;;  %v13329_v29 = vcombine.high %v1308_v23, %v1312_v24  ;;  %v13331_v30 = vcombine.high %v1309_v25, %v1313_v26  ;;  %v1368_v16 = vld [vmem:[%s14205_s27 + $0x2420] sm:$0xff]  ;;  %v1365_v17 = vld [vmem:[%s14205_s27 + $0x2408] sm:$0xff] }
 0x21e   : > { %10167 = vmatprep.mubr.bf16.mxu0 %v14084_v32  ;;  %10726 = vmatprep.mubr.bf16.mxu1 %v14084_v32  ;;  %v1320_v32 = vld [vmem:[%s14205_s27 + $0x22a0] sm:$0xff]  ;;  %v1369_v18 = vld [vmem:[%s14205_s27 + $0x2428] sm:$0xff] }
 0x220   : > { %10138 = vmatpush1.bf16.msra.mxu0 %v13264_v35  ;;  %10697 = vmatpush1.bf16.msra.mxu1 %v13266_v36  ;;  %v13328_v35 = vcombine.low %v1308_v23, %v1312_v24  ;;  %v13330_v36 = vcombine.low %v1309_v25, %v1313_v26  ;;  %v1372_v23 = vld [vmem:[%s14205_s27 + $0x2440] sm:$0xff]  ;;  %v1373_v26 = vld [vmem:[%s14205_s27 + $0x2448] sm:$0xff] }
 0x221   : > { %10139 = vmatprep.subr.bf16.mxu0 %v13273_v37  ;;  %10698 = vmatprep.subr.bf16.mxu1 %v13275_v38  ;;  %v13337_v37 = vcombine.high %v1316_v31, %v1320_v32  ;;  %v13339_v38 = vcombine.high %v1317_v33, %v1321_v34  ;;  %v1376_v24 = vld [vmem:[%s14205_s27 + $0x2460] sm:$0xff] }
 0x222   : > { %v14086_v25 = vld [vmem:[%s15996_s0 + $0x40] ss:$100 sps:$4 sm:$0xff]  }
 0x224   : > { %10140 = vmatpush1.bf16.msra.mxu0 %v13272_v43  ;;  %10699 = vmatpush1.bf16.msra.mxu1 %v13274_v44  ;;  %v13336_v43 = vcombine.low %v1316_v31, %v1320_v32  ;;  %v13338_v44 = vcombine.low %v1317_v33, %v1321_v34  ;;  %v1380_v32 = vld [vmem:[%s14205_s27 + $0x2480] sm:$0xff]  ;;  %v14087_v34 = vld [vmem:[%s15996_s0 + $0x4c] ss:$100 sps:$4 sm:$0xff]  }
 0x225   : > { %10141 = vmatprep.subr.bf16.mxu0 %v13281_v45  ;;  %10700 = vmatprep.subr.bf16.mxu1 %v13283_v46  ;;  %v13345_v45 = vcombine.high %v1324_v39, %v1328_v40  ;;  %v13347_v46 = vcombine.high %v1325_v41, %v1329_v42  ;;  %v1384_v33 = vld [vmem:[%s14205_s27 + $0x24a0] sm:$0xff] }
 0x228   : > { %10142 = vmatpush1.bf16.msra.mxu0 %v13280_v51  ;;  %10701 = vmatpush1.bf16.msra.mxu1 %v13282_v52  ;;  %v13344_v51 = vcombine.low %v1324_v39, %v1328_v40  ;;  %v13346_v52 = vcombine.low %v1325_v41, %v1329_v42  ;;  %v13401_v39 = vcombine.high %v1380_v32, %v1384_v33  ;;  %v1388_v41 = vld [vmem:[%s14205_s27 + $0x24c0] sm:$0xff] }
 0x229   : > { %10143 = vmatprep.subr.bf16.mxu0 %v13289_v53  ;;  %10702 = vmatprep.subr.bf16.mxu1 %v13291_v54  ;;  %v13353_v53 = vcombine.high %v1332_v47, %v1336_v48  ;;  %v13355_v54 = vcombine.high %v1333_v49, %v1337_v50  ;;  %v1392_v42 = vld [vmem:[%s14205_s27 + $0x24e0] sm:$0xff] }
 0x22c   : > { %10144 = vmatpush1.bf16.msra.mxu0 %v13288_v59  ;;  %10703 = vmatpush1.bf16.msra.mxu1 %v13290_v60  ;;  %v13352_v59 = vcombine.low %v1332_v47, %v1336_v48  ;;  %v13354_v60 = vcombine.low %v1333_v49, %v1337_v50  ;;  %v13409_v47 = vcombine.high %v1388_v41, %v1392_v42  ;;  %v1396_v49 = vld [vmem:[%s14205_s27 + $0x2500] sm:$0xff] }
 0x22d   : > { %10145 = vmatprep.subr.bf16.mxu0 %v13297_v61  ;;  %10704 = vmatprep.subr.bf16.mxu1 %v13299_v62  ;;  %v13361_v61 = vcombine.high %v1340_v55, %v1344_v56  ;;  %v13363_v62 = vcombine.high %v1341_v57, %v1345_v58  ;;  %v1400_v50 = vld [vmem:[%s14205_s27 + $0x2520] sm:$0xff] }
 0x230   : > { %10146 = vmatpush1.bf16.msra.mxu0 %v13296_v3  ;;  %10705 = vmatpush1.bf16.msra.mxu1 %v13298_v4  ;;  %v13360_v3 = vcombine.low %v1340_v55, %v1344_v56  ;;  %v13362_v4 = vcombine.low %v1341_v57, %v1345_v58  ;;  %v13417_v55 = vcombine.high %v1396_v49, %v1400_v50  ;;  %v1404_v57 = vld [vmem:[%s14205_s27 + $0x2540] sm:$0xff] }
 0x231   : > { %10147 = vmatprep.subr.bf16.mxu0 %v13305_v5  ;;  %10706 = vmatprep.subr.bf16.mxu1 %v13307_v6  ;;  %v13369_v5 = vcombine.high %v1348_v63, %v1352_v0  ;;  %v13371_v6 = vcombine.high %v1349_v1, %v1353_v2  ;;  %v1408_v58 = vld [vmem:[%s14205_s27 + $0x2560] sm:$0xff] }
 0x234   : > { %10148 = vmatpush1.bf16.msra.mxu0 %v13304_v11  ;;  %10707 = vmatpush1.bf16.msra.mxu1 %v13306_v12  ;;  %v13368_v11 = vcombine.low %v1348_v63, %v1352_v0  ;;  %v13370_v12 = vcombine.low %v1349_v1, %v1353_v2  ;;  %v13425_v63 = vcombine.high %v1404_v57, %v1408_v58  ;;  %v1412_v1 = vld [vmem:[%s14205_s27 + $0x2580] sm:$0xff] }
 0x235   : > { %10149 = vmatprep.subr.bf16.mxu0 %v13313_v13  ;;  %10708 = vmatprep.subr.bf16.mxu1 %v13315_v14  ;;  %v13377_v13 = vcombine.high %v1356_v7, %v1360_v8  ;;  %v13379_v14 = vcombine.high %v1357_v9, %v1361_v10  ;;  %v1416_v2 = vld [vmem:[%s14205_s27 + $0x25a0] sm:$0xff] }
 0x238   : > { %10150 = vmatpush1.bf16.msra.mxu0 %v13312_v19  ;;  %10709 = vmatpush1.bf16.msra.mxu1 %v13314_v20  ;;  %v13376_v19 = vcombine.low %v1356_v7, %v1360_v8  ;;  %v13378_v20 = vcombine.low %v1357_v9, %v1361_v10  ;;  %v13433_v7 = vcombine.high %v1412_v1, %v1416_v2  ;;  %v1420_v9 = vld [vmem:[%s14205_s27 + $0x25c0] sm:$0xff] }
 0x239   : > { %10151 = vmatprep.subr.bf16.mxu0 %v13321_v21  ;;  %10710 = vmatprep.subr.bf16.mxu1 %v13323_v22  ;;  %v13385_v21 = vcombine.high %v1364_v15, %v1368_v16  ;;  %v13387_v22 = vcombine.high %v1365_v17, %v1369_v18  ;;  %v1424_v10 = vld [vmem:[%s14205_s27 + $0x25e0] sm:$0xff] }
 0x23c   : > { %10152 = vmatpush1.bf16.msra.mxu0 %v13320_v27  ;;  %10711 = vmatpush1.bf16.msra.mxu1 %v13322_v28  ;;  %v1377_v27 = vld [vmem:[%s14205_s27 + $0x2468] sm:$0xff]  ;;  %v13384_v28 = vcombine.low %v1364_v15, %v1368_v16  ;;  %v13441_v15 = vcombine.high %v1420_v9, %v1424_v10 }
 0x23d   : > { %10153 = vmatprep.subr.bf16.mxu0 %v13329_v29  ;;  %10712 = vmatprep.subr.bf16.mxu1 %v13331_v30  ;;  %v13386_v29 = vcombine.low %v1365_v17, %v1369_v18  ;;  %v13393_v30 = vcombine.high %v1372_v23, %v1376_v24  ;;  %v13395_v31 = vcombine.high %v1373_v26, %v1377_v27  ;;  %v1428_v17 = vld [vmem:[%s14205_s27 + $0x2600] sm:$0xff] }
 0x23e   : > { %v1432_v18 = vld [vmem:[%s14205_s27 + $0x2620] sm:$0xff] }
 0x240   : > { %10154 = vmatpush1.bf16.msra.mxu0 %v13328_v35  ;;  %10713 = vmatpush1.bf16.msra.mxu1 %v13330_v36  ;;  %v1381_v35 = vld [vmem:[%s14205_s27 + $0x2488] sm:$0xff] }
 0x241   : > { %10155 = vmatprep.subr.bf16.mxu0 %v13337_v37  ;;  %10714 = vmatprep.subr.bf16.mxu1 %v13339_v38  ;;  %v1385_v36 = vld [vmem:[%s14205_s27 + $0x24a8] sm:$0xff]  ;;  %v13392_v37 = vcombine.low %v1372_v23, %v1376_v24  ;;  %v13394_v38 = vcombine.low %v1373_v26, %v1377_v27  ;;  %v13449_v23 = vcombine.high %v1428_v17, %v1432_v18  ;;  %v1440_v26 = vld [vmem:[%s14205_s27 + $0x2660] sm:$0xff] }
 0x242   : > { %v13403_v40 = vcombine.high %v1381_v35, %v1385_v36  ;;  %v1437_v27 = vld [vmem:[%s14205_s27 + $0x2648] sm:$0xff] }
 0x244   : > { %10156 = vmatpush1.bf16.msra.mxu0 %v13336_v43  ;;  %10715 = vmatpush1.bf16.msra.mxu1 %v13338_v44  ;;  %v1389_v43 = vld [vmem:[%s14205_s27 + $0x24c8] sm:$0xff] }
 0x245   : > { %10157 = vmatprep.subr.bf16.mxu0 %v13345_v45  ;;  %10716 = vmatprep.subr.bf16.mxu1 %v13347_v46  ;;  %v1393_v44 = vld [vmem:[%s14205_s27 + $0x24e8] sm:$0xff]  ;;  %v13400_v45 = vcombine.low %v1380_v32, %v1384_v33  ;;  %v13402_v46 = vcombine.low %v1381_v35, %v1385_v36  ;;  %v1444_v33 = vld [vmem:[%s14205_s27 + $0x2680] sm:$0xff] }
 0x246   : > { %v13411_v48 = vcombine.high %v1389_v43, %v1393_v44  ;;  %v1445_v35 = vld [vmem:[%s14205_s27 + $0x2688] sm:$0xff] }
 0x247   : > { %v1449_v36 = vld [vmem:[%s14205_s27 + $0x26a8] sm:$0xff] }
 0x248   : > { %10158 = vmatpush1.bf16.msra.mxu0 %v13344_v51  ;;  %10717 = vmatpush1.bf16.msra.mxu1 %v13346_v52  ;;  %v1397_v51 = vld [vmem:[%s14205_s27 + $0x2508] sm:$0xff] }
 0x249   : > { %10159 = vmatprep.subr.bf16.mxu0 %v13353_v53  ;;  %10718 = vmatprep.subr.bf16.mxu1 %v13355_v54  ;;  %v1401_v52 = vld [vmem:[%s14205_s27 + $0x2528] sm:$0xff]  ;;  %v13408_v53 = vcombine.low %v1388_v41, %v1392_v42  ;;  %v13410_v54 = vcombine.low %v1389_v43, %v1393_v44  ;;  %v1452_v41 = vld [vmem:[%s14205_s27 + $0x26c0] sm:$0xff] }
 0x24a   : > { %v13419_v56 = vcombine.high %v1397_v51, %v1401_v52  ;;  %v1456_v42 = vld [vmem:[%s14205_s27 + $0x26e0] sm:$0xff]  ;;  %v1453_v43 = vld [vmem:[%s14205_s27 + $0x26c8] sm:$0xff] }
 0x24b   : > { %v1457_v44 = vld [vmem:[%s14205_s27 + $0x26e8] sm:$0xff] }
 0x24c   : > { %10160 = vmatpush1.bf16.msra.mxu0 %v13352_v59  ;;  %10719 = vmatpush1.bf16.msra.mxu1 %v13354_v60  ;;  %v1405_v59 = vld [vmem:[%s14205_s27 + $0x2548] sm:$0xff] }
 0x24d   : > { %10161 = vmatprep.subr.bf16.mxu0 %v13361_v61  ;;  %10720 = vmatprep.subr.bf16.mxu1 %v13363_v62  ;;  %v1409_v60 = vld [vmem:[%s14205_s27 + $0x2568] sm:$0xff]  ;;  %v13416_v61 = vcombine.low %v1396_v49, %v1400_v50  ;;  %v13418_v62 = vcombine.low %v1397_v51, %v1401_v52  ;;  %v1460_v49 = vld [vmem:[%s14205_s27 + $0x2700] sm:$0xff] }
 0x24e   : > { %v13427_v0 = vcombine.high %v1405_v59, %v1409_v60  ;;  %v1464_v50 = vld [vmem:[%s14205_s27 + $0x2720] sm:$0xff]  ;;  %v1461_v51 = vld [vmem:[%s14205_s27 + $0x2708] sm:$0xff] }
 0x24f   : > { %v1465_v52 = vld [vmem:[%s14205_s27 + $0x2728] sm:$0xff] }
 0x250   : > { %10162 = vmatpush1.bf16.msra.mxu0 %v13360_v3  ;;  %10721 = vmatpush1.bf16.msra.mxu1 %v13362_v4  ;;  %v1413_v3 = vld [vmem:[%s14205_s27 + $0x2588] sm:$0xff] }
 0x251   : > { %10163 = vmatprep.subr.bf16.mxu0 %v13369_v5  ;;  %10722 = vmatprep.subr.bf16.mxu1 %v13371_v6  ;;  %v1417_v4 = vld [vmem:[%s14205_s27 + $0x25a8] sm:$0xff]  ;;  %v13424_v5 = vcombine.low %v1404_v57, %v1408_v58  ;;  %v13426_v6 = vcombine.low %v1405_v59, %v1409_v60  ;;  %v1468_v57 = vld [vmem:[%s14205_s27 + $0x2740] sm:$0xff] }
 0x252   : > { %v13435_v8 = vcombine.high %v1413_v3, %v1417_v4  ;;  %v1472_v58 = vld [vmem:[%s14205_s27 + $0x2760] sm:$0xff]  ;;  %v1469_v59 = vld [vmem:[%s14205_s27 + $0x2748] sm:$0xff] }
 0x253   : > { %v1473_v60 = vld [vmem:[%s14205_s27 + $0x2768] sm:$0xff] }
 0x254   : > { %10164 = vmatpush1.bf16.msra.mxu0 %v13368_v11  ;;  %10723 = vmatpush1.bf16.msra.mxu1 %v13370_v12  ;;  %v1421_v11 = vld [vmem:[%s14205_s27 + $0x25c8] sm:$0xff] }
 0x255   : > { %10165 = vmatprep.subr.bf16.mxu0 %v13377_v13  ;;  %10724 = vmatprep.subr.bf16.mxu1 %v13379_v14  ;;  %v1425_v12 = vld [vmem:[%s14205_s27 + $0x25e8] sm:$0xff]  ;;  %v13432_v13 = vcombine.low %v1412_v1, %v1416_v2  ;;  %v13434_v14 = vcombine.low %v1413_v3, %v1417_v4  ;;  %v1476_v1 = vld [vmem:[%s14205_s27 + $0x2780] sm:$0xff] }
 0x256   : > { %v13443_v16 = vcombine.high %v1421_v11, %v1425_v12  ;;  %v1480_v2 = vld [vmem:[%s14205_s27 + $0x27a0] sm:$0xff]  ;;  %v1477_v3 = vld [vmem:[%s14205_s27 + $0x2788] sm:$0xff] }
 0x257   : > { %v1481_v4 = vld [vmem:[%s14205_s27 + $0x27a8] sm:$0xff] }
 0x258   : > { %10166 = vmatpush1.bf16.msra.mxu0 %v13376_v19  ;;  %10725 = vmatpush1.bf16.msra.mxu1 %v13378_v20  ;;  %v1429_v19 = vld [vmem:[%s14205_s27 + $0x2608] sm:$0xff] }
 0x259   : > { %10178 = vmatprep.subr.bf16.mxu0 %v13385_v21  ;;  %10737 = vmatprep.subr.bf16.mxu1 %v13387_v22  ;;  %v1433_v20 = vld [vmem:[%s14205_s27 + $0x2628] sm:$0xff]  ;;  %v13440_v21 = vcombine.low %v1420_v9, %v1424_v10  ;;  %v13442_v22 = vcombine.low %v1421_v11, %v1425_v12  ;;  %v1484_v9 = vld [vmem:[%s14205_s27 + $0x27c0] sm:$0xff] }
 0x25a   : > { %v13451_v24 = vcombine.high %v1429_v19, %v1433_v20  ;;  %v1488_v10 = vld [vmem:[%s14205_s27 + $0x27e0] sm:$0xff]  ;;  %v1485_v11 = vld [vmem:[%s14205_s27 + $0x27c8] sm:$0xff] }
 0x25b   : > { %10168 = vmatmul.mubr.bf16.vlgmr.msra.gmra.mrb[0].mxu0 %v14086_v25  ;;  %10727 = vmatmul.mubr.bf16.vlgmr.msra.gmra.mrb[0].mxu1 %v14086_v25  ;;  %v1436_v25 = vld [vmem:[%s14205_s27 + $0x2640] sm:$0xff]  ;;  %v1489_v12 = vld [vmem:[%s14205_s27 + $0x27e8] sm:$0xff] }
 0x25c   : > { %10179 = vmatpush1.bf16.msra.mxu0 %v13384_v28  ;;  %10738 = vmatpush1.bf16.msra.mxu1 %v13386_v29  ;;  %v1441_v28 = vld [vmem:[%s14205_s27 + $0x2668] sm:$0xff]  ;;  %v13448_v29 = vcombine.low %v1428_v17, %v1432_v18  ;;  %v1492_v17 = vld [vmem:[%s14205_s27 + $0x2800] sm:$0xff] }
 0x25d   : > { %10180 = vmatprep.subr.bf16.mxu0 %v13393_v30  ;;  %10739 = vmatprep.subr.bf16.mxu1 %v13395_v31  ;;  %v13450_v30 = vcombine.low %v1429_v19, %v1433_v20  ;;  %v13457_v31 = vcombine.high %v1436_v25, %v1440_v26  ;;  %v13459_v32 = vcombine.high %v1437_v27, %v1441_v28  ;;  %v1496_v18 = vld [vmem:[%s14205_s27 + $0x2820] sm:$0xff]  ;;  %v1493_v19 = vld [vmem:[%s14205_s27 + $0x2808] sm:$0xff] }
 0x25e   : > { %10210 = vmatprep.mubr.bf16.mxu0 %v14087_v34  ;;  %10769 = vmatprep.mubr.bf16.mxu1 %v14087_v34  ;;  %v1448_v34 = vld [vmem:[%s14205_s27 + $0x26a0] sm:$0xff]  ;;  %v1497_v20 = vld [vmem:[%s14205_s27 + $0x2828] sm:$0xff] }
 0x260   : > { %10181 = vmatpush1.bf16.msra.mxu0 %v13392_v37  ;;  %10740 = vmatpush1.bf16.msra.mxu1 %v13394_v38  ;;  %v13456_v37 = vcombine.low %v1436_v25, %v1440_v26  ;;  %v13458_v38 = vcombine.low %v1437_v27, %v1441_v28  ;;  %v1500_v25 = vld [vmem:[%s14205_s27 + $0x2840] sm:$0xff]  ;;  %v14089_v27 = vld [vmem:[%s15996_s0 + $0x48] ss:$100 sps:$4 sm:$0xff]  }
 0x261   : > { %10182 = vmatprep.subr.bf16.mxu0 %v13401_v39  ;;  %10741 = vmatprep.subr.bf16.mxu1 %v13403_v40  ;;  %v13465_v39 = vcombine.high %v1444_v33, %v1448_v34  ;;  %v13467_v40 = vcombine.high %v1445_v35, %v1449_v36  ;;  %v1504_v26 = vld [vmem:[%s14205_s27 + $0x2860] sm:$0xff]  ;;  %v1501_v28 = vld [vmem:[%s14205_s27 + $0x2848] sm:$0xff] }
 0x264   : > { %10183 = vmatpush1.bf16.msra.mxu0 %v13400_v45  ;;  %10742 = vmatpush1.bf16.msra.mxu1 %v13402_v46  ;;  %v13464_v45 = vcombine.low %v1444_v33, %v1448_v34  ;;  %v13466_v46 = vcombine.low %v1445_v35, %v1449_v36  ;;  %v1508_v34 = vld [vmem:[%s14205_s27 + $0x2880] sm:$0xff]  ;;  %v14090_v36 = vld [vmem:[%s15996_s0 + $0x54] ss:$100 sps:$4 sm:$0xff]  }
 0x265   : > { %10184 = vmatprep.subr.bf16.mxu0 %v13409_v47  ;;  %10743 = vmatprep.subr.bf16.mxu1 %v13411_v48  ;;  %v13473_v47 = vcombine.high %v1452_v41, %v1456_v42  ;;  %v13475_v48 = vcombine.high %v1453_v43, %v1457_v44  ;;  %v1512_v35 = vld [vmem:[%s14205_s27 + $0x28a0] sm:$0xff] }
 0x268   : > { %10185 = vmatpush1.bf16.msra.mxu0 %v13408_v53  ;;  %10744 = vmatpush1.bf16.msra.mxu1 %v13410_v54  ;;  %v13472_v53 = vcombine.low %v1452_v41, %v1456_v42  ;;  %v13474_v54 = vcombine.low %v1453_v43, %v1457_v44  ;;  %v13529_v41 = vcombine.high %v1508_v34, %v1512_v35  ;;  %v1516_v43 = vld [vmem:[%s14205_s27 + $0x28c0] sm:$0xff] }
 0x269   : > { %10186 = vmatprep.subr.bf16.mxu0 %v13417_v55  ;;  %10745 = vmatprep.subr.bf16.mxu1 %v13419_v56  ;;  %v13481_v55 = vcombine.high %v1460_v49, %v1464_v50  ;;  %v13483_v56 = vcombine.high %v1461_v51, %v1465_v52  ;;  %v1520_v44 = vld [vmem:[%s14205_s27 + $0x28e0] sm:$0xff] }
 0x26c   : > { %10187 = vmatpush1.bf16.msra.mxu0 %v13416_v61  ;;  %10746 = vmatpush1.bf16.msra.mxu1 %v13418_v62  ;;  %v13480_v61 = vcombine.low %v1460_v49, %v1464_v50  ;;  %v13482_v62 = vcombine.low %v1461_v51, %v1465_v52  ;;  %v13537_v49 = vcombine.high %v1516_v43, %v1520_v44  ;;  %v1524_v51 = vld [vmem:[%s14205_s27 + $0x2900] sm:$0xff] }
 0x26d   : > { %10188 = vmatprep.subr.bf16.mxu0 %v13425_v63  ;;  %10747 = vmatprep.subr.bf16.mxu1 %v13427_v0  ;;  %v13489_v63 = vcombine.high %v1468_v57, %v1472_v58  ;;  %v13491_v0 = vcombine.high %v1469_v59, %v1473_v60  ;;  %v1528_v52 = vld [vmem:[%s14205_s27 + $0x2920] sm:$0xff] }
 0x270   : > { %10189 = vmatpush1.bf16.msra.mxu0 %v13424_v5  ;;  %10748 = vmatpush1.bf16.msra.mxu1 %v13426_v6  ;;  %v13488_v5 = vcombine.low %v1468_v57, %v1472_v58  ;;  %v13490_v6 = vcombine.low %v1469_v59, %v1473_v60  ;;  %v13545_v57 = vcombine.high %v1524_v51, %v1528_v52  ;;  %v1532_v59 = vld [vmem:[%s14205_s27 + $0x2940] sm:$0xff] }
 0x271   : > { %10190 = vmatprep.subr.bf16.mxu0 %v13433_v7  ;;  %10749 = vmatprep.subr.bf16.mxu1 %v13435_v8  ;;  %v13497_v7 = vcombine.high %v1476_v1, %v1480_v2  ;;  %v13499_v8 = vcombine.high %v1477_v3, %v1481_v4  ;;  %v1536_v60 = vld [vmem:[%s14205_s27 + $0x2960] sm:$0xff] }
 0x274   : > { %10191 = vmatpush1.bf16.msra.mxu0 %v13432_v13  ;;  %10750 = vmatpush1.bf16.msra.mxu1 %v13434_v14  ;;  %v13496_v13 = vcombine.low %v1476_v1, %v1480_v2  ;;  %v13498_v14 = vcombine.low %v1477_v3, %v1481_v4  ;;  %v13553_v1 = vcombine.high %v1532_v59, %v1536_v60  ;;  %v1540_v3 = vld [vmem:[%s14205_s27 + $0x2980] sm:$0xff] }
 0x275   : > { %10192 = vmatprep.subr.bf16.mxu0 %v13441_v15  ;;  %10751 = vmatprep.subr.bf16.mxu1 %v13443_v16  ;;  %v13505_v15 = vcombine.high %v1484_v9, %v1488_v10  ;;  %v13507_v16 = vcombine.high %v1485_v11, %v1489_v12  ;;  %v1544_v4 = vld [vmem:[%s14205_s27 + $0x29a0] sm:$0xff] }
 0x278   : > { %10193 = vmatpush1.bf16.msra.mxu0 %v13440_v21  ;;  %10752 = vmatpush1.bf16.msra.mxu1 %v13442_v22  ;;  %v13504_v21 = vcombine.low %v1484_v9, %v1488_v10  ;;  %v13506_v22 = vcombine.low %v1485_v11, %v1489_v12  ;;  %v13561_v9 = vcombine.high %v1540_v3, %v1544_v4  ;;  %v1548_v11 = vld [vmem:[%s14205_s27 + $0x29c0] sm:$0xff] }
 0x279   : > { %10194 = vmatprep.subr.bf16.mxu0 %v13449_v23  ;;  %10753 = vmatprep.subr.bf16.mxu1 %v13451_v24  ;;  %v13513_v23 = vcombine.high %v1492_v17, %v1496_v18  ;;  %v13515_v24 = vcombine.high %v1493_v19, %v1497_v20  ;;  %v1552_v12 = vld [vmem:[%s14205_s27 + $0x29e0] sm:$0xff] }
 0x27c   : > { %10195 = vmatpush1.bf16.msra.mxu0 %v13448_v29  ;;  %10754 = vmatpush1.bf16.msra.mxu1 %v13450_v30  ;;  %v1505_v29 = vld [vmem:[%s14205_s27 + $0x2868] sm:$0xff]  ;;  %v13512_v30 = vcombine.low %v1492_v17, %v1496_v18  ;;  %v13569_v17 = vcombine.high %v1548_v11, %v1552_v12 }
 0x27d   : > { %10196 = vmatprep.subr.bf16.mxu0 %v13457_v31  ;;  %10755 = vmatprep.subr.bf16.mxu1 %v13459_v32  ;;  %v13514_v31 = vcombine.low %v1493_v19, %v1497_v20  ;;  %v13521_v32 = vcombine.high %v1500_v25, %v1504_v26  ;;  %v13523_v33 = vcombine.high %v1501_v28, %v1505_v29  ;;  %v1556_v19 = vld [vmem:[%s14205_s27 + $0x2a00] sm:$0xff] }
 0x27e   : > { %v1560_v20 = vld [vmem:[%s14205_s27 + $0x2a20] sm:$0xff] }
 0x280   : > { %10197 = vmatpush1.bf16.msra.mxu0 %v13456_v37  ;;  %10756 = vmatpush1.bf16.msra.mxu1 %v13458_v38  ;;  %v1509_v37 = vld [vmem:[%s14205_s27 + $0x2888] sm:$0xff] }
 0x281   : > { %10198 = vmatprep.subr.bf16.mxu0 %v13465_v39  ;;  %10757 = vmatprep.subr.bf16.mxu1 %v13467_v40  ;;  %v1513_v38 = vld [vmem:[%s14205_s27 + $0x28a8] sm:$0xff]  ;;  %v13520_v39 = vcombine.low %v1500_v25, %v1504_v26  ;;  %v13522_v40 = vcombine.low %v1501_v28, %v1505_v29  ;;  %v13577_v25 = vcombine.high %v1556_v19, %v1560_v20  ;;  %v1568_v28 = vld [vmem:[%s14205_s27 + $0x2a60] sm:$0xff] }
 0x282   : > { %v13531_v42 = vcombine.high %v1509_v37, %v1513_v38  ;;  %v1565_v29 = vld [vmem:[%s14205_s27 + $0x2a48] sm:$0xff] }
 0x284   : > { %10199 = vmatpush1.bf16.msra.mxu0 %v13464_v45  ;;  %10758 = vmatpush1.bf16.msra.mxu1 %v13466_v46  ;;  %v1517_v45 = vld [vmem:[%s14205_s27 + $0x28c8] sm:$0xff] }
 0x285   : > { %10200 = vmatprep.subr.bf16.mxu0 %v13473_v47  ;;  %10759 = vmatprep.subr.bf16.mxu1 %v13475_v48  ;;  %v1521_v46 = vld [vmem:[%s14205_s27 + $0x28e8] sm:$0xff]  ;;  %v13528_v47 = vcombine.low %v1508_v34, %v1512_v35  ;;  %v13530_v48 = vcombine.low %v1509_v37, %v1513_v38  ;;  %v1572_v35 = vld [vmem:[%s14205_s27 + $0x2a80] sm:$0xff] }
 0x286   : > { %v13539_v50 = vcombine.high %v1517_v45, %v1521_v46  ;;  %v1573_v37 = vld [vmem:[%s14205_s27 + $0x2a88] sm:$0xff] }
 0x287   : > { %v1577_v38 = vld [vmem:[%s14205_s27 + $0x2aa8] sm:$0xff] }
 0x288   : > { %10201 = vmatpush1.bf16.msra.mxu0 %v13472_v53  ;;  %10760 = vmatpush1.bf16.msra.mxu1 %v13474_v54  ;;  %v1525_v53 = vld [vmem:[%s14205_s27 + $0x2908] sm:$0xff] }
 0x289   : > { %10202 = vmatprep.subr.bf16.mxu0 %v13481_v55  ;;  %10761 = vmatprep.subr.bf16.mxu1 %v13483_v56  ;;  %v1529_v54 = vld [vmem:[%s14205_s27 + $0x2928] sm:$0xff]  ;;  %v13536_v55 = vcombine.low %v1516_v43, %v1520_v44  ;;  %v13538_v56 = vcombine.low %v1517_v45, %v1521_v46  ;;  %v1580_v43 = vld [vmem:[%s14205_s27 + $0x2ac0] sm:$0xff] }
 0x28a   : > { %v13547_v58 = vcombine.high %v1525_v53, %v1529_v54  ;;  %v1584_v44 = vld [vmem:[%s14205_s27 + $0x2ae0] sm:$0xff]  ;;  %v1581_v45 = vld [vmem:[%s14205_s27 + $0x2ac8] sm:$0xff] }
 0x28b   : > { %v1585_v46 = vld [vmem:[%s14205_s27 + $0x2ae8] sm:$0xff] }
 0x28c   : > { %10203 = vmatpush1.bf16.msra.mxu0 %v13480_v61  ;;  %10762 = vmatpush1.bf16.msra.mxu1 %v13482_v62  ;;  %v1533_v61 = vld [vmem:[%s14205_s27 + $0x2948] sm:$0xff] }
 0x28d   : > { %10204 = vmatprep.subr.bf16.mxu0 %v13489_v63  ;;  %10763 = vmatprep.subr.bf16.mxu1 %v13491_v0  ;;  %v1537_v62 = vld [vmem:[%s14205_s27 + $0x2968] sm:$0xff]  ;;  %v13544_v63 = vcombine.low %v1524_v51, %v1528_v52  ;;  %v13546_v0 = vcombine.low %v1525_v53, %v1529_v54  ;;  %v1588_v51 = vld [vmem:[%s14205_s27 + $0x2b00] sm:$0xff] }
 0x28e   : > { %v13555_v2 = vcombine.high %v1533_v61, %v1537_v62  ;;  %v1592_v52 = vld [vmem:[%s14205_s27 + $0x2b20] sm:$0xff]  ;;  %v1589_v53 = vld [vmem:[%s14205_s27 + $0x2b08] sm:$0xff] }
 0x28f   : > { %v1593_v54 = vld [vmem:[%s14205_s27 + $0x2b28] sm:$0xff] }
 0x290   : > { %10205 = vmatpush1.bf16.msra.mxu0 %v13488_v5  ;;  %10764 = vmatpush1.bf16.msra.mxu1 %v13490_v6  ;;  %v1541_v5 = vld [vmem:[%s14205_s27 + $0x2988] sm:$0xff] }
 0x291   : > { %10206 = vmatprep.subr.bf16.mxu0 %v13497_v7  ;;  %10765 = vmatprep.subr.bf16.mxu1 %v13499_v8  ;;  %v1545_v6 = vld [vmem:[%s14205_s27 + $0x29a8] sm:$0xff]  ;;  %v13552_v7 = vcombine.low %v1532_v59, %v1536_v60  ;;  %v13554_v8 = vcombine.low %v1533_v61, %v1537_v62  ;;  %v1596_v59 = vld [vmem:[%s14205_s27 + $0x2b40] sm:$0xff] }
 0x292   : > { %v13563_v10 = vcombine.high %v1541_v5, %v1545_v6  ;;  %v1600_v60 = vld [vmem:[%s14205_s27 + $0x2b60] sm:$0xff]  ;;  %v1597_v61 = vld [vmem:[%s14205_s27 + $0x2b48] sm:$0xff] }
 0x293   : > { %v1601_v62 = vld [vmem:[%s14205_s27 + $0x2b68] sm:$0xff] }
 0x294   : > { %10207 = vmatpush1.bf16.msra.mxu0 %v13496_v13  ;;  %10766 = vmatpush1.bf16.msra.mxu1 %v13498_v14  ;;  %v1549_v13 = vld [vmem:[%s14205_s27 + $0x29c8] sm:$0xff] }
 0x295   : > { %10208 = vmatprep.subr.bf16.mxu0 %v13505_v15  ;;  %10767 = vmatprep.subr.bf16.mxu1 %v13507_v16  ;;  %v1553_v14 = vld [vmem:[%s14205_s27 + $0x29e8] sm:$0xff]  ;;  %v13560_v15 = vcombine.low %v1540_v3, %v1544_v4  ;;  %v13562_v16 = vcombine.low %v1541_v5, %v1545_v6  ;;  %v1604_v3 = vld [vmem:[%s14205_s27 + $0x2b80] sm:$0xff] }
 0x296   : > { %v13571_v18 = vcombine.high %v1549_v13, %v1553_v14  ;;  %v1608_v4 = vld [vmem:[%s14205_s27 + $0x2ba0] sm:$0xff]  ;;  %v1605_v5 = vld [vmem:[%s14205_s27 + $0x2b88] sm:$0xff] }
 0x297   : > { %v1609_v6 = vld [vmem:[%s14205_s27 + $0x2ba8] sm:$0xff] }
 0x298   : > { %10209 = vmatpush1.bf16.msra.mxu0 %v13504_v21  ;;  %10768 = vmatpush1.bf16.msra.mxu1 %v13506_v22  ;;  %v1557_v21 = vld [vmem:[%s14205_s27 + $0x2a08] sm:$0xff] }
 0x299   : > { %10221 = vmatprep.subr.bf16.mxu0 %v13513_v23  ;;  %10780 = vmatprep.subr.bf16.mxu1 %v13515_v24  ;;  %v1561_v22 = vld [vmem:[%s14205_s27 + $0x2a28] sm:$0xff]  ;;  %v13568_v23 = vcombine.low %v1548_v11, %v1552_v12  ;;  %v13570_v24 = vcombine.low %v1549_v13, %v1553_v14  ;;  %v1612_v11 = vld [vmem:[%s14205_s27 + $0x2bc0] sm:$0xff] }
 0x29a   : > { %v13579_v26 = vcombine.high %v1557_v21, %v1561_v22  ;;  %v1616_v12 = vld [vmem:[%s14205_s27 + $0x2be0] sm:$0xff]  ;;  %v1613_v13 = vld [vmem:[%s14205_s27 + $0x2bc8] sm:$0xff] }
 0x29b   : > { %10211 = vmatmul.mubr.bf16.vlgmr.msra.gmra.mrb[0].mxu0 %v14089_v27  ;;  %10770 = vmatmul.mubr.bf16.vlgmr.msra.gmra.mrb[0].mxu1 %v14089_v27  ;;  %v1564_v27 = vld [vmem:[%s14205_s27 + $0x2a40] sm:$0xff]  ;;  %v1617_v14 = vld [vmem:[%s14205_s27 + $0x2be8] sm:$0xff] }
 0x29c   : > { %10222 = vmatpush1.bf16.msra.mxu0 %v13512_v30  ;;  %10781 = vmatpush1.bf16.msra.mxu1 %v13514_v31  ;;  %v1569_v30 = vld [vmem:[%s14205_s27 + $0x2a68] sm:$0xff]  ;;  %v13576_v31 = vcombine.low %v1556_v19, %v1560_v20  ;;  %v1620_v19 = vld [vmem:[%s14205_s27 + $0x2c00] sm:$0xff] }
 0x29d   : > { %10223 = vmatprep.subr.bf16.mxu0 %v13521_v32  ;;  %10782 = vmatprep.subr.bf16.mxu1 %v13523_v33  ;;  %v13578_v32 = vcombine.low %v1557_v21, %v1561_v22  ;;  %v13585_v33 = vcombine.high %v1564_v27, %v1568_v28  ;;  %v13587_v34 = vcombine.high %v1565_v29, %v1569_v30  ;;  %v1624_v20 = vld [vmem:[%s14205_s27 + $0x2c20] sm:$0xff]  ;;  %v1621_v21 = vld [vmem:[%s14205_s27 + $0x2c08] sm:$0xff] }
 0x29e   : > { %10253 = vmatprep.mubr.bf16.mxu0 %v14090_v36  ;;  %10812 = vmatprep.mubr.bf16.mxu1 %v14090_v36  ;;  %v1576_v36 = vld [vmem:[%s14205_s27 + $0x2aa0] sm:$0xff]  ;;  %v1625_v22 = vld [vmem:[%s14205_s27 + $0x2c28] sm:$0xff] }
 0x2a0   : > { %10224 = vmatpush1.bf16.msra.mxu0 %v13520_v39  ;;  %10783 = vmatpush1.bf16.msra.mxu1 %v13522_v40  ;;  %v13584_v39 = vcombine.low %v1564_v27, %v1568_v28  ;;  %v13586_v40 = vcombine.low %v1565_v29, %v1569_v30  ;;  %v1628_v27 = vld [vmem:[%s14205_s27 + $0x2c40] sm:$0xff]  ;;  %v14092_v29 = vld [vmem:[%s15996_s0 + $0x50] ss:$100 sps:$4 sm:$0xff]   ;;  %v1629_v30 = vld [vmem:[%s14205_s27 + $0x2c48] sm:$0xff] }
 0x2a1   : > { %10225 = vmatprep.subr.bf16.mxu0 %v13529_v41  ;;  %10784 = vmatprep.subr.bf16.mxu1 %v13531_v42  ;;  %v13593_v41 = vcombine.high %v1572_v35, %v1576_v36  ;;  %v13595_v42 = vcombine.high %v1573_v37, %v1577_v38  ;;  %v1632_v28 = vld [vmem:[%s14205_s27 + $0x2c60] sm:$0xff] }
 0x2a4   : > { %10226 = vmatpush1.bf16.msra.mxu0 %v13528_v47  ;;  %10785 = vmatpush1.bf16.msra.mxu1 %v13530_v48  ;;  %v13592_v47 = vcombine.low %v1572_v35, %v1576_v36  ;;  %v13594_v48 = vcombine.low %v1573_v37, %v1577_v38  ;;  %v1636_v36 = vld [vmem:[%s14205_s27 + $0x2c80] sm:$0xff] }
 0x2a5   : > { %10227 = vmatprep.subr.bf16.mxu0 %v13537_v49  ;;  %10786 = vmatprep.subr.bf16.mxu1 %v13539_v50  ;;  %v13601_v49 = vcombine.high %v1580_v43, %v1584_v44  ;;  %v13603_v50 = vcombine.high %v1581_v45, %v1585_v46  ;;  %v1640_v37 = vld [vmem:[%s14205_s27 + $0x2ca0] sm:$0xff] }
 0x2a6   : > { %v14093_v38 = vld [vmem:[%s15996_s0 + $0x5c] ss:$100 sps:$4 sm:$0xff]  }
 0x2a8   : > { %10228 = vmatpush1.bf16.msra.mxu0 %v13536_v55  ;;  %10787 = vmatpush1.bf16.msra.mxu1 %v13538_v56  ;;  %v13600_v55 = vcombine.low %v1580_v43, %v1584_v44  ;;  %v13602_v56 = vcombine.low %v1581_v45, %v1585_v46  ;;  %v13657_v43 = vcombine.high %v1636_v36, %v1640_v37  ;;  %v1644_v45 = vld [vmem:[%s14205_s27 + $0x2cc0] sm:$0xff] }
 0x2a9   : > { %10229 = vmatprep.subr.bf16.mxu0 %v13545_v57  ;;  %10788 = vmatprep.subr.bf16.mxu1 %v13547_v58  ;;  %v13609_v57 = vcombine.high %v1588_v51, %v1592_v52  ;;  %v13611_v58 = vcombine.high %v1589_v53, %v1593_v54  ;;  %v1648_v46 = vld [vmem:[%s14205_s27 + $0x2ce0] sm:$0xff] }
 0x2ac   : > { %10230 = vmatpush1.bf16.msra.mxu0 %v13544_v63  ;;  %10789 = vmatpush1.bf16.msra.mxu1 %v13546_v0  ;;  %v13608_v63 = vcombine.low %v1588_v51, %v1592_v52  ;;  %v13610_v0 = vcombine.low %v1589_v53, %v1593_v54  ;;  %v13665_v51 = vcombine.high %v1644_v45, %v1648_v46  ;;  %v1652_v53 = vld [vmem:[%s14205_s27 + $0x2d00] sm:$0xff] }
 0x2ad   : > { %10231 = vmatprep.subr.bf16.mxu0 %v13553_v1  ;;  %10790 = vmatprep.subr.bf16.mxu1 %v13555_v2  ;;  %v13617_v1 = vcombine.high %v1596_v59, %v1600_v60  ;;  %v13619_v2 = vcombine.high %v1597_v61, %v1601_v62  ;;  %v1656_v54 = vld [vmem:[%s14205_s27 + $0x2d20] sm:$0xff] }
 0x2b0   : > { %10232 = vmatpush1.bf16.msra.mxu0 %v13552_v7  ;;  %10791 = vmatpush1.bf16.msra.mxu1 %v13554_v8  ;;  %v13616_v7 = vcombine.low %v1596_v59, %v1600_v60  ;;  %v13618_v8 = vcombine.low %v1597_v61, %v1601_v62  ;;  %v13673_v59 = vcombine.high %v1652_v53, %v1656_v54  ;;  %v1660_v61 = vld [vmem:[%s14205_s27 + $0x2d40] sm:$0xff] }
 0x2b1   : > { %10233 = vmatprep.subr.bf16.mxu0 %v13561_v9  ;;  %10792 = vmatprep.subr.bf16.mxu1 %v13563_v10  ;;  %v13625_v9 = vcombine.high %v1604_v3, %v1608_v4  ;;  %v13627_v10 = vcombine.high %v1605_v5, %v1609_v6  ;;  %v1664_v62 = vld [vmem:[%s14205_s27 + $0x2d60] sm:$0xff] }
 0x2b4   : > { %10234 = vmatpush1.bf16.msra.mxu0 %v13560_v15  ;;  %10793 = vmatpush1.bf16.msra.mxu1 %v13562_v16  ;;  %v13624_v15 = vcombine.low %v1604_v3, %v1608_v4  ;;  %v13626_v16 = vcombine.low %v1605_v5, %v1609_v6  ;;  %v13681_v3 = vcombine.high %v1660_v61, %v1664_v62  ;;  %v1668_v5 = vld [vmem:[%s14205_s27 + $0x2d80] sm:$0xff] }
 0x2b5   : > { %10235 = vmatprep.subr.bf16.mxu0 %v13569_v17  ;;  %10794 = vmatprep.subr.bf16.mxu1 %v13571_v18  ;;  %v13633_v17 = vcombine.high %v1612_v11, %v1616_v12  ;;  %v13635_v18 = vcombine.high %v1613_v13, %v1617_v14  ;;  %v1672_v6 = vld [vmem:[%s14205_s27 + $0x2da0] sm:$0xff] }
 0x2b8   : > { %10236 = vmatpush1.bf16.msra.mxu0 %v13568_v23  ;;  %10795 = vmatpush1.bf16.msra.mxu1 %v13570_v24  ;;  %v13632_v23 = vcombine.low %v1612_v11, %v1616_v12  ;;  %v13634_v24 = vcombine.low %v1613_v13, %v1617_v14  ;;  %v13689_v11 = vcombine.high %v1668_v5, %v1672_v6  ;;  %v1676_v13 = vld [vmem:[%s14205_s27 + $0x2dc0] sm:$0xff] }
 0x2b9   : > { %10237 = vmatprep.subr.bf16.mxu0 %v13577_v25  ;;  %10796 = vmatprep.subr.bf16.mxu1 %v13579_v26  ;;  %v13641_v25 = vcombine.high %v1620_v19, %v1624_v20  ;;  %v13643_v26 = vcombine.high %v1621_v21, %v1625_v22  ;;  %v1680_v14 = vld [vmem:[%s14205_s27 + $0x2de0] sm:$0xff] }
 0x2bc   : > { %10238 = vmatpush1.bf16.msra.mxu0 %v13576_v31  ;;  %10797 = vmatpush1.bf16.msra.mxu1 %v13578_v32  ;;  %v1633_v31 = vld [vmem:[%s14205_s27 + $0x2c68] sm:$0xff]  ;;  %v13640_v32 = vcombine.low %v1620_v19, %v1624_v20  ;;  %v13697_v19 = vcombine.high %v1676_v13, %v1680_v14 }
 0x2bd   : > { %10239 = vmatprep.subr.bf16.mxu0 %v13585_v33  ;;  %10798 = vmatprep.subr.bf16.mxu1 %v13587_v34  ;;  %v13642_v33 = vcombine.low %v1621_v21, %v1625_v22  ;;  %v13649_v34 = vcombine.high %v1628_v27, %v1632_v28  ;;  %v13651_v35 = vcombine.high %v1629_v30, %v1633_v31  ;;  %v1684_v21 = vld [vmem:[%s14205_s27 + $0x2e00] sm:$0xff] }
 0x2be   : > { %v1688_v22 = vld [vmem:[%s14205_s27 + $0x2e20] sm:$0xff] }
 0x2c0   : > { %10240 = vmatpush1.bf16.msra.mxu0 %v13584_v39  ;;  %10799 = vmatpush1.bf16.msra.mxu1 %v13586_v40  ;;  %v1637_v39 = vld [vmem:[%s14205_s27 + $0x2c88] sm:$0xff] }
 0x2c1   : > { %10241 = vmatprep.subr.bf16.mxu0 %v13593_v41  ;;  %10800 = vmatprep.subr.bf16.mxu1 %v13595_v42  ;;  %v1641_v40 = vld [vmem:[%s14205_s27 + $0x2ca8] sm:$0xff]  ;;  %v13648_v41 = vcombine.low %v1628_v27, %v1632_v28  ;;  %v13650_v42 = vcombine.low %v1629_v30, %v1633_v31  ;;  %v13705_v27 = vcombine.high %v1684_v21, %v1688_v22  ;;  %v1696_v30 = vld [vmem:[%s14205_s27 + $0x2e60] sm:$0xff] }
 0x2c2   : > { %v13659_v44 = vcombine.high %v1637_v39, %v1641_v40  ;;  %v1693_v31 = vld [vmem:[%s14205_s27 + $0x2e48] sm:$0xff] }
 0x2c4   : > { %10242 = vmatpush1.bf16.msra.mxu0 %v13592_v47  ;;  %10801 = vmatpush1.bf16.msra.mxu1 %v13594_v48  ;;  %v1645_v47 = vld [vmem:[%s14205_s27 + $0x2cc8] sm:$0xff] }
 0x2c5   : > { %10243 = vmatprep.subr.bf16.mxu0 %v13601_v49  ;;  %10802 = vmatprep.subr.bf16.mxu1 %v13603_v50  ;;  %v1649_v48 = vld [vmem:[%s14205_s27 + $0x2ce8] sm:$0xff]  ;;  %v13656_v49 = vcombine.low %v1636_v36, %v1640_v37  ;;  %v13658_v50 = vcombine.low %v1637_v39, %v1641_v40  ;;  %v1700_v37 = vld [vmem:[%s14205_s27 + $0x2e80] sm:$0xff] }
 0x2c6   : > { %v13667_v52 = vcombine.high %v1645_v47, %v1649_v48  ;;  %v1701_v39 = vld [vmem:[%s14205_s27 + $0x2e88] sm:$0xff] }
 0x2c7   : > { %v1705_v40 = vld [vmem:[%s14205_s27 + $0x2ea8] sm:$0xff] }
 0x2c8   : > { %10244 = vmatpush1.bf16.msra.mxu0 %v13600_v55  ;;  %10803 = vmatpush1.bf16.msra.mxu1 %v13602_v56  ;;  %v1653_v55 = vld [vmem:[%s14205_s27 + $0x2d08] sm:$0xff] }
 0x2c9   : > { %10245 = vmatprep.subr.bf16.mxu0 %v13609_v57  ;;  %10804 = vmatprep.subr.bf16.mxu1 %v13611_v58  ;;  %v1657_v56 = vld [vmem:[%s14205_s27 + $0x2d28] sm:$0xff]  ;;  %v13664_v57 = vcombine.low %v1644_v45, %v1648_v46  ;;  %v13666_v58 = vcombine.low %v1645_v47, %v1649_v48  ;;  %v1708_v45 = vld [vmem:[%s14205_s27 + $0x2ec0] sm:$0xff] }
 0x2ca   : > { %v13675_v60 = vcombine.high %v1653_v55, %v1657_v56  ;;  %v1712_v46 = vld [vmem:[%s14205_s27 + $0x2ee0] sm:$0xff]  ;;  %v1709_v47 = vld [vmem:[%s14205_s27 + $0x2ec8] sm:$0xff] }
 0x2cb   : > { %v1713_v48 = vld [vmem:[%s14205_s27 + $0x2ee8] sm:$0xff] }
 0x2cc   : > { %10246 = vmatpush1.bf16.msra.mxu0 %v13608_v63  ;;  %10805 = vmatpush1.bf16.msra.mxu1 %v13610_v0  ;;  %v1661_v63 = vld [vmem:[%s14205_s27 + $0x2d48] sm:$0xff] }
 0x2cd   : > { %10247 = vmatprep.subr.bf16.mxu0 %v13617_v1  ;;  %10806 = vmatprep.subr.bf16.mxu1 %v13619_v2  ;;  %v1665_v0 = vld [vmem:[%s14205_s27 + $0x2d68] sm:$0xff]  ;;  %v13672_v1 = vcombine.low %v1652_v53, %v1656_v54  ;;  %v13674_v2 = vcombine.low %v1653_v55, %v1657_v56  ;;  %v1716_v53 = vld [vmem:[%s14205_s27 + $0x2f00] sm:$0xff] }
 0x2ce   : > { %v13683_v4 = vcombine.high %v1661_v63, %v1665_v0  ;;  %v1720_v54 = vld [vmem:[%s14205_s27 + $0x2f20] sm:$0xff]  ;;  %v1717_v55 = vld [vmem:[%s14205_s27 + $0x2f08] sm:$0xff] }
 0x2cf   : > { %v1721_v56 = vld [vmem:[%s14205_s27 + $0x2f28] sm:$0xff] }
 0x2d0   : > { %10248 = vmatpush1.bf16.msra.mxu0 %v13616_v7  ;;  %10807 = vmatpush1.bf16.msra.mxu1 %v13618_v8  ;;  %v1669_v7 = vld [vmem:[%s14205_s27 + $0x2d88] sm:$0xff] }
 0x2d1   : > { %10249 = vmatprep.subr.bf16.mxu0 %v13625_v9  ;;  %10808 = vmatprep.subr.bf16.mxu1 %v13627_v10  ;;  %v1673_v8 = vld [vmem:[%s14205_s27 + $0x2da8] sm:$0xff]  ;;  %v13680_v9 = vcombine.low %v1660_v61, %v1664_v62  ;;  %v13682_v10 = vcombine.low %v1661_v63, %v1665_v0  ;;  %v1724_v61 = vld [vmem:[%s14205_s27 + $0x2f40] sm:$0xff] }
 0x2d2   : > { %v13691_v12 = vcombine.high %v1669_v7, %v1673_v8  ;;  %v1728_v62 = vld [vmem:[%s14205_s27 + $0x2f60] sm:$0xff]  ;;  %v1725_v63 = vld [vmem:[%s14205_s27 + $0x2f48] sm:$0xff] }
 0x2d3   : > { %v1729_v0 = vld [vmem:[%s14205_s27 + $0x2f68] sm:$0xff] }
 0x2d4   : > { %10250 = vmatpush1.bf16.msra.mxu0 %v13624_v15  ;;  %10809 = vmatpush1.bf16.msra.mxu1 %v13626_v16  ;;  %v1677_v15 = vld [vmem:[%s14205_s27 + $0x2dc8] sm:$0xff] }
 0x2d5   : > { %10251 = vmatprep.subr.bf16.mxu0 %v13633_v17  ;;  %10810 = vmatprep.subr.bf16.mxu1 %v13635_v18  ;;  %v1681_v16 = vld [vmem:[%s14205_s27 + $0x2de8] sm:$0xff]  ;;  %v13688_v17 = vcombine.low %v1668_v5, %v1672_v6  ;;  %v13690_v18 = vcombine.low %v1669_v7, %v1673_v8  ;;  %v1732_v5 = vld [vmem:[%s14205_s27 + $0x2f80] sm:$0xff] }
 0x2d6   : > { %v13699_v20 = vcombine.high %v1677_v15, %v1681_v16  ;;  %v1736_v6 = vld [vmem:[%s14205_s27 + $0x2fa0] sm:$0xff]  ;;  %v1733_v7 = vld [vmem:[%s14205_s27 + $0x2f88] sm:$0xff] }
 0x2d7   : > { %v1737_v8 = vld [vmem:[%s14205_s27 + $0x2fa8] sm:$0xff] }
 0x2d8   : > { %10252 = vmatpush1.bf16.msra.mxu0 %v13632_v23  ;;  %10811 = vmatpush1.bf16.msra.mxu1 %v13634_v24  ;;  %v1685_v23 = vld [vmem:[%s14205_s27 + $0x2e08] sm:$0xff] }
 0x2d9   : > { %10264 = vmatprep.subr.bf16.mxu0 %v13641_v25  ;;  %10823 = vmatprep.subr.bf16.mxu1 %v13643_v26  ;;  %v1689_v24 = vld [vmem:[%s14205_s27 + $0x2e28] sm:$0xff]  ;;  %v13696_v25 = vcombine.low %v1676_v13, %v1680_v14  ;;  %v13698_v26 = vcombine.low %v1677_v15, %v1681_v16  ;;  %v1740_v13 = vld [vmem:[%s14205_s27 + $0x2fc0] sm:$0xff] }
 0x2da   : > { %v13707_v28 = vcombine.high %v1685_v23, %v1689_v24  ;;  %v1744_v14 = vld [vmem:[%s14205_s27 + $0x2fe0] sm:$0xff]  ;;  %v1741_v15 = vld [vmem:[%s14205_s27 + $0x2fc8] sm:$0xff] }
 0x2db   : > { %10254 = vmatmul.mubr.bf16.vlgmr.msra.gmra.mrb[0].mxu0 %v14092_v29  ;;  %10813 = vmatmul.mubr.bf16.vlgmr.msra.gmra.mrb[0].mxu1 %v14092_v29  ;;  %v1692_v29 = vld [vmem:[%s14205_s27 + $0x2e40] sm:$0xff]  ;;  %v1745_v16 = vld [vmem:[%s14205_s27 + $0x2fe8] sm:$0xff] }
 0x2dc   : > { %10265 = vmatpush1.bf16.msra.mxu0 %v13640_v32  ;;  %10824 = vmatpush1.bf16.msra.mxu1 %v13642_v33  ;;  %v1697_v32 = vld [vmem:[%s14205_s27 + $0x2e68] sm:$0xff]  ;;  %v13704_v33 = vcombine.low %v1684_v21, %v1688_v22  ;;  %v1748_v21 = vld [vmem:[%s14205_s27 + $0x3000] sm:$0xff] }
 0x2dd   : > { %10266 = vmatprep.subr.bf16.mxu0 %v13649_v34  ;;  %10825 = vmatprep.subr.bf16.mxu1 %v13651_v35  ;;  %v13706_v34 = vcombine.low %v1685_v23, %v1689_v24  ;;  %v13713_v35 = vcombine.high %v1692_v29, %v1696_v30  ;;  %v13715_v36 = vcombine.high %v1693_v31, %v1697_v32  ;;  %v1752_v22 = vld [vmem:[%s14205_s27 + $0x3020] sm:$0xff]  ;;  %v1749_v23 = vld [vmem:[%s14205_s27 + $0x3008] sm:$0xff] }
 0x2de   : > { %10296 = vmatprep.mubr.bf16.mxu0 %v14093_v38  ;;  %10855 = vmatprep.mubr.bf16.mxu1 %v14093_v38  ;;  %v1704_v38 = vld [vmem:[%s14205_s27 + $0x2ea0] sm:$0xff]  ;;  %v1753_v24 = vld [vmem:[%s14205_s27 + $0x3028] sm:$0xff] }
 0x2e0   : > { %10267 = vmatpush1.bf16.msra.mxu0 %v13648_v41  ;;  %10826 = vmatpush1.bf16.msra.mxu1 %v13650_v42  ;;  %v13712_v41 = vcombine.low %v1692_v29, %v1696_v30  ;;  %v13714_v42 = vcombine.low %v1693_v31, %v1697_v32  ;;  %v1756_v29 = vld [vmem:[%s14205_s27 + $0x3040] sm:$0xff]  ;;  %v14095_v31 = vld [vmem:[%s15996_s0 + $0x58] ss:$100 sps:$4 sm:$0xff]   ;;  %v1757_v32 = vld [vmem:[%s14205_s27 + $0x3048] sm:$0xff] }
 0x2e1   : > { %10268 = vmatprep.subr.bf16.mxu0 %v13657_v43  ;;  %10827 = vmatprep.subr.bf16.mxu1 %v13659_v44  ;;  %v13721_v43 = vcombine.high %v1700_v37, %v1704_v38  ;;  %v13723_v44 = vcombine.high %v1701_v39, %v1705_v40  ;;  %v1760_v30 = vld [vmem:[%s14205_s27 + $0x3060] sm:$0xff] }
 0x2e4   : > { %10269 = vmatpush1.bf16.msra.mxu0 %v13656_v49  ;;  %10828 = vmatpush1.bf16.msra.mxu1 %v13658_v50  ;;  %v13720_v49 = vcombine.low %v1700_v37, %v1704_v38  ;;  %v13722_v50 = vcombine.low %v1701_v39, %v1705_v40  ;;  %v1764_v38 = vld [vmem:[%s14205_s27 + $0x3080] sm:$0xff]  ;;  %v1765_v40 = vld [vmem:[%s14205_s27 + $0x3088] sm:$0xff] }
 0x2e5   : > { %10270 = vmatprep.subr.bf16.mxu0 %v13665_v51  ;;  %10829 = vmatprep.subr.bf16.mxu1 %v13667_v52  ;;  %v13729_v51 = vcombine.high %v1708_v45, %v1712_v46  ;;  %v13731_v52 = vcombine.high %v1709_v47, %v1713_v48  ;;  %v1768_v39 = vld [vmem:[%s14205_s27 + $0x30a0] sm:$0xff] }
 0x2e8   : > { %10271 = vmatpush1.bf16.msra.mxu0 %v13664_v57  ;;  %10830 = vmatpush1.bf16.msra.mxu1 %v13666_v58  ;;  %v13728_v57 = vcombine.low %v1708_v45, %v1712_v46  ;;  %v13730_v58 = vcombine.low %v1709_v47, %v1713_v48  ;;  %v1772_v46 = vld [vmem:[%s14205_s27 + $0x30c0] sm:$0xff]  ;;  %v14147_v48 = vmov 0  }
 0x2e9   : > { %10272 = vmatprep.subr.bf16.mxu0 %v13673_v59  ;;  %10831 = vmatprep.subr.bf16.mxu1 %v13675_v60  ;;  %v13737_v59 = vcombine.high %v1716_v53, %v1720_v54  ;;  %v13739_v60 = vcombine.high %v1717_v55, %v1721_v56  ;;  %v1776_v47 = vld [vmem:[%s14205_s27 + $0x30e0] sm:$0xff] }
 0x2ec   : > { %10273 = vmatpush1.bf16.msra.mxu0 %v13672_v1  ;;  %10832 = vmatpush1.bf16.msra.mxu1 %v13674_v2  ;;  %v13736_v1 = vcombine.low %v1716_v53, %v1720_v54  ;;  %v13738_v2 = vcombine.low %v1717_v55, %v1721_v56  ;;  %v13793_v53 = vcombine.high %v1772_v46, %v1776_v47  ;;  %v214_v55 = vld [vmem:[%s14205_s27 + $0x10] sm:$0xff] }
 0x2ed   : > { %10274 = vmatprep.subr.bf16.mxu0 %v13681_v3  ;;  %10833 = vmatprep.subr.bf16.mxu1 %v13683_v4  ;;  %v13745_v3 = vcombine.high %v1724_v61, %v1728_v62  ;;  %v13747_v4 = vcombine.high %v1725_v63, %v1729_v0  ;;  %v218_v56 = vld [vmem:[%s14205_s27 + $0x30] sm:$0xff] }
 0x2f0   : > { %10275 = vmatpush1.bf16.msra.mxu0 %v13680_v9  ;;  %10834 = vmatpush1.bf16.msra.mxu1 %v13682_v10  ;;  %v13744_v9 = vcombine.low %v1724_v61, %v1728_v62  ;;  %v13746_v10 = vcombine.low %v1725_v63, %v1729_v0  ;;  %v12237_v61 = vcombine.high %v214_v55, %v218_v56  ;;  %v222_v63 = vld [vmem:[%s14205_s27 + $0x50] sm:$0xff] }
 0x2f1   : > { %10276 = vmatprep.subr.bf16.mxu0 %v13689_v11  ;;  %10835 = vmatprep.subr.bf16.mxu1 %v13691_v12  ;;  %v13753_v11 = vcombine.high %v1732_v5, %v1736_v6  ;;  %v13755_v12 = vcombine.high %v1733_v7, %v1737_v8  ;;  %v226_v0 = vld [vmem:[%s14205_s27 + $0x70] sm:$0xff] }
 0x2f4   : > { %10277 = vmatpush1.bf16.msra.mxu0 %v13688_v17  ;;  %10836 = vmatpush1.bf16.msra.mxu1 %v13690_v18  ;;  %v13752_v17 = vcombine.low %v1732_v5, %v1736_v6  ;;  %v13754_v18 = vcombine.low %v1733_v7, %v1737_v8  ;;  %v12245_v6 = vcombine.high %v222_v63, %v226_v0  ;;  %v230_v8 = vld [vmem:[%s14205_s27 + $0x90] sm:$0xff] }
 0x2f5   : > { %10278 = vmatprep.subr.bf16.mxu0 %v13697_v19  ;;  %10837 = vmatprep.subr.bf16.mxu1 %v13699_v20  ;;  %v13761_v19 = vcombine.high %v1740_v13, %v1744_v14  ;;  %v13763_v20 = vcombine.high %v1741_v15, %v1745_v16 }
 0x2f8   : > { %10279 = vmatpush1.bf16.msra.mxu0 %v13696_v25  ;;  %10838 = vmatpush1.bf16.msra.mxu1 %v13698_v26  ;;  %v13760_v25 = vcombine.low %v1740_v13, %v1744_v14  ;;  %v13762_v26 = vcombine.low %v1741_v15, %v1745_v16  ;;  %v238_v16 = vld [vmem:[%s14205_s27 + $0xd0] sm:$0xff] }
 0x2f9   : > { %10280 = vmatprep.subr.bf16.mxu0 %v13705_v27  ;;  %10839 = vmatprep.subr.bf16.mxu1 %v13707_v28  ;;  %v13769_v27 = vcombine.high %v1748_v21, %v1752_v22  ;;  %v13771_v28 = vcombine.high %v1749_v23, %v1753_v24 }
 0x2fc   : > { %10281 = vmatpush1.bf16.msra.mxu0 %v13704_v33  ;;  %10840 = vmatpush1.bf16.msra.mxu1 %v13706_v34  ;;  %v1761_v33 = vld [vmem:[%s14205_s27 + $0x3068] sm:$0xff]  ;;  %v13768_v34 = vcombine.low %v1748_v21, %v1752_v22 }
 0x2fd   : > { %10282 = vmatprep.subr.bf16.mxu0 %v13713_v35  ;;  %10841 = vmatprep.subr.bf16.mxu1 %v13715_v36  ;;  %v13770_v35 = vcombine.low %v1749_v23, %v1753_v24  ;;  %v13777_v36 = vcombine.high %v1756_v29, %v1760_v30  ;;  %v13779_v37 = vcombine.high %v1757_v32, %v1761_v33 }
 0x300   : > { %10283 = vmatpush1.bf16.msra.mxu0 %v13712_v41  ;;  %10842 = vmatpush1.bf16.msra.mxu1 %v13714_v42  ;;  %v1769_v41 = vld [vmem:[%s14205_s27 + $0x30a8] sm:$0xff]  ;;  %v13776_v42 = vcombine.low %v1756_v29, %v1760_v30 }
 0x301   : > { %10284 = vmatprep.subr.bf16.mxu0 %v13721_v43  ;;  %10843 = vmatprep.subr.bf16.mxu1 %v13723_v44  ;;  %v13778_v43 = vcombine.low %v1757_v32, %v1761_v33  ;;  %v13785_v44 = vcombine.high %v1764_v38, %v1768_v39  ;;  %v13787_v45 = vcombine.high %v1765_v40, %v1769_v41  ;;  %v254_v33 = vld [vmem:[%s14205_s27 + $0x150] sm:$0xff] }
 0x304   : > { %10285 = vmatpush1.bf16.msra.mxu0 %v13720_v49  ;;  %10844 = vmatpush1.bf16.msra.mxu1 %v13722_v50  ;;  %v1773_v49 = vld [vmem:[%s14205_s27 + $0x30c8] sm:$0xff] }
 0x305   : > { %10286 = vmatprep.subr.bf16.mxu0 %v13729_v51  ;;  %10845 = vmatprep.subr.bf16.mxu1 %v13731_v52  ;;  %v1777_v50 = vld [vmem:[%s14205_s27 + $0x30e8] sm:$0xff]  ;;  %v13784_v51 = vcombine.low %v1764_v38, %v1768_v39  ;;  %v13786_v52 = vcombine.low %v1765_v40, %v1769_v41  ;;  %v262_v41 = vld [vmem:[%s14205_s27 + $0x190] sm:$0xff] }
 0x306   : > { %v13795_v54 = vcombine.high %v1773_v49, %v1777_v50 }
 0x308   : > { %10287 = vmatpush1.bf16.msra.mxu0 %v13728_v57  ;;  %10846 = vmatpush1.bf16.msra.mxu1 %v13730_v58  ;;  %v215_v57 = vld [vmem:[%s14205_s27 + $0x18] sm:$0xff] }
 0x309   : > { %10288 = vmatprep.subr.bf16.mxu0 %v13737_v59  ;;  %10847 = vmatprep.subr.bf16.mxu1 %v13739_v60  ;;  %v219_v58 = vld [vmem:[%s14205_s27 + $0x38] sm:$0xff]  ;;  %v13792_v59 = vcombine.low %v1772_v46, %v1776_v47  ;;  %v13794_v60 = vcombine.low %v1773_v49, %v1777_v50  ;;  %v270_v50 = vld [vmem:[%s14205_s27 + $0x1d0] sm:$0xff] }
 0x30a   : > { %v12239_v62 = vcombine.high %v215_v57, %v219_v58  ;;  %v12238_v5 = vcombine.low %v215_v57, %v219_v58  ;;  %v278_v58 = vld [vmem:[%s14205_s27 + $0x210] sm:$0xff] }
 0x30c   : > { %10289 = vmatpush1.bf16.msra.mxu0 %v13736_v1  ;;  %10848 = vmatpush1.bf16.msra.mxu1 %v13738_v2  ;;  %v14096_v1 = vld [vmem:[%s15996_s0 + $0x60] ss:$100 sps:$4 sm:$0xff]   ;;  %v223_v2 = vld [vmem:[%s14205_s27 + $0x58] sm:$0xff] }
 0x30d   : > { %10290 = vmatprep.subr.bf16.mxu0 %v13745_v3  ;;  %10849 = vmatprep.subr.bf16.mxu1 %v13747_v4  ;;  %v227_v3 = vld [vmem:[%s14205_s27 + $0x78] sm:$0xff]  ;;  %v12236_v4 = vcombine.low %v214_v55, %v218_v56 }
 0x30e   : > { %v12247_v7 = vcombine.high %v223_v2, %v227_v3  ;;  %v12246_v13 = vcombine.low %v223_v2, %v227_v3  ;;  %v286_v2 = vld [vmem:[%s14205_s27 + $0x250] sm:$0xff] }
 0x30f   : > { %v290_v3 = vld [vmem:[%s14205_s27 + $0x270] sm:$0xff] }
 0x310   : > { %10291 = vmatpush1.bf16.msra.mxu0 %v13744_v9  ;;  %10850 = vmatpush1.bf16.msra.mxu1 %v13746_v10  ;;  %v234_v9 = vld [vmem:[%s14205_s27 + $0xb0] sm:$0xff]  ;;  %v231_v10 = vld [vmem:[%s14205_s27 + $0x98] sm:$0xff] }
 0x311   : > { %10292 = vmatprep.subr.bf16.mxu0 %v13753_v11  ;;  %10851 = vmatprep.subr.bf16.mxu1 %v13755_v12  ;;  %v235_v11 = vld [vmem:[%s14205_s27 + $0xb8] sm:$0xff]  ;;  %v12244_v12 = vcombine.low %v222_v63, %v226_v0  ;;  %v12253_v14 = vcombine.high %v230_v8, %v234_v9  ;;  %v12252_v21 = vcombine.low %v230_v8, %v234_v9 }
 0x312   : > { %v12255_v15 = vcombine.high %v231_v10, %v235_v11  ;;  %v12254_v22 = vcombine.low %v231_v10, %v235_v11  ;;  %v12309_v8 = vcombine.high %v286_v2, %v290_v3  ;;  %v294_v10 = vld [vmem:[%s14205_s27 + $0x290] sm:$0xff] }
 0x313   : > { %v298_v11 = vld [vmem:[%s14205_s27 + $0x2b0] sm:$0xff] }
 0x314   : > { %10293 = vmatpush1.bf16.msra.mxu0 %v13752_v17  ;;  %10852 = vmatpush1.bf16.msra.mxu1 %v13754_v18  ;;  %v242_v17 = vld [vmem:[%s14205_s27 + $0xf0] sm:$0xff]  ;;  %v14097_v18 = vld [vmem:[%s15996_s0 + $0x4] ss:$100 sps:$4 sm:$0xff]  }
 0x315   : > { %10294 = vmatprep.subr.bf16.mxu0 %v13761_v19  ;;  %10853 = vmatprep.subr.bf16.mxu1 %v13763_v20  ;;  %v239_v19 = vld [vmem:[%s14205_s27 + $0xd8] sm:$0xff]  ;;  %v12261_v23 = vcombine.high %v238_v16, %v242_v17  ;;  %v12260_v29 = vcombine.low %v238_v16, %v242_v17  ;;  %v12317_v16 = vcombine.high %v294_v10, %v298_v11 }
 0x316   : > { %v243_v20 = vld [vmem:[%s14205_s27 + $0xf8] sm:$0xff] }
 0x317   : > { %v12263_v24 = vcombine.high %v239_v19, %v243_v20  ;;  %v12262_v30 = vcombine.low %v239_v19, %v243_v20  ;;  %v306_v19 = vld [vmem:[%s14205_s27 + $0x2f0] sm:$0xff]  ;;  %v303_v20 = vld [vmem:[%s14205_s27 + $0x2d8] sm:$0xff] }
 0x318   : > { %10295 = vmatpush1.bf16.msra.mxu0 %v13760_v25  ;;  %10854 = vmatpush1.bf16.msra.mxu1 %v13762_v26  ;;  %v246_v25 = vld [vmem:[%s14205_s27 + $0x110] sm:$0xff] }
 0x319   : > { %10307 = vmatprep.subr.bf16.mxu0 %v13769_v27  ;;  %10866 = vmatprep.subr.bf16.mxu1 %v13771_v28  ;;  %v250_v26 = vld [vmem:[%s14205_s27 + $0x130] sm:$0xff]  ;;  %v247_v27 = vld [vmem:[%s14205_s27 + $0x118] sm:$0xff] }
 0x31a   : > { %v251_v28 = vld [vmem:[%s14205_s27 + $0x138] sm:$0xff] }
 0x31b   : > { %10297 = vmatmul.mubr.bf16.vlgmr.msra.gmra.mrb[0].mxu0 %v14095_v31  ;;  %10856 = vmatmul.mubr.bf16.vlgmr.msra.gmra.mrb[0].mxu1 %v14095_v31  ;;  %v12269_v31 = vcombine.high %v246_v25, %v250_v26  ;;  %v12271_v32 = vcombine.high %v247_v27, %v251_v28  ;;  %v12270_v38 = vcombine.low %v247_v27, %v251_v28  ;;  %v314_v27 = vld [vmem:[%s14205_s27 + $0x330] sm:$0xff]  ;;  %v311_v28 = vld [vmem:[%s14205_s27 + $0x318] sm:$0xff] }
 0x31c   : > { %10308 = vmatpush1.bf16.msra.mxu0 %v13768_v34  ;;  %10867 = vmatpush1.bf16.msra.mxu1 %v13770_v35  ;;  %v258_v34 = vld [vmem:[%s14205_s27 + $0x170] sm:$0xff]  ;;  %v255_v35 = vld [vmem:[%s14205_s27 + $0x158] sm:$0xff] }
 0x31d   : > { %10309 = vmatprep.subr.bf16.mxu0 %v13777_v36  ;;  %10868 = vmatprep.subr.bf16.mxu1 %v13779_v37  ;;  %v259_v36 = vld [vmem:[%s14205_s27 + $0x178] sm:$0xff]  ;;  %v12268_v37 = vcombine.low %v246_v25, %v250_v26  ;;  %v12277_v39 = vcombine.high %v254_v33, %v258_v34  ;;  %v310_v26 = vld [vmem:[%s14205_s27 + $0x310] sm:$0xff] }
 0x31e   : > { %10339 = vmatprep.mubr.bf16.mxu0 %v14147_v48  ;;  %10898 = vmatprep.mubr.bf16.mxu1 %v14147_v48  ;;  %v12279_v40 = vcombine.high %v255_v35, %v259_v36  ;;  %v12278_v46 = vcombine.low %v255_v35, %v259_v36  ;;  %v322_v35 = vld [vmem:[%s14205_s27 + $0x370] sm:$0xff]  ;;  %v319_v36 = vld [vmem:[%s14205_s27 + $0x358] sm:$0xff] }
 0x320   : > { %10310 = vmatpush1.bf16.msra.mxu0 %v13776_v42  ;;  %10869 = vmatpush1.bf16.msra.mxu1 %v13778_v43  ;;  %v266_v42 = vld [vmem:[%s14205_s27 + $0x1b0] sm:$0xff]  ;;  %v263_v43 = vld [vmem:[%s14205_s27 + $0x198] sm:$0xff] }
 0x321   : > { %10311 = vmatprep.subr.bf16.mxu0 %v13785_v44  ;;  %10870 = vmatprep.subr.bf16.mxu1 %v13787_v45  ;;  %v267_v44 = vld [vmem:[%s14205_s27 + $0x1b8] sm:$0xff]  ;;  %v12276_v45 = vcombine.low %v254_v33, %v258_v34  ;;  %v12285_v47 = vcombine.high %v262_v41, %v266_v42  ;;  %v318_v34 = vld [vmem:[%s14205_s27 + $0x350] sm:$0xff] }
 0x322   : > { %v12287_v49 = vcombine.high %v263_v43, %v267_v44  ;;  %v12286_v55 = vcombine.low %v263_v43, %v267_v44  ;;  %v330_v43 = vld [vmem:[%s14205_s27 + $0x3b0] sm:$0xff]  ;;  %v327_v44 = vld [vmem:[%s14205_s27 + $0x398] sm:$0xff] }
 0x324   : > { %10312 = vmatpush1.bf16.msra.mxu0 %v13784_v51  ;;  %10871 = vmatpush1.bf16.msra.mxu1 %v13786_v52  ;;  %v274_v51 = vld [vmem:[%s14205_s27 + $0x1f0] sm:$0xff]  ;;  %v271_v52 = vld [vmem:[%s14205_s27 + $0x1d8] sm:$0xff] }
 0x325   : > { %10313 = vmatprep.subr.bf16.mxu0 %v13793_v53  ;;  %10872 = vmatprep.subr.bf16.mxu1 %v13795_v54  ;;  %v275_v53 = vld [vmem:[%s14205_s27 + $0x1f8] sm:$0xff]  ;;  %v12284_v54 = vcombine.low %v262_v41, %v266_v42  ;;  %v12293_v56 = vcombine.high %v270_v50, %v274_v51  ;;  %v326_v42 = vld [vmem:[%s14205_s27 + $0x390] sm:$0xff] }
 0x326   : > { %v12295_v57 = vcombine.high %v271_v52, %v275_v53  ;;  %v12294_v63 = vcombine.low %v271_v52, %v275_v53  ;;  %v338_v52 = vld [vmem:[%s14205_s27 + $0x3f0] sm:$0xff]  ;;  %v335_v53 = vld [vmem:[%s14205_s27 + $0x3d8] sm:$0xff] }
 0x328   : > { %10314 = vmatpush1.bf16.msra.mxu0 %v13792_v59  ;;  %10873 = vmatpush1.bf16.msra.mxu1 %v13794_v60  ;;  %v282_v59 = vld [vmem:[%s14205_s27 + $0x230] sm:$0xff]  ;;  %v279_v60 = vld [vmem:[%s14205_s27 + $0x218] sm:$0xff] }
 0x329   : > { %10909 = vmatprep.subr.bf16.mxu0 %v12237_v61  ;;  %11468 = vmatprep.subr.bf16.mxu1 %v12239_v62  ;;  %v283_v61 = vld [vmem:[%s14205_s27 + $0x238] sm:$0xff]  ;;  %v12292_v62 = vcombine.low %v270_v50, %v274_v51  ;;  %v12301_v0 = vcombine.high %v278_v58, %v282_v59  ;;  %v334_v51 = vld [vmem:[%s14205_s27 + $0x3d0] sm:$0xff] }
 0x32b   : > { %13800 = vmatmul.mubr.msk.bf16.vlgmr.msra.gmra.mrb[0].mxu0 %vm9787_vm0, %v14096_v1  ;;  %13801 = vmatmul.mubr.msk.bf16.vlgmr.msra.gmra.mrb[0].mxu1 %vm9787_vm0, %v14096_v1  ;;  %v12303_v1 = vcombine.high %v279_v60, %v283_v61 }
 0x32c   : > { %10910 = vmatpush1.bf16.msra.mxu0 %v12236_v4  ;;  %11469 = vmatpush1.bf16.msra.mxu1 %v12238_v5  ;;  %v287_v4 = vld [vmem:[%s14205_s27 + $0x258] sm:$0xff] }
 0x32d   : > { %10911 = vmatprep.subr.bf16.mxu0 %v12245_v6  ;;  %11470 = vmatprep.subr.bf16.mxu1 %v12247_v7  ;;  %v291_v5 = vld [vmem:[%s14205_s27 + $0x278] sm:$0xff]  ;;  %v12300_v6 = vcombine.low %v278_v58, %v282_v59  ;;  %v12302_v7 = vcombine.low %v279_v60, %v283_v61  ;;  %v342_v59 = vld [vmem:[%s14205_s27 + $0x410] sm:$0xff] }
 0x32e   : > { %10941 = vmatprep.mubr.bf16.mxu0 %v14097_v18  ;;  %11500 = vmatprep.mubr.bf16.mxu1 %v14097_v18  ;;  %v12311_v9 = vcombine.high %v287_v4, %v291_v5  ;;  %v302_v18 = vld [vmem:[%s14205_s27 + $0x2d0] sm:$0xff]  ;;  %v343_v61 = vld [vmem:[%s14205_s27 + $0x418] sm:$0xff] }
 0x32f   : > { %v346_v60 = vld [vmem:[%s14205_s27 + $0x430] sm:$0xff] }
 0x330   : > { %10912 = vmatpush1.bf16.msra.mxu0 %v12244_v12  ;;  %11471 = vmatpush1.bf16.msra.mxu1 %v12246_v13  ;;  %v295_v12 = vld [vmem:[%s14205_s27 + $0x298] sm:$0xff] }
 0x331   : > { %10913 = vmatprep.subr.bf16.mxu0 %v12253_v14  ;;  %11472 = vmatprep.subr.bf16.mxu1 %v12255_v15  ;;  %v299_v13 = vld [vmem:[%s14205_s27 + $0x2b8] sm:$0xff]  ;;  %v12308_v14 = vcombine.low %v286_v2, %v290_v3  ;;  %v12310_v15 = vcombine.low %v287_v4, %v291_v5  ;;  %v350_v3 = vld [vmem:[%s14205_s27 + $0x450] sm:$0xff] }
 0x332   : > { %v12319_v17 = vcombine.high %v295_v12, %v299_v13  ;;  %v354_v4 = vld [vmem:[%s14205_s27 + $0x470] sm:$0xff]  ;;  %v351_v5 = vld [vmem:[%s14205_s27 + $0x458] sm:$0xff] }
 0x334   : > { %10914 = vmatpush1.bf16.msra.mxu0 %v12252_v21  ;;  %11473 = vmatpush1.bf16.msra.mxu1 %v12254_v22  ;;  %v307_v21 = vld [vmem:[%s14205_s27 + $0x2f8] sm:$0xff]  ;;  %v12316_v22 = vcombine.low %v294_v10, %v298_v11  ;;  %v358_v11 = vld [vmem:[%s14205_s27 + $0x490] sm:$0xff] }
 0x335   : > { %10915 = vmatprep.subr.bf16.mxu0 %v12261_v23  ;;  %11474 = vmatprep.subr.bf16.mxu1 %v12263_v24  ;;  %v12318_v23 = vcombine.low %v295_v12, %v299_v13  ;;  %v12325_v24 = vcombine.high %v302_v18, %v306_v19  ;;  %v12327_v25 = vcombine.high %v303_v20, %v307_v21  ;;  %v362_v12 = vld [vmem:[%s14205_s27 + $0x4b0] sm:$0xff]  ;;  %v14098_v13 = vld [vmem:[%s15996_s0] ss:$100 sps:$4 sm:$0xff]  }
 0x338   : > { %10916 = vmatpush1.bf16.msra.mxu0 %v12260_v29  ;;  %11475 = vmatpush1.bf16.msra.mxu1 %v12262_v30  ;;  %v315_v29 = vld [vmem:[%s14205_s27 + $0x338] sm:$0xff]  ;;  %v12324_v30 = vcombine.low %v302_v18, %v306_v19  ;;  %v12381_v18 = vcombine.high %v358_v11, %v362_v12 }
 0x339   : > { %10917 = vmatprep.subr.bf16.mxu0 %v12269_v31  ;;  %11476 = vmatprep.subr.bf16.mxu1 %v12271_v32  ;;  %v12326_v31 = vcombine.low %v303_v20, %v307_v21  ;;  %v12333_v32 = vcombine.high %v310_v26, %v314_v27  ;;  %v12335_v33 = vcombine.high %v311_v28, %v315_v29  ;;  %v366_v20 = vld [vmem:[%s14205_s27 + $0x4d0] sm:$0xff] }
 0x33a   : > { %v370_v21 = vld [vmem:[%s14205_s27 + $0x4f0] sm:$0xff] }
 0x33c   : > { %10918 = vmatpush1.bf16.msra.mxu0 %v12268_v37  ;;  %11477 = vmatpush1.bf16.msra.mxu1 %v12270_v38  ;;  %v323_v37 = vld [vmem:[%s14205_s27 + $0x378] sm:$0xff]  ;;  %v12332_v38 = vcombine.low %v310_v26, %v314_v27  ;;  %v12389_v27 = vcombine.high %v366_v20, %v370_v21 }
 0x33d   : > { %10919 = vmatprep.subr.bf16.mxu0 %v12277_v39  ;;  %11478 = vmatprep.subr.bf16.mxu1 %v12279_v40  ;;  %v12334_v39 = vcombine.low %v311_v28, %v315_v29  ;;  %v12341_v40 = vcombine.high %v318_v34, %v322_v35  ;;  %v12343_v41 = vcombine.high %v319_v36, %v323_v37  ;;  %v374_v29 = vld [vmem:[%s14205_s27 + $0x510] sm:$0xff] }
 0x340   : > { %10920 = vmatpush1.bf16.msra.mxu0 %v12276_v45  ;;  %11479 = vmatpush1.bf16.msra.mxu1 %v12278_v46  ;;  %v331_v45 = vld [vmem:[%s14205_s27 + $0x3b8] sm:$0xff]  ;;  %v12340_v46 = vcombine.low %v318_v34, %v322_v35 }
 0x341   : > { %10921 = vmatprep.subr.bf16.mxu0 %v12285_v47  ;;  %11480 = vmatprep.subr.bf16.mxu1 %v12287_v49  ;;  %v12342_v47 = vcombine.low %v319_v36, %v323_v37  ;;  %v12349_v49 = vcombine.high %v326_v42, %v330_v43  ;;  %v12351_v50 = vcombine.high %v327_v44, %v331_v45  ;;  %v382_v37 = vld [vmem:[%s14205_s27 + $0x550] sm:$0xff] }
 0x344   : > { %10922 = vmatpush1.bf16.msra.mxu0 %v12284_v54  ;;  %11481 = vmatpush1.bf16.msra.mxu1 %v12286_v55  ;;  %v339_v54 = vld [vmem:[%s14205_s27 + $0x3f8] sm:$0xff]  ;;  %v12348_v55 = vcombine.low %v326_v42, %v330_v43 }
 0x345   : > { %10923 = vmatprep.subr.bf16.mxu0 %v12293_v56  ;;  %11482 = vmatprep.subr.bf16.mxu1 %v12295_v57  ;;  %v12350_v56 = vcombine.low %v327_v44, %v331_v45  ;;  %v12357_v57 = vcombine.high %v334_v51, %v338_v52  ;;  %v12359_v58 = vcombine.high %v335_v53, %v339_v54  ;;  %v390_v45 = vld [vmem:[%s14205_s27 + $0x590] sm:$0xff] }
 0x348   : > { %10924 = vmatpush1.bf16.msra.mxu0 %v12292_v62  ;;  %11483 = vmatpush1.bf16.msra.mxu1 %v12294_v63  ;;  %v347_v62 = vld [vmem:[%s14205_s27 + $0x438] sm:$0xff]  ;;  %v12356_v63 = vcombine.low %v334_v51, %v338_v52 }
 0x349   : > { %10925 = vmatprep.subr.bf16.mxu0 %v12301_v0  ;;  %11484 = vmatprep.subr.bf16.mxu1 %v12303_v1  ;;  %v12358_v0 = vcombine.low %v335_v53, %v339_v54  ;;  %v12365_v1 = vcombine.high %v342_v59, %v346_v60  ;;  %v12367_v2 = vcombine.high %v343_v61, %v347_v62  ;;  %v398_v54 = vld [vmem:[%s14205_s27 + $0x5d0] sm:$0xff] }
 0x34c   : > { %10926 = vmatpush1.bf16.msra.mxu0 %v12300_v6  ;;  %11485 = vmatpush1.bf16.msra.mxu1 %v12302_v7  ;;  %v355_v6 = vld [vmem:[%s14205_s27 + $0x478] sm:$0xff]  ;;  %v12364_v7 = vcombine.low %v342_v59, %v346_v60 }
 0x34d   : > { %10927 = vmatprep.subr.bf16.mxu0 %v12309_v8  ;;  %11486 = vmatprep.subr.bf16.mxu1 %v12311_v9  ;;  %v12366_v8 = vcombine.low %v343_v61, %v347_v62  ;;  %v12373_v9 = vcombine.high %v350_v3, %v354_v4  ;;  %v12375_v10 = vcombine.high %v351_v5, %v355_v6  ;;  %v406_v62 = vld [vmem:[%s14205_s27 + $0x610] sm:$0xff] }
 0x350   : > { %10928 = vmatpush1.bf16.msra.mxu0 %v12308_v14  ;;  %11487 = vmatpush1.bf16.msra.mxu1 %v12310_v15  ;;  %v359_v14 = vld [vmem:[%s14205_s27 + $0x498] sm:$0xff] }
 0x351   : > { %10929 = vmatprep.subr.bf16.mxu0 %v12317_v16  ;;  %11488 = vmatprep.subr.bf16.mxu1 %v12319_v17  ;;  %v363_v15 = vld [vmem:[%s14205_s27 + $0x4b8] sm:$0xff]  ;;  %v12372_v16 = vcombine.low %v350_v3, %v354_v4  ;;  %v12374_v17 = vcombine.low %v351_v5, %v355_v6  ;;  %v414_v6 = vld [vmem:[%s14205_s27 + $0x650] sm:$0xff] }
 0x352   : > { %v12383_v19 = vcombine.high %v359_v14, %v363_v15  ;;  %v12382_v26 = vcombine.low %v359_v14, %v363_v15  ;;  %v422_v14 = vld [vmem:[%s14205_s27 + $0x690] sm:$0xff] }
 0x353   : > { %v426_v15 = vld [vmem:[%s14205_s27 + $0x6b0] sm:$0xff] }
 0x354   : > { %10930 = vmatpush1.bf16.msra.mxu0 %v12316_v22  ;;  %11489 = vmatpush1.bf16.msra.mxu1 %v12318_v23  ;;  %v14099_v22 = vld [vmem:[%s15996_s0 + $0xc] ss:$100 sps:$4 sm:$0xff]   ;;  %v367_v23 = vld [vmem:[%s14205_s27 + $0x4d8] sm:$0xff] }
 0x355   : > { %10931 = vmatprep.subr.bf16.mxu0 %v12325_v24  ;;  %11490 = vmatprep.subr.bf16.mxu1 %v12327_v25  ;;  %v371_v24 = vld [vmem:[%s14205_s27 + $0x4f8] sm:$0xff]  ;;  %v12380_v25 = vcombine.low %v358_v11, %v362_v12 }
 0x356   : > { %v12391_v28 = vcombine.high %v367_v23, %v371_v24  ;;  %v12390_v34 = vcombine.low %v367_v23, %v371_v24  ;;  %v434_v23 = vld [vmem:[%s14205_s27 + $0x6f0] sm:$0xff]  ;;  %v431_v24 = vld [vmem:[%s14205_s27 + $0x6d8] sm:$0xff] }
 0x358   : > { %10932 = vmatpush1.bf16.msra.mxu0 %v12324_v30  ;;  %11491 = vmatpush1.bf16.msra.mxu1 %v12326_v31  ;;  %v378_v30 = vld [vmem:[%s14205_s27 + $0x530] sm:$0xff]  ;;  %v375_v31 = vld [vmem:[%s14205_s27 + $0x518] sm:$0xff] }
 0x359   : > { %10933 = vmatprep.subr.bf16.mxu0 %v12333_v32  ;;  %11492 = vmatprep.subr.bf16.mxu1 %v12335_v33  ;;  %v379_v32 = vld [vmem:[%s14205_s27 + $0x538] sm:$0xff]  ;;  %v12388_v33 = vcombine.low %v366_v20, %v370_v21  ;;  %v12397_v35 = vcombine.high %v374_v29, %v378_v30  ;;  %v12445_v20 = vcombine.high %v422_v14, %v426_v15 }
 0x35a   : > { %v12399_v36 = vcombine.high %v375_v31, %v379_v32  ;;  %v12398_v42 = vcombine.low %v375_v31, %v379_v32  ;;  %v442_v31 = vld [vmem:[%s14205_s27 + $0x730] sm:$0xff]  ;;  %v439_v32 = vld [vmem:[%s14205_s27 + $0x718] sm:$0xff] }
 0x35c   : > { %10934 = vmatpush1.bf16.msra.mxu0 %v12332_v38  ;;  %11493 = vmatpush1.bf16.msra.mxu1 %v12334_v39  ;;  %v386_v38 = vld [vmem:[%s14205_s27 + $0x570] sm:$0xff]  ;;  %v383_v39 = vld [vmem:[%s14205_s27 + $0x558] sm:$0xff] }
 0x35d   : > { %10935 = vmatprep.subr.bf16.mxu0 %v12341_v40  ;;  %11494 = vmatprep.subr.bf16.mxu1 %v12343_v41  ;;  %v387_v40 = vld [vmem:[%s14205_s27 + $0x578] sm:$0xff]  ;;  %v12396_v41 = vcombine.low %v374_v29, %v378_v30  ;;  %v12405_v43 = vcombine.high %v382_v37, %v386_v38  ;;  %v438_v30 = vld [vmem:[%s14205_s27 + $0x710] sm:$0xff] }
 0x35e   : > { %v12407_v44 = vcombine.high %v383_v39, %v387_v40  ;;  %v12406_v51 = vcombine.low %v383_v39, %v387_v40  ;;  %v450_v39 = vld [vmem:[%s14205_s27 + $0x770] sm:$0xff]  ;;  %v447_v40 = vld [vmem:[%s14205_s27 + $0x758] sm:$0xff] }
 0x360   : > { %10936 = vmatpush1.bf16.msra.mxu0 %v12340_v46  ;;  %11495 = vmatpush1.bf16.msra.mxu1 %v12342_v47  ;;  %v394_v46 = vld [vmem:[%s14205_s27 + $0x5b0] sm:$0xff]  ;;  %v391_v47 = vld [vmem:[%s14205_s27 + $0x598] sm:$0xff] }
 0x361   : > { %10937 = vmatprep.subr.bf16.mxu0 %v12349_v49  ;;  %11496 = vmatprep.subr.bf16.mxu1 %v12351_v50  ;;  %v395_v49 = vld [vmem:[%s14205_s27 + $0x5b8] sm:$0xff]  ;;  %v12404_v50 = vcombine.low %v382_v37, %v386_v38  ;;  %v12413_v52 = vcombine.high %v390_v45, %v394_v46  ;;  %v446_v38 = vld [vmem:[%s14205_s27 + $0x750] sm:$0xff] }
 0x362   : > { %v12415_v53 = vcombine.high %v391_v47, %v395_v49  ;;  %v12414_v59 = vcombine.low %v391_v47, %v395_v49  ;;  %v458_v47 = vld [vmem:[%s14205_s27 + $0x7b0] sm:$0xff]  ;;  %v455_v49 = vld [vmem:[%s14205_s27 + $0x798] sm:$0xff] }
 0x364   : > { %10938 = vmatpush1.bf16.msra.mxu0 %v12348_v55  ;;  %11497 = vmatpush1.bf16.msra.mxu1 %v12350_v56  ;;  %v402_v55 = vld [vmem:[%s14205_s27 + $0x5f0] sm:$0xff]  ;;  %v399_v56 = vld [vmem:[%s14205_s27 + $0x5d8] sm:$0xff] }
 0x365   : > { %10939 = vmatprep.subr.bf16.mxu0 %v12357_v57  ;;  %11498 = vmatprep.subr.bf16.mxu1 %v12359_v58  ;;  %v403_v57 = vld [vmem:[%s14205_s27 + $0x5f8] sm:$0xff]  ;;  %v12412_v58 = vcombine.low %v390_v45, %v394_v46  ;;  %v12421_v60 = vcombine.high %v398_v54, %v402_v55  ;;  %v454_v46 = vld [vmem:[%s14205_s27 + $0x790] sm:$0xff] }
 0x366   : > { %v12423_v61 = vcombine.high %v399_v56, %v403_v57  ;;  %v12422_v3 = vcombine.low %v399_v56, %v403_v57  ;;  %v466_v56 = vld [vmem:[%s14205_s27 + $0x7f0] sm:$0xff]  ;;  %v463_v57 = vld [vmem:[%s14205_s27 + $0x7d8] sm:$0xff] }
 0x368   : > { %10940 = vmatpush1.bf16.msra.mxu0 %v12356_v63  ;;  %11499 = vmatpush1.bf16.msra.mxu1 %v12358_v0  ;;  %v410_v63 = vld [vmem:[%s14205_s27 + $0x630] sm:$0xff]  ;;  %v407_v0 = vld [vmem:[%s14205_s27 + $0x618] sm:$0xff] }
 0x369   : > { %10952 = vmatprep.subr.bf16.mxu0 %v12365_v1  ;;  %11511 = vmatprep.subr.bf16.mxu1 %v12367_v2  ;;  %v411_v1 = vld [vmem:[%s14205_s27 + $0x638] sm:$0xff]  ;;  %v12420_v2 = vcombine.low %v398_v54, %v402_v55  ;;  %v12429_v4 = vcombine.high %v406_v62, %v410_v63  ;;  %v462_v55 = vld [vmem:[%s14205_s27 + $0x7d0] sm:$0xff] }
 0x36a   : > { %v12431_v5 = vcombine.high %v407_v0, %v411_v1  ;;  %v12430_v11 = vcombine.low %v407_v0, %v411_v1  ;;  %v474_v0 = vld [vmem:[%s14205_s27 + $0x830] sm:$0xff]  ;;  %v471_v1 = vld [vmem:[%s14205_s27 + $0x818] sm:$0xff] }
 0x36b   : > { %10942 = vmatmul.mubr.bf16.vlgmr.msra.gmra.mrb[4].mxu0 %v14098_v13  ;;  %11501 = vmatmul.mubr.bf16.vlgmr.msra.gmra.mrb[4].mxu1 %v14098_v13 }
 0x36c   : > { %10953 = vmatpush1.bf16.msra.mxu0 %v12364_v7  ;;  %11512 = vmatpush1.bf16.msra.mxu1 %v12366_v8  ;;  %v418_v7 = vld [vmem:[%s14205_s27 + $0x670] sm:$0xff]  ;;  %v415_v8 = vld [vmem:[%s14205_s27 + $0x658] sm:$0xff] }
 0x36d   : > { %10954 = vmatprep.subr.bf16.mxu0 %v12373_v9  ;;  %11513 = vmatprep.subr.bf16.mxu1 %v12375_v10  ;;  %v419_v9 = vld [vmem:[%s14205_s27 + $0x678] sm:$0xff]  ;;  %v12428_v10 = vcombine.low %v406_v62, %v410_v63  ;;  %v12437_v12 = vcombine.high %v414_v6, %v418_v7  ;;  %v470_v63 = vld [vmem:[%s14205_s27 + $0x810] sm:$0xff] }
 0x36e   : > { %10984 = vmatprep.mubr.bf16.mxu0 %v14099_v22  ;;  %11543 = vmatprep.mubr.bf16.mxu1 %v14099_v22  ;;  %v12439_v13 = vcombine.high %v415_v8, %v419_v9  ;;  %v430_v22 = vld [vmem:[%s14205_s27 + $0x6d0] sm:$0xff] }
 0x370   : > { %10955 = vmatpush1.bf16.msra.mxu0 %v12372_v16  ;;  %11514 = vmatpush1.bf16.msra.mxu1 %v12374_v17  ;;  %v423_v16 = vld [vmem:[%s14205_s27 + $0x698] sm:$0xff] }
 0x371   : > { %10956 = vmatprep.subr.bf16.mxu0 %v12381_v18  ;;  %11515 = vmatprep.subr.bf16.mxu1 %v12383_v19  ;;  %v427_v17 = vld [vmem:[%s14205_s27 + $0x6b8] sm:$0xff]  ;;  %v12436_v18 = vcombine.low %v414_v6, %v418_v7  ;;  %v12438_v19 = vcombine.low %v415_v8, %v419_v9  ;;  %v478_v7 = vld [vmem:[%s14205_s27 + $0x850] sm:$0xff] }
 0x372   : > { %v12447_v21 = vcombine.high %v423_v16, %v427_v17  ;;  %v482_v8 = vld [vmem:[%s14205_s27 + $0x870] sm:$0xff]  ;;  %v479_v9 = vld [vmem:[%s14205_s27 + $0x858] sm:$0xff] }
 0x374   : > { %10957 = vmatpush1.bf16.msra.mxu0 %v12380_v25  ;;  %11516 = vmatpush1.bf16.msra.mxu1 %v12382_v26  ;;  %v435_v25 = vld [vmem:[%s14205_s27 + $0x6f8] sm:$0xff]  ;;  %v12444_v26 = vcombine.low %v422_v14, %v426_v15  ;;  %v486_v15 = vld [vmem:[%s14205_s27 + $0x890] sm:$0xff] }
 0x375   : > { %10958 = vmatprep.subr.bf16.mxu0 %v12389_v27  ;;  %11517 = vmatprep.subr.bf16.mxu1 %v12391_v28  ;;  %v12446_v27 = vcombine.low %v423_v16, %v427_v17  ;;  %v12453_v28 = vcombine.high %v430_v22, %v434_v23  ;;  %v12455_v29 = vcombine.high %v431_v24, %v435_v25  ;;  %v490_v16 = vld [vmem:[%s14205_s27 + $0x8b0] sm:$0xff]  ;;  %v14100_v17 = vld [vmem:[%s15996_s0 + $0x8] ss:$100 sps:$4 sm:$0xff]  }
 0x378   : > { %10959 = vmatpush1.bf16.msra.mxu0 %v12388_v33  ;;  %11518 = vmatpush1.bf16.msra.mxu1 %v12390_v34  ;;  %v443_v33 = vld [vmem:[%s14205_s27 + $0x738] sm:$0xff]  ;;  %v12452_v34 = vcombine.low %v430_v22, %v434_v23  ;;  %v12509_v22 = vcombine.high %v486_v15, %v490_v16 }
 0x379   : > { %10960 = vmatprep.subr.bf16.mxu0 %v12397_v35  ;;  %11519 = vmatprep.subr.bf16.mxu1 %v12399_v36  ;;  %v12454_v35 = vcombine.low %v431_v24, %v435_v25  ;;  %v12461_v36 = vcombine.high %v438_v30, %v442_v31  ;;  %v12463_v37 = vcombine.high %v439_v32, %v443_v33  ;;  %v494_v24 = vld [vmem:[%s14205_s27 + $0x8d0] sm:$0xff] }
 0x37a   : > { %v498_v25 = vld [vmem:[%s14205_s27 + $0x8f0] sm:$0xff] }
 0x37c   : > { %10961 = vmatpush1.bf16.msra.mxu0 %v12396_v41  ;;  %11520 = vmatpush1.bf16.msra.mxu1 %v12398_v42  ;;  %v451_v41 = vld [vmem:[%s14205_s27 + $0x778] sm:$0xff]  ;;  %v12460_v42 = vcombine.low %v438_v30, %v442_v31  ;;  %v12517_v31 = vcombine.high %v494_v24, %v498_v25 }
 0x37d   : > { %10962 = vmatprep.subr.bf16.mxu0 %v12405_v43  ;;  %11521 = vmatprep.subr.bf16.mxu1 %v12407_v44  ;;  %v12462_v43 = vcombine.low %v439_v32, %v443_v33  ;;  %v12469_v44 = vcombine.high %v446_v38, %v450_v39  ;;  %v12471_v45 = vcombine.high %v447_v40, %v451_v41  ;;  %v502_v33 = vld [vmem:[%s14205_s27 + $0x910] sm:$0xff] }
 0x380   : > { %10963 = vmatpush1.bf16.msra.mxu0 %v12404_v50  ;;  %11522 = vmatpush1.bf16.msra.mxu1 %v12406_v51  ;;  %v459_v50 = vld [vmem:[%s14205_s27 + $0x7b8] sm:$0xff]  ;;  %v12468_v51 = vcombine.low %v446_v38, %v450_v39 }
 0x381   : > { %10964 = vmatprep.subr.bf16.mxu0 %v12413_v52  ;;  %11523 = vmatprep.subr.bf16.mxu1 %v12415_v53  ;;  %v12470_v52 = vcombine.low %v447_v40, %v451_v41  ;;  %v12477_v53 = vcombine.high %v454_v46, %v458_v47  ;;  %v12479_v54 = vcombine.high %v455_v49, %v459_v50  ;;  %v510_v41 = vld [vmem:[%s14205_s27 + $0x950] sm:$0xff] }
 0x384   : > { %10965 = vmatpush1.bf16.msra.mxu0 %v12412_v58  ;;  %11524 = vmatpush1.bf16.msra.mxu1 %v12414_v59  ;;  %v467_v58 = vld [vmem:[%s14205_s27 + $0x7f8] sm:$0xff]  ;;  %v12476_v59 = vcombine.low %v454_v46, %v458_v47 }
 0x385   : > { %10966 = vmatprep.subr.bf16.mxu0 %v12421_v60  ;;  %11525 = vmatprep.subr.bf16.mxu1 %v12423_v61  ;;  %v12478_v60 = vcombine.low %v455_v49, %v459_v50  ;;  %v12485_v61 = vcombine.high %v462_v55, %v466_v56  ;;  %v12487_v62 = vcombine.high %v463_v57, %v467_v58  ;;  %v518_v50 = vld [vmem:[%s14205_s27 + $0x990] sm:$0xff] }
 0x388   : > { %10967 = vmatpush1.bf16.msra.mxu0 %v12420_v2  ;;  %11526 = vmatpush1.bf16.msra.mxu1 %v12422_v3  ;;  %v475_v2 = vld [vmem:[%s14205_s27 + $0x838] sm:$0xff]  ;;  %v12484_v3 = vcombine.low %v462_v55, %v466_v56 }
 0x389   : > { %10968 = vmatprep.subr.bf16.mxu0 %v12429_v4  ;;  %11527 = vmatprep.subr.bf16.mxu1 %v12431_v5  ;;  %v12486_v4 = vcombine.low %v463_v57, %v467_v58  ;;  %v12493_v5 = vcombine.high %v470_v63, %v474_v0  ;;  %v12495_v6 = vcombine.high %v471_v1, %v475_v2  ;;  %v526_v58 = vld [vmem:[%s14205_s27 + $0x9d0] sm:$0xff] }
 0x38c   : > { %10969 = vmatpush1.bf16.msra.mxu0 %v12428_v10  ;;  %11528 = vmatpush1.bf16.msra.mxu1 %v12430_v11  ;;  %v483_v10 = vld [vmem:[%s14205_s27 + $0x878] sm:$0xff]  ;;  %v12492_v11 = vcombine.low %v470_v63, %v474_v0 }
 0x38d   : > { %10970 = vmatprep.subr.bf16.mxu0 %v12437_v12  ;;  %11529 = vmatprep.subr.bf16.mxu1 %v12439_v13  ;;  %v12494_v12 = vcombine.low %v471_v1, %v475_v2  ;;  %v12501_v13 = vcombine.high %v478_v7, %v482_v8  ;;  %v12503_v14 = vcombine.high %v479_v9, %v483_v10  ;;  %v534_v2 = vld [vmem:[%s14205_s27 + $0xa10] sm:$0xff] }
 0x390   : > { %10971 = vmatpush1.bf16.msra.mxu0 %v12436_v18  ;;  %11530 = vmatpush1.bf16.msra.mxu1 %v12438_v19  ;;  %v487_v18 = vld [vmem:[%s14205_s27 + $0x898] sm:$0xff] }
 0x391   : > { %10972 = vmatprep.subr.bf16.mxu0 %v12445_v20  ;;  %11531 = vmatprep.subr.bf16.mxu1 %v12447_v21  ;;  %v491_v19 = vld [vmem:[%s14205_s27 + $0x8b8] sm:$0xff]  ;;  %v12500_v20 = vcombine.low %v478_v7, %v482_v8  ;;  %v12502_v21 = vcombine.low %v479_v9, %v483_v10  ;;  %v542_v10 = vld [vmem:[%s14205_s27 + $0xa50] sm:$0xff] }
 0x392   : > { %v12511_v23 = vcombine.high %v487_v18, %v491_v19  ;;  %v12510_v30 = vcombine.low %v487_v18, %v491_v19  ;;  %v550_v18 = vld [vmem:[%s14205_s27 + $0xa90] sm:$0xff] }
 0x393   : > { %v554_v19 = vld [vmem:[%s14205_s27 + $0xab0] sm:$0xff] }
 0x394   : > { %10973 = vmatpush1.bf16.msra.mxu0 %v12444_v26  ;;  %11532 = vmatpush1.bf16.msra.mxu1 %v12446_v27  ;;  %v14101_v26 = vld [vmem:[%s15996_s0 + $0x14] ss:$100 sps:$4 sm:$0xff]  }
 0x395   : > { %10974 = vmatprep.subr.bf16.mxu0 %v12453_v28  ;;  %11533 = vmatprep.subr.bf16.mxu1 %v12455_v29  ;;  %v495_v27 = vld [vmem:[%s14205_s27 + $0x8d8] sm:$0xff]  ;;  %v12508_v29 = vcombine.low %v486_v15, %v490_v16 }
 0x396   : > { %v499_v28 = vld [vmem:[%s14205_s27 + $0x8f8] sm:$0xff] }
 0x397   : > { %v12519_v32 = vcombine.high %v495_v27, %v499_v28  ;;  %v12518_v38 = vcombine.low %v495_v27, %v499_v28  ;;  %v562_v27 = vld [vmem:[%s14205_s27 + $0xaf0] sm:$0xff]  ;;  %v559_v28 = vld [vmem:[%s14205_s27 + $0xad8] sm:$0xff] }
 0x398   : > { %10975 = vmatpush1.bf16.msra.mxu0 %v12452_v34  ;;  %11534 = vmatpush1.bf16.msra.mxu1 %v12454_v35  ;;  %v506_v34 = vld [vmem:[%s14205_s27 + $0x930] sm:$0xff]  ;;  %v503_v35 = vld [vmem:[%s14205_s27 + $0x918] sm:$0xff] }
 0x399   : > { %10976 = vmatprep.subr.bf16.mxu0 %v12461_v36  ;;  %11535 = vmatprep.subr.bf16.mxu1 %v12463_v37  ;;  %v507_v36 = vld [vmem:[%s14205_s27 + $0x938] sm:$0xff]  ;;  %v12516_v37 = vcombine.low %v494_v24, %v498_v25  ;;  %v12525_v39 = vcombine.high %v502_v33, %v506_v34  ;;  %v12573_v24 = vcombine.high %v550_v18, %v554_v19 }
 0x39a   : > { %v12527_v40 = vcombine.high %v503_v35, %v507_v36  ;;  %v12526_v46 = vcombine.low %v503_v35, %v507_v36  ;;  %v570_v35 = vld [vmem:[%s14205_s27 + $0xb30] sm:$0xff]  ;;  %v567_v36 = vld [vmem:[%s14205_s27 + $0xb18] sm:$0xff] }
 0x39c   : > { %10977 = vmatpush1.bf16.msra.mxu0 %v12460_v42  ;;  %11536 = vmatpush1.bf16.msra.mxu1 %v12462_v43  ;;  %v514_v42 = vld [vmem:[%s14205_s27 + $0x970] sm:$0xff]  ;;  %v511_v43 = vld [vmem:[%s14205_s27 + $0x958] sm:$0xff] }
 0x39d   : > { %10978 = vmatprep.subr.bf16.mxu0 %v12469_v44  ;;  %11537 = vmatprep.subr.bf16.mxu1 %v12471_v45  ;;  %v515_v44 = vld [vmem:[%s14205_s27 + $0x978] sm:$0xff]  ;;  %v12524_v45 = vcombine.low %v502_v33, %v506_v34  ;;  %v12533_v47 = vcombine.high %v510_v41, %v514_v42  ;;  %v566_v34 = vld [vmem:[%s14205_s27 + $0xb10] sm:$0xff] }
 0x39e   : > { %v12535_v49 = vcombine.high %v511_v43, %v515_v44  ;;  %v12534_v55 = vcombine.low %v511_v43, %v515_v44  ;;  %v578_v43 = vld [vmem:[%s14205_s27 + $0xb70] sm:$0xff]  ;;  %v575_v44 = vld [vmem:[%s14205_s27 + $0xb58] sm:$0xff] }
 0x3a0   : > { %10979 = vmatpush1.bf16.msra.mxu0 %v12468_v51  ;;  %11538 = vmatpush1.bf16.msra.mxu1 %v12470_v52  ;;  %v522_v51 = vld [vmem:[%s14205_s27 + $0x9b0] sm:$0xff]  ;;  %v519_v52 = vld [vmem:[%s14205_s27 + $0x998] sm:$0xff] }
 0x3a1   : > { %10980 = vmatprep.subr.bf16.mxu0 %v12477_v53  ;;  %11539 = vmatprep.subr.bf16.mxu1 %v12479_v54  ;;  %v523_v53 = vld [vmem:[%s14205_s27 + $0x9b8] sm:$0xff]  ;;  %v12532_v54 = vcombine.low %v510_v41, %v514_v42  ;;  %v12541_v56 = vcombine.high %v518_v50, %v522_v51  ;;  %v574_v42 = vld [vmem:[%s14205_s27 + $0xb50] sm:$0xff] }
 0x3a2   : > { %v12543_v57 = vcombine.high %v519_v52, %v523_v53  ;;  %v12542_v63 = vcombine.low %v519_v52, %v523_v53  ;;  %v586_v52 = vld [vmem:[%s14205_s27 + $0xbb0] sm:$0xff]  ;;  %v583_v53 = vld [vmem:[%s14205_s27 + $0xb98] sm:$0xff] }
 0x3a4   : > { %10981 = vmatpush1.bf16.msra.mxu0 %v12476_v59  ;;  %11540 = vmatpush1.bf16.msra.mxu1 %v12478_v60  ;;  %v530_v59 = vld [vmem:[%s14205_s27 + $0x9f0] sm:$0xff]  ;;  %v527_v60 = vld [vmem:[%s14205_s27 + $0x9d8] sm:$0xff] }
 0x3a5   : > { %10982 = vmatprep.subr.bf16.mxu0 %v12485_v61  ;;  %11541 = vmatprep.subr.bf16.mxu1 %v12487_v62  ;;  %v531_v61 = vld [vmem:[%s14205_s27 + $0x9f8] sm:$0xff]  ;;  %v12540_v62 = vcombine.low %v518_v50, %v522_v51  ;;  %v12549_v0 = vcombine.high %v526_v58, %v530_v59  ;;  %v582_v51 = vld [vmem:[%s14205_s27 + $0xb90] sm:$0xff] }
 0x3a6   : > { %v12551_v1 = vcombine.high %v527_v60, %v531_v61  ;;  %v12550_v7 = vcombine.low %v527_v60, %v531_v61  ;;  %v594_v60 = vld [vmem:[%s14205_s27 + $0xbf0] sm:$0xff]  ;;  %v591_v61 = vld [vmem:[%s14205_s27 + $0xbd8] sm:$0xff] }
 0x3a8   : > { %10983 = vmatpush1.bf16.msra.mxu0 %v12484_v3  ;;  %11542 = vmatpush1.bf16.msra.mxu1 %v12486_v4  ;;  %v538_v3 = vld [vmem:[%s14205_s27 + $0xa30] sm:$0xff]  ;;  %v535_v4 = vld [vmem:[%s14205_s27 + $0xa18] sm:$0xff] }
 0x3a9   : > { %10995 = vmatprep.subr.bf16.mxu0 %v12493_v5  ;;  %11554 = vmatprep.subr.bf16.mxu1 %v12495_v6  ;;  %v539_v5 = vld [vmem:[%s14205_s27 + $0xa38] sm:$0xff]  ;;  %v12548_v6 = vcombine.low %v526_v58, %v530_v59  ;;  %v12557_v8 = vcombine.high %v534_v2, %v538_v3  ;;  %v590_v59 = vld [vmem:[%s14205_s27 + $0xbd0] sm:$0xff] }
 0x3aa   : > { %v12559_v9 = vcombine.high %v535_v4, %v539_v5  ;;  %v12558_v15 = vcombine.low %v535_v4, %v539_v5  ;;  %v602_v4 = vld [vmem:[%s14205_s27 + $0xc30] sm:$0xff]  ;;  %v599_v5 = vld [vmem:[%s14205_s27 + $0xc18] sm:$0xff] }
 0x3ab   : > { %10985 = vmatmul.mubr.bf16.vlgmr.msra.gmra.mrb[4].mxu0 %v14100_v17  ;;  %11544 = vmatmul.mubr.bf16.vlgmr.msra.gmra.mrb[4].mxu1 %v14100_v17 }
 0x3ac   : > { %10996 = vmatpush1.bf16.msra.mxu0 %v12492_v11  ;;  %11555 = vmatpush1.bf16.msra.mxu1 %v12494_v12  ;;  %v546_v11 = vld [vmem:[%s14205_s27 + $0xa70] sm:$0xff]  ;;  %v543_v12 = vld [vmem:[%s14205_s27 + $0xa58] sm:$0xff] }
 0x3ad   : > { %10997 = vmatprep.subr.bf16.mxu0 %v12501_v13  ;;  %11556 = vmatprep.subr.bf16.mxu1 %v12503_v14  ;;  %v547_v13 = vld [vmem:[%s14205_s27 + $0xa78] sm:$0xff]  ;;  %v12556_v14 = vcombine.low %v534_v2, %v538_v3  ;;  %v12565_v16 = vcombine.high %v542_v10, %v546_v11  ;;  %v598_v3 = vld [vmem:[%s14205_s27 + $0xc10] sm:$0xff] }
 0x3ae   : > { %11027 = vmatprep.mubr.bf16.mxu0 %v14101_v26  ;;  %11586 = vmatprep.mubr.bf16.mxu1 %v14101_v26  ;;  %v12567_v17 = vcombine.high %v543_v12, %v547_v13  ;;  %v558_v26 = vld [vmem:[%s14205_s27 + $0xad0] sm:$0xff] }
 0x3b0   : > { %10998 = vmatpush1.bf16.msra.mxu0 %v12500_v20  ;;  %11557 = vmatpush1.bf16.msra.mxu1 %v12502_v21  ;;  %v551_v20 = vld [vmem:[%s14205_s27 + $0xa98] sm:$0xff] }
 0x3b1   : > { %10999 = vmatprep.subr.bf16.mxu0 %v12509_v22  ;;  %11558 = vmatprep.subr.bf16.mxu1 %v12511_v23  ;;  %v555_v21 = vld [vmem:[%s14205_s27 + $0xab8] sm:$0xff]  ;;  %v12564_v22 = vcombine.low %v542_v10, %v546_v11  ;;  %v12566_v23 = vcombine.low %v543_v12, %v547_v13  ;;  %v606_v11 = vld [vmem:[%s14205_s27 + $0xc50] sm:$0xff] }
 0x3b2   : > { %v12575_v25 = vcombine.high %v551_v20, %v555_v21  ;;  %v610_v12 = vld [vmem:[%s14205_s27 + $0xc70] sm:$0xff]  ;;  %v607_v13 = vld [vmem:[%s14205_s27 + $0xc58] sm:$0xff] }
 0x3b4   : > { %11000 = vmatpush1.bf16.msra.mxu0 %v12508_v29  ;;  %11559 = vmatpush1.bf16.msra.mxu1 %v12510_v30  ;;  %v563_v29 = vld [vmem:[%s14205_s27 + $0xaf8] sm:$0xff]  ;;  %v12572_v30 = vcombine.low %v550_v18, %v554_v19  ;;  %v614_v19 = vld [vmem:[%s14205_s27 + $0xc90] sm:$0xff] }
 0x3b5   : > { %11001 = vmatprep.subr.bf16.mxu0 %v12517_v31  ;;  %11560 = vmatprep.subr.bf16.mxu1 %v12519_v32  ;;  %v12574_v31 = vcombine.low %v551_v20, %v555_v21  ;;  %v12581_v32 = vcombine.high %v558_v26, %v562_v27  ;;  %v12583_v33 = vcombine.high %v559_v28, %v563_v29  ;;  %v618_v20 = vld [vmem:[%s14205_s27 + $0xcb0] sm:$0xff] }
 0x3b6   : > { %v14102_v21 = vld [vmem:[%s15996_s0 + $0x10] ss:$100 sps:$4 sm:$0xff]  }
 0x3b8   : > { %11002 = vmatpush1.bf16.msra.mxu0 %v12516_v37  ;;  %11561 = vmatpush1.bf16.msra.mxu1 %v12518_v38  ;;  %v571_v37 = vld [vmem:[%s14205_s27 + $0xb38] sm:$0xff]  ;;  %v12580_v38 = vcombine.low %v558_v26, %v562_v27  ;;  %v12637_v26 = vcombine.high %v614_v19, %v618_v20 }
 0x3b9   : > { %11003 = vmatprep.subr.bf16.mxu0 %v12525_v39  ;;  %11562 = vmatprep.subr.bf16.mxu1 %v12527_v40  ;;  %v12582_v39 = vcombine.low %v559_v28, %v563_v29  ;;  %v12589_v40 = vcombine.high %v566_v34, %v570_v35  ;;  %v12591_v41 = vcombine.high %v567_v36, %v571_v37  ;;  %v622_v28 = vld [vmem:[%s14205_s27 + $0xcd0] sm:$0xff] }
 0x3ba   : > { %v626_v29 = vld [vmem:[%s14205_s27 + $0xcf0] sm:$0xff] }
 0x3bc   : > { %11004 = vmatpush1.bf16.msra.mxu0 %v12524_v45  ;;  %11563 = vmatpush1.bf16.msra.mxu1 %v12526_v46  ;;  %v579_v45 = vld [vmem:[%s14205_s27 + $0xb78] sm:$0xff]  ;;  %v12588_v46 = vcombine.low %v566_v34, %v570_v35  ;;  %v12636_v34 = vcombine.low %v614_v19, %v618_v20 }
 0x3bd   : > { %11005 = vmatprep.subr.bf16.mxu0 %v12533_v47  ;;  %11564 = vmatprep.subr.bf16.mxu1 %v12535_v49  ;;  %v12590_v47 = vcombine.low %v567_v36, %v571_v37  ;;  %v12597_v49 = vcombine.high %v574_v42, %v578_v43  ;;  %v12599_v50 = vcombine.high %v575_v44, %v579_v45 }
 0x3be   : > { %v12645_v36 = vcombine.high %v622_v28, %v626_v29 }
 0x3c0   : > { %11006 = vmatpush1.bf16.msra.mxu0 %v12532_v54  ;;  %11565 = vmatpush1.bf16.msra.mxu1 %v12534_v55  ;;  %v587_v54 = vld [vmem:[%s14205_s27 + $0xbb8] sm:$0xff]  ;;  %v12596_v55 = vcombine.low %v574_v42, %v578_v43  ;;  %v12644_v43 = vcombine.low %v622_v28, %v626_v29 }
 0x3c1   : > { %11007 = vmatprep.subr.bf16.mxu0 %v12541_v56  ;;  %11566 = vmatprep.subr.bf16.mxu1 %v12543_v57  ;;  %v12598_v56 = vcombine.low %v575_v44, %v579_v45  ;;  %v12605_v57 = vcombine.high %v582_v51, %v586_v52  ;;  %v12607_v58 = vcombine.high %v583_v53, %v587_v54 }
 0x3c4   : > { %11008 = vmatpush1.bf16.msra.mxu0 %v12540_v62  ;;  %11567 = vmatpush1.bf16.msra.mxu1 %v12542_v63  ;;  %v595_v62 = vld [vmem:[%s14205_s27 + $0xbf8] sm:$0xff]  ;;  %v12604_v63 = vcombine.low %v582_v51, %v586_v52 }
 0x3c5   : > { %11009 = vmatprep.subr.bf16.mxu0 %v12549_v0  ;;  %11568 = vmatprep.subr.bf16.mxu1 %v12551_v1  ;;  %v12606_v0 = vcombine.low %v583_v53, %v587_v54  ;;  %v12613_v1 = vcombine.high %v590_v59, %v594_v60  ;;  %v12615_v2 = vcombine.high %v591_v61, %v595_v62  ;;  %v639_v51 = vld [vmem:[%s14205_s27 + $0xd58] sm:$0xff]  ;;  %v1780_v54 = vld [vmem:[%s15312_s7] sm:$0xff] }
 0x3c6   : > { %v643_v52 = vld [vmem:[%s14205_s27 + $0xd78] sm:$0xff] }
 0x3c8   : > { %11010 = vmatpush1.bf16.msra.mxu0 %v12548_v6  ;;  %11569 = vmatpush1.bf16.msra.mxu1 %v12550_v7  ;;  %v603_v6 = vld [vmem:[%s14205_s27 + $0xc38] sm:$0xff]  ;;  %v12612_v7 = vcombine.low %v590_v59, %v594_v60  ;;  %v12663_v60 = vcombine.high %v639_v51, %v643_v52 }
 0x3c9   : > { %11011 = vmatprep.subr.bf16.mxu0 %v12557_v8  ;;  %11570 = vmatprep.subr.bf16.mxu1 %v12559_v9  ;;  %v12614_v8 = vcombine.low %v591_v61, %v595_v62  ;;  %v12621_v9 = vcombine.high %v598_v3, %v602_v4  ;;  %v12623_v10 = vcombine.high %v599_v5, %v603_v6  ;;  %v646_v61 = vld [vmem:[%s14205_s27 + $0xd90] sm:$0xff] }
 0x3ca   : > { %v650_v62 = vld [vmem:[%s14205_s27 + $0xdb0] sm:$0xff] }
 0x3cc   : > { %11012 = vmatpush1.bf16.msra.mxu0 %v12556_v14  ;;  %11571 = vmatpush1.bf16.msra.mxu1 %v12558_v15  ;;  %v611_v14 = vld [vmem:[%s14205_s27 + $0xc78] sm:$0xff]  ;;  %v12620_v15 = vcombine.low %v598_v3, %v602_v4 }
 0x3cd   : > { %11013 = vmatprep.subr.bf16.mxu0 %v12565_v16  ;;  %11572 = vmatprep.subr.bf16.mxu1 %v12567_v17  ;;  %v12622_v16 = vcombine.low %v599_v5, %v603_v6  ;;  %v12629_v17 = vcombine.high %v606_v11, %v610_v12  ;;  %v12631_v18 = vcombine.high %v607_v13, %v611_v14 }
 0x3ce   : > { %v12662_v6 = vcombine.low %v639_v51, %v643_v52 }
 0x3d0   : > { %11014 = vmatpush1.bf16.msra.mxu0 %v12564_v22  ;;  %11573 = vmatpush1.bf16.msra.mxu1 %v12566_v23  ;;  %v615_v22 = vld [vmem:[%s14205_s27 + $0xc98] sm:$0xff] }
 0x3d1   : > { %11015 = vmatprep.subr.bf16.mxu0 %v12573_v24  ;;  %11574 = vmatprep.subr.bf16.mxu1 %v12575_v25  ;;  %v619_v23 = vld [vmem:[%s14205_s27 + $0xcb8] sm:$0xff]  ;;  %v12628_v24 = vcombine.low %v606_v11, %v610_v12  ;;  %v12630_v25 = vcombine.low %v607_v13, %v611_v14 }
 0x3d2   : > { %v12639_v27 = vcombine.high %v615_v22, %v619_v23  ;;  %v12638_v35 = vcombine.low %v615_v22, %v619_v23  ;;  %v655_v12 = vld [vmem:[%s14205_s27 + $0xdd8] sm:$0xff] }
 0x3d3   : > { %v659_v13 = vld [vmem:[%s14205_s27 + $0xdf8] sm:$0xff] }
 0x3d4   : > { %11016 = vmatpush1.bf16.msra.mxu0 %v12572_v30  ;;  %11575 = vmatpush1.bf16.msra.mxu1 %v12574_v31  ;;  %v14103_v30 = vld [vmem:[%s15996_s0 + $0x1c] ss:$100 sps:$4 sm:$0xff]   ;;  %v12679_v29 = vcombine.high %v655_v12, %v659_v13 }
 0x3d5   : > { %11017 = vmatprep.subr.bf16.mxu0 %v12581_v32  ;;  %11576 = vmatprep.subr.bf16.mxu1 %v12583_v33  ;;  %v623_v31 = vld [vmem:[%s14205_s27 + $0xcd8] sm:$0xff]  ;;  %v1782_v33 = vlaneseq }
 0x3d6   : > { %v627_v32 = vld [vmem:[%s14205_s27 + $0xcf8] sm:$0xff] }
 0x3d7   : > { %v12647_v37 = vcombine.high %v623_v31, %v627_v32  ;;  %v15307_v42 = vshrl.u32 %v1782_v33, 7  ;;  %v12646_v44 = vcombine.low %v623_v31, %v627_v32 }
 0x3d8   : > { %11018 = vmatpush1.bf16.msra.mxu0 %v12580_v38  ;;  %11577 = vmatpush1.bf16.msra.mxu1 %v12582_v39  ;;  %v630_v38 = vld [vmem:[%s14205_s27 + $0xd10] sm:$0xff] }
 0x3d9   : > { %11019 = vmatprep.subr.bf16.mxu0 %v12589_v40  ;;  %11578 = vmatprep.subr.bf16.mxu1 %v12591_v41  ;;  %v634_v39 = vld [vmem:[%s14205_s27 + $0xd30] sm:$0xff]  ;;  %v631_v40 = vld [vmem:[%s14205_s27 + $0xd18] sm:$0xff] }
 0x3da   : > { %v635_v41 = vld [vmem:[%s14205_s27 + $0xd38] sm:$0xff]  ;;  %v12653_v45 = vcombine.high %v630_v38, %v634_v39  ;;  %v12652_v53 = vcombine.low %v630_v38, %v634_v39 }
 0x3dc   : > { %11020 = vmatpush1.bf16.msra.mxu0 %v12588_v46  ;;  %11579 = vmatpush1.bf16.msra.mxu1 %v12590_v47  ;;  %v12655_v46 = vcombine.high %v631_v40, %v635_v41  ;;  %v638_v47 = vld [vmem:[%s14205_s27 + $0xd50] sm:$0xff] }
 0x3dd   : > { %11021 = vmatprep.subr.bf16.mxu0 %v12597_v49  ;;  %11580 = vmatprep.subr.bf16.mxu1 %v12599_v50  ;;  %v642_v49 = vld [vmem:[%s14205_s27 + $0xd70] sm:$0xff]  ;;  %v1784_v50 = vsub.s32 0, %v15307_v42 }
 0x3de   : > { %v12661_v59 = vcombine.high %v638_v47, %v642_v49  ;;  %v12660_v4 = vcombine.low %v638_v47, %v642_v49 }
 0x3e0   : > { %11022 = vmatpush1.bf16.msra.mxu0 %v12596_v55  ;;  %11581 = vmatpush1.bf16.msra.mxu1 %v12598_v56  ;;  %v1792_v55 = vsub.s32 2, %v15307_v42  ;;  %v1788_v56 = vsub.s32 1, %v15307_v42 }
 0x3e1   : > { %11023 = vmatprep.subr.bf16.mxu0 %v12605_v57  ;;  %11582 = vmatprep.subr.bf16.mxu1 %v12607_v58  ;;  %v12654_v57 = vcombine.low %v631_v40, %v635_v41  ;;  %v1796_v58 = vsub.s32 3, %v15307_v42  ;;  %v663_v40 = vld [vmem:[%s14205_s27 + $0xe18] sm:$0xff] }
 0x3e2   : > { %v1789_v3 = vrot.slane %v1780_v54, %v1788_v56  ;;  %v667_v41 = vld [vmem:[%s14205_s27 + $0xe38] sm:$0xff] }
 0x3e3   : > { %v1797_v5 = vrot.slane %v1780_v54, %v1796_v58  ;;  %v675_v58 = vld [vmem:[%s14205_s27 + $0xe78] sm:$0xff] }
 0x3e4   : > { %11024 = vmatpush1.bf16.msra.mxu0 %v12604_v63  ;;  %11583 = vmatpush1.bf16.msra.mxu1 %v12606_v0  ;;  %v1785_v63 = vrot.slane %v1780_v54, %v1784_v50  ;;  %v647_v0 = vld [vmem:[%s14205_s27 + $0xd98] sm:$0xff]  ;;  %v12678_v50 = vcombine.low %v655_v12, %v659_v13 }
 0x3e5   : > { %11025 = vmatprep.subr.bf16.mxu0 %v12613_v1  ;;  %11584 = vmatprep.subr.bf16.mxu1 %v12615_v2  ;;  %v651_v1 = vld [vmem:[%s14205_s27 + $0xdb8] sm:$0xff]  ;;  %v1793_v2 = vrot.slane %v1780_v54, %v1792_v55  ;;  %v670_v54 = vld [vmem:[%s14205_s27 + $0xe50] sm:$0xff] }
 0x3e6   : > { %v12671_v11 = vcombine.high %v647_v0, %v651_v1  ;;  %v12670_v22 = vcombine.low %v647_v0, %v651_v1  ;;  %v674_v55 = vld [vmem:[%s14205_s27 + $0xe70] sm:$0xff]  ;;  %v679_v1 = vld [vmem:[%s14205_s27 + $0xe98] sm:$0xff] }
 0x3e7   : > { %v682_v0 = vld [vmem:[%s14205_s27 + $0xeb0] sm:$0xff] }
 0x3e8   : > { %11026 = vmatpush1.bf16.msra.mxu0 %v12612_v7  ;;  %11585 = vmatpush1.bf16.msra.mxu1 %v12614_v8  ;;  %v12669_v7 = vcombine.high %v646_v61, %v650_v62  ;;  %v15329_v8 = vld [vmem:[%s14205_s27 + $0xdd0] sm:$0xff] }
 0x3e9   : > { %11038 = vmatprep.subr.bf16.mxu0 %v12621_v9  ;;  %11597 = vmatprep.subr.bf16.mxu1 %v12623_v10  ;;  %v658_v9 = vld [vmem:[%s14205_s27 + $0xdf0] sm:$0xff] }
 0x3ea   : > { %v12677_v23 = vcombine.high %v15329_v8, %v658_v9 }
 0x3eb   : > { %11028 = vmatmul.mubr.bf16.vlgmr.msra.gmra.mrb[4].mxu0 %v14102_v21  ;;  %11587 = vmatmul.mubr.bf16.vlgmr.msra.gmra.mrb[4].mxu1 %v14102_v21 }
 0x3ec   : > { %11039 = vmatpush1.bf16.msra.mxu0 %v12620_v15  ;;  %11598 = vmatpush1.bf16.msra.mxu1 %v12622_v16 }
 0x3ed   : > { %11040 = vmatprep.subr.bf16.mxu0 %v12629_v17  ;;  %11599 = vmatprep.subr.bf16.mxu1 %v12631_v18  ;;  %v12668_v17 = vcombine.low %v646_v61, %v650_v62  ;;  %v12693_v61 = vcombine.high %v670_v54, %v674_v55 }
 0x3ee   : > { %11070 = vmatprep.mubr.bf16.mxu0 %v14103_v30  ;;  %11629 = vmatprep.mubr.bf16.mxu1 %v14103_v30 }
 0x3f0   : > { %11041 = vmatpush1.bf16.msra.mxu0 %v12628_v24  ;;  %11600 = vmatpush1.bf16.msra.mxu1 %v12630_v25 }
 0x3f1   : > { %11042 = vmatprep.subr.bf16.mxu0 %v12637_v26  ;;  %11601 = vmatprep.subr.bf16.mxu1 %v12639_v27 }
 0x3f4   : > { %11043 = vmatpush1.bf16.msra.mxu0 %v12636_v34  ;;  %11602 = vmatpush1.bf16.msra.mxu1 %v12638_v35  ;;  %v662_v35 = vld [vmem:[%s14205_s27 + $0xe10] sm:$0xff] }
 0x3f5   : > { %11044 = vmatprep.subr.bf16.mxu0 %v12645_v36  ;;  %11603 = vmatprep.subr.bf16.mxu1 %v12647_v37  ;;  %v666_v36 = vld [vmem:[%s14205_s27 + $0xe30] sm:$0xff] }
 0x3f6   : > { %v12685_v51 = vcombine.high %v662_v35, %v666_v36 }
 0x3f8   : > { %11045 = vmatpush1.bf16.msra.mxu0 %v12644_v43  ;;  %11604 = vmatpush1.bf16.msra.mxu1 %v12646_v44 }
 0x3f9   : > { %11046 = vmatprep.subr.bf16.mxu0 %v12653_v45  ;;  %11605 = vmatprep.subr.bf16.mxu1 %v12655_v46  ;;  %v12676_v46 = vcombine.low %v15329_v8, %v658_v9  ;;  %v690_v8 = vld [vmem:[%s14205_s27 + $0xef0] sm:$0xff]  ;;  %v687_v9 = vld [vmem:[%s14205_s27 + $0xed8] sm:$0xff] }
 0x3fc   : > { %11047 = vmatpush1.bf16.msra.mxu0 %v12652_v53  ;;  %11606 = vmatpush1.bf16.msra.mxu1 %v12654_v57  ;;  %v12687_v53 = vcombine.high %v663_v40, %v667_v41  ;;  %v671_v57 = vld [vmem:[%s14205_s27 + $0xe58] sm:$0xff] }
 0x3fd   : > { %11048 = vmatprep.subr.bf16.mxu0 %v12661_v59  ;;  %11607 = vmatprep.subr.bf16.mxu1 %v12663_v60  ;;  %v12684_v59 = vcombine.low %v662_v35, %v666_v36  ;;  %v12686_v60 = vcombine.low %v663_v40, %v667_v41  ;;  %v12695_v62 = vcombine.high %v671_v57, %v675_v58  ;;  %v722_v40 = vld [vmem:[%s14205_s27 + $0xff0] sm:$0xff]  ;;  %v719_v41 = vld [vmem:[%s14205_s27 + $0xfd8] sm:$0xff] }
 0x3fe   : > { %v10341_v10 = vpop.f32.mrb[0].mxu0  ;;  %v10900_v15 = vpop.f32.mrb[0].mxu1 }
 0x3ff   : > { %v13826_v14 = vadd.f32 %v10341_v10, %v1785_v63  ;;  %v10343_v16 = vpop.f32.mrb[1].mxu0  ;;  %v13830_v18 = vadd.f32 %v10900_v15, %v1793_v2  ;;  %v10902_v20 = vpop.f32.mrb[1].mxu1  ;;  %v691_v10 = vld [vmem:[%s14205_s27 + $0xef8] sm:$0xff]  ;;  %v694_v15 = vld [vmem:[%s14205_s27 + $0xf10] sm:$0xff] }
 0x400   : > { %v13827_v19 = vadd.f32 %v10343_v16, %v1789_v3  ;;  %v10345_v21 = vpop.f32.mrb[2].mxu0  ;;  %11049 = vmatpush1.bf16.msra.mxu0 %v12660_v4  ;;  %v13831_v25 = vadd.f32 %v10902_v20, %v1797_v5  ;;  %v10904_v27 = vpop.f32.mrb[2].mxu1  ;;  %11608 = vmatpush1.bf16.msra.mxu1 %v12662_v6  ;;  %v12694_v4 = vcombine.low %v671_v57, %v675_v58  ;;  %v698_v16 = vld [vmem:[%s14205_s27 + $0xf30] sm:$0xff] }
 0x401   : > { %v12027_v24 = vmax.f32 %v13826_v14, 0.0  ;;  %v13828_v26 = vadd.f32 %v10345_v21, %v1785_v63  ;;  %v10347_v28 = vpop.f32.mrb[3].mxu0  ;;  %11050 = vmatprep.subr.bf16.mxu0 %v12669_v7  ;;  %v12029_v30 = vmax.f32 %v13830_v18, 0.0  ;;  %v13832_v32 = vadd.f32 %v10904_v27, %v1793_v2  ;;  %v10906_v34 = vpop.f32.mrb[3].mxu1  ;;  %11609 = vmatprep.subr.bf16.mxu1 %v12671_v11  ;;  %v678_v63 = vld [vmem:[%s14205_s27 + $0xe90] sm:$0xff]  ;;  %v683_v2 = vld [vmem:[%s14205_s27 + $0xeb8] sm:$0xff] }
 0x402   : > { %v12028_v31 = vmax.f32 %v13827_v19, 0.0  ;;  %v13829_v33 = vadd.f32 %v10347_v28, %v1789_v3  ;;  %v12030_v37 = vmax.f32 %v13831_v25, 0.0  ;;  %v13833_v39 = vadd.f32 %v10906_v34, %v1797_v5  ;;  %v686_v7 = vld [vmem:[%s14205_s27 + $0xed0] sm:$0xff]  ;;  %v699_v18 = vld [vmem:[%s14205_s27 + $0xf38] sm:$0xff] }
 0x403   : > { %v12035_v38 = vmax.f32 %v13828_v26, 0.0  ;;  %v12037_v44 = vmax.f32 %v13832_v32, 0.0  ;;  %v12692_v3 = vcombine.low %v670_v54, %v674_v55  ;;  %v12701_v5 = vcombine.high %v678_v63, %v682_v0  ;;  %v703_v25 = vld [vmem:[%s14205_s27 + $0xf58] sm:$0xff]  ;;  %v714_v32 = vld [vmem:[%s14205_s27 + $0xfb0] sm:$0xff] }
 0x404   : > { %v13817_v43 = vpack.c.bf16 %v12028_v31, %v12027_v24  ;;  %v12036_v45 = vmax.f32 %v13829_v33, 0.0  ;;  %11051 = vmatpush1.bf16.msra.mxu0 %v12668_v17  ;;  %v13818_v47 = vpack.c.bf16 %v12030_v37, %v12029_v30  ;;  %v12038_v49 = vmax.f32 %v13833_v39, 0.0  ;;  %11610 = vmatpush1.bf16.msra.mxu1 %v12670_v22  ;;  %v695_v17 = vld [vmem:[%s14205_s27 + $0xf18] sm:$0xff]  ;;  %v706_v24 = vld [vmem:[%s14205_s27 + $0xf70] sm:$0xff] }
 0x405   : > { %11052 = vmatprep.subr.bf16.mxu0 %v12677_v23  ;;  %11611 = vmatprep.subr.bf16.mxu1 %v12679_v29  ;;  %v12703_v6 = vcombine.high %v679_v1, %v683_v2  ;;  %v12700_v11 = vcombine.low %v678_v63, %v682_v0  ;;  %v12702_v12 = vcombine.low %v679_v1, %v683_v2  ;;  %v702_v23 = vld [vmem:[%s14205_s27 + $0xf50] sm:$0xff]  ;;  %v707_v26 = vld [vmem:[%s14205_s27 + $0xf78] sm:$0xff] }
 0x406   : > { %12091 = vst [vmem:[%s15343_s12] sm:$0xff] %v13817_v43  ;;  %v13821_v52 = vpack.c.bf16 %v12036_v45, %v12035_v38  ;;  %12092 = vst [vmem:[%s15343_s12 + $0x8] sm:$0xff] %v13818_v47  ;;  %v13822_v56 = vpack.c.bf16 %v12038_v49, %v12037_v44  ;;  %v12709_v13 = vcombine.high %v686_v7, %v690_v8  ;;  %v710_v31 = vld [vmem:[%s14205_s27 + $0xf90] sm:$0xff]  ;;  %v711_v33 = vld [vmem:[%s14205_s27 + $0xf98] sm:$0xff] }
 0x407   : > { %v12711_v14 = vcombine.high %v687_v9, %v691_v10  ;;  %v12708_v19 = vcombine.low %v686_v7, %v690_v8  ;;  %v12710_v20 = vcombine.low %v687_v9, %v691_v10  ;;  %v12717_v21 = vcombine.high %v694_v15, %v698_v16  ;;  %v715_v34 = vld [vmem:[%s14205_s27 + $0xfb8] sm:$0xff]  ;;  %v718_v39 = vld [vmem:[%s14205_s27 + $0xfd0] sm:$0xff] }
 0x408   : > { %12095 = vst [vmem:[%s15343_s12 + $0x20] sm:$0xff] %v13821_v52  ;;  %11053 = vmatpush1.bf16.msra.mxu0 %v12676_v46  ;;  %12096 = vst [vmem:[%s15343_s12 + $0x28] sm:$0xff] %v13822_v56  ;;  %11612 = vmatpush1.bf16.msra.mxu1 %v12678_v50  ;;  %v12719_v22 = vcombine.high %v695_v17, %v699_v18  ;;  %v12716_v27 = vcombine.low %v694_v15, %v698_v16  ;;  %v723_v43 = vld [vmem:[%s14205_s27 + $0xff8] sm:$0xff]  ;;  %v726_v49 = vld [vmem:[%s14205_s27 + $0x1010] sm:$0xff] }
 0x409   : > { %11054 = vmatprep.subr.bf16.mxu0 %v12685_v51  ;;  %11613 = vmatprep.subr.bf16.mxu1 %v12687_v53  ;;  %v12718_v28 = vcombine.low %v695_v17, %v699_v18  ;;  %v12725_v29 = vcombine.high %v702_v23, %v706_v24  ;;  %v12727_v30 = vcombine.high %v703_v25, %v707_v26  ;;  %v730_v50 = vld [vmem:[%s14205_s27 + $0x1030] sm:$0xff]  ;;  %v727_v51 = vld [vmem:[%s14205_s27 + $0x1018] sm:$0xff] }
 0x40a   : > { %v12724_v35 = vcombine.low %v702_v23, %v706_v24  ;;  %v12726_v36 = vcombine.low %v703_v25, %v707_v26  ;;  %v12733_v37 = vcombine.high %v710_v31, %v714_v32  ;;  %v12735_v38 = vcombine.high %v711_v33, %v715_v34  ;;  %v731_v52 = vld [vmem:[%s14205_s27 + $0x1038] sm:$0xff]  ;;  %v734_v57 = vld [vmem:[%s14205_s27 + $0x1050] sm:$0xff] }
 0x40b   : > { %v12732_v44 = vcombine.low %v710_v31, %v714_v32  ;;  %v12734_v45 = vcombine.low %v711_v33, %v715_v34  ;;  %v12741_v46 = vcombine.high %v718_v39, %v722_v40  ;;  %v12743_v47 = vcombine.high %v719_v41, %v723_v43  ;;  %v738_v58 = vld [vmem:[%s14205_s27 + $0x1070] sm:$0xff] }
 0x40c   : > { %11055 = vmatpush1.bf16.msra.mxu0 %v12684_v59  ;;  %11614 = vmatpush1.bf16.msra.mxu1 %v12686_v60  ;;  %v12740_v53 = vcombine.low %v718_v39, %v722_v40  ;;  %v12742_v54 = vcombine.low %v719_v41, %v723_v43  ;;  %v12749_v55 = vcombine.high %v726_v49, %v730_v50  ;;  %v735_v59 = vld [vmem:[%s14205_s27 + $0x1058] sm:$0xff]  ;;  %v742_v1 = vld [vmem:[%s14205_s27 + $0x1090] sm:$0xff] }
 0x40d   : > { %11056 = vmatprep.subr.bf16.mxu0 %v12693_v61  ;;  %11615 = vmatprep.subr.bf16.mxu1 %v12695_v62  ;;  %v12751_v56 = vcombine.high %v727_v51, %v731_v52  ;;  %v739_v60 = vld [vmem:[%s14205_s27 + $0x1078] sm:$0xff]  ;;  %v12748_v61 = vcombine.low %v726_v49, %v730_v50  ;;  %v12750_v62 = vcombine.low %v727_v51, %v731_v52  ;;  %v746_v2 = vld [vmem:[%s14205_s27 + $0x10b0] sm:$0xff] }
 0x40e   : > { %v12757_v63 = vcombine.high %v734_v57, %v738_v58  ;;  %v12759_v0 = vcombine.high %v735_v59, %v739_v60  ;;  %v12758_v7 = vcombine.low %v735_v59, %v739_v60  ;;  %v12765_v8 = vcombine.high %v742_v1, %v746_v2  ;;  %v750_v10 = vld [vmem:[%s14205_s27 + $0x10d0] sm:$0xff] }
 0x40f   : > { %v12764_v15 = vcombine.low %v742_v1, %v746_v2 }
 0x410   : > { %11057 = vmatpush1.bf16.msra.mxu0 %v12692_v3  ;;  %11616 = vmatpush1.bf16.msra.mxu1 %v12694_v4  ;;  %v14104_v3 = vld [vmem:[%s15996_s0 + $0x18] ss:$100 sps:$4 sm:$0xff]  }
 0x411   : > { %11058 = vmatprep.subr.bf16.mxu0 %v12701_v5  ;;  %11617 = vmatprep.subr.bf16.mxu1 %v12703_v6  ;;  %v743_v4 = vld [vmem:[%s14205_s27 + $0x1098] sm:$0xff]  ;;  %v12756_v6 = vcombine.low %v734_v57, %v738_v58 }
 0x412   : > { %v747_v5 = vld [vmem:[%s14205_s27 + $0x10b8] sm:$0xff] }
 0x413   : > { %v12767_v9 = vcombine.high %v743_v4, %v747_v5  ;;  %v12766_v16 = vcombine.low %v743_v4, %v747_v5  ;;  %v806_v5 = vld [vmem:[%s14205_s27 + $0x1290] sm:$0xff] }
 0x414   : > { %11059 = vmatpush1.bf16.msra.mxu0 %v12700_v11  ;;  %11618 = vmatpush1.bf16.msra.mxu1 %v12702_v12  ;;  %v754_v11 = vld [vmem:[%s14205_s27 + $0x10f0] sm:$0xff]  ;;  %v14105_v12 = vld [vmem:[%s15996_s0 + $0x24] ss:$100 sps:$4 sm:$0xff]  }
 0x415   : > { %11060 = vmatprep.subr.bf16.mxu0 %v12709_v13  ;;  %11619 = vmatprep.subr.bf16.mxu1 %v12711_v14  ;;  %v751_v13 = vld [vmem:[%s14205_s27 + $0x10d8] sm:$0xff]  ;;  %v12773_v17 = vcombine.high %v750_v10, %v754_v11  ;;  %v12772_v23 = vcombine.low %v750_v10, %v754_v11 }
 0x416   : > { %v755_v14 = vld [vmem:[%s14205_s27 + $0x10f8] sm:$0xff] }
 0x417   : > { %v12775_v18 = vcombine.high %v751_v13, %v755_v14  ;;  %v12774_v24 = vcombine.low %v751_v13, %v755_v14  ;;  %v814_v13 = vld [vmem:[%s14205_s27 + $0x12d0] sm:$0xff] }
 0x418   : > { %11061 = vmatpush1.bf16.msra.mxu0 %v12708_v19  ;;  %11620 = vmatpush1.bf16.msra.mxu1 %v12710_v20  ;;  %v758_v19 = vld [vmem:[%s14205_s27 + $0x1110] sm:$0xff] }
 0x419   : > { %11062 = vmatprep.subr.bf16.mxu0 %v12717_v21  ;;  %11621 = vmatprep.subr.bf16.mxu1 %v12719_v22  ;;  %v762_v20 = vld [vmem:[%s14205_s27 + $0x1130] sm:$0xff]  ;;  %v759_v21 = vld [vmem:[%s14205_s27 + $0x1118] sm:$0xff] }
 0x41a   : > { %v763_v22 = vld [vmem:[%s14205_s27 + $0x1138] sm:$0xff]  ;;  %v12781_v25 = vcombine.high %v758_v19, %v762_v20  ;;  %v12780_v31 = vcombine.low %v758_v19, %v762_v20  ;;  %v818_v14 = vld [vmem:[%s14205_s27 + $0x12f0] sm:$0xff] }
 0x41b   : > { %v12783_v26 = vcombine.high %v759_v21, %v763_v22  ;;  %v12782_v32 = vcombine.low %v759_v21, %v763_v22  ;;  %v12837_v19 = vcombine.high %v814_v13, %v818_v14  ;;  %v822_v21 = vld [vmem:[%s14205_s27 + $0x1310] sm:$0xff] }
 0x41c   : > { %11063 = vmatpush1.bf16.msra.mxu0 %v12716_v27  ;;  %11622 = vmatpush1.bf16.msra.mxu1 %v12718_v28  ;;  %v766_v27 = vld [vmem:[%s14205_s27 + $0x1150] sm:$0xff] }
 0x41d   : > { %11064 = vmatprep.subr.bf16.mxu0 %v12725_v29  ;;  %11623 = vmatprep.subr.bf16.mxu1 %v12727_v30  ;;  %v770_v28 = vld [vmem:[%s14205_s27 + $0x1170] sm:$0xff]  ;;  %v767_v29 = vld [vmem:[%s14205_s27 + $0x1158] sm:$0xff] }
 0x41e   : > { %v771_v30 = vld [vmem:[%s14205_s27 + $0x1178] sm:$0xff]  ;;  %v12789_v33 = vcombine.high %v766_v27, %v770_v28  ;;  %v12788_v39 = vcombine.low %v766_v27, %v770_v28  ;;  %v826_v22 = vld [vmem:[%s14205_s27 + $0x1330] sm:$0xff] }
 0x41f   : > { %v12791_v34 = vcombine.high %v767_v29, %v771_v30  ;;  %v12790_v40 = vcombine.low %v767_v29, %v771_v30  ;;  %v12845_v27 = vcombine.high %v822_v21, %v826_v22  ;;  %v830_v29 = vld [vmem:[%s14205_s27 + $0x1350] sm:$0xff] }
 0x420   : > { %11065 = vmatpush1.bf16.msra.mxu0 %v12724_v35  ;;  %11624 = vmatpush1.bf16.msra.mxu1 %v12726_v36  ;;  %v774_v35 = vld [vmem:[%s14205_s27 + $0x1190] sm:$0xff] }
 0x421   : > { %11066 = vmatprep.subr.bf16.mxu0 %v12733_v37  ;;  %11625 = vmatprep.subr.bf16.mxu1 %v12735_v38  ;;  %v778_v36 = vld [vmem:[%s14205_s27 + $0x11b0] sm:$0xff]  ;;  %v775_v37 = vld [vmem:[%s14205_s27 + $0x1198] sm:$0xff] }
 0x422   : > { %v779_v38 = vld [vmem:[%s14205_s27 + $0x11b8] sm:$0xff]  ;;  %v12797_v41 = vcombine.high %v774_v35, %v778_v36  ;;  %v12796_v49 = vcombine.low %v774_v35, %v778_v36  ;;  %v834_v30 = vld [vmem:[%s14205_s27 + $0x1370] sm:$0xff] }
 0x423   : > { %v12799_v43 = vcombine.high %v775_v37, %v779_v38  ;;  %v12798_v50 = vcombine.low %v775_v37, %v779_v38  ;;  %v12853_v35 = vcombine.high %v830_v29, %v834_v30  ;;  %v838_v37 = vld [vmem:[%s14205_s27 + $0x1390] sm:$0xff] }
 0x424   : > { %11067 = vmatpush1.bf16.msra.mxu0 %v12732_v44  ;;  %11626 = vmatpush1.bf16.msra.mxu1 %v12734_v45  ;;  %v782_v44 = vld [vmem:[%s14205_s27 + $0x11d0] sm:$0xff] }
 0x425   : > { %11068 = vmatprep.subr.bf16.mxu0 %v12741_v46  ;;  %11627 = vmatprep.subr.bf16.mxu1 %v12743_v47  ;;  %v786_v45 = vld [vmem:[%s14205_s27 + $0x11f0] sm:$0xff]  ;;  %v783_v46 = vld [vmem:[%s14205_s27 + $0x11d8] sm:$0xff] }
 0x426   : > { %v787_v47 = vld [vmem:[%s14205_s27 + $0x11f8] sm:$0xff]  ;;  %v12805_v51 = vcombine.high %v782_v44, %v786_v45  ;;  %v12804_v57 = vcombine.low %v782_v44, %v786_v45  ;;  %v842_v38 = vld [vmem:[%s14205_s27 + $0x13b0] sm:$0xff] }
 0x427   : > { %v12807_v52 = vcombine.high %v783_v46, %v787_v47  ;;  %v12806_v58 = vcombine.low %v783_v46, %v787_v47  ;;  %v12861_v44 = vcombine.high %v838_v37, %v842_v38  ;;  %v846_v46 = vld [vmem:[%s14205_s27 + $0x13d0] sm:$0xff] }
 0x428   : > { %11069 = vmatpush1.bf16.msra.mxu0 %v12740_v53  ;;  %11628 = vmatpush1.bf16.msra.mxu1 %v12742_v54  ;;  %v790_v53 = vld [vmem:[%s14205_s27 + $0x1210] sm:$0xff] }
 0x429   : > { %11081 = vmatprep.subr.bf16.mxu0 %v12749_v55  ;;  %11640 = vmatprep.subr.bf16.mxu1 %v12751_v56  ;;  %v794_v54 = vld [vmem:[%s14205_s27 + $0x1230] sm:$0xff]  ;;  %v791_v55 = vld [vmem:[%s14205_s27 + $0x1218] sm:$0xff] }
 0x42a   : > { %v795_v56 = vld [vmem:[%s14205_s27 + $0x1238] sm:$0xff]  ;;  %v12813_v59 = vcombine.high %v790_v53, %v794_v54  ;;  %v12812_v1 = vcombine.low %v790_v53, %v794_v54  ;;  %v850_v47 = vld [vmem:[%s14205_s27 + $0x13f0] sm:$0xff] }
 0x42b   : > { %11071 = vmatmul.mubr.bf16.vlgmr.msra.gmra.mrb[4].mxu0 %v14104_v3  ;;  %11630 = vmatmul.mubr.bf16.vlgmr.msra.gmra.mrb[4].mxu1 %v14104_v3  ;;  %v12815_v60 = vcombine.high %v791_v55, %v795_v56  ;;  %v12814_v2 = vcombine.low %v791_v55, %v795_v56  ;;  %v12869_v53 = vcombine.high %v846_v46, %v850_v47  ;;  %v854_v55 = vld [vmem:[%s14205_s27 + $0x1410] sm:$0xff] }
 0x42c   : > { %11082 = vmatpush1.bf16.msra.mxu0 %v12748_v61  ;;  %11641 = vmatpush1.bf16.msra.mxu1 %v12750_v62  ;;  %v798_v61 = vld [vmem:[%s14205_s27 + $0x1250] sm:$0xff] }
 0x42d   : > { %11083 = vmatprep.subr.bf16.mxu0 %v12757_v63  ;;  %11642 = vmatprep.subr.bf16.mxu1 %v12759_v0  ;;  %v802_v62 = vld [vmem:[%s14205_s27 + $0x1270] sm:$0xff]  ;;  %v799_v63 = vld [vmem:[%s14205_s27 + $0x1258] sm:$0xff] }
 0x42e   : > { %11113 = vmatprep.mubr.bf16.mxu0 %v14105_v12  ;;  %11672 = vmatprep.mubr.bf16.mxu1 %v14105_v12  ;;  %v803_v0 = vld [vmem:[%s14205_s27 + $0x1278] sm:$0xff]  ;;  %v12821_v3 = vcombine.high %v798_v61, %v802_v62  ;;  %v858_v56 = vld [vmem:[%s14205_s27 + $0x1430] sm:$0xff] }
 0x42f   : > { %v12823_v4 = vcombine.high %v799_v63, %v803_v0  ;;  %v12822_v10 = vcombine.low %v799_v63, %v803_v0  ;;  %v862_v63 = vld [vmem:[%s14205_s27 + $0x1450] sm:$0xff] }
 0x430   : > { %11084 = vmatpush1.bf16.msra.mxu0 %v12756_v6  ;;  %11643 = vmatpush1.bf16.msra.mxu1 %v12758_v7  ;;  %v810_v6 = vld [vmem:[%s14205_s27 + $0x12b0] sm:$0xff]  ;;  %v807_v7 = vld [vmem:[%s14205_s27 + $0x1298] sm:$0xff] }
 0x431   : > { %11085 = vmatprep.subr.bf16.mxu0 %v12765_v8  ;;  %11644 = vmatprep.subr.bf16.mxu1 %v12767_v9  ;;  %v811_v8 = vld [vmem:[%s14205_s27 + $0x12b8] sm:$0xff]  ;;  %v12820_v9 = vcombine.low %v798_v61, %v802_v62  ;;  %v12829_v11 = vcombine.high %v806_v5, %v810_v6  ;;  %v12877_v61 = vcombine.high %v854_v55, %v858_v56  ;;  %v866_v0 = vld [vmem:[%s14205_s27 + $0x1470] sm:$0xff] }
 0x432   : > { %v12831_v12 = vcombine.high %v807_v7, %v811_v8 }
 0x434   : > { %11086 = vmatpush1.bf16.msra.mxu0 %v12764_v15  ;;  %11645 = vmatpush1.bf16.msra.mxu1 %v12766_v16  ;;  %v815_v15 = vld [vmem:[%s14205_s27 + $0x12d8] sm:$0xff] }
 0x435   : > { %11087 = vmatprep.subr.bf16.mxu0 %v12773_v17  ;;  %11646 = vmatprep.subr.bf16.mxu1 %v12775_v18  ;;  %v819_v16 = vld [vmem:[%s14205_s27 + $0x12f8] sm:$0xff]  ;;  %v12828_v17 = vcombine.low %v806_v5, %v810_v6  ;;  %v12830_v18 = vcombine.low %v807_v7, %v811_v8  ;;  %v12885_v5 = vcombine.high %v862_v63, %v866_v0  ;;  %v870_v7 = vld [vmem:[%s14205_s27 + $0x1490] sm:$0xff] }
 0x436   : > { %v12839_v20 = vcombine.high %v815_v15, %v819_v16  ;;  %v874_v8 = vld [vmem:[%s14205_s27 + $0x14b0] sm:$0xff] }
 0x438   : > { %11088 = vmatpush1.bf16.msra.mxu0 %v12772_v23  ;;  %11647 = vmatpush1.bf16.msra.mxu1 %v12774_v24  ;;  %v823_v23 = vld [vmem:[%s14205_s27 + $0x1318] sm:$0xff] }
 0x439   : > { %11089 = vmatprep.subr.bf16.mxu0 %v12781_v25  ;;  %11648 = vmatprep.subr.bf16.mxu1 %v12783_v26  ;;  %v827_v24 = vld [vmem:[%s14205_s27 + $0x1338] sm:$0xff]  ;;  %v12836_v25 = vcombine.low %v814_v13, %v818_v14  ;;  %v12838_v26 = vcombine.low %v815_v15, %v819_v16  ;;  %v12893_v14 = vcombine.high %v870_v7, %v874_v8  ;;  %v878_v16 = vld [vmem:[%s14205_s27 + $0x14d0] sm:$0xff] }
 0x43a   : > { %v12847_v28 = vcombine.high %v823_v23, %v827_v24 }
 0x43c   : > { %11090 = vmatpush1.bf16.msra.mxu0 %v12780_v31  ;;  %11649 = vmatpush1.bf16.msra.mxu1 %v12782_v32  ;;  %v831_v31 = vld [vmem:[%s14205_s27 + $0x1358] sm:$0xff] }
 0x43d   : > { %11091 = vmatprep.subr.bf16.mxu0 %v12789_v33  ;;  %11650 = vmatprep.subr.bf16.mxu1 %v12791_v34  ;;  %v835_v32 = vld [vmem:[%s14205_s27 + $0x1378] sm:$0xff]  ;;  %v12844_v33 = vcombine.low %v822_v21, %v826_v22  ;;  %v12846_v34 = vcombine.low %v823_v23, %v827_v24  ;;  %v12892_v21 = vcombine.low %v870_v7, %v874_v8 }
 0x43e   : > { %v12855_v36 = vcombine.high %v831_v31, %v835_v32 }
 0x440   : > { %11092 = vmatpush1.bf16.msra.mxu0 %v12788_v39  ;;  %11651 = vmatpush1.bf16.msra.mxu1 %v12790_v40  ;;  %v839_v39 = vld [vmem:[%s14205_s27 + $0x1398] sm:$0xff] }
 0x441   : > { %11093 = vmatprep.subr.bf16.mxu0 %v12797_v41  ;;  %11652 = vmatprep.subr.bf16.mxu1 %v12799_v43  ;;  %v843_v40 = vld [vmem:[%s14205_s27 + $0x13b8] sm:$0xff]  ;;  %v12852_v41 = vcombine.low %v830_v29, %v834_v30  ;;  %v12854_v43 = vcombine.low %v831_v31, %v835_v32 }
 0x442   : > { %v12863_v45 = vcombine.high %v839_v39, %v843_v40 }
 0x444   : > { %11094 = vmatpush1.bf16.msra.mxu0 %v12796_v49  ;;  %11653 = vmatpush1.bf16.msra.mxu1 %v12798_v50  ;;  %v847_v49 = vld [vmem:[%s14205_s27 + $0x13d8] sm:$0xff] }
 0x445   : > { %11095 = vmatprep.subr.bf16.mxu0 %v12805_v51  ;;  %11654 = vmatprep.subr.bf16.mxu1 %v12807_v52  ;;  %v851_v50 = vld [vmem:[%s14205_s27 + $0x13f8] sm:$0xff]  ;;  %v12860_v51 = vcombine.low %v838_v37, %v842_v38  ;;  %v12862_v52 = vcombine.low %v839_v39, %v843_v40 }
 0x446   : > { %v12871_v54 = vcombine.high %v847_v49, %v851_v50 }
 0x448   : > { %11096 = vmatpush1.bf16.msra.mxu0 %v12804_v57  ;;  %11655 = vmatpush1.bf16.msra.mxu1 %v12806_v58  ;;  %v855_v57 = vld [vmem:[%s14205_s27 + $0x1418] sm:$0xff] }
 0x449   : > { %11097 = vmatprep.subr.bf16.mxu0 %v12813_v59  ;;  %11656 = vmatprep.subr.bf16.mxu1 %v12815_v60  ;;  %v859_v58 = vld [vmem:[%s14205_s27 + $0x1438] sm:$0xff]  ;;  %v12868_v59 = vcombine.low %v846_v46, %v850_v47  ;;  %v12870_v60 = vcombine.low %v847_v49, %v851_v50 }
 0x44a   : > { %v12879_v62 = vcombine.high %v855_v57, %v859_v58 }
 0x44c   : > { %11098 = vmatpush1.bf16.msra.mxu0 %v12812_v1  ;;  %11657 = vmatpush1.bf16.msra.mxu1 %v12814_v2  ;;  %v863_v1 = vld [vmem:[%s14205_s27 + $0x1458] sm:$0xff] }
 0x44d   : > { %11099 = vmatprep.subr.bf16.mxu0 %v12821_v3  ;;  %11658 = vmatprep.subr.bf16.mxu1 %v12823_v4  ;;  %v867_v2 = vld [vmem:[%s14205_s27 + $0x1478] sm:$0xff]  ;;  %v12876_v3 = vcombine.low %v854_v55, %v858_v56  ;;  %v12878_v4 = vcombine.low %v855_v57, %v859_v58 }
 0x44e   : > { %v12887_v6 = vcombine.high %v863_v1, %v867_v2  ;;  %v12886_v13 = vcombine.low %v863_v1, %v867_v2 }
 0x450   : > { %11100 = vmatpush1.bf16.msra.mxu0 %v12820_v9  ;;  %11659 = vmatpush1.bf16.msra.mxu1 %v12822_v10  ;;  %v14106_v9 = vld [vmem:[%s15996_s0 + $0x20] ss:$100 sps:$4 sm:$0xff]   ;;  %v871_v10 = vld [vmem:[%s14205_s27 + $0x1498] sm:$0xff] }
 0x451   : > { %11101 = vmatprep.subr.bf16.mxu0 %v12829_v11  ;;  %11660 = vmatprep.subr.bf16.mxu1 %v12831_v12  ;;  %v875_v11 = vld [vmem:[%s14205_s27 + $0x14b8] sm:$0xff]  ;;  %v12884_v12 = vcombine.low %v862_v63, %v866_v0 }
 0x452   : > { %v12895_v15 = vcombine.high %v871_v10, %v875_v11  ;;  %v12894_v22 = vcombine.low %v871_v10, %v875_v11  ;;  %v934_v11 = vld [vmem:[%s14205_s27 + $0x1690] sm:$0xff] }
 0x454   : > { %11102 = vmatpush1.bf16.msra.mxu0 %v12828_v17  ;;  %11661 = vmatpush1.bf16.msra.mxu1 %v12830_v18  ;;  %v882_v17 = vld [vmem:[%s14205_s27 + $0x14f0] sm:$0xff] }
 0x455   : > { %11103 = vmatprep.subr.bf16.mxu0 %v12837_v19  ;;  %11662 = vmatprep.subr.bf16.mxu1 %v12839_v20  ;;  %v14107_v18 = vld [vmem:[%s15996_s0 + $0x2c] ss:$100 sps:$4 sm:$0xff]   ;;  %v879_v19 = vld [vmem:[%s14205_s27 + $0x14d8] sm:$0xff]  ;;  %v12901_v23 = vcombine.high %v878_v16, %v882_v17  ;;  %v12900_v29 = vcombine.low %v878_v16, %v882_v17 }
 0x456   : > { %v883_v20 = vld [vmem:[%s14205_s27 + $0x14f8] sm:$0xff] }
 0x457   : > { %v12903_v24 = vcombine.high %v879_v19, %v883_v20  ;;  %v12902_v30 = vcombine.low %v879_v19, %v883_v20  ;;  %v942_v19 = vld [vmem:[%s14205_s27 + $0x16d0] sm:$0xff] }
 0x458   : > { %11104 = vmatpush1.bf16.msra.mxu0 %v12836_v25  ;;  %11663 = vmatpush1.bf16.msra.mxu1 %v12838_v26  ;;  %v886_v25 = vld [vmem:[%s14205_s27 + $0x1510] sm:$0xff] }
 0x459   : > { %11105 = vmatprep.subr.bf16.mxu0 %v12845_v27  ;;  %11664 = vmatprep.subr.bf16.mxu1 %v12847_v28  ;;  %v890_v26 = vld [vmem:[%s14205_s27 + $0x1530] sm:$0xff]  ;;  %v887_v27 = vld [vmem:[%s14205_s27 + $0x1518] sm:$0xff] }
 0x45a   : > { %v891_v28 = vld [vmem:[%s14205_s27 + $0x1538] sm:$0xff]  ;;  %v12909_v31 = vcombine.high %v886_v25, %v890_v26  ;;  %v12908_v37 = vcombine.low %v886_v25, %v890_v26  ;;  %v946_v20 = vld [vmem:[%s14205_s27 + $0x16f0] sm:$0xff] }
 0x45b   : > { %v12911_v32 = vcombine.high %v887_v27, %v891_v28  ;;  %v12910_v38 = vcombine.low %v887_v27, %v891_v28  ;;  %v12965_v25 = vcombine.high %v942_v19, %v946_v20  ;;  %v950_v27 = vld [vmem:[%s14205_s27 + $0x1710] sm:$0xff] }
 0x45c   : > { %11106 = vmatpush1.bf16.msra.mxu0 %v12844_v33  ;;  %11665 = vmatpush1.bf16.msra.mxu1 %v12846_v34  ;;  %v894_v33 = vld [vmem:[%s14205_s27 + $0x1550] sm:$0xff] }
 0x45d   : > { %11107 = vmatprep.subr.bf16.mxu0 %v12853_v35  ;;  %11666 = vmatprep.subr.bf16.mxu1 %v12855_v36  ;;  %v898_v34 = vld [vmem:[%s14205_s27 + $0x1570] sm:$0xff]  ;;  %v895_v35 = vld [vmem:[%s14205_s27 + $0x1558] sm:$0xff] }
 0x45e   : > { %v899_v36 = vld [vmem:[%s14205_s27 + $0x1578] sm:$0xff]  ;;  %v12917_v39 = vcombine.high %v894_v33, %v898_v34  ;;  %v12916_v46 = vcombine.low %v894_v33, %v898_v34  ;;  %v954_v28 = vld [vmem:[%s14205_s27 + $0x1730] sm:$0xff] }
 0x45f   : > { %v12919_v40 = vcombine.high %v895_v35, %v899_v36  ;;  %v12918_v47 = vcombine.low %v895_v35, %v899_v36  ;;  %v12973_v33 = vcombine.high %v950_v27, %v954_v28  ;;  %v958_v35 = vld [vmem:[%s14205_s27 + $0x1750] sm:$0xff] }
 0x460   : > { %11108 = vmatpush1.bf16.msra.mxu0 %v12852_v41  ;;  %11667 = vmatpush1.bf16.msra.mxu1 %v12854_v43  ;;  %v902_v41 = vld [vmem:[%s14205_s27 + $0x1590] sm:$0xff] }
 0x461   : > { %11109 = vmatprep.subr.bf16.mxu0 %v12861_v44  ;;  %11668 = vmatprep.subr.bf16.mxu1 %v12863_v45  ;;  %v906_v43 = vld [vmem:[%s14205_s27 + $0x15b0] sm:$0xff]  ;;  %v903_v44 = vld [vmem:[%s14205_s27 + $0x1598] sm:$0xff] }
 0x462   : > { %v907_v45 = vld [vmem:[%s14205_s27 + $0x15b8] sm:$0xff]  ;;  %v12925_v49 = vcombine.high %v902_v41, %v906_v43  ;;  %v12924_v55 = vcombine.low %v902_v41, %v906_v43  ;;  %v962_v36 = vld [vmem:[%s14205_s27 + $0x1770] sm:$0xff] }
 0x463   : > { %v12927_v50 = vcombine.high %v903_v44, %v907_v45  ;;  %v12926_v56 = vcombine.low %v903_v44, %v907_v45  ;;  %v12981_v41 = vcombine.high %v958_v35, %v962_v36  ;;  %v966_v44 = vld [vmem:[%s14205_s27 + $0x1790] sm:$0xff] }
 0x464   : > { %11110 = vmatpush1.bf16.msra.mxu0 %v12860_v51  ;;  %11669 = vmatpush1.bf16.msra.mxu1 %v12862_v52  ;;  %v910_v51 = vld [vmem:[%s14205_s27 + $0x15d0] sm:$0xff] }
 0x465   : > { %11111 = vmatprep.subr.bf16.mxu0 %v12869_v53  ;;  %11670 = vmatprep.subr.bf16.mxu1 %v12871_v54  ;;  %v914_v52 = vld [vmem:[%s14205_s27 + $0x15f0] sm:$0xff]  ;;  %v911_v53 = vld [vmem:[%s14205_s27 + $0x15d8] sm:$0xff] }
 0x466   : > { %v915_v54 = vld [vmem:[%s14205_s27 + $0x15f8] sm:$0xff]  ;;  %v12933_v57 = vcombine.high %v910_v51, %v914_v52  ;;  %v12932_v63 = vcombine.low %v910_v51, %v914_v52  ;;  %v970_v45 = vld [vmem:[%s14205_s27 + $0x17b0] sm:$0xff] }
 0x467   : > { %v12935_v58 = vcombine.high %v911_v53, %v915_v54  ;;  %v12934_v0 = vcombine.low %v911_v53, %v915_v54  ;;  %v12989_v51 = vcombine.high %v966_v44, %v970_v45  ;;  %v974_v53 = vld [vmem:[%s14205_s27 + $0x17d0] sm:$0xff] }
 0x468   : > { %11112 = vmatpush1.bf16.msra.mxu0 %v12868_v59  ;;  %11671 = vmatpush1.bf16.msra.mxu1 %v12870_v60  ;;  %v918_v59 = vld [vmem:[%s14205_s27 + $0x1610] sm:$0xff] }
 0x469   : > { %11124 = vmatprep.subr.bf16.mxu0 %v12877_v61  ;;  %11683 = vmatprep.subr.bf16.mxu1 %v12879_v62  ;;  %v922_v60 = vld [vmem:[%s14205_s27 + $0x1630] sm:$0xff]  ;;  %v919_v61 = vld [vmem:[%s14205_s27 + $0x1618] sm:$0xff] }
 0x46a   : > { %v923_v62 = vld [vmem:[%s14205_s27 + $0x1638] sm:$0xff]  ;;  %v12941_v1 = vcombine.high %v918_v59, %v922_v60  ;;  %v12940_v7 = vcombine.low %v918_v59, %v922_v60  ;;  %v978_v54 = vld [vmem:[%s14205_s27 + $0x17f0] sm:$0xff] }
 0x46b   : > { %11114 = vmatmul.mubr.bf16.vlgmr.msra.gmra.mrb[4].mxu0 %v14106_v9  ;;  %11673 = vmatmul.mubr.bf16.vlgmr.msra.gmra.mrb[4].mxu1 %v14106_v9  ;;  %v12943_v2 = vcombine.high %v919_v61, %v923_v62  ;;  %v12942_v8 = vcombine.low %v919_v61, %v923_v62  ;;  %v12997_v59 = vcombine.high %v974_v53, %v978_v54  ;;  %v982_v61 = vld [vmem:[%s14205_s27 + $0x1810] sm:$0xff] }
 0x46c   : > { %11125 = vmatpush1.bf16.msra.mxu0 %v12876_v3  ;;  %11684 = vmatpush1.bf16.msra.mxu1 %v12878_v4  ;;  %v926_v3 = vld [vmem:[%s14205_s27 + $0x1650] sm:$0xff] }
 0x46d   : > { %11126 = vmatprep.subr.bf16.mxu0 %v12885_v5  ;;  %11685 = vmatprep.subr.bf16.mxu1 %v12887_v6  ;;  %v930_v4 = vld [vmem:[%s14205_s27 + $0x1670] sm:$0xff]  ;;  %v927_v5 = vld [vmem:[%s14205_s27 + $0x1658] sm:$0xff] }
 0x46e   : > { %11156 = vmatprep.mubr.bf16.mxu0 %v14107_v18  ;;  %11715 = vmatprep.mubr.bf16.mxu1 %v14107_v18  ;;  %v931_v6 = vld [vmem:[%s14205_s27 + $0x1678] sm:$0xff]  ;;  %v12949_v9 = vcombine.high %v926_v3, %v930_v4  ;;  %v986_v62 = vld [vmem:[%s14205_s27 + $0x1830] sm:$0xff] }
 0x46f   : > { %v12951_v10 = vcombine.high %v927_v5, %v931_v6  ;;  %v12950_v16 = vcombine.low %v927_v5, %v931_v6  ;;  %v990_v5 = vld [vmem:[%s14205_s27 + $0x1850] sm:$0xff] }
 0x470   : > { %11127 = vmatpush1.bf16.msra.mxu0 %v12884_v12  ;;  %11686 = vmatpush1.bf16.msra.mxu1 %v12886_v13  ;;  %v938_v12 = vld [vmem:[%s14205_s27 + $0x16b0] sm:$0xff]  ;;  %v935_v13 = vld [vmem:[%s14205_s27 + $0x1698] sm:$0xff] }
 0x471   : > { %11128 = vmatprep.subr.bf16.mxu0 %v12893_v14  ;;  %11687 = vmatprep.subr.bf16.mxu1 %v12895_v15  ;;  %v939_v14 = vld [vmem:[%s14205_s27 + $0x16b8] sm:$0xff]  ;;  %v12948_v15 = vcombine.low %v926_v3, %v930_v4  ;;  %v12957_v17 = vcombine.high %v934_v11, %v938_v12  ;;  %v13005_v3 = vcombine.high %v982_v61, %v986_v62  ;;  %v994_v6 = vld [vmem:[%s14205_s27 + $0x1870] sm:$0xff] }
 0x472   : > { %v12959_v18 = vcombine.high %v935_v13, %v939_v14 }
 0x474   : > { %11129 = vmatpush1.bf16.msra.mxu0 %v12892_v21  ;;  %11688 = vmatpush1.bf16.msra.mxu1 %v12894_v22  ;;  %v943_v21 = vld [vmem:[%s14205_s27 + $0x16d8] sm:$0xff] }
 0x475   : > { %11130 = vmatprep.subr.bf16.mxu0 %v12901_v23  ;;  %11689 = vmatprep.subr.bf16.mxu1 %v12903_v24  ;;  %v947_v22 = vld [vmem:[%s14205_s27 + $0x16f8] sm:$0xff]  ;;  %v12956_v23 = vcombine.low %v934_v11, %v938_v12  ;;  %v12958_v24 = vcombine.low %v935_v13, %v939_v14  ;;  %v13013_v11 = vcombine.high %v990_v5, %v994_v6  ;;  %v998_v13 = vld [vmem:[%s14205_s27 + $0x1890] sm:$0xff] }
 0x476   : > { %v12967_v26 = vcombine.high %v943_v21, %v947_v22  ;;  %v1002_v14 = vld [vmem:[%s14205_s27 + $0x18b0] sm:$0xff] }
 0x478   : > { %11131 = vmatpush1.bf16.msra.mxu0 %v12900_v29  ;;  %11690 = vmatpush1.bf16.msra.mxu1 %v12902_v30  ;;  %v951_v29 = vld [vmem:[%s14205_s27 + $0x1718] sm:$0xff] }
 0x479   : > { %11132 = vmatprep.subr.bf16.mxu0 %v12909_v31  ;;  %11691 = vmatprep.subr.bf16.mxu1 %v12911_v32  ;;  %v955_v30 = vld [vmem:[%s14205_s27 + $0x1738] sm:$0xff]  ;;  %v12964_v31 = vcombine.low %v942_v19, %v946_v20  ;;  %v12966_v32 = vcombine.low %v943_v21, %v947_v22  ;;  %v13021_v20 = vcombine.high %v998_v13, %v1002_v14  ;;  %v1006_v22 = vld [vmem:[%s14205_s27 + $0x18d0] sm:$0xff] }
 0x47a   : > { %v12975_v34 = vcombine.high %v951_v29, %v955_v30 }
 0x47c   : > { %11133 = vmatpush1.bf16.msra.mxu0 %v12908_v37  ;;  %11692 = vmatpush1.bf16.msra.mxu1 %v12910_v38  ;;  %v959_v37 = vld [vmem:[%s14205_s27 + $0x1758] sm:$0xff] }
 0x47d   : > { %11134 = vmatprep.subr.bf16.mxu0 %v12917_v39  ;;  %11693 = vmatprep.subr.bf16.mxu1 %v12919_v40  ;;  %v963_v38 = vld [vmem:[%s14205_s27 + $0x1778] sm:$0xff]  ;;  %v12972_v39 = vcombine.low %v950_v27, %v954_v28  ;;  %v12974_v40 = vcombine.low %v951_v29, %v955_v30  ;;  %v13020_v27 = vcombine.low %v998_v13, %v1002_v14 }
 0x47e   : > { %v12983_v43 = vcombine.high %v959_v37, %v963_v38 }
 0x480   : > { %11135 = vmatpush1.bf16.msra.mxu0 %v12916_v46  ;;  %11694 = vmatpush1.bf16.msra.mxu1 %v12918_v47  ;;  %v967_v46 = vld [vmem:[%s14205_s27 + $0x1798] sm:$0xff] }
 0x481   : > { %11136 = vmatprep.subr.bf16.mxu0 %v12925_v49  ;;  %11695 = vmatprep.subr.bf16.mxu1 %v12927_v50  ;;  %v971_v47 = vld [vmem:[%s14205_s27 + $0x17b8] sm:$0xff]  ;;  %v12980_v49 = vcombine.low %v958_v35, %v962_v36  ;;  %v12982_v50 = vcombine.low %v959_v37, %v963_v38 }
 0x482   : > { %v12991_v52 = vcombine.high %v967_v46, %v971_v47 }
 0x484   : > { %11137 = vmatpush1.bf16.msra.mxu0 %v12924_v55  ;;  %11696 = vmatpush1.bf16.msra.mxu1 %v12926_v56  ;;  %v975_v55 = vld [vmem:[%s14205_s27 + $0x17d8] sm:$0xff] }
 0x485   : > { %11138 = vmatprep.subr.bf16.mxu0 %v12933_v57  ;;  %11697 = vmatprep.subr.bf16.mxu1 %v12935_v58  ;;  %v979_v56 = vld [vmem:[%s14205_s27 + $0x17f8] sm:$0xff]  ;;  %v12988_v57 = vcombine.low %v966_v44, %v970_v45  ;;  %v12990_v58 = vcombine.low %v967_v46, %v971_v47 }
 0x486   : > { %v12999_v60 = vcombine.high %v975_v55, %v979_v56 }
 0x488   : > { %11139 = vmatpush1.bf16.msra.mxu0 %v12932_v63  ;;  %11698 = vmatpush1.bf16.msra.mxu1 %v12934_v0  ;;  %v983_v63 = vld [vmem:[%s14205_s27 + $0x1818] sm:$0xff] }
 0x489   : > { %11140 = vmatprep.subr.bf16.mxu0 %v12941_v1  ;;  %11699 = vmatprep.subr.bf16.mxu1 %v12943_v2  ;;  %v987_v0 = vld [vmem:[%s14205_s27 + $0x1838] sm:$0xff]  ;;  %v12996_v1 = vcombine.low %v974_v53, %v978_v54  ;;  %v12998_v2 = vcombine.low %v975_v55, %v979_v56 }
 0x48a   : > { %v13007_v4 = vcombine.high %v983_v63, %v987_v0 }
 0x48c   : > { %11141 = vmatpush1.bf16.msra.mxu0 %v12940_v7  ;;  %11700 = vmatpush1.bf16.msra.mxu1 %v12942_v8  ;;  %v991_v7 = vld [vmem:[%s14205_s27 + $0x1858] sm:$0xff] }
 0x48d   : > { %11142 = vmatprep.subr.bf16.mxu0 %v12949_v9  ;;  %11701 = vmatprep.subr.bf16.mxu1 %v12951_v10  ;;  %v995_v8 = vld [vmem:[%s14205_s27 + $0x1878] sm:$0xff]  ;;  %v13004_v9 = vcombine.low %v982_v61, %v986_v62  ;;  %v13006_v10 = vcombine.low %v983_v63, %v987_v0 }
 0x48e   : > { %v13015_v12 = vcombine.high %v991_v7, %v995_v8  ;;  %v13014_v19 = vcombine.low %v991_v7, %v995_v8 }
 0x490   : > { %11143 = vmatpush1.bf16.msra.mxu0 %v12948_v15  ;;  %11702 = vmatpush1.bf16.msra.mxu1 %v12950_v16  ;;  %v14108_v15 = vld [vmem:[%s15996_s0 + $0x28] ss:$100 sps:$4 sm:$0xff]   ;;  %v999_v16 = vld [vmem:[%s14205_s27 + $0x1898] sm:$0xff] }
 0x491   : > { %11144 = vmatprep.subr.bf16.mxu0 %v12957_v17  ;;  %11703 = vmatprep.subr.bf16.mxu1 %v12959_v18  ;;  %v1003_v17 = vld [vmem:[%s14205_s27 + $0x18b8] sm:$0xff]  ;;  %v13012_v18 = vcombine.low %v990_v5, %v994_v6 }
 0x492   : > { %v13023_v21 = vcombine.high %v999_v16, %v1003_v17  ;;  %v13022_v28 = vcombine.low %v999_v16, %v1003_v17  ;;  %v1062_v17 = vld [vmem:[%s14205_s27 + $0x1a90] sm:$0xff] }
 0x494   : > { %11145 = vmatpush1.bf16.msra.mxu0 %v12956_v23  ;;  %11704 = vmatpush1.bf16.msra.mxu1 %v12958_v24  ;;  %v1010_v23 = vld [vmem:[%s14205_s27 + $0x18f0] sm:$0xff] }
 0x495   : > { %11146 = vmatprep.subr.bf16.mxu0 %v12965_v25  ;;  %11705 = vmatprep.subr.bf16.mxu1 %v12967_v26  ;;  %v14109_v24 = vld [vmem:[%s15996_s0 + $0x34] ss:$100 sps:$4 sm:$0xff]   ;;  %v13029_v29 = vcombine.high %v1006_v22, %v1010_v23  ;;  %v13028_v35 = vcombine.low %v1006_v22, %v1010_v23 }
 0x496   : > { %v1007_v25 = vld [vmem:[%s14205_s27 + $0x18d8] sm:$0xff] }
 0x497   : > { %v1011_v26 = vld [vmem:[%s14205_s27 + $0x18f8] sm:$0xff] }
 0x498   : > { %11147 = vmatpush1.bf16.msra.mxu0 %v12964_v31  ;;  %11706 = vmatpush1.bf16.msra.mxu1 %v12966_v32  ;;  %v13031_v30 = vcombine.high %v1007_v25, %v1011_v26  ;;  %v1014_v31 = vld [vmem:[%s14205_s27 + $0x1910] sm:$0xff]  ;;  %v13030_v36 = vcombine.low %v1007_v25, %v1011_v26 }
 0x499   : > { %11148 = vmatprep.subr.bf16.mxu0 %v12973_v33  ;;  %11707 = vmatprep.subr.bf16.mxu1 %v12975_v34  ;;  %v1018_v32 = vld [vmem:[%s14205_s27 + $0x1930] sm:$0xff]  ;;  %v1015_v33 = vld [vmem:[%s14205_s27 + $0x1918] sm:$0xff] }
 0x49a   : > { %v1019_v34 = vld [vmem:[%s14205_s27 + $0x1938] sm:$0xff]  ;;  %v13037_v37 = vcombine.high %v1014_v31, %v1018_v32  ;;  %v13036_v44 = vcombine.low %v1014_v31, %v1018_v32  ;;  %v1070_v25 = vld [vmem:[%s14205_s27 + $0x1ad0] sm:$0xff] }
 0x49b   : > { %v13039_v38 = vcombine.high %v1015_v33, %v1019_v34  ;;  %v13038_v45 = vcombine.low %v1015_v33, %v1019_v34  ;;  %v1074_v26 = vld [vmem:[%s14205_s27 + $0x1af0] sm:$0xff] }
 0x49c   : > { %11149 = vmatpush1.bf16.msra.mxu0 %v12972_v39  ;;  %11708 = vmatpush1.bf16.msra.mxu1 %v12974_v40  ;;  %v1022_v39 = vld [vmem:[%s14205_s27 + $0x1950] sm:$0xff]  ;;  %v13093_v31 = vcombine.high %v1070_v25, %v1074_v26 }
 0x49d   : > { %11150 = vmatprep.subr.bf16.mxu0 %v12981_v41  ;;  %11709 = vmatprep.subr.bf16.mxu1 %v12983_v43  ;;  %v1026_v40 = vld [vmem:[%s14205_s27 + $0x1970] sm:$0xff]  ;;  %v1023_v41 = vld [vmem:[%s14205_s27 + $0x1958] sm:$0xff] }
 0x49e   : > { %v1027_v43 = vld [vmem:[%s14205_s27 + $0x1978] sm:$0xff]  ;;  %v13045_v46 = vcombine.high %v1022_v39, %v1026_v40  ;;  %v13044_v53 = vcombine.low %v1022_v39, %v1026_v40  ;;  %v1078_v33 = vld [vmem:[%s14205_s27 + $0x1b10] sm:$0xff] }
 0x49f   : > { %v13047_v47 = vcombine.high %v1023_v41, %v1027_v43  ;;  %v13046_v54 = vcombine.low %v1023_v41, %v1027_v43  ;;  %v1082_v34 = vld [vmem:[%s14205_s27 + $0x1b30] sm:$0xff] }
 0x4a0   : > { %11151 = vmatpush1.bf16.msra.mxu0 %v12980_v49  ;;  %11710 = vmatpush1.bf16.msra.mxu1 %v12982_v50  ;;  %v1030_v49 = vld [vmem:[%s14205_s27 + $0x1990] sm:$0xff]  ;;  %v13101_v39 = vcombine.high %v1078_v33, %v1082_v34 }
 0x4a1   : > { %11152 = vmatprep.subr.bf16.mxu0 %v12989_v51  ;;  %11711 = vmatprep.subr.bf16.mxu1 %v12991_v52  ;;  %v1034_v50 = vld [vmem:[%s14205_s27 + $0x19b0] sm:$0xff]  ;;  %v1031_v51 = vld [vmem:[%s14205_s27 + $0x1998] sm:$0xff] }
 0x4a2   : > { %v1035_v52 = vld [vmem:[%s14205_s27 + $0x19b8] sm:$0xff]  ;;  %v13053_v55 = vcombine.high %v1030_v49, %v1034_v50  ;;  %v13052_v61 = vcombine.low %v1030_v49, %v1034_v50  ;;  %v1086_v41 = vld [vmem:[%s14205_s27 + $0x1b50] sm:$0xff] }
 0x4a3   : > { %v13055_v56 = vcombine.high %v1031_v51, %v1035_v52  ;;  %v13054_v62 = vcombine.low %v1031_v51, %v1035_v52  ;;  %v1090_v43 = vld [vmem:[%s14205_s27 + $0x1b70] sm:$0xff] }
 0x4a4   : > { %11153 = vmatpush1.bf16.msra.mxu0 %v12988_v57  ;;  %11712 = vmatpush1.bf16.msra.mxu1 %v12990_v58  ;;  %v1038_v57 = vld [vmem:[%s14205_s27 + $0x19d0] sm:$0xff]  ;;  %v13109_v49 = vcombine.high %v1086_v41, %v1090_v43 }
 0x4a5   : > { %11154 = vmatprep.subr.bf16.mxu0 %v12997_v59  ;;  %11713 = vmatprep.subr.bf16.mxu1 %v12999_v60  ;;  %v1042_v58 = vld [vmem:[%s14205_s27 + $0x19f0] sm:$0xff]  ;;  %v1039_v59 = vld [vmem:[%s14205_s27 + $0x19d8] sm:$0xff] }
 0x4a6   : > { %v1043_v60 = vld [vmem:[%s14205_s27 + $0x19f8] sm:$0xff]  ;;  %v13061_v63 = vcombine.high %v1038_v57, %v1042_v58  ;;  %v13060_v5 = vcombine.low %v1038_v57, %v1042_v58  ;;  %v1094_v51 = vld [vmem:[%s14205_s27 + $0x1b90] sm:$0xff] }
 0x4a7   : > { %v13063_v0 = vcombine.high %v1039_v59, %v1043_v60  ;;  %v13062_v6 = vcombine.low %v1039_v59, %v1043_v60  ;;  %v1098_v52 = vld [vmem:[%s14205_s27 + $0x1bb0] sm:$0xff] }
 0x4a8   : > { %11155 = vmatpush1.bf16.msra.mxu0 %v12996_v1  ;;  %11714 = vmatpush1.bf16.msra.mxu1 %v12998_v2  ;;  %v1046_v1 = vld [vmem:[%s14205_s27 + $0x1a10] sm:$0xff]  ;;  %v13117_v57 = vcombine.high %v1094_v51, %v1098_v52 }
 0x4a9   : > { %11167 = vmatprep.subr.bf16.mxu0 %v13005_v3  ;;  %11726 = vmatprep.subr.bf16.mxu1 %v13007_v4  ;;  %v1050_v2 = vld [vmem:[%s14205_s27 + $0x1a30] sm:$0xff]  ;;  %v1047_v3 = vld [vmem:[%s14205_s27 + $0x1a18] sm:$0xff] }
 0x4aa   : > { %v1051_v4 = vld [vmem:[%s14205_s27 + $0x1a38] sm:$0xff]  ;;  %v13069_v7 = vcombine.high %v1046_v1, %v1050_v2  ;;  %v13068_v13 = vcombine.low %v1046_v1, %v1050_v2  ;;  %v1102_v59 = vld [vmem:[%s14205_s27 + $0x1bd0] sm:$0xff] }
 0x4ab   : > { %11157 = vmatmul.mubr.bf16.vlgmr.msra.gmra.mrb[4].mxu0 %v14108_v15  ;;  %11716 = vmatmul.mubr.bf16.vlgmr.msra.gmra.mrb[4].mxu1 %v14108_v15  ;;  %v13071_v8 = vcombine.high %v1047_v3, %v1051_v4  ;;  %v13070_v14 = vcombine.low %v1047_v3, %v1051_v4  ;;  %v1106_v60 = vld [vmem:[%s14205_s27 + $0x1bf0] sm:$0xff] }
 0x4ac   : > { %11168 = vmatpush1.bf16.msra.mxu0 %v13004_v9  ;;  %11727 = vmatpush1.bf16.msra.mxu1 %v13006_v10  ;;  %v1054_v9 = vld [vmem:[%s14205_s27 + $0x1a50] sm:$0xff]  ;;  %v13125_v1 = vcombine.high %v1102_v59, %v1106_v60 }
 0x4ad   : > { %11169 = vmatprep.subr.bf16.mxu0 %v13013_v11  ;;  %11728 = vmatprep.subr.bf16.mxu1 %v13015_v12  ;;  %v1058_v10 = vld [vmem:[%s14205_s27 + $0x1a70] sm:$0xff]  ;;  %v1055_v11 = vld [vmem:[%s14205_s27 + $0x1a58] sm:$0xff] }
 0x4ae   : > { %11199 = vmatprep.mubr.bf16.mxu0 %v14109_v24  ;;  %11758 = vmatprep.mubr.bf16.mxu1 %v14109_v24  ;;  %v1059_v12 = vld [vmem:[%s14205_s27 + $0x1a78] sm:$0xff]  ;;  %v13077_v15 = vcombine.high %v1054_v9, %v1058_v10  ;;  %v1110_v3 = vld [vmem:[%s14205_s27 + $0x1c10] sm:$0xff] }
 0x4af   : > { %v13079_v16 = vcombine.high %v1055_v11, %v1059_v12  ;;  %v13078_v22 = vcombine.low %v1055_v11, %v1059_v12  ;;  %v1114_v4 = vld [vmem:[%s14205_s27 + $0x1c30] sm:$0xff] }
 0x4b0   : > { %11170 = vmatpush1.bf16.msra.mxu0 %v13012_v18  ;;  %11729 = vmatpush1.bf16.msra.mxu1 %v13014_v19  ;;  %v1066_v18 = vld [vmem:[%s14205_s27 + $0x1ab0] sm:$0xff]  ;;  %v1063_v19 = vld [vmem:[%s14205_s27 + $0x1a98] sm:$0xff] }
 0x4b1   : > { %11171 = vmatprep.subr.bf16.mxu0 %v13021_v20  ;;  %11730 = vmatprep.subr.bf16.mxu1 %v13023_v21  ;;  %v1067_v20 = vld [vmem:[%s14205_s27 + $0x1ab8] sm:$0xff]  ;;  %v13076_v21 = vcombine.low %v1054_v9, %v1058_v10  ;;  %v13085_v23 = vcombine.high %v1062_v17, %v1066_v18  ;;  %v13133_v9 = vcombine.high %v1110_v3, %v1114_v4  ;;  %v1118_v11 = vld [vmem:[%s14205_s27 + $0x1c50] sm:$0xff] }
 0x4b2   : > { %v13087_v24 = vcombine.high %v1063_v19, %v1067_v20  ;;  %v1122_v12 = vld [vmem:[%s14205_s27 + $0x1c70] sm:$0xff] }
 0x4b4   : > { %11172 = vmatpush1.bf16.msra.mxu0 %v13020_v27  ;;  %11731 = vmatpush1.bf16.msra.mxu1 %v13022_v28  ;;  %v1071_v27 = vld [vmem:[%s14205_s27 + $0x1ad8] sm:$0xff] }
 0x4b5   : > { %11173 = vmatprep.subr.bf16.mxu0 %v13029_v29  ;;  %11732 = vmatprep.subr.bf16.mxu1 %v13031_v30  ;;  %v1075_v28 = vld [vmem:[%s14205_s27 + $0x1af8] sm:$0xff]  ;;  %v13084_v29 = vcombine.low %v1062_v17, %v1066_v18  ;;  %v13086_v30 = vcombine.low %v1063_v19, %v1067_v20  ;;  %v13141_v17 = vcombine.high %v1118_v11, %v1122_v12  ;;  %v1126_v19 = vld [vmem:[%s14205_s27 + $0x1c90] sm:$0xff] }
 0x4b6   : > { %v13095_v32 = vcombine.high %v1071_v27, %v1075_v28  ;;  %v1130_v20 = vld [vmem:[%s14205_s27 + $0x1cb0] sm:$0xff] }
 0x4b8   : > { %11174 = vmatpush1.bf16.msra.mxu0 %v13028_v35  ;;  %11733 = vmatpush1.bf16.msra.mxu1 %v13030_v36  ;;  %v1079_v35 = vld [vmem:[%s14205_s27 + $0x1b18] sm:$0xff] }
 0x4b9   : > { %11175 = vmatprep.subr.bf16.mxu0 %v13037_v37  ;;  %11734 = vmatprep.subr.bf16.mxu1 %v13039_v38  ;;  %v1083_v36 = vld [vmem:[%s14205_s27 + $0x1b38] sm:$0xff]  ;;  %v13092_v37 = vcombine.low %v1070_v25, %v1074_v26  ;;  %v13094_v38 = vcombine.low %v1071_v27, %v1075_v28  ;;  %v13149_v26 = vcombine.high %v1126_v19, %v1130_v20  ;;  %v1134_v28 = vld [vmem:[%s14205_s27 + $0x1cd0] sm:$0xff] }
 0x4ba   : > { %v13103_v40 = vcombine.high %v1079_v35, %v1083_v36 }
 0x4bc   : > { %11176 = vmatpush1.bf16.msra.mxu0 %v13036_v44  ;;  %11735 = vmatpush1.bf16.msra.mxu1 %v13038_v45  ;;  %v1087_v44 = vld [vmem:[%s14205_s27 + $0x1b58] sm:$0xff] }
 0x4bd   : > { %11177 = vmatprep.subr.bf16.mxu0 %v13045_v46  ;;  %11736 = vmatprep.subr.bf16.mxu1 %v13047_v47  ;;  %v1091_v45 = vld [vmem:[%s14205_s27 + $0x1b78] sm:$0xff]  ;;  %v13100_v46 = vcombine.low %v1078_v33, %v1082_v34  ;;  %v13102_v47 = vcombine.low %v1079_v35, %v1083_v36  ;;  %v13148_v33 = vcombine.low %v1126_v19, %v1130_v20 }
 0x4be   : > { %v13111_v50 = vcombine.high %v1087_v44, %v1091_v45 }
 0x4c0   : > { %11178 = vmatpush1.bf16.msra.mxu0 %v13044_v53  ;;  %11737 = vmatpush1.bf16.msra.mxu1 %v13046_v54  ;;  %v1095_v53 = vld [vmem:[%s14205_s27 + $0x1b98] sm:$0xff] }
 0x4c1   : > { %11179 = vmatprep.subr.bf16.mxu0 %v13053_v55  ;;  %11738 = vmatprep.subr.bf16.mxu1 %v13055_v56  ;;  %v1099_v54 = vld [vmem:[%s14205_s27 + $0x1bb8] sm:$0xff]  ;;  %v13108_v55 = vcombine.low %v1086_v41, %v1090_v43  ;;  %v13110_v56 = vcombine.low %v1087_v44, %v1091_v45 }
 0x4c2   : > { %v13119_v58 = vcombine.high %v1095_v53, %v1099_v54 }
 0x4c4   : > { %11180 = vmatpush1.bf16.msra.mxu0 %v13052_v61  ;;  %11739 = vmatpush1.bf16.msra.mxu1 %v13054_v62  ;;  %v1103_v61 = vld [vmem:[%s14205_s27 + $0x1bd8] sm:$0xff] }
 0x4c5   : > { %11181 = vmatprep.subr.bf16.mxu0 %v13061_v63  ;;  %11740 = vmatprep.subr.bf16.mxu1 %v13063_v0  ;;  %v1107_v62 = vld [vmem:[%s14205_s27 + $0x1bf8] sm:$0xff]  ;;  %v13116_v63 = vcombine.low %v1094_v51, %v1098_v52  ;;  %v13118_v0 = vcombine.low %v1095_v53, %v1099_v54 }
 0x4c6   : > { %v13127_v2 = vcombine.high %v1103_v61, %v1107_v62 }
 0x4c8   : > { %11182 = vmatpush1.bf16.msra.mxu0 %v13060_v5  ;;  %11741 = vmatpush1.bf16.msra.mxu1 %v13062_v6  ;;  %v1111_v5 = vld [vmem:[%s14205_s27 + $0x1c18] sm:$0xff] }
 0x4c9   : > { %11183 = vmatprep.subr.bf16.mxu0 %v13069_v7  ;;  %11742 = vmatprep.subr.bf16.mxu1 %v13071_v8  ;;  %v1115_v6 = vld [vmem:[%s14205_s27 + $0x1c38] sm:$0xff]  ;;  %v13124_v7 = vcombine.low %v1102_v59, %v1106_v60  ;;  %v13126_v8 = vcombine.low %v1103_v61, %v1107_v62 }
 0x4ca   : > { %v13135_v10 = vcombine.high %v1111_v5, %v1115_v6 }
 0x4cc   : > { %11184 = vmatpush1.bf16.msra.mxu0 %v13068_v13  ;;  %11743 = vmatpush1.bf16.msra.mxu1 %v13070_v14  ;;  %v1119_v13 = vld [vmem:[%s14205_s27 + $0x1c58] sm:$0xff] }
 0x4cd   : > { %11185 = vmatprep.subr.bf16.mxu0 %v13077_v15  ;;  %11744 = vmatprep.subr.bf16.mxu1 %v13079_v16  ;;  %v1123_v14 = vld [vmem:[%s14205_s27 + $0x1c78] sm:$0xff]  ;;  %v13132_v15 = vcombine.low %v1110_v3, %v1114_v4  ;;  %v13134_v16 = vcombine.low %v1111_v5, %v1115_v6 }
 0x4ce   : > { %v13143_v18 = vcombine.high %v1119_v13, %v1123_v14  ;;  %v13142_v25 = vcombine.low %v1119_v13, %v1123_v14 }
 0x4d0   : > { %11186 = vmatpush1.bf16.msra.mxu0 %v13076_v21  ;;  %11745 = vmatpush1.bf16.msra.mxu1 %v13078_v22  ;;  %v14110_v21 = vld [vmem:[%s15996_s0 + $0x30] ss:$100 sps:$4 sm:$0xff]   ;;  %v1127_v22 = vld [vmem:[%s14205_s27 + $0x1c98] sm:$0xff] }
 0x4d1   : > { %11187 = vmatprep.subr.bf16.mxu0 %v13085_v23  ;;  %11746 = vmatprep.subr.bf16.mxu1 %v13087_v24  ;;  %v1131_v23 = vld [vmem:[%s14205_s27 + $0x1cb8] sm:$0xff]  ;;  %v13140_v24 = vcombine.low %v1118_v11, %v1122_v12 }
 0x4d2   : > { %v13151_v27 = vcombine.high %v1127_v22, %v1131_v23  ;;  %v13150_v34 = vcombine.low %v1127_v22, %v1131_v23  ;;  %v1190_v23 = vld [vmem:[%s14205_s27 + $0x1e90] sm:$0xff] }
 0x4d4   : > { %11188 = vmatpush1.bf16.msra.mxu0 %v13084_v29  ;;  %11747 = vmatpush1.bf16.msra.mxu1 %v13086_v30  ;;  %v1138_v29 = vld [vmem:[%s14205_s27 + $0x1cf0] sm:$0xff]  ;;  %v14111_v30 = vld [vmem:[%s15996_s0 + $0x3c] ss:$100 sps:$4 sm:$0xff]  }
 0x4d5   : > { %11189 = vmatprep.subr.bf16.mxu0 %v13093_v31  ;;  %11748 = vmatprep.subr.bf16.mxu1 %v13095_v32  ;;  %v1135_v31 = vld [vmem:[%s14205_s27 + $0x1cd8] sm:$0xff]  ;;  %v13157_v35 = vcombine.high %v1134_v28, %v1138_v29  ;;  %v13156_v41 = vcombine.low %v1134_v28, %v1138_v29 }
 0x4d6   : > { %v1139_v32 = vld [vmem:[%s14205_s27 + $0x1cf8] sm:$0xff] }
 0x4d7   : > { %v13159_v36 = vcombine.high %v1135_v31, %v1139_v32  ;;  %v13158_v43 = vcombine.low %v1135_v31, %v1139_v32  ;;  %v1198_v31 = vld [vmem:[%s14205_s27 + $0x1ed0] sm:$0xff] }
 0x4d8   : > { %11190 = vmatpush1.bf16.msra.mxu0 %v13092_v37  ;;  %11749 = vmatpush1.bf16.msra.mxu1 %v13094_v38  ;;  %v1142_v37 = vld [vmem:[%s14205_s27 + $0x1d10] sm:$0xff] }
 0x4d9   : > { %11191 = vmatprep.subr.bf16.mxu0 %v13101_v39  ;;  %11750 = vmatprep.subr.bf16.mxu1 %v13103_v40  ;;  %v1146_v38 = vld [vmem:[%s14205_s27 + $0x1d30] sm:$0xff]  ;;  %v1143_v39 = vld [vmem:[%s14205_s27 + $0x1d18] sm:$0xff] }
 0x4da   : > { %v1147_v40 = vld [vmem:[%s14205_s27 + $0x1d38] sm:$0xff]  ;;  %v13165_v44 = vcombine.high %v1142_v37, %v1146_v38  ;;  %v13164_v51 = vcombine.low %v1142_v37, %v1146_v38  ;;  %v1202_v32 = vld [vmem:[%s14205_s27 + $0x1ef0] sm:$0xff] }
 0x4db   : > { %v13167_v45 = vcombine.high %v1143_v39, %v1147_v40  ;;  %v13166_v52 = vcombine.low %v1143_v39, %v1147_v40  ;;  %v13221_v37 = vcombine.high %v1198_v31, %v1202_v32  ;;  %v1206_v39 = vld [vmem:[%s14205_s27 + $0x1f10] sm:$0xff] }
 0x4dc   : > { %11192 = vmatpush1.bf16.msra.mxu0 %v13100_v46  ;;  %11751 = vmatpush1.bf16.msra.mxu1 %v13102_v47  ;;  %v1150_v46 = vld [vmem:[%s14205_s27 + $0x1d50] sm:$0xff] }
 0x4dd   : > { %11193 = vmatprep.subr.bf16.mxu0 %v13109_v49  ;;  %11752 = vmatprep.subr.bf16.mxu1 %v13111_v50  ;;  %v1154_v47 = vld [vmem:[%s14205_s27 + $0x1d70] sm:$0xff]  ;;  %v1151_v49 = vld [vmem:[%s14205_s27 + $0x1d58] sm:$0xff] }
 0x4de   : > { %v1155_v50 = vld [vmem:[%s14205_s27 + $0x1d78] sm:$0xff]  ;;  %v13173_v53 = vcombine.high %v1150_v46, %v1154_v47  ;;  %v13172_v59 = vcombine.low %v1150_v46, %v1154_v47  ;;  %v1210_v40 = vld [vmem:[%s14205_s27 + $0x1f30] sm:$0xff] }
 0x4df   : > { %v13175_v54 = vcombine.high %v1151_v49, %v1155_v50  ;;  %v13174_v60 = vcombine.low %v1151_v49, %v1155_v50  ;;  %v13229_v46 = vcombine.high %v1206_v39, %v1210_v40  ;;  %v1214_v49 = vld [vmem:[%s14205_s27 + $0x1f50] sm:$0xff] }
 0x4e0   : > { %11194 = vmatpush1.bf16.msra.mxu0 %v13108_v55  ;;  %11753 = vmatpush1.bf16.msra.mxu1 %v13110_v56  ;;  %v1158_v55 = vld [vmem:[%s14205_s27 + $0x1d90] sm:$0xff] }
 0x4e1   : > { %11195 = vmatprep.subr.bf16.mxu0 %v13117_v57  ;;  %11754 = vmatprep.subr.bf16.mxu1 %v13119_v58  ;;  %v1162_v56 = vld [vmem:[%s14205_s27 + $0x1db0] sm:$0xff]  ;;  %v1159_v57 = vld [vmem:[%s14205_s27 + $0x1d98] sm:$0xff] }
 0x4e2   : > { %v1163_v58 = vld [vmem:[%s14205_s27 + $0x1db8] sm:$0xff]  ;;  %v13181_v61 = vcombine.high %v1158_v55, %v1162_v56  ;;  %v13180_v3 = vcombine.low %v1158_v55, %v1162_v56  ;;  %v1218_v50 = vld [vmem:[%s14205_s27 + $0x1f70] sm:$0xff] }
 0x4e3   : > { %v13183_v62 = vcombine.high %v1159_v57, %v1163_v58  ;;  %v13182_v4 = vcombine.low %v1159_v57, %v1163_v58  ;;  %v13237_v55 = vcombine.high %v1214_v49, %v1218_v50  ;;  %v1222_v57 = vld [vmem:[%s14205_s27 + $0x1f90] sm:$0xff] }
 0x4e4   : > { %11196 = vmatpush1.bf16.msra.mxu0 %v13116_v63  ;;  %11755 = vmatpush1.bf16.msra.mxu1 %v13118_v0  ;;  %v1166_v63 = vld [vmem:[%s14205_s27 + $0x1dd0] sm:$0xff] }
 0x4e5   : > { %11197 = vmatprep.subr.bf16.mxu0 %v13125_v1  ;;  %11756 = vmatprep.subr.bf16.mxu1 %v13127_v2  ;;  %v1170_v0 = vld [vmem:[%s14205_s27 + $0x1df0] sm:$0xff]  ;;  %v1167_v1 = vld [vmem:[%s14205_s27 + $0x1dd8] sm:$0xff] }
 0x4e6   : > { %v1171_v2 = vld [vmem:[%s14205_s27 + $0x1df8] sm:$0xff]  ;;  %v13189_v5 = vcombine.high %v1166_v63, %v1170_v0  ;;  %v13188_v11 = vcombine.low %v1166_v63, %v1170_v0  ;;  %v1226_v58 = vld [vmem:[%s14205_s27 + $0x1fb0] sm:$0xff] }
 0x4e7   : > { %v13191_v6 = vcombine.high %v1167_v1, %v1171_v2  ;;  %v13190_v12 = vcombine.low %v1167_v1, %v1171_v2  ;;  %v13245_v63 = vcombine.high %v1222_v57, %v1226_v58  ;;  %v1230_v1 = vld [vmem:[%s14205_s27 + $0x1fd0] sm:$0xff] }
 0x4e8   : > { %11198 = vmatpush1.bf16.msra.mxu0 %v13124_v7  ;;  %11757 = vmatpush1.bf16.msra.mxu1 %v13126_v8  ;;  %v1174_v7 = vld [vmem:[%s14205_s27 + $0x1e10] sm:$0xff] }
 0x4e9   : > { %11210 = vmatprep.subr.bf16.mxu0 %v13133_v9  ;;  %11769 = vmatprep.subr.bf16.mxu1 %v13135_v10  ;;  %v1178_v8 = vld [vmem:[%s14205_s27 + $0x1e30] sm:$0xff]  ;;  %v1175_v9 = vld [vmem:[%s14205_s27 + $0x1e18] sm:$0xff] }
 0x4ea   : > { %v1179_v10 = vld [vmem:[%s14205_s27 + $0x1e38] sm:$0xff]  ;;  %v13197_v13 = vcombine.high %v1174_v7, %v1178_v8  ;;  %v13196_v19 = vcombine.low %v1174_v7, %v1178_v8  ;;  %v1234_v2 = vld [vmem:[%s14205_s27 + $0x1ff0] sm:$0xff] }
 0x4eb   : > { %11200 = vmatmul.mubr.bf16.vlgmr.msra.gmra.mrb[4].mxu0 %v14110_v21  ;;  %11759 = vmatmul.mubr.bf16.vlgmr.msra.gmra.mrb[4].mxu1 %v14110_v21  ;;  %v13199_v14 = vcombine.high %v1175_v9, %v1179_v10  ;;  %v13198_v20 = vcombine.low %v1175_v9, %v1179_v10  ;;  %v13253_v7 = vcombine.high %v1230_v1, %v1234_v2  ;;  %v1238_v9 = vld [vmem:[%s14205_s27 + $0x2010] sm:$0xff] }
 0x4ec   : > { %11211 = vmatpush1.bf16.msra.mxu0 %v13132_v15  ;;  %11770 = vmatpush1.bf16.msra.mxu1 %v13134_v16  ;;  %v1182_v15 = vld [vmem:[%s14205_s27 + $0x1e50] sm:$0xff] }
 0x4ed   : > { %11212 = vmatprep.subr.bf16.mxu0 %v13141_v17  ;;  %11771 = vmatprep.subr.bf16.mxu1 %v13143_v18  ;;  %v1186_v16 = vld [vmem:[%s14205_s27 + $0x1e70] sm:$0xff]  ;;  %v1183_v17 = vld [vmem:[%s14205_s27 + $0x1e58] sm:$0xff] }
 0x4ee   : > { %11242 = vmatprep.mubr.bf16.mxu0 %v14111_v30  ;;  %11801 = vmatprep.mubr.bf16.mxu1 %v14111_v30  ;;  %v1187_v18 = vld [vmem:[%s14205_s27 + $0x1e78] sm:$0xff]  ;;  %v13205_v21 = vcombine.high %v1182_v15, %v1186_v16  ;;  %v1242_v10 = vld [vmem:[%s14205_s27 + $0x2030] sm:$0xff] }
 0x4ef   : > { %v13207_v22 = vcombine.high %v1183_v17, %v1187_v18  ;;  %v13206_v28 = vcombine.low %v1183_v17, %v1187_v18  ;;  %v1246_v17 = vld [vmem:[%s14205_s27 + $0x2050] sm:$0xff] }
 0x4f0   : > { %11213 = vmatpush1.bf16.msra.mxu0 %v13140_v24  ;;  %11772 = vmatpush1.bf16.msra.mxu1 %v13142_v25  ;;  %v1194_v24 = vld [vmem:[%s14205_s27 + $0x1eb0] sm:$0xff]  ;;  %v1191_v25 = vld [vmem:[%s14205_s27 + $0x1e98] sm:$0xff] }
 0x4f1   : > { %11214 = vmatprep.subr.bf16.mxu0 %v13149_v26  ;;  %11773 = vmatprep.subr.bf16.mxu1 %v13151_v27  ;;  %v1195_v26 = vld [vmem:[%s14205_s27 + $0x1eb8] sm:$0xff]  ;;  %v13204_v27 = vcombine.low %v1182_v15, %v1186_v16  ;;  %v13213_v29 = vcombine.high %v1190_v23, %v1194_v24  ;;  %v13261_v15 = vcombine.high %v1238_v9, %v1242_v10  ;;  %v1250_v18 = vld [vmem:[%s14205_s27 + $0x2070] sm:$0xff] }
 0x4f2   : > { %v13215_v30 = vcombine.high %v1191_v25, %v1195_v26 }
 0x4f4   : > { %11215 = vmatpush1.bf16.msra.mxu0 %v13148_v33  ;;  %11774 = vmatpush1.bf16.msra.mxu1 %v13150_v34  ;;  %v1199_v33 = vld [vmem:[%s14205_s27 + $0x1ed8] sm:$0xff] }
 0x4f5   : > { %11216 = vmatprep.subr.bf16.mxu0 %v13157_v35  ;;  %11775 = vmatprep.subr.bf16.mxu1 %v13159_v36  ;;  %v1203_v34 = vld [vmem:[%s14205_s27 + $0x1ef8] sm:$0xff]  ;;  %v13212_v35 = vcombine.low %v1190_v23, %v1194_v24  ;;  %v13214_v36 = vcombine.low %v1191_v25, %v1195_v26  ;;  %v13269_v23 = vcombine.high %v1246_v17, %v1250_v18  ;;  %v1254_v25 = vld [vmem:[%s14205_s27 + $0x2090] sm:$0xff] }
 0x4f6   : > { %v13223_v38 = vcombine.high %v1199_v33, %v1203_v34  ;;  %v1258_v26 = vld [vmem:[%s14205_s27 + $0x20b0] sm:$0xff] }
 0x4f8   : > { %11217 = vmatpush1.bf16.msra.mxu0 %v13156_v41  ;;  %11776 = vmatpush1.bf16.msra.mxu1 %v13158_v43  ;;  %v1207_v41 = vld [vmem:[%s14205_s27 + $0x1f18] sm:$0xff] }
 0x4f9   : > { %11218 = vmatprep.subr.bf16.mxu0 %v13165_v44  ;;  %11777 = vmatprep.subr.bf16.mxu1 %v13167_v45  ;;  %v1211_v43 = vld [vmem:[%s14205_s27 + $0x1f38] sm:$0xff]  ;;  %v13220_v44 = vcombine.low %v1198_v31, %v1202_v32  ;;  %v13222_v45 = vcombine.low %v1199_v33, %v1203_v34  ;;  %v13277_v32 = vcombine.high %v1254_v25, %v1258_v26  ;;  %v1262_v34 = vld [vmem:[%s14205_s27 + $0x20d0] sm:$0xff] }
 0x4fa   : > { %v13231_v47 = vcombine.high %v1207_v41, %v1211_v43 }
 0x4fc   : > { %11219 = vmatpush1.bf16.msra.mxu0 %v13164_v51  ;;  %11778 = vmatpush1.bf16.msra.mxu1 %v13166_v52  ;;  %v1215_v51 = vld [vmem:[%s14205_s27 + $0x1f58] sm:$0xff] }
 0x4fd   : > { %11220 = vmatprep.subr.bf16.mxu0 %v13173_v53  ;;  %11779 = vmatprep.subr.bf16.mxu1 %v13175_v54  ;;  %v1219_v52 = vld [vmem:[%s14205_s27 + $0x1f78] sm:$0xff]  ;;  %v13228_v53 = vcombine.low %v1206_v39, %v1210_v40  ;;  %v13230_v54 = vcombine.low %v1207_v41, %v1211_v43  ;;  %v13276_v39 = vcombine.low %v1254_v25, %v1258_v26 }
 0x4fe   : > { %v13239_v56 = vcombine.high %v1215_v51, %v1219_v52 }
 0x500   : > { %11221 = vmatpush1.bf16.msra.mxu0 %v13172_v59  ;;  %11780 = vmatpush1.bf16.msra.mxu1 %v13174_v60  ;;  %v1223_v59 = vld [vmem:[%s14205_s27 + $0x1f98] sm:$0xff] }
 0x501   : > { %11222 = vmatprep.subr.bf16.mxu0 %v13181_v61  ;;  %11781 = vmatprep.subr.bf16.mxu1 %v13183_v62  ;;  %v1227_v60 = vld [vmem:[%s14205_s27 + $0x1fb8] sm:$0xff]  ;;  %v13236_v61 = vcombine.low %v1214_v49, %v1218_v50  ;;  %v13238_v62 = vcombine.low %v1215_v51, %v1219_v52 }
 0x502   : > { %v13247_v0 = vcombine.high %v1223_v59, %v1227_v60 }
 0x504   : > { %11223 = vmatpush1.bf16.msra.mxu0 %v13180_v3  ;;  %11782 = vmatpush1.bf16.msra.mxu1 %v13182_v4  ;;  %v1231_v3 = vld [vmem:[%s14205_s27 + $0x1fd8] sm:$0xff] }
 0x505   : > { %11224 = vmatprep.subr.bf16.mxu0 %v13189_v5  ;;  %11783 = vmatprep.subr.bf16.mxu1 %v13191_v6  ;;  %v1235_v4 = vld [vmem:[%s14205_s27 + $0x1ff8] sm:$0xff]  ;;  %v13244_v5 = vcombine.low %v1222_v57, %v1226_v58  ;;  %v13246_v6 = vcombine.low %v1223_v59, %v1227_v60 }
 0x506   : > { %v13255_v8 = vcombine.high %v1231_v3, %v1235_v4 }
 0x508   : > { %11225 = vmatpush1.bf16.msra.mxu0 %v13188_v11  ;;  %11784 = vmatpush1.bf16.msra.mxu1 %v13190_v12  ;;  %v1239_v11 = vld [vmem:[%s14205_s27 + $0x2018] sm:$0xff] }
 0x509   : > { %11226 = vmatprep.subr.bf16.mxu0 %v13197_v13  ;;  %11785 = vmatprep.subr.bf16.mxu1 %v13199_v14  ;;  %v1243_v12 = vld [vmem:[%s14205_s27 + $0x2038] sm:$0xff]  ;;  %v13252_v13 = vcombine.low %v1230_v1, %v1234_v2  ;;  %v13254_v14 = vcombine.low %v1231_v3, %v1235_v4 }
 0x50a   : > { %v13263_v16 = vcombine.high %v1239_v11, %v1243_v12 }
 0x50c   : > { %11227 = vmatpush1.bf16.msra.mxu0 %v13196_v19  ;;  %11786 = vmatpush1.bf16.msra.mxu1 %v13198_v20  ;;  %v1247_v19 = vld [vmem:[%s14205_s27 + $0x2058] sm:$0xff] }
 0x50d   : > { %11228 = vmatprep.subr.bf16.mxu0 %v13205_v21  ;;  %11787 = vmatprep.subr.bf16.mxu1 %v13207_v22  ;;  %v1251_v20 = vld [vmem:[%s14205_s27 + $0x2078] sm:$0xff]  ;;  %v13260_v21 = vcombine.low %v1238_v9, %v1242_v10  ;;  %v13262_v22 = vcombine.low %v1239_v11, %v1243_v12 }
 0x50e   : > { %v13271_v24 = vcombine.high %v1247_v19, %v1251_v20  ;;  %v13270_v31 = vcombine.low %v1247_v19, %v1251_v20 }
 0x510   : > { %11229 = vmatpush1.bf16.msra.mxu0 %v13204_v27  ;;  %11788 = vmatpush1.bf16.msra.mxu1 %v13206_v28  ;;  %v14112_v27 = vld [vmem:[%s15996_s0 + $0x38] ss:$100 sps:$4 sm:$0xff]  }
 0x511   : > { %11230 = vmatprep.subr.bf16.mxu0 %v13213_v29  ;;  %11789 = vmatprep.subr.bf16.mxu1 %v13215_v30  ;;  %v1255_v28 = vld [vmem:[%s14205_s27 + $0x2098] sm:$0xff]  ;;  %v13268_v30 = vcombine.low %v1246_v17, %v1250_v18 }
 0x512   : > { %v1259_v29 = vld [vmem:[%s14205_s27 + $0x20b8] sm:$0xff] }
 0x513   : > { %v13279_v33 = vcombine.high %v1255_v28, %v1259_v29  ;;  %v13278_v40 = vcombine.low %v1255_v28, %v1259_v29  ;;  %v1318_v29 = vld [vmem:[%s14205_s27 + $0x2290] sm:$0xff] }
 0x514   : > { %11231 = vmatpush1.bf16.msra.mxu0 %v13212_v35  ;;  %11790 = vmatpush1.bf16.msra.mxu1 %v13214_v36  ;;  %v1266_v35 = vld [vmem:[%s14205_s27 + $0x20f0] sm:$0xff]  ;;  %v14113_v36 = vld [vmem:[%s15996_s0 + $0x44] ss:$100 sps:$4 sm:$0xff]  }
 0x515   : > { %11232 = vmatprep.subr.bf16.mxu0 %v13221_v37  ;;  %11791 = vmatprep.subr.bf16.mxu1 %v13223_v38  ;;  %v1263_v37 = vld [vmem:[%s14205_s27 + $0x20d8] sm:$0xff]  ;;  %v13285_v41 = vcombine.high %v1262_v34, %v1266_v35  ;;  %v13284_v49 = vcombine.low %v1262_v34, %v1266_v35 }
 0x516   : > { %v1267_v38 = vld [vmem:[%s14205_s27 + $0x20f8] sm:$0xff] }
 0x517   : > { %v13287_v43 = vcombine.high %v1263_v37, %v1267_v38  ;;  %v13286_v50 = vcombine.low %v1263_v37, %v1267_v38  ;;  %v1326_v37 = vld [vmem:[%s14205_s27 + $0x22d0] sm:$0xff] }
 0x518   : > { %11233 = vmatpush1.bf16.msra.mxu0 %v13220_v44  ;;  %11792 = vmatpush1.bf16.msra.mxu1 %v13222_v45  ;;  %v1270_v44 = vld [vmem:[%s14205_s27 + $0x2110] sm:$0xff] }
 0x519   : > { %11234 = vmatprep.subr.bf16.mxu0 %v13229_v46  ;;  %11793 = vmatprep.subr.bf16.mxu1 %v13231_v47  ;;  %v1274_v45 = vld [vmem:[%s14205_s27 + $0x2130] sm:$0xff]  ;;  %v1271_v46 = vld [vmem:[%s14205_s27 + $0x2118] sm:$0xff] }
 0x51a   : > { %v1275_v47 = vld [vmem:[%s14205_s27 + $0x2138] sm:$0xff]  ;;  %v13293_v51 = vcombine.high %v1270_v44, %v1274_v45  ;;  %v13292_v57 = vcombine.low %v1270_v44, %v1274_v45  ;;  %v1330_v38 = vld [vmem:[%s14205_s27 + $0x22f0] sm:$0xff] }
 0x51b   : > { %v13295_v52 = vcombine.high %v1271_v46, %v1275_v47  ;;  %v13294_v58 = vcombine.low %v1271_v46, %v1275_v47  ;;  %v13349_v44 = vcombine.high %v1326_v37, %v1330_v38  ;;  %v1334_v46 = vld [vmem:[%s14205_s27 + $0x2310] sm:$0xff] }
 0x51c   : > { %11235 = vmatpush1.bf16.msra.mxu0 %v13228_v53  ;;  %11794 = vmatpush1.bf16.msra.mxu1 %v13230_v54  ;;  %v1278_v53 = vld [vmem:[%s14205_s27 + $0x2150] sm:$0xff] }
 0x51d   : > { %11236 = vmatprep.subr.bf16.mxu0 %v13237_v55  ;;  %11795 = vmatprep.subr.bf16.mxu1 %v13239_v56  ;;  %v1282_v54 = vld [vmem:[%s14205_s27 + $0x2170] sm:$0xff]  ;;  %v1279_v55 = vld [vmem:[%s14205_s27 + $0x2158] sm:$0xff] }
 0x51e   : > { %v1283_v56 = vld [vmem:[%s14205_s27 + $0x2178] sm:$0xff]  ;;  %v13301_v59 = vcombine.high %v1278_v53, %v1282_v54  ;;  %v13300_v1 = vcombine.low %v1278_v53, %v1282_v54  ;;  %v1338_v47 = vld [vmem:[%s14205_s27 + $0x2330] sm:$0xff] }
 0x51f   : > { %v13303_v60 = vcombine.high %v1279_v55, %v1283_v56  ;;  %v13302_v2 = vcombine.low %v1279_v55, %v1283_v56  ;;  %v13357_v53 = vcombine.high %v1334_v46, %v1338_v47  ;;  %v1342_v55 = vld [vmem:[%s14205_s27 + $0x2350] sm:$0xff] }
 0x520   : > { %11237 = vmatpush1.bf16.msra.mxu0 %v13236_v61  ;;  %11796 = vmatpush1.bf16.msra.mxu1 %v13238_v62  ;;  %v1286_v61 = vld [vmem:[%s14205_s27 + $0x2190] sm:$0xff] }
 0x521   : > { %11238 = vmatprep.subr.bf16.mxu0 %v13245_v63  ;;  %11797 = vmatprep.subr.bf16.mxu1 %v13247_v0  ;;  %v1290_v62 = vld [vmem:[%s14205_s27 + $0x21b0] sm:$0xff]  ;;  %v1287_v63 = vld [vmem:[%s14205_s27 + $0x2198] sm:$0xff] }
 0x522   : > { %v1291_v0 = vld [vmem:[%s14205_s27 + $0x21b8] sm:$0xff]  ;;  %v13309_v3 = vcombine.high %v1286_v61, %v1290_v62  ;;  %v13308_v9 = vcombine.low %v1286_v61, %v1290_v62  ;;  %v1346_v56 = vld [vmem:[%s14205_s27 + $0x2370] sm:$0xff] }
 0x523   : > { %v13311_v4 = vcombine.high %v1287_v63, %v1291_v0  ;;  %v13310_v10 = vcombine.low %v1287_v63, %v1291_v0  ;;  %v13365_v61 = vcombine.high %v1342_v55, %v1346_v56  ;;  %v1350_v63 = vld [vmem:[%s14205_s27 + $0x2390] sm:$0xff] }
 0x524   : > { %11239 = vmatpush1.bf16.msra.mxu0 %v13244_v5  ;;  %11798 = vmatpush1.bf16.msra.mxu1 %v13246_v6  ;;  %v1294_v5 = vld [vmem:[%s14205_s27 + $0x21d0] sm:$0xff] }
 0x525   : > { %11240 = vmatprep.subr.bf16.mxu0 %v13253_v7  ;;  %11799 = vmatprep.subr.bf16.mxu1 %v13255_v8  ;;  %v1298_v6 = vld [vmem:[%s14205_s27 + $0x21f0] sm:$0xff]  ;;  %v1295_v7 = vld [vmem:[%s14205_s27 + $0x21d8] sm:$0xff] }
 0x526   : > { %v1299_v8 = vld [vmem:[%s14205_s27 + $0x21f8] sm:$0xff]  ;;  %v13317_v11 = vcombine.high %v1294_v5, %v1298_v6  ;;  %v13316_v17 = vcombine.low %v1294_v5, %v1298_v6  ;;  %v1354_v0 = vld [vmem:[%s14205_s27 + $0x23b0] sm:$0xff] }
 0x527   : > { %v13319_v12 = vcombine.high %v1295_v7, %v1299_v8  ;;  %v13318_v18 = vcombine.low %v1295_v7, %v1299_v8  ;;  %v13373_v5 = vcombine.high %v1350_v63, %v1354_v0  ;;  %v1358_v7 = vld [vmem:[%s14205_s27 + $0x23d0] sm:$0xff] }
 0x528   : > { %11241 = vmatpush1.bf16.msra.mxu0 %v13252_v13  ;;  %11800 = vmatpush1.bf16.msra.mxu1 %v13254_v14  ;;  %v1302_v13 = vld [vmem:[%s14205_s27 + $0x2210] sm:$0xff] }
 0x529   : > { %11253 = vmatprep.subr.bf16.mxu0 %v13261_v15  ;;  %11812 = vmatprep.subr.bf16.mxu1 %v13263_v16  ;;  %v1306_v14 = vld [vmem:[%s14205_s27 + $0x2230] sm:$0xff]  ;;  %v1303_v15 = vld [vmem:[%s14205_s27 + $0x2218] sm:$0xff] }
 0x52a   : > { %v1307_v16 = vld [vmem:[%s14205_s27 + $0x2238] sm:$0xff]  ;;  %v13325_v19 = vcombine.high %v1302_v13, %v1306_v14  ;;  %v13324_v25 = vcombine.low %v1302_v13, %v1306_v14  ;;  %v1362_v8 = vld [vmem:[%s14205_s27 + $0x23f0] sm:$0xff] }
 0x52b   : > { %11243 = vmatmul.mubr.bf16.vlgmr.msra.gmra.mrb[4].mxu0 %v14112_v27  ;;  %11802 = vmatmul.mubr.bf16.vlgmr.msra.gmra.mrb[4].mxu1 %v14112_v27  ;;  %v13327_v20 = vcombine.high %v1303_v15, %v1307_v16  ;;  %v13326_v26 = vcombine.low %v1303_v15, %v1307_v16  ;;  %v13381_v13 = vcombine.high %v1358_v7, %v1362_v8  ;;  %v1366_v15 = vld [vmem:[%s14205_s27 + $0x2410] sm:$0xff] }
 0x52c   : > { %11254 = vmatpush1.bf16.msra.mxu0 %v13260_v21  ;;  %11813 = vmatpush1.bf16.msra.mxu1 %v13262_v22  ;;  %v1310_v21 = vld [vmem:[%s14205_s27 + $0x2250] sm:$0xff] }
 0x52d   : > { %11255 = vmatprep.subr.bf16.mxu0 %v13269_v23  ;;  %11814 = vmatprep.subr.bf16.mxu1 %v13271_v24  ;;  %v1314_v22 = vld [vmem:[%s14205_s27 + $0x2270] sm:$0xff]  ;;  %v1311_v23 = vld [vmem:[%s14205_s27 + $0x2258] sm:$0xff] }
 0x52e   : > { %11285 = vmatprep.mubr.bf16.mxu0 %v14113_v36  ;;  %11844 = vmatprep.mubr.bf16.mxu1 %v14113_v36  ;;  %v1315_v24 = vld [vmem:[%s14205_s27 + $0x2278] sm:$0xff]  ;;  %v13333_v27 = vcombine.high %v1310_v21, %v1314_v22  ;;  %v1370_v16 = vld [vmem:[%s14205_s27 + $0x2430] sm:$0xff] }
 0x52f   : > { %v13335_v28 = vcombine.high %v1311_v23, %v1315_v24  ;;  %v13334_v34 = vcombine.low %v1311_v23, %v1315_v24  ;;  %v1374_v23 = vld [vmem:[%s14205_s27 + $0x2450] sm:$0xff] }
 0x530   : > { %11256 = vmatpush1.bf16.msra.mxu0 %v13268_v30  ;;  %11815 = vmatpush1.bf16.msra.mxu1 %v13270_v31  ;;  %v1322_v30 = vld [vmem:[%s14205_s27 + $0x22b0] sm:$0xff]  ;;  %v1319_v31 = vld [vmem:[%s14205_s27 + $0x2298] sm:$0xff] }
 0x531   : > { %11257 = vmatprep.subr.bf16.mxu0 %v13277_v32  ;;  %11816 = vmatprep.subr.bf16.mxu1 %v13279_v33  ;;  %v1323_v32 = vld [vmem:[%s14205_s27 + $0x22b8] sm:$0xff]  ;;  %v13332_v33 = vcombine.low %v1310_v21, %v1314_v22  ;;  %v13341_v35 = vcombine.high %v1318_v29, %v1322_v30  ;;  %v13389_v21 = vcombine.high %v1366_v15, %v1370_v16  ;;  %v1378_v24 = vld [vmem:[%s14205_s27 + $0x2470] sm:$0xff] }
 0x532   : > { %v13343_v36 = vcombine.high %v1319_v31, %v1323_v32 }
 0x534   : > { %11258 = vmatpush1.bf16.msra.mxu0 %v13276_v39  ;;  %11817 = vmatpush1.bf16.msra.mxu1 %v13278_v40  ;;  %v1327_v39 = vld [vmem:[%s14205_s27 + $0x22d8] sm:$0xff] }
 0x535   : > { %11259 = vmatprep.subr.bf16.mxu0 %v13285_v41  ;;  %11818 = vmatprep.subr.bf16.mxu1 %v13287_v43  ;;  %v1331_v40 = vld [vmem:[%s14205_s27 + $0x22f8] sm:$0xff]  ;;  %v13340_v41 = vcombine.low %v1318_v29, %v1322_v30  ;;  %v13342_v43 = vcombine.low %v1319_v31, %v1323_v32  ;;  %v13397_v29 = vcombine.high %v1374_v23, %v1378_v24  ;;  %v1382_v31 = vld [vmem:[%s14205_s27 + $0x2490] sm:$0xff] }
 0x536   : > { %v13351_v45 = vcombine.high %v1327_v39, %v1331_v40  ;;  %v1386_v32 = vld [vmem:[%s14205_s27 + $0x24b0] sm:$0xff] }
 0x538   : > { %11260 = vmatpush1.bf16.msra.mxu0 %v13284_v49  ;;  %11819 = vmatpush1.bf16.msra.mxu1 %v13286_v50  ;;  %v1335_v49 = vld [vmem:[%s14205_s27 + $0x2318] sm:$0xff] }
 0x539   : > { %11261 = vmatprep.subr.bf16.mxu0 %v13293_v51  ;;  %11820 = vmatprep.subr.bf16.mxu1 %v13295_v52  ;;  %v1339_v50 = vld [vmem:[%s14205_s27 + $0x2338] sm:$0xff]  ;;  %v13348_v51 = vcombine.low %v1326_v37, %v1330_v38  ;;  %v13350_v52 = vcombine.low %v1327_v39, %v1331_v40  ;;  %v13405_v38 = vcombine.high %v1382_v31, %v1386_v32  ;;  %v1390_v40 = vld [vmem:[%s14205_s27 + $0x24d0] sm:$0xff] }
 0x53a   : > { %v13359_v54 = vcombine.high %v1335_v49, %v1339_v50 }
 0x53c   : > { %11262 = vmatpush1.bf16.msra.mxu0 %v13292_v57  ;;  %11821 = vmatpush1.bf16.msra.mxu1 %v13294_v58  ;;  %v1343_v57 = vld [vmem:[%s14205_s27 + $0x2358] sm:$0xff] }
 0x53d   : > { %11263 = vmatprep.subr.bf16.mxu0 %v13301_v59  ;;  %11822 = vmatprep.subr.bf16.mxu1 %v13303_v60  ;;  %v1347_v58 = vld [vmem:[%s14205_s27 + $0x2378] sm:$0xff]  ;;  %v13356_v59 = vcombine.low %v1334_v46, %v1338_v47  ;;  %v13358_v60 = vcombine.low %v1335_v49, %v1339_v50  ;;  %v13404_v46 = vcombine.low %v1382_v31, %v1386_v32 }
 0x53e   : > { %v13367_v62 = vcombine.high %v1343_v57, %v1347_v58 }
 0x540   : > { %11264 = vmatpush1.bf16.msra.mxu0 %v13300_v1  ;;  %11823 = vmatpush1.bf16.msra.mxu1 %v13302_v2  ;;  %v1351_v1 = vld [vmem:[%s14205_s27 + $0x2398] sm:$0xff] }
 0x541   : > { %11265 = vmatprep.subr.bf16.mxu0 %v13309_v3  ;;  %11824 = vmatprep.subr.bf16.mxu1 %v13311_v4  ;;  %v1355_v2 = vld [vmem:[%s14205_s27 + $0x23b8] sm:$0xff]  ;;  %v13364_v3 = vcombine.low %v1342_v55, %v1346_v56  ;;  %v13366_v4 = vcombine.low %v1343_v57, %v1347_v58 }
 0x542   : > { %v13375_v6 = vcombine.high %v1351_v1, %v1355_v2 }
 0x544   : > { %11266 = vmatpush1.bf16.msra.mxu0 %v13308_v9  ;;  %11825 = vmatpush1.bf16.msra.mxu1 %v13310_v10  ;;  %v1359_v9 = vld [vmem:[%s14205_s27 + $0x23d8] sm:$0xff] }
 0x545   : > { %11267 = vmatprep.subr.bf16.mxu0 %v13317_v11  ;;  %11826 = vmatprep.subr.bf16.mxu1 %v13319_v12  ;;  %v1363_v10 = vld [vmem:[%s14205_s27 + $0x23f8] sm:$0xff]  ;;  %v13372_v11 = vcombine.low %v1350_v63, %v1354_v0  ;;  %v13374_v12 = vcombine.low %v1351_v1, %v1355_v2 }
 0x546   : > { %v13383_v14 = vcombine.high %v1359_v9, %v1363_v10 }
 0x548   : > { %11268 = vmatpush1.bf16.msra.mxu0 %v13316_v17  ;;  %11827 = vmatpush1.bf16.msra.mxu1 %v13318_v18  ;;  %v1367_v17 = vld [vmem:[%s14205_s27 + $0x2418] sm:$0xff] }
 0x549   : > { %11269 = vmatprep.subr.bf16.mxu0 %v13325_v19  ;;  %11828 = vmatprep.subr.bf16.mxu1 %v13327_v20  ;;  %v1371_v18 = vld [vmem:[%s14205_s27 + $0x2438] sm:$0xff]  ;;  %v13380_v19 = vcombine.low %v1358_v7, %v1362_v8  ;;  %v13382_v20 = vcombine.low %v1359_v9, %v1363_v10 }
 0x54a   : > { %v13391_v22 = vcombine.high %v1367_v17, %v1371_v18 }
 0x54c   : > { %11270 = vmatpush1.bf16.msra.mxu0 %v13324_v25  ;;  %11829 = vmatpush1.bf16.msra.mxu1 %v13326_v26  ;;  %v1375_v25 = vld [vmem:[%s14205_s27 + $0x2458] sm:$0xff] }
 0x54d   : > { %11271 = vmatprep.subr.bf16.mxu0 %v13333_v27  ;;  %11830 = vmatprep.subr.bf16.mxu1 %v13335_v28  ;;  %v1379_v26 = vld [vmem:[%s14205_s27 + $0x2478] sm:$0xff]  ;;  %v13388_v27 = vcombine.low %v1366_v15, %v1370_v16  ;;  %v13390_v28 = vcombine.low %v1367_v17, %v1371_v18 }
 0x54e   : > { %v13399_v30 = vcombine.high %v1375_v25, %v1379_v26  ;;  %v13398_v37 = vcombine.low %v1375_v25, %v1379_v26 }
 0x550   : > { %11272 = vmatpush1.bf16.msra.mxu0 %v13332_v33  ;;  %11831 = vmatpush1.bf16.msra.mxu1 %v13334_v34  ;;  %v14114_v33 = vld [vmem:[%s15996_s0 + $0x40] ss:$100 sps:$4 sm:$0xff]   ;;  %v1383_v34 = vld [vmem:[%s14205_s27 + $0x2498] sm:$0xff] }
 0x551   : > { %11273 = vmatprep.subr.bf16.mxu0 %v13341_v35  ;;  %11832 = vmatprep.subr.bf16.mxu1 %v13343_v36  ;;  %v1387_v35 = vld [vmem:[%s14205_s27 + $0x24b8] sm:$0xff]  ;;  %v13396_v36 = vcombine.low %v1374_v23, %v1378_v24 }
 0x552   : > { %v13407_v39 = vcombine.high %v1383_v34, %v1387_v35  ;;  %v13406_v47 = vcombine.low %v1383_v34, %v1387_v35  ;;  %v1446_v35 = vld [vmem:[%s14205_s27 + $0x2690] sm:$0xff] }
 0x554   : > { %11274 = vmatpush1.bf16.msra.mxu0 %v13340_v41  ;;  %11833 = vmatpush1.bf16.msra.mxu1 %v13342_v43  ;;  %v1394_v41 = vld [vmem:[%s14205_s27 + $0x24f0] sm:$0xff] }
 0x555   : > { %11275 = vmatprep.subr.bf16.mxu0 %v13349_v44  ;;  %11834 = vmatprep.subr.bf16.mxu1 %v13351_v45  ;;  %v14115_v43 = vld [vmem:[%s15996_s0 + $0x4c] ss:$100 sps:$4 sm:$0xff]   ;;  %v1391_v44 = vld [vmem:[%s14205_s27 + $0x24d8] sm:$0xff]  ;;  %v13413_v49 = vcombine.high %v1390_v40, %v1394_v41  ;;  %v13412_v55 = vcombine.low %v1390_v40, %v1394_v41 }
 0x556   : > { %v1395_v45 = vld [vmem:[%s14205_s27 + $0x24f8] sm:$0xff] }
 0x557   : > { %v13415_v50 = vcombine.high %v1391_v44, %v1395_v45  ;;  %v13414_v56 = vcombine.low %v1391_v44, %v1395_v45  ;;  %v1454_v44 = vld [vmem:[%s14205_s27 + $0x26d0] sm:$0xff] }
 0x558   : > { %11276 = vmatpush1.bf16.msra.mxu0 %v13348_v51  ;;  %11835 = vmatpush1.bf16.msra.mxu1 %v13350_v52  ;;  %v1398_v51 = vld [vmem:[%s14205_s27 + $0x2510] sm:$0xff] }
 0x559   : > { %11277 = vmatprep.subr.bf16.mxu0 %v13357_v53  ;;  %11836 = vmatprep.subr.bf16.mxu1 %v13359_v54  ;;  %v1402_v52 = vld [vmem:[%s14205_s27 + $0x2530] sm:$0xff]  ;;  %v1399_v53 = vld [vmem:[%s14205_s27 + $0x2518] sm:$0xff] }
 0x55a   : > { %v1403_v54 = vld [vmem:[%s14205_s27 + $0x2538] sm:$0xff]  ;;  %v13421_v57 = vcombine.high %v1398_v51, %v1402_v52  ;;  %v13420_v63 = vcombine.low %v1398_v51, %v1402_v52  ;;  %v1458_v45 = vld [vmem:[%s14205_s27 + $0x26f0] sm:$0xff] }
 0x55b   : > { %v13423_v58 = vcombine.high %v1399_v53, %v1403_v54  ;;  %v13422_v0 = vcombine.low %v1399_v53, %v1403_v54  ;;  %v13477_v51 = vcombine.high %v1454_v44, %v1458_v45  ;;  %v1462_v53 = vld [vmem:[%s14205_s27 + $0x2710] sm:$0xff] }
 0x55c   : > { %11278 = vmatpush1.bf16.msra.mxu0 %v13356_v59  ;;  %11837 = vmatpush1.bf16.msra.mxu1 %v13358_v60  ;;  %v1406_v59 = vld [vmem:[%s14205_s27 + $0x2550] sm:$0xff] }
 0x55d   : > { %11279 = vmatprep.subr.bf16.mxu0 %v13365_v61  ;;  %11838 = vmatprep.subr.bf16.mxu1 %v13367_v62  ;;  %v1410_v60 = vld [vmem:[%s14205_s27 + $0x2570] sm:$0xff]  ;;  %v1407_v61 = vld [vmem:[%s14205_s27 + $0x2558] sm:$0xff] }
 0x55e   : > { %v1411_v62 = vld [vmem:[%s14205_s27 + $0x2578] sm:$0xff]  ;;  %v13429_v1 = vcombine.high %v1406_v59, %v1410_v60  ;;  %v13428_v7 = vcombine.low %v1406_v59, %v1410_v60  ;;  %v1466_v54 = vld [vmem:[%s14205_s27 + $0x2730] sm:$0xff] }
 0x55f   : > { %v13431_v2 = vcombine.high %v1407_v61, %v1411_v62  ;;  %v13430_v8 = vcombine.low %v1407_v61, %v1411_v62  ;;  %v13485_v59 = vcombine.high %v1462_v53, %v1466_v54  ;;  %v1470_v61 = vld [vmem:[%s14205_s27 + $0x2750] sm:$0xff] }
 0x560   : > { %11280 = vmatpush1.bf16.msra.mxu0 %v13364_v3  ;;  %11839 = vmatpush1.bf16.msra.mxu1 %v13366_v4  ;;  %v1414_v3 = vld [vmem:[%s14205_s27 + $0x2590] sm:$0xff] }
 0x561   : > { %11281 = vmatprep.subr.bf16.mxu0 %v13373_v5  ;;  %11840 = vmatprep.subr.bf16.mxu1 %v13375_v6  ;;  %v1418_v4 = vld [vmem:[%s14205_s27 + $0x25b0] sm:$0xff]  ;;  %v1415_v5 = vld [vmem:[%s14205_s27 + $0x2598] sm:$0xff] }
 0x562   : > { %v1419_v6 = vld [vmem:[%s14205_s27 + $0x25b8] sm:$0xff]  ;;  %v13437_v9 = vcombine.high %v1414_v3, %v1418_v4  ;;  %v13436_v15 = vcombine.low %v1414_v3, %v1418_v4  ;;  %v1474_v62 = vld [vmem:[%s14205_s27 + $0x2770] sm:$0xff] }
 0x563   : > { %v13439_v10 = vcombine.high %v1415_v5, %v1419_v6  ;;  %v13438_v16 = vcombine.low %v1415_v5, %v1419_v6  ;;  %v13493_v3 = vcombine.high %v1470_v61, %v1474_v62  ;;  %v1478_v5 = vld [vmem:[%s14205_s27 + $0x2790] sm:$0xff] }
 0x564   : > { %11282 = vmatpush1.bf16.msra.mxu0 %v13372_v11  ;;  %11841 = vmatpush1.bf16.msra.mxu1 %v13374_v12  ;;  %v1422_v11 = vld [vmem:[%s14205_s27 + $0x25d0] sm:$0xff] }
 0x565   : > { %11283 = vmatprep.subr.bf16.mxu0 %v13381_v13  ;;  %11842 = vmatprep.subr.bf16.mxu1 %v13383_v14  ;;  %v1426_v12 = vld [vmem:[%s14205_s27 + $0x25f0] sm:$0xff]  ;;  %v1423_v13 = vld [vmem:[%s14205_s27 + $0x25d8] sm:$0xff] }
 0x566   : > { %v1427_v14 = vld [vmem:[%s14205_s27 + $0x25f8] sm:$0xff]  ;;  %v13445_v17 = vcombine.high %v1422_v11, %v1426_v12  ;;  %v13444_v23 = vcombine.low %v1422_v11, %v1426_v12  ;;  %v1482_v6 = vld [vmem:[%s14205_s27 + $0x27b0] sm:$0xff] }
 0x567   : > { %v13447_v18 = vcombine.high %v1423_v13, %v1427_v14  ;;  %v13446_v24 = vcombine.low %v1423_v13, %v1427_v14  ;;  %v13501_v11 = vcombine.high %v1478_v5, %v1482_v6  ;;  %v1486_v13 = vld [vmem:[%s14205_s27 + $0x27d0] sm:$0xff] }
 0x568   : > { %11284 = vmatpush1.bf16.msra.mxu0 %v13380_v19  ;;  %11843 = vmatpush1.bf16.msra.mxu1 %v13382_v20  ;;  %v1430_v19 = vld [vmem:[%s14205_s27 + $0x2610] sm:$0xff] }
 0x569   : > { %11296 = vmatprep.subr.bf16.mxu0 %v13389_v21  ;;  %11855 = vmatprep.subr.bf16.mxu1 %v13391_v22  ;;  %v1434_v20 = vld [vmem:[%s14205_s27 + $0x2630] sm:$0xff]  ;;  %v1431_v21 = vld [vmem:[%s14205_s27 + $0x2618] sm:$0xff] }
 0x56a   : > { %v1435_v22 = vld [vmem:[%s14205_s27 + $0x2638] sm:$0xff]  ;;  %v13453_v25 = vcombine.high %v1430_v19, %v1434_v20  ;;  %v13452_v31 = vcombine.low %v1430_v19, %v1434_v20  ;;  %v1490_v14 = vld [vmem:[%s14205_s27 + $0x27f0] sm:$0xff] }
 0x56b   : > { %11286 = vmatmul.mubr.bf16.vlgmr.msra.gmra.mrb[4].mxu0 %v14114_v33  ;;  %11845 = vmatmul.mubr.bf16.vlgmr.msra.gmra.mrb[4].mxu1 %v14114_v33  ;;  %v13455_v26 = vcombine.high %v1431_v21, %v1435_v22  ;;  %v13454_v32 = vcombine.low %v1431_v21, %v1435_v22  ;;  %v13509_v19 = vcombine.high %v1486_v13, %v1490_v14  ;;  %v1494_v21 = vld [vmem:[%s14205_s27 + $0x2810] sm:$0xff] }
 0x56c   : > { %11297 = vmatpush1.bf16.msra.mxu0 %v13388_v27  ;;  %11856 = vmatpush1.bf16.msra.mxu1 %v13390_v28  ;;  %v1438_v27 = vld [vmem:[%s14205_s27 + $0x2650] sm:$0xff] }
 0x56d   : > { %11298 = vmatprep.subr.bf16.mxu0 %v13397_v29  ;;  %11857 = vmatprep.subr.bf16.mxu1 %v13399_v30  ;;  %v1442_v28 = vld [vmem:[%s14205_s27 + $0x2670] sm:$0xff]  ;;  %v1439_v29 = vld [vmem:[%s14205_s27 + $0x2658] sm:$0xff] }
 0x56e   : > { %11328 = vmatprep.mubr.bf16.mxu0 %v14115_v43  ;;  %11887 = vmatprep.mubr.bf16.mxu1 %v14115_v43  ;;  %v1443_v30 = vld [vmem:[%s14205_s27 + $0x2678] sm:$0xff]  ;;  %v13461_v33 = vcombine.high %v1438_v27, %v1442_v28  ;;  %v1498_v22 = vld [vmem:[%s14205_s27 + $0x2830] sm:$0xff] }
 0x56f   : > { %v13463_v34 = vcombine.high %v1439_v29, %v1443_v30  ;;  %v13462_v40 = vcombine.low %v1439_v29, %v1443_v30  ;;  %v1502_v29 = vld [vmem:[%s14205_s27 + $0x2850] sm:$0xff] }
 0x570   : > { %11299 = vmatpush1.bf16.msra.mxu0 %v13396_v36  ;;  %11858 = vmatpush1.bf16.msra.mxu1 %v13398_v37  ;;  %v1450_v36 = vld [vmem:[%s14205_s27 + $0x26b0] sm:$0xff]  ;;  %v1447_v37 = vld [vmem:[%s14205_s27 + $0x2698] sm:$0xff] }
 0x571   : > { %11300 = vmatprep.subr.bf16.mxu0 %v13405_v38  ;;  %11859 = vmatprep.subr.bf16.mxu1 %v13407_v39  ;;  %v1451_v38 = vld [vmem:[%s14205_s27 + $0x26b8] sm:$0xff]  ;;  %v13460_v39 = vcombine.low %v1438_v27, %v1442_v28  ;;  %v13469_v41 = vcombine.high %v1446_v35, %v1450_v36  ;;  %v13517_v27 = vcombine.high %v1494_v21, %v1498_v22  ;;  %v1506_v30 = vld [vmem:[%s14205_s27 + $0x2870] sm:$0xff] }
 0x572   : > { %v13471_v43 = vcombine.high %v1447_v37, %v1451_v38 }
 0x574   : > { %11301 = vmatpush1.bf16.msra.mxu0 %v13404_v46  ;;  %11860 = vmatpush1.bf16.msra.mxu1 %v13406_v47  ;;  %v1455_v46 = vld [vmem:[%s14205_s27 + $0x26d8] sm:$0xff] }
 0x575   : > { %11302 = vmatprep.subr.bf16.mxu0 %v13413_v49  ;;  %11861 = vmatprep.subr.bf16.mxu1 %v13415_v50  ;;  %v1459_v47 = vld [vmem:[%s14205_s27 + $0x26f8] sm:$0xff]  ;;  %v13468_v49 = vcombine.low %v1446_v35, %v1450_v36  ;;  %v13470_v50 = vcombine.low %v1447_v37, %v1451_v38  ;;  %v13525_v35 = vcombine.high %v1502_v29, %v1506_v30  ;;  %v1510_v37 = vld [vmem:[%s14205_s27 + $0x2890] sm:$0xff] }
 0x576   : > { %v13479_v52 = vcombine.high %v1455_v46, %v1459_v47  ;;  %v1514_v38 = vld [vmem:[%s14205_s27 + $0x28b0] sm:$0xff] }
 0x578   : > { %11303 = vmatpush1.bf16.msra.mxu0 %v13412_v55  ;;  %11862 = vmatpush1.bf16.msra.mxu1 %v13414_v56  ;;  %v1463_v55 = vld [vmem:[%s14205_s27 + $0x2718] sm:$0xff] }
 0x579   : > { %11304 = vmatprep.subr.bf16.mxu0 %v13421_v57  ;;  %11863 = vmatprep.subr.bf16.mxu1 %v13423_v58  ;;  %v1467_v56 = vld [vmem:[%s14205_s27 + $0x2738] sm:$0xff]  ;;  %v13476_v57 = vcombine.low %v1454_v44, %v1458_v45  ;;  %v13478_v58 = vcombine.low %v1455_v46, %v1459_v47  ;;  %v13533_v45 = vcombine.high %v1510_v37, %v1514_v38  ;;  %v1518_v47 = vld [vmem:[%s14205_s27 + $0x28d0] sm:$0xff] }
 0x57a   : > { %v13487_v60 = vcombine.high %v1463_v55, %v1467_v56 }
 0x57c   : > { %11305 = vmatpush1.bf16.msra.mxu0 %v13420_v63  ;;  %11864 = vmatpush1.bf16.msra.mxu1 %v13422_v0  ;;  %v1471_v63 = vld [vmem:[%s14205_s27 + $0x2758] sm:$0xff] }
 0x57d   : > { %11306 = vmatprep.subr.bf16.mxu0 %v13429_v1  ;;  %11865 = vmatprep.subr.bf16.mxu1 %v13431_v2  ;;  %v1475_v0 = vld [vmem:[%s14205_s27 + $0x2778] sm:$0xff]  ;;  %v13484_v1 = vcombine.low %v1462_v53, %v1466_v54  ;;  %v13486_v2 = vcombine.low %v1463_v55, %v1467_v56  ;;  %v13532_v53 = vcombine.low %v1510_v37, %v1514_v38 }
 0x57e   : > { %v13495_v4 = vcombine.high %v1471_v63, %v1475_v0 }
 0x580   : > { %11307 = vmatpush1.bf16.msra.mxu0 %v13428_v7  ;;  %11866 = vmatpush1.bf16.msra.mxu1 %v13430_v8  ;;  %v1479_v7 = vld [vmem:[%s14205_s27 + $0x2798] sm:$0xff] }
 0x581   : > { %11308 = vmatprep.subr.bf16.mxu0 %v13437_v9  ;;  %11867 = vmatprep.subr.bf16.mxu1 %v13439_v10  ;;  %v1483_v8 = vld [vmem:[%s14205_s27 + $0x27b8] sm:$0xff]  ;;  %v13492_v9 = vcombine.low %v1470_v61, %v1474_v62  ;;  %v13494_v10 = vcombine.low %v1471_v63, %v1475_v0 }
 0x582   : > { %v13503_v12 = vcombine.high %v1479_v7, %v1483_v8 }
 0x584   : > { %11309 = vmatpush1.bf16.msra.mxu0 %v13436_v15  ;;  %11868 = vmatpush1.bf16.msra.mxu1 %v13438_v16  ;;  %v1487_v15 = vld [vmem:[%s14205_s27 + $0x27d8] sm:$0xff] }
 0x585   : > { %11310 = vmatprep.subr.bf16.mxu0 %v13445_v17  ;;  %11869 = vmatprep.subr.bf16.mxu1 %v13447_v18  ;;  %v1491_v16 = vld [vmem:[%s14205_s27 + $0x27f8] sm:$0xff]  ;;  %v13500_v17 = vcombine.low %v1478_v5, %v1482_v6  ;;  %v13502_v18 = vcombine.low %v1479_v7, %v1483_v8 }
 0x586   : > { %v13511_v20 = vcombine.high %v1487_v15, %v1491_v16 }
 0x588   : > { %11311 = vmatpush1.bf16.msra.mxu0 %v13444_v23  ;;  %11870 = vmatpush1.bf16.msra.mxu1 %v13446_v24  ;;  %v1495_v23 = vld [vmem:[%s14205_s27 + $0x2818] sm:$0xff] }
 0x589   : > { %11312 = vmatprep.subr.bf16.mxu0 %v13453_v25  ;;  %11871 = vmatprep.subr.bf16.mxu1 %v13455_v26  ;;  %v1499_v24 = vld [vmem:[%s14205_s27 + $0x2838] sm:$0xff]  ;;  %v13508_v25 = vcombine.low %v1486_v13, %v1490_v14  ;;  %v13510_v26 = vcombine.low %v1487_v15, %v1491_v16 }
 0x58a   : > { %v13519_v28 = vcombine.high %v1495_v23, %v1499_v24 }
 0x58c   : > { %11313 = vmatpush1.bf16.msra.mxu0 %v13452_v31  ;;  %11872 = vmatpush1.bf16.msra.mxu1 %v13454_v32  ;;  %v1503_v31 = vld [vmem:[%s14205_s27 + $0x2858] sm:$0xff] }
 0x58d   : > { %11314 = vmatprep.subr.bf16.mxu0 %v13461_v33  ;;  %11873 = vmatprep.subr.bf16.mxu1 %v13463_v34  ;;  %v1507_v32 = vld [vmem:[%s14205_s27 + $0x2878] sm:$0xff]  ;;  %v13516_v33 = vcombine.low %v1494_v21, %v1498_v22  ;;  %v13518_v34 = vcombine.low %v1495_v23, %v1499_v24 }
 0x58e   : > { %v13527_v36 = vcombine.high %v1503_v31, %v1507_v32  ;;  %v13526_v44 = vcombine.low %v1503_v31, %v1507_v32 }
 0x590   : > { %11315 = vmatpush1.bf16.msra.mxu0 %v13460_v39  ;;  %11874 = vmatpush1.bf16.msra.mxu1 %v13462_v40  ;;  %v14116_v39 = vld [vmem:[%s15996_s0 + $0x48] ss:$100 sps:$4 sm:$0xff]   ;;  %v1511_v40 = vld [vmem:[%s14205_s27 + $0x2898] sm:$0xff] }
 0x591   : > { %11316 = vmatprep.subr.bf16.mxu0 %v13469_v41  ;;  %11875 = vmatprep.subr.bf16.mxu1 %v13471_v43  ;;  %v1515_v41 = vld [vmem:[%s14205_s27 + $0x28b8] sm:$0xff]  ;;  %v13524_v43 = vcombine.low %v1502_v29, %v1506_v30 }
 0x592   : > { %v13535_v46 = vcombine.high %v1511_v40, %v1515_v41  ;;  %v13534_v54 = vcombine.low %v1511_v40, %v1515_v41  ;;  %v1574_v41 = vld [vmem:[%s14205_s27 + $0x2a90] sm:$0xff] }
 0x594   : > { %11317 = vmatpush1.bf16.msra.mxu0 %v13468_v49  ;;  %11876 = vmatpush1.bf16.msra.mxu1 %v13470_v50  ;;  %v1522_v49 = vld [vmem:[%s14205_s27 + $0x28f0] sm:$0xff] }
 0x595   : > { %11318 = vmatprep.subr.bf16.mxu0 %v13477_v51  ;;  %11877 = vmatprep.subr.bf16.mxu1 %v13479_v52  ;;  %v14117_v50 = vld [vmem:[%s15996_s0 + $0x54] ss:$100 sps:$4 sm:$0xff]   ;;  %v13541_v55 = vcombine.high %v1518_v47, %v1522_v49  ;;  %v13540_v61 = vcombine.low %v1518_v47, %v1522_v49 }
 0x596   : > { %v1519_v51 = vld [vmem:[%s14205_s27 + $0x28d8] sm:$0xff] }
 0x597   : > { %v1523_v52 = vld [vmem:[%s14205_s27 + $0x28f8] sm:$0xff] }
 0x598   : > { %11319 = vmatpush1.bf16.msra.mxu0 %v13476_v57  ;;  %11878 = vmatpush1.bf16.msra.mxu1 %v13478_v58  ;;  %v13543_v56 = vcombine.high %v1519_v51, %v1523_v52  ;;  %v1526_v57 = vld [vmem:[%s14205_s27 + $0x2910] sm:$0xff]  ;;  %v13542_v62 = vcombine.low %v1519_v51, %v1523_v52 }
 0x599   : > { %11320 = vmatprep.subr.bf16.mxu0 %v13485_v59  ;;  %11879 = vmatprep.subr.bf16.mxu1 %v13487_v60  ;;  %v1530_v58 = vld [vmem:[%s14205_s27 + $0x2930] sm:$0xff]  ;;  %v1527_v59 = vld [vmem:[%s14205_s27 + $0x2918] sm:$0xff] }
 0x59a   : > { %v1531_v60 = vld [vmem:[%s14205_s27 + $0x2938] sm:$0xff]  ;;  %v13549_v63 = vcombine.high %v1526_v57, %v1530_v58  ;;  %v13548_v5 = vcombine.low %v1526_v57, %v1530_v58  ;;  %v1582_v51 = vld [vmem:[%s14205_s27 + $0x2ad0] sm:$0xff] }
 0x59b   : > { %v13551_v0 = vcombine.high %v1527_v59, %v1531_v60  ;;  %v13550_v6 = vcombine.low %v1527_v59, %v1531_v60  ;;  %v1586_v52 = vld [vmem:[%s14205_s27 + $0x2af0] sm:$0xff] }
 0x59c   : > { %11321 = vmatpush1.bf16.msra.mxu0 %v13484_v1  ;;  %11880 = vmatpush1.bf16.msra.mxu1 %v13486_v2  ;;  %v1534_v1 = vld [vmem:[%s14205_s27 + $0x2950] sm:$0xff]  ;;  %v13605_v57 = vcombine.high %v1582_v51, %v1586_v52 }
 0x59d   : > { %11322 = vmatprep.subr.bf16.mxu0 %v13493_v3  ;;  %11881 = vmatprep.subr.bf16.mxu1 %v13495_v4  ;;  %v1538_v2 = vld [vmem:[%s14205_s27 + $0x2970] sm:$0xff]  ;;  %v1535_v3 = vld [vmem:[%s14205_s27 + $0x2958] sm:$0xff] }
 0x59e   : > { %v1539_v4 = vld [vmem:[%s14205_s27 + $0x2978] sm:$0xff]  ;;  %v13557_v7 = vcombine.high %v1534_v1, %v1538_v2  ;;  %v13556_v13 = vcombine.low %v1534_v1, %v1538_v2  ;;  %v1590_v59 = vld [vmem:[%s14205_s27 + $0x2b10] sm:$0xff] }
 0x59f   : > { %v13559_v8 = vcombine.high %v1535_v3, %v1539_v4  ;;  %v13558_v14 = vcombine.low %v1535_v3, %v1539_v4  ;;  %v1594_v60 = vld [vmem:[%s14205_s27 + $0x2b30] sm:$0xff] }
 0x5a0   : > { %11323 = vmatpush1.bf16.msra.mxu0 %v13492_v9  ;;  %11882 = vmatpush1.bf16.msra.mxu1 %v13494_v10  ;;  %v1542_v9 = vld [vmem:[%s14205_s27 + $0x2990] sm:$0xff]  ;;  %v13613_v1 = vcombine.high %v1590_v59, %v1594_v60 }
 0x5a1   : > { %11324 = vmatprep.subr.bf16.mxu0 %v13501_v11  ;;  %11883 = vmatprep.subr.bf16.mxu1 %v13503_v12  ;;  %v1546_v10 = vld [vmem:[%s14205_s27 + $0x29b0] sm:$0xff]  ;;  %v1543_v11 = vld [vmem:[%s14205_s27 + $0x2998] sm:$0xff] }
 0x5a2   : > { %v1547_v12 = vld [vmem:[%s14205_s27 + $0x29b8] sm:$0xff]  ;;  %v13565_v15 = vcombine.high %v1542_v9, %v1546_v10  ;;  %v13564_v21 = vcombine.low %v1542_v9, %v1546_v10  ;;  %v1598_v3 = vld [vmem:[%s14205_s27 + $0x2b50] sm:$0xff] }
 0x5a3   : > { %v13567_v16 = vcombine.high %v1543_v11, %v1547_v12  ;;  %v13566_v22 = vcombine.low %v1543_v11, %v1547_v12  ;;  %v1602_v4 = vld [vmem:[%s14205_s27 + $0x2b70] sm:$0xff] }
 0x5a4   : > { %11325 = vmatpush1.bf16.msra.mxu0 %v13500_v17  ;;  %11884 = vmatpush1.bf16.msra.mxu1 %v13502_v18  ;;  %v1550_v17 = vld [vmem:[%s14205_s27 + $0x29d0] sm:$0xff]  ;;  %v13621_v9 = vcombine.high %v1598_v3, %v1602_v4 }
 0x5a5   : > { %11326 = vmatprep.subr.bf16.mxu0 %v13509_v19  ;;  %11885 = vmatprep.subr.bf16.mxu1 %v13511_v20  ;;  %v1554_v18 = vld [vmem:[%s14205_s27 + $0x29f0] sm:$0xff]  ;;  %v1551_v19 = vld [vmem:[%s14205_s27 + $0x29d8] sm:$0xff] }
 0x5a6   : > { %v1555_v20 = vld [vmem:[%s14205_s27 + $0x29f8] sm:$0xff]  ;;  %v13573_v23 = vcombine.high %v1550_v17, %v1554_v18  ;;  %v13572_v29 = vcombine.low %v1550_v17, %v1554_v18  ;;  %v1606_v11 = vld [vmem:[%s14205_s27 + $0x2b90] sm:$0xff] }
 0x5a7   : > { %v13575_v24 = vcombine.high %v1551_v19, %v1555_v20  ;;  %v13574_v30 = vcombine.low %v1551_v19, %v1555_v20  ;;  %v1610_v12 = vld [vmem:[%s14205_s27 + $0x2bb0] sm:$0xff] }
 0x5a8   : > { %11327 = vmatpush1.bf16.msra.mxu0 %v13508_v25  ;;  %11886 = vmatpush1.bf16.msra.mxu1 %v13510_v26  ;;  %v1558_v25 = vld [vmem:[%s14205_s27 + $0x2a10] sm:$0xff]  ;;  %v13629_v17 = vcombine.high %v1606_v11, %v1610_v12 }
 0x5a9   : > { %11339 = vmatprep.subr.bf16.mxu0 %v13517_v27  ;;  %11898 = vmatprep.subr.bf16.mxu1 %v13519_v28  ;;  %v1562_v26 = vld [vmem:[%s14205_s27 + $0x2a30] sm:$0xff]  ;;  %v1559_v27 = vld [vmem:[%s14205_s27 + $0x2a18] sm:$0xff] }
 0x5aa   : > { %v1563_v28 = vld [vmem:[%s14205_s27 + $0x2a38] sm:$0xff]  ;;  %v13581_v31 = vcombine.high %v1558_v25, %v1562_v26  ;;  %v13580_v37 = vcombine.low %v1558_v25, %v1562_v26  ;;  %v1614_v19 = vld [vmem:[%s14205_s27 + $0x2bd0] sm:$0xff] }
 0x5ab   : > { %11329 = vmatmul.mubr.bf16.vlgmr.msra.gmra.mrb[4].mxu0 %v14116_v39  ;;  %11888 = vmatmul.mubr.bf16.vlgmr.msra.gmra.mrb[4].mxu1 %v14116_v39  ;;  %v13583_v32 = vcombine.high %v1559_v27, %v1563_v28  ;;  %v13582_v38 = vcombine.low %v1559_v27, %v1563_v28  ;;  %v1618_v20 = vld [vmem:[%s14205_s27 + $0x2bf0] sm:$0xff] }
 0x5ac   : > { %11340 = vmatpush1.bf16.msra.mxu0 %v13516_v33  ;;  %11899 = vmatpush1.bf16.msra.mxu1 %v13518_v34  ;;  %v1566_v33 = vld [vmem:[%s14205_s27 + $0x2a50] sm:$0xff]  ;;  %v13637_v25 = vcombine.high %v1614_v19, %v1618_v20 }
 0x5ad   : > { %11341 = vmatprep.subr.bf16.mxu0 %v13525_v35  ;;  %11900 = vmatprep.subr.bf16.mxu1 %v13527_v36  ;;  %v1570_v34 = vld [vmem:[%s14205_s27 + $0x2a70] sm:$0xff]  ;;  %v1567_v35 = vld [vmem:[%s14205_s27 + $0x2a58] sm:$0xff] }
 0x5ae   : > { %11371 = vmatprep.mubr.bf16.mxu0 %v14117_v50  ;;  %11930 = vmatprep.mubr.bf16.mxu1 %v14117_v50  ;;  %v1571_v36 = vld [vmem:[%s14205_s27 + $0x2a78] sm:$0xff]  ;;  %v13589_v39 = vcombine.high %v1566_v33, %v1570_v34  ;;  %v1622_v27 = vld [vmem:[%s14205_s27 + $0x2c10] sm:$0xff] }
 0x5af   : > { %v13591_v40 = vcombine.high %v1567_v35, %v1571_v36  ;;  %v13590_v47 = vcombine.low %v1567_v35, %v1571_v36  ;;  %v1626_v28 = vld [vmem:[%s14205_s27 + $0x2c30] sm:$0xff] }
 0x5b0   : > { %11342 = vmatpush1.bf16.msra.mxu0 %v13524_v43  ;;  %11901 = vmatpush1.bf16.msra.mxu1 %v13526_v44  ;;  %v1578_v43 = vld [vmem:[%s14205_s27 + $0x2ab0] sm:$0xff]  ;;  %v1575_v44 = vld [vmem:[%s14205_s27 + $0x2a98] sm:$0xff] }
 0x5b1   : > { %11343 = vmatprep.subr.bf16.mxu0 %v13533_v45  ;;  %11902 = vmatprep.subr.bf16.mxu1 %v13535_v46  ;;  %v1579_v45 = vld [vmem:[%s14205_s27 + $0x2ab8] sm:$0xff]  ;;  %v13588_v46 = vcombine.low %v1566_v33, %v1570_v34  ;;  %v13597_v49 = vcombine.high %v1574_v41, %v1578_v43  ;;  %v13645_v33 = vcombine.high %v1622_v27, %v1626_v28  ;;  %v1630_v35 = vld [vmem:[%s14205_s27 + $0x2c50] sm:$0xff] }
 0x5b2   : > { %v13599_v50 = vcombine.high %v1575_v44, %v1579_v45  ;;  %v1634_v36 = vld [vmem:[%s14205_s27 + $0x2c70] sm:$0xff] }
 0x5b4   : > { %11344 = vmatpush1.bf16.msra.mxu0 %v13532_v53  ;;  %11903 = vmatpush1.bf16.msra.mxu1 %v13534_v54  ;;  %v1583_v53 = vld [vmem:[%s14205_s27 + $0x2ad8] sm:$0xff] }
 0x5b5   : > { %11345 = vmatprep.subr.bf16.mxu0 %v13541_v55  ;;  %11904 = vmatprep.subr.bf16.mxu1 %v13543_v56  ;;  %v1587_v54 = vld [vmem:[%s14205_s27 + $0x2af8] sm:$0xff]  ;;  %v13596_v55 = vcombine.low %v1574_v41, %v1578_v43  ;;  %v13598_v56 = vcombine.low %v1575_v44, %v1579_v45  ;;  %v13653_v41 = vcombine.high %v1630_v35, %v1634_v36  ;;  %v1638_v44 = vld [vmem:[%s14205_s27 + $0x2c90] sm:$0xff] }
 0x5b6   : > { %v13607_v58 = vcombine.high %v1583_v53, %v1587_v54  ;;  %v1642_v45 = vld [vmem:[%s14205_s27 + $0x2cb0] sm:$0xff] }
 0x5b8   : > { %11346 = vmatpush1.bf16.msra.mxu0 %v13540_v61  ;;  %11905 = vmatpush1.bf16.msra.mxu1 %v13542_v62  ;;  %v1591_v61 = vld [vmem:[%s14205_s27 + $0x2b18] sm:$0xff] }
 0x5b9   : > { %11347 = vmatprep.subr.bf16.mxu0 %v13549_v63  ;;  %11906 = vmatprep.subr.bf16.mxu1 %v13551_v0  ;;  %v1595_v62 = vld [vmem:[%s14205_s27 + $0x2b38] sm:$0xff]  ;;  %v13604_v63 = vcombine.low %v1582_v51, %v1586_v52  ;;  %v13606_v0 = vcombine.low %v1583_v53, %v1587_v54  ;;  %v13661_v52 = vcombine.high %v1638_v44, %v1642_v45  ;;  %v1646_v54 = vld [vmem:[%s14205_s27 + $0x2cd0] sm:$0xff] }
 0x5ba   : > { %v13615_v2 = vcombine.high %v1591_v61, %v1595_v62 }
 0x5bc   : > { %11348 = vmatpush1.bf16.msra.mxu0 %v13548_v5  ;;  %11907 = vmatpush1.bf16.msra.mxu1 %v13550_v6  ;;  %v1599_v5 = vld [vmem:[%s14205_s27 + $0x2b58] sm:$0xff] }
 0x5bd   : > { %11349 = vmatprep.subr.bf16.mxu0 %v13557_v7  ;;  %11908 = vmatprep.subr.bf16.mxu1 %v13559_v8  ;;  %v1603_v6 = vld [vmem:[%s14205_s27 + $0x2b78] sm:$0xff]  ;;  %v13612_v7 = vcombine.low %v1590_v59, %v1594_v60  ;;  %v13614_v8 = vcombine.low %v1591_v61, %v1595_v62  ;;  %v13660_v59 = vcombine.low %v1638_v44, %v1642_v45 }
 0x5be   : > { %v13623_v10 = vcombine.high %v1599_v5, %v1603_v6 }
 0x5c0   : > { %11350 = vmatpush1.bf16.msra.mxu0 %v13556_v13  ;;  %11909 = vmatpush1.bf16.msra.mxu1 %v13558_v14  ;;  %v1607_v13 = vld [vmem:[%s14205_s27 + $0x2b98] sm:$0xff] }
 0x5c1   : > { %11351 = vmatprep.subr.bf16.mxu0 %v13565_v15  ;;  %11910 = vmatprep.subr.bf16.mxu1 %v13567_v16  ;;  %v1611_v14 = vld [vmem:[%s14205_s27 + $0x2bb8] sm:$0xff]  ;;  %v13620_v15 = vcombine.low %v1598_v3, %v1602_v4  ;;  %v13622_v16 = vcombine.low %v1599_v5, %v1603_v6 }
 0x5c2   : > { %v13631_v18 = vcombine.high %v1607_v13, %v1611_v14 }
 0x5c4   : > { %11352 = vmatpush1.bf16.msra.mxu0 %v13564_v21  ;;  %11911 = vmatpush1.bf16.msra.mxu1 %v13566_v22  ;;  %v1615_v21 = vld [vmem:[%s14205_s27 + $0x2bd8] sm:$0xff] }
 0x5c5   : > { %11353 = vmatprep.subr.bf16.mxu0 %v13573_v23  ;;  %11912 = vmatprep.subr.bf16.mxu1 %v13575_v24  ;;  %v1619_v22 = vld [vmem:[%s14205_s27 + $0x2bf8] sm:$0xff]  ;;  %v13628_v23 = vcombine.low %v1606_v11, %v1610_v12  ;;  %v13630_v24 = vcombine.low %v1607_v13, %v1611_v14 }
 0x5c6   : > { %v13639_v26 = vcombine.high %v1615_v21, %v1619_v22 }
 0x5c8   : > { %11354 = vmatpush1.bf16.msra.mxu0 %v13572_v29  ;;  %11913 = vmatpush1.bf16.msra.mxu1 %v13574_v30  ;;  %v1623_v29 = vld [vmem:[%s14205_s27 + $0x2c18] sm:$0xff] }
 0x5c9   : > { %11355 = vmatprep.subr.bf16.mxu0 %v13581_v31  ;;  %11914 = vmatprep.subr.bf16.mxu1 %v13583_v32  ;;  %v1627_v30 = vld [vmem:[%s14205_s27 + $0x2c38] sm:$0xff]  ;;  %v13636_v31 = vcombine.low %v1614_v19, %v1618_v20  ;;  %v13638_v32 = vcombine.low %v1615_v21, %v1619_v22 }
 0x5ca   : > { %v13647_v34 = vcombine.high %v1623_v29, %v1627_v30 }
 0x5cc   : > { %11356 = vmatpush1.bf16.msra.mxu0 %v13580_v37  ;;  %11915 = vmatpush1.bf16.msra.mxu1 %v13582_v38  ;;  %v1631_v37 = vld [vmem:[%s14205_s27 + $0x2c58] sm:$0xff] }
 0x5cd   : > { %11357 = vmatprep.subr.bf16.mxu0 %v13589_v39  ;;  %11916 = vmatprep.subr.bf16.mxu1 %v13591_v40  ;;  %v1635_v38 = vld [vmem:[%s14205_s27 + $0x2c78] sm:$0xff]  ;;  %v13644_v39 = vcombine.low %v1622_v27, %v1626_v28  ;;  %v13646_v40 = vcombine.low %v1623_v29, %v1627_v30 }
 0x5ce   : > { %v13655_v43 = vcombine.high %v1631_v37, %v1635_v38  ;;  %v13654_v51 = vcombine.low %v1631_v37, %v1635_v38 }
 0x5d0   : > { %11358 = vmatpush1.bf16.msra.mxu0 %v13588_v46  ;;  %11917 = vmatpush1.bf16.msra.mxu1 %v13590_v47  ;;  %v14118_v46 = vld [vmem:[%s15996_s0 + $0x50] ss:$100 sps:$4 sm:$0xff]   ;;  %v1639_v47 = vld [vmem:[%s14205_s27 + $0x2c98] sm:$0xff] }
 0x5d1   : > { %11359 = vmatprep.subr.bf16.mxu0 %v13597_v49  ;;  %11918 = vmatprep.subr.bf16.mxu1 %v13599_v50  ;;  %v1643_v49 = vld [vmem:[%s14205_s27 + $0x2cb8] sm:$0xff]  ;;  %v13652_v50 = vcombine.low %v1630_v35, %v1634_v36 }
 0x5d2   : > { %v13663_v53 = vcombine.high %v1639_v47, %v1643_v49  ;;  %v13662_v60 = vcombine.low %v1639_v47, %v1643_v49  ;;  %v1702_v49 = vld [vmem:[%s14205_s27 + $0x2e90] sm:$0xff] }
 0x5d4   : > { %11360 = vmatpush1.bf16.msra.mxu0 %v13596_v55  ;;  %11919 = vmatpush1.bf16.msra.mxu1 %v13598_v56  ;;  %v1650_v55 = vld [vmem:[%s14205_s27 + $0x2cf0] sm:$0xff]  ;;  %v14119_v56 = vld [vmem:[%s15996_s0 + $0x5c] ss:$100 sps:$4 sm:$0xff]  }
 0x5d5   : > { %11361 = vmatprep.subr.bf16.mxu0 %v13605_v57  ;;  %11920 = vmatprep.subr.bf16.mxu1 %v13607_v58  ;;  %v1647_v57 = vld [vmem:[%s14205_s27 + $0x2cd8] sm:$0xff]  ;;  %v13669_v61 = vcombine.high %v1646_v54, %v1650_v55  ;;  %v13668_v3 = vcombine.low %v1646_v54, %v1650_v55 }
 0x5d6   : > { %v1651_v58 = vld [vmem:[%s14205_s27 + $0x2cf8] sm:$0xff] }
 0x5d7   : > { %v13671_v62 = vcombine.high %v1647_v57, %v1651_v58  ;;  %v13670_v4 = vcombine.low %v1647_v57, %v1651_v58  ;;  %v1710_v57 = vld [vmem:[%s14205_s27 + $0x2ed0] sm:$0xff] }
 0x5d8   : > { %11362 = vmatpush1.bf16.msra.mxu0 %v13604_v63  ;;  %11921 = vmatpush1.bf16.msra.mxu1 %v13606_v0  ;;  %v1654_v63 = vld [vmem:[%s14205_s27 + $0x2d10] sm:$0xff] }
 0x5d9   : > { %11363 = vmatprep.subr.bf16.mxu0 %v13613_v1  ;;  %11922 = vmatprep.subr.bf16.mxu1 %v13615_v2  ;;  %v1658_v0 = vld [vmem:[%s14205_s27 + $0x2d30] sm:$0xff]  ;;  %v1655_v1 = vld [vmem:[%s14205_s27 + $0x2d18] sm:$0xff] }
 0x5da   : > { %v1659_v2 = vld [vmem:[%s14205_s27 + $0x2d38] sm:$0xff]  ;;  %v13677_v5 = vcombine.high %v1654_v63, %v1658_v0  ;;  %v13676_v11 = vcombine.low %v1654_v63, %v1658_v0  ;;  %v1714_v58 = vld [vmem:[%s14205_s27 + $0x2ef0] sm:$0xff] }
 0x5db   : > { %v13679_v6 = vcombine.high %v1655_v1, %v1659_v2  ;;  %v13678_v12 = vcombine.low %v1655_v1, %v1659_v2  ;;  %v13733_v63 = vcombine.high %v1710_v57, %v1714_v58  ;;  %v1718_v1 = vld [vmem:[%s14205_s27 + $0x2f10] sm:$0xff] }
 0x5dc   : > { %11364 = vmatpush1.bf16.msra.mxu0 %v13612_v7  ;;  %11923 = vmatpush1.bf16.msra.mxu1 %v13614_v8  ;;  %v1662_v7 = vld [vmem:[%s14205_s27 + $0x2d50] sm:$0xff] }
 0x5dd   : > { %11365 = vmatprep.subr.bf16.mxu0 %v13621_v9  ;;  %11924 = vmatprep.subr.bf16.mxu1 %v13623_v10  ;;  %v1666_v8 = vld [vmem:[%s14205_s27 + $0x2d70] sm:$0xff]  ;;  %v1663_v9 = vld [vmem:[%s14205_s27 + $0x2d58] sm:$0xff] }
 0x5de   : > { %v1667_v10 = vld [vmem:[%s14205_s27 + $0x2d78] sm:$0xff]  ;;  %v13685_v13 = vcombine.high %v1662_v7, %v1666_v8  ;;  %v13684_v19 = vcombine.low %v1662_v7, %v1666_v8  ;;  %v1722_v2 = vld [vmem:[%s14205_s27 + $0x2f30] sm:$0xff] }
 0x5df   : > { %v13687_v14 = vcombine.high %v1663_v9, %v1667_v10  ;;  %v13686_v20 = vcombine.low %v1663_v9, %v1667_v10  ;;  %v13741_v7 = vcombine.high %v1718_v1, %v1722_v2  ;;  %v1726_v9 = vld [vmem:[%s14205_s27 + $0x2f50] sm:$0xff] }
 0x5e0   : > { %11366 = vmatpush1.bf16.msra.mxu0 %v13620_v15  ;;  %11925 = vmatpush1.bf16.msra.mxu1 %v13622_v16  ;;  %v1670_v15 = vld [vmem:[%s14205_s27 + $0x2d90] sm:$0xff] }
 0x5e1   : > { %11367 = vmatprep.subr.bf16.mxu0 %v13629_v17  ;;  %11926 = vmatprep.subr.bf16.mxu1 %v13631_v18  ;;  %v1674_v16 = vld [vmem:[%s14205_s27 + $0x2db0] sm:$0xff]  ;;  %v1671_v17 = vld [vmem:[%s14205_s27 + $0x2d98] sm:$0xff] }
 0x5e2   : > { %v1675_v18 = vld [vmem:[%s14205_s27 + $0x2db8] sm:$0xff]  ;;  %v13693_v21 = vcombine.high %v1670_v15, %v1674_v16  ;;  %v13692_v27 = vcombine.low %v1670_v15, %v1674_v16  ;;  %v1730_v10 = vld [vmem:[%s14205_s27 + $0x2f70] sm:$0xff] }
 0x5e3   : > { %v13695_v22 = vcombine.high %v1671_v17, %v1675_v18  ;;  %v13694_v28 = vcombine.low %v1671_v17, %v1675_v18  ;;  %v13749_v15 = vcombine.high %v1726_v9, %v1730_v10  ;;  %v1734_v17 = vld [vmem:[%s14205_s27 + $0x2f90] sm:$0xff] }
 0x5e4   : > { %11368 = vmatpush1.bf16.msra.mxu0 %v13628_v23  ;;  %11927 = vmatpush1.bf16.msra.mxu1 %v13630_v24  ;;  %v1678_v23 = vld [vmem:[%s14205_s27 + $0x2dd0] sm:$0xff] }
 0x5e5   : > { %11369 = vmatprep.subr.bf16.mxu0 %v13637_v25  ;;  %11928 = vmatprep.subr.bf16.mxu1 %v13639_v26  ;;  %v1682_v24 = vld [vmem:[%s14205_s27 + $0x2df0] sm:$0xff]  ;;  %v1679_v25 = vld [vmem:[%s14205_s27 + $0x2dd8] sm:$0xff] }
 0x5e6   : > { %v1683_v26 = vld [vmem:[%s14205_s27 + $0x2df8] sm:$0xff]  ;;  %v13701_v29 = vcombine.high %v1678_v23, %v1682_v24  ;;  %v13700_v35 = vcombine.low %v1678_v23, %v1682_v24  ;;  %v1738_v18 = vld [vmem:[%s14205_s27 + $0x2fb0] sm:$0xff] }
 0x5e7   : > { %v13703_v30 = vcombine.high %v1679_v25, %v1683_v26  ;;  %v13702_v36 = vcombine.low %v1679_v25, %v1683_v26  ;;  %v13757_v23 = vcombine.high %v1734_v17, %v1738_v18  ;;  %v1742_v25 = vld [vmem:[%s14205_s27 + $0x2fd0] sm:$0xff] }
 0x5e8   : > { %11370 = vmatpush1.bf16.msra.mxu0 %v13636_v31  ;;  %11929 = vmatpush1.bf16.msra.mxu1 %v13638_v32  ;;  %v1686_v31 = vld [vmem:[%s14205_s27 + $0x2e10] sm:$0xff] }
 0x5e9   : > { %11382 = vmatprep.subr.bf16.mxu0 %v13645_v33  ;;  %11941 = vmatprep.subr.bf16.mxu1 %v13647_v34  ;;  %v1690_v32 = vld [vmem:[%s14205_s27 + $0x2e30] sm:$0xff]  ;;  %v1687_v33 = vld [vmem:[%s14205_s27 + $0x2e18] sm:$0xff] }
 0x5ea   : > { %v1691_v34 = vld [vmem:[%s14205_s27 + $0x2e38] sm:$0xff]  ;;  %v13709_v37 = vcombine.high %v1686_v31, %v1690_v32  ;;  %v13708_v44 = vcombine.low %v1686_v31, %v1690_v32  ;;  %v1746_v26 = vld [vmem:[%s14205_s27 + $0x2ff0] sm:$0xff] }
 0x5eb   : > { %11372 = vmatmul.mubr.bf16.vlgmr.msra.gmra.mrb[4].mxu0 %v14118_v46  ;;  %11931 = vmatmul.mubr.bf16.vlgmr.msra.gmra.mrb[4].mxu1 %v14118_v46  ;;  %v13711_v38 = vcombine.high %v1687_v33, %v1691_v34  ;;  %v13710_v45 = vcombine.low %v1687_v33, %v1691_v34  ;;  %v13765_v31 = vcombine.high %v1742_v25, %v1746_v26  ;;  %v1750_v33 = vld [vmem:[%s14205_s27 + $0x3010] sm:$0xff] }
 0x5ec   : > { %11383 = vmatpush1.bf16.msra.mxu0 %v13644_v39  ;;  %11942 = vmatpush1.bf16.msra.mxu1 %v13646_v40  ;;  %v1694_v39 = vld [vmem:[%s14205_s27 + $0x2e50] sm:$0xff] }
 0x5ed   : > { %11384 = vmatprep.subr.bf16.mxu0 %v13653_v41  ;;  %11943 = vmatprep.subr.bf16.mxu1 %v13655_v43  ;;  %v1698_v40 = vld [vmem:[%s14205_s27 + $0x2e70] sm:$0xff]  ;;  %v1695_v41 = vld [vmem:[%s14205_s27 + $0x2e58] sm:$0xff] }
 0x5ee   : > { %11414 = vmatprep.mubr.bf16.mxu0 %v14119_v56  ;;  %11973 = vmatprep.mubr.bf16.mxu1 %v14119_v56  ;;  %v1699_v43 = vld [vmem:[%s14205_s27 + $0x2e78] sm:$0xff]  ;;  %v13717_v46 = vcombine.high %v1694_v39, %v1698_v40  ;;  %v1754_v34 = vld [vmem:[%s14205_s27 + $0x3030] sm:$0xff] }
 0x5ef   : > { %v13719_v47 = vcombine.high %v1695_v41, %v1699_v43  ;;  %v13718_v54 = vcombine.low %v1695_v41, %v1699_v43  ;;  %v1758_v41 = vld [vmem:[%s14205_s27 + $0x3050] sm:$0xff] }
 0x5f0   : > { %11385 = vmatpush1.bf16.msra.mxu0 %v13652_v50  ;;  %11944 = vmatpush1.bf16.msra.mxu1 %v13654_v51  ;;  %v1706_v50 = vld [vmem:[%s14205_s27 + $0x2eb0] sm:$0xff]  ;;  %v1703_v51 = vld [vmem:[%s14205_s27 + $0x2e98] sm:$0xff] }
 0x5f1   : > { %11386 = vmatprep.subr.bf16.mxu0 %v13661_v52  ;;  %11945 = vmatprep.subr.bf16.mxu1 %v13663_v53  ;;  %v1707_v52 = vld [vmem:[%s14205_s27 + $0x2eb8] sm:$0xff]  ;;  %v13716_v53 = vcombine.low %v1694_v39, %v1698_v40  ;;  %v13725_v55 = vcombine.high %v1702_v49, %v1706_v50  ;;  %v13773_v39 = vcombine.high %v1750_v33, %v1754_v34  ;;  %v1762_v43 = vld [vmem:[%s14205_s27 + $0x3070] sm:$0xff] }
 0x5f2   : > { %v13727_v56 = vcombine.high %v1703_v51, %v1707_v52 }
 0x5f4   : > { %11387 = vmatpush1.bf16.msra.mxu0 %v13660_v59  ;;  %11946 = vmatpush1.bf16.msra.mxu1 %v13662_v60  ;;  %v1711_v59 = vld [vmem:[%s14205_s27 + $0x2ed8] sm:$0xff] }
 0x5f5   : > { %11388 = vmatprep.subr.bf16.mxu0 %v13669_v61  ;;  %11947 = vmatprep.subr.bf16.mxu1 %v13671_v62  ;;  %v1715_v60 = vld [vmem:[%s14205_s27 + $0x2ef8] sm:$0xff]  ;;  %v13724_v61 = vcombine.low %v1702_v49, %v1706_v50  ;;  %v13726_v62 = vcombine.low %v1703_v51, %v1707_v52  ;;  %v13781_v49 = vcombine.high %v1758_v41, %v1762_v43  ;;  %v1766_v51 = vld [vmem:[%s14205_s27 + $0x3090] sm:$0xff] }
 0x5f6   : > { %v13735_v0 = vcombine.high %v1711_v59, %v1715_v60  ;;  %v1770_v52 = vld [vmem:[%s14205_s27 + $0x30b0] sm:$0xff] }
 0x5f8   : > { %11389 = vmatpush1.bf16.msra.mxu0 %v13668_v3  ;;  %11948 = vmatpush1.bf16.msra.mxu1 %v13670_v4  ;;  %v1719_v3 = vld [vmem:[%s14205_s27 + $0x2f18] sm:$0xff] }
 0x5f9   : > { %11390 = vmatprep.subr.bf16.mxu0 %v13677_v5  ;;  %11949 = vmatprep.subr.bf16.mxu1 %v13679_v6  ;;  %v1723_v4 = vld [vmem:[%s14205_s27 + $0x2f38] sm:$0xff]  ;;  %v13732_v5 = vcombine.low %v1710_v57, %v1714_v58  ;;  %v13734_v6 = vcombine.low %v1711_v59, %v1715_v60  ;;  %v13789_v58 = vcombine.high %v1766_v51, %v1770_v52  ;;  %v1774_v60 = vld [vmem:[%s14205_s27 + $0x30d0] sm:$0xff] }
 0x5fa   : > { %v13743_v8 = vcombine.high %v1719_v3, %v1723_v4 }
 0x5fc   : > { %11391 = vmatpush1.bf16.msra.mxu0 %v13676_v11  ;;  %11950 = vmatpush1.bf16.msra.mxu1 %v13678_v12  ;;  %v1727_v11 = vld [vmem:[%s14205_s27 + $0x2f58] sm:$0xff] }
 0x5fd   : > { %11392 = vmatprep.subr.bf16.mxu0 %v13685_v13  ;;  %11951 = vmatprep.subr.bf16.mxu1 %v13687_v14  ;;  %v1731_v12 = vld [vmem:[%s14205_s27 + $0x2f78] sm:$0xff]  ;;  %v13740_v13 = vcombine.low %v1718_v1, %v1722_v2  ;;  %v13742_v14 = vcombine.low %v1719_v3, %v1723_v4 }
 0x5fe   : > { %v13751_v16 = vcombine.high %v1727_v11, %v1731_v12 }
 0x600   : > { %11393 = vmatpush1.bf16.msra.mxu0 %v13684_v19  ;;  %11952 = vmatpush1.bf16.msra.mxu1 %v13686_v20  ;;  %v1735_v19 = vld [vmem:[%s14205_s27 + $0x2f98] sm:$0xff] }
 0x601   : > { %11394 = vmatprep.subr.bf16.mxu0 %v13693_v21  ;;  %11953 = vmatprep.subr.bf16.mxu1 %v13695_v22  ;;  %v1739_v20 = vld [vmem:[%s14205_s27 + $0x2fb8] sm:$0xff]  ;;  %v13748_v21 = vcombine.low %v1726_v9, %v1730_v10  ;;  %v13750_v22 = vcombine.low %v1727_v11, %v1731_v12  ;;  %v1812_v9 = vsub.s32 7, %v15307_v42  ;;  %v14122_v10 = vld [vmem:[%s15312_s7] sm:$0xff]  ;;  %s13825_s7 = sshll.u32 (%p14193_p4), %s14181_s15, 5 }
 0x602   : > { %v13759_v24 = vcombine.high %v1735_v19, %v1739_v20  ;;  %s12108_s9 = scalar_lea.vmem (%p14193_p4), %s15999_s3, %s13825_s7 }
 0x604   : > { %11395 = vmatpush1.bf16.msra.mxu0 %v13692_v27  ;;  %11954 = vmatpush1.bf16.msra.mxu1 %v13694_v28  ;;  %v1743_v27 = vld [vmem:[%s14205_s27 + $0x2fd8] sm:$0xff] }
 0x605   : > { %11396 = vmatprep.subr.bf16.mxu0 %v13701_v29  ;;  %11955 = vmatprep.subr.bf16.mxu1 %v13703_v30  ;;  %v1747_v28 = vld [vmem:[%s14205_s27 + $0x2ff8] sm:$0xff]  ;;  %v13756_v29 = vcombine.low %v1734_v17, %v1738_v18  ;;  %v13758_v30 = vcombine.low %v1735_v19, %v1739_v20 }
 0x606   : > { %v13767_v32 = vcombine.high %v1743_v27, %v1747_v28 }
 0x608   : > { %11397 = vmatpush1.bf16.msra.mxu0 %v13700_v35  ;;  %11956 = vmatpush1.bf16.msra.mxu1 %v13702_v36  ;;  %v1751_v35 = vld [vmem:[%s14205_s27 + $0x3018] sm:$0xff] }
 0x609   : > { %11398 = vmatprep.subr.bf16.mxu0 %v13709_v37  ;;  %11957 = vmatprep.subr.bf16.mxu1 %v13711_v38  ;;  %v1755_v36 = vld [vmem:[%s14205_s27 + $0x3038] sm:$0xff]  ;;  %v13764_v37 = vcombine.low %v1742_v25, %v1746_v26  ;;  %v13766_v38 = vcombine.low %v1743_v27, %v1747_v28 }
 0x60a   : > { %v13775_v40 = vcombine.high %v1751_v35, %v1755_v36 }
 0x60c   : > { %11399 = vmatpush1.bf16.msra.mxu0 %v13708_v44  ;;  %11958 = vmatpush1.bf16.msra.mxu1 %v13710_v45  ;;  %v1759_v44 = vld [vmem:[%s14205_s27 + $0x3058] sm:$0xff] }
 0x60d   : > { %11400 = vmatprep.subr.bf16.mxu0 %v13717_v46  ;;  %11959 = vmatprep.subr.bf16.mxu1 %v13719_v47  ;;  %v1763_v45 = vld [vmem:[%s14205_s27 + $0x3078] sm:$0xff]  ;;  %v13772_v46 = vcombine.low %v1750_v33, %v1754_v34  ;;  %v13774_v47 = vcombine.low %v1751_v35, %v1755_v36 }
 0x60e   : > { %v13783_v50 = vcombine.high %v1759_v44, %v1763_v45  ;;  %v13782_v57 = vcombine.low %v1759_v44, %v1763_v45  ;;  %v12123_v44 = vld [vmem:[%s15343_s12 + $0x8] sm:$0xff] (%p14193_p4) }
 0x60f   : > { %12124 = vst [vmem:[%s12108_s9 + $0x8] sm:$0xff] (%p14193_p4), %v12123_v44 }
 0x610   : > { %11401 = vmatpush1.bf16.msra.mxu0 %v13716_v53  ;;  %11960 = vmatpush1.bf16.msra.mxu1 %v13718_v54  ;;  %v14120_v53 = vld [vmem:[%s15996_s0 + $0x58] ss:$100 sps:$4 sm:$0xff]  }
 0x611   : > { %11402 = vmatprep.subr.bf16.mxu0 %v13725_v55  ;;  %11961 = vmatprep.subr.bf16.mxu1 %v13727_v56  ;;  %v1767_v54 = vld [vmem:[%s14205_s27 + $0x3098] sm:$0xff]  ;;  %v13780_v56 = vcombine.low %v1758_v41, %v1762_v43  ;;  %v12121_v43 = vld [vmem:[%s15343_s12] sm:$0xff] (%p14193_p4) }
 0x612   : > { %v1771_v55 = vld [vmem:[%s14205_s27 + $0x30b8] sm:$0xff]  ;;  %12122 = vst [vmem:[%s12108_s9] sm:$0xff] (%p14193_p4), %v12121_v43 }
 0x613   : > { %v13791_v59 = vcombine.high %v1767_v54, %v1771_v55  ;;  %v13790_v1 = vcombine.low %v1767_v54, %v1771_v55 }
 0x614   : > { %11403 = vmatpush1.bf16.msra.mxu0 %v13724_v61  ;;  %11962 = vmatpush1.bf16.msra.mxu1 %v13726_v62  ;;  %v1778_v61 = vld [vmem:[%s14205_s27 + $0x30f0] sm:$0xff]  ;;  %v1775_v62 = vld [vmem:[%s14205_s27 + $0x30d8] sm:$0xff] }
 0x615   : > { %11404 = vmatprep.subr.bf16.mxu0 %v13733_v63  ;;  %11963 = vmatprep.subr.bf16.mxu1 %v13735_v0  ;;  %v1779_v63 = vld [vmem:[%s14205_s27 + $0x30f8] sm:$0xff]  ;;  %v13788_v0 = vcombine.low %v1766_v51, %v1770_v52  ;;  %v13797_v2 = vcombine.high %v1774_v60, %v1778_v61  ;;  %v13796_v4 = vcombine.low %v1774_v60, %v1778_v61 }
 0x616   : > { %v13799_v3 = vcombine.high %v1775_v62, %v1779_v63 }
 0x618   : > { %11405 = vmatpush1.bf16.msra.mxu0 %v13732_v5  ;;  %11964 = vmatpush1.bf16.msra.mxu1 %v13734_v6  ;;  %v13798_v5 = vcombine.low %v1775_v62, %v1779_v63  ;;  %v1800_v6 = vsub.s32 4, %v15307_v42 }
 0x619   : > { %11406 = vmatprep.subr.bf16.mxu0 %v13741_v7  ;;  %11965 = vmatprep.subr.bf16.mxu1 %v13743_v8  ;;  %v1808_v7 = vsub.s32 6, %v15307_v42  ;;  %v1804_v8 = vsub.s32 5, %v15307_v42 }
 0x61a   : > { %v1801_v11 = vrot.slane %v14122_v10, %v1800_v6 }
 0x61b   : > { %v1809_v12 = vrot.slane %v14122_v10, %v1808_v7 }
 0x61c   : > { %11407 = vmatpush1.bf16.msra.mxu0 %v13740_v13  ;;  %11966 = vmatpush1.bf16.msra.mxu1 %v13742_v14  ;;  %v1805_v13 = vrot.slane %v14122_v10, %v1804_v8  ;;  %v1813_v14 = vrot.slane %v14122_v10, %v1812_v9 }
 0x61d   : > { %11408 = vmatprep.subr.bf16.mxu0 %v13749_v15  ;;  %11967 = vmatprep.subr.bf16.mxu1 %v13751_v16 }
 0x620   : > { %11409 = vmatpush1.bf16.msra.mxu0 %v13748_v21  ;;  %11968 = vmatpush1.bf16.msra.mxu1 %v13750_v22 }
 0x621   : > { %11410 = vmatprep.subr.bf16.mxu0 %v13757_v23  ;;  %11969 = vmatprep.subr.bf16.mxu1 %v13759_v24 }
 0x624   : > { %11411 = vmatpush1.bf16.msra.mxu0 %v13756_v29  ;;  %11970 = vmatpush1.bf16.msra.mxu1 %v13758_v30 }
 0x625   : > { %11412 = vmatprep.subr.bf16.mxu0 %v13765_v31  ;;  %11971 = vmatprep.subr.bf16.mxu1 %v13767_v32 }
 0x628   : > { %11413 = vmatpush1.bf16.msra.mxu0 %v13764_v37  ;;  %11972 = vmatpush1.bf16.msra.mxu1 %v13766_v38 }
 0x629   : > { %11425 = vmatprep.subr.bf16.mxu0 %v13773_v39  ;;  %11984 = vmatprep.subr.bf16.mxu1 %v13775_v40 }
 0x62b   : > { %11415 = vmatmul.mubr.bf16.vlgmr.msra.gmra.mrb[4].mxu0 %v14120_v53  ;;  %11974 = vmatmul.mubr.bf16.vlgmr.msra.gmra.mrb[4].mxu1 %v14120_v53 }
 0x62c   : > { %11426 = vmatpush1.bf16.msra.mxu0 %v13772_v46  ;;  %11985 = vmatpush1.bf16.msra.mxu1 %v13774_v47  ;;  %v12129_v47 = vld [vmem:[%s15343_s12 + $0x20] sm:$0xff] (%p14193_p4) }
 0x62d   : > { %11427 = vmatprep.subr.bf16.mxu0 %v13781_v49  ;;  %11986 = vmatprep.subr.bf16.mxu1 %v13783_v50  ;;  %v12131_v49 = vld [vmem:[%s15343_s12 + $0x28] sm:$0xff] (%p14193_p4)  ;;  %12130 = vst [vmem:[%s12108_s9 + $0x40] sm:$0xff] (%p14193_p4), %v12129_v47 }
 0x62e   : > { %11457 = vmatprep.mubr.bf16.mxu0 %v14147_v48  ;;  %12016 = vmatprep.mubr.bf16.mxu1 %v14147_v48  ;;  %v14121_v48 = vld [vmem:[%s15996_s0 + $0x60] ss:$100 sps:$4 sm:$0xff]   ;;  %12132 = vst [vmem:[%s12108_s9 + $0x48] sm:$0xff] (%p14193_p4), %v12131_v49 }
 0x630   : > { %11428 = vmatpush1.bf16.msra.mxu0 %v13780_v56  ;;  %11987 = vmatpush1.bf16.msra.mxu1 %v13782_v57 }
 0x631   : > { %11429 = vmatprep.subr.bf16.mxu0 %v13789_v58  ;;  %11988 = vmatprep.subr.bf16.mxu1 %v13791_v59 }
 0x634   : > { %11430 = vmatpush1.bf16.msra.mxu0 %v13788_v0  ;;  %11989 = vmatpush1.bf16.msra.mxu1 %v13790_v1 }
 0x635   : > { %11431 = vmatprep.subr.bf16.mxu0 %v13797_v2  ;;  %11990 = vmatprep.subr.bf16.mxu1 %v13799_v3 }
 0x638   : > { %11432 = vmatpush1.bf16.msra.mxu0 %v13796_v4  ;;  %11991 = vmatpush1.bf16.msra.mxu1 %v13798_v5 }
 0x63b   : > { %13802 = vmatmul.mubr.msk.bf16.vlgmr.msra.gmra.mrb[4].mxu0 %vm9787_vm0, %v14121_v48  ;;  %13803 = vmatmul.mubr.msk.bf16.vlgmr.msra.gmra.mrb[4].mxu1 %vm9787_vm0, %v14121_v48 }
 0x70e   : > { %v11459_v15 = vpop.f32.mrb[4].mxu0  ;;  %v12018_v17 = vpop.f32.mrb[4].mxu1 }
 0x70f   : > { %v13834_v16 = vadd.f32 %v11459_v15, %v1801_v11  ;;  %v11461_v18 = vpop.f32.mrb[5].mxu0  ;;  %v13838_v19 = vadd.f32 %v12018_v17, %v1809_v12  ;;  %v12020_v21 = vpop.f32.mrb[5].mxu1 }
 0x710   : > { %v13835_v20 = vadd.f32 %v11461_v18, %v1805_v13  ;;  %v11463_v22 = vpop.f32.mrb[6].mxu0  ;;  %v13839_v24 = vadd.f32 %v12020_v21, %v1813_v14  ;;  %v12022_v26 = vpop.f32.mrb[6].mxu1 }
 0x711   : > { %v12031_v23 = vmax.f32 %v13834_v16, 0.0  ;;  %v13836_v25 = vadd.f32 %v11463_v22, %v1801_v11  ;;  %v11465_v27 = vpop.f32.mrb[7].mxu0  ;;  %v12033_v42 = vmax.f32 %v13838_v19, 0.0  ;;  %v13840_v29 = vadd.f32 %v12022_v26, %v1809_v12  ;;  %v12024_v31 = vpop.f32.mrb[7].mxu1 }
 0x712   : > { %v12032_v28 = vmax.f32 %v13835_v20, 0.0  ;;  %v13837_v30 = vadd.f32 %v11465_v27, %v1805_v13  ;;  %v12034_v32 = vmax.f32 %v13839_v24, 0.0  ;;  %v13841_v34 = vadd.f32 %v12024_v31, %v1813_v14  ;;  %12105 = sbr.rel (!%p14193_p4) target bundleno = 1825 (0x721), region = 36 }
 0x713   : > { %v12039_v33 = vmax.f32 %v13836_v25, 0.0  ;;  %v12041_v36 = vmax.f32 %v13840_v29, 0.0 }
 0x714   : > { %v13819_v35 = vpack.c.bf16 %v12032_v28, %v12031_v23  ;;  %v12040_v37 = vmax.f32 %v13837_v30, 0.0  ;;  %v13820_v38 = vpack.c.bf16 %v12034_v32, %v12033_v42  ;;  %v12042_v39 = vmax.f32 %v13841_v34, 0.0 }
 0x716   : > { %12093 = vst [vmem:[%s15343_s12 + $0x10] sm:$0xff] %v13819_v35  ;;  %v13823_v40 = vpack.c.bf16 %v12040_v37, %v12039_v33  ;;  %12094 = vst [vmem:[%s15343_s12 + $0x18] sm:$0xff] %v13820_v38  ;;  %v13824_v41 = vpack.c.bf16 %v12042_v39, %v12041_v36 }
 0x718   : > { %12097 = vst [vmem:[%s15343_s12 + $0x30] sm:$0xff] %v13823_v40  ;;  %12098 = vst [vmem:[%s15343_s12 + $0x38] sm:$0xff] %v13824_v41 }
 0x71d   : > { %v12125_v45 = vld [vmem:[%s15343_s12 + $0x10] sm:$0xff]  ;;  %v12127_v46 = vld [vmem:[%s15343_s12 + $0x18] sm:$0xff] }
 0x71e   : > { %12126 = vst [vmem:[%s12108_s9 + $0x10] sm:$0xff] %v12125_v45  ;;  %12128 = vst [vmem:[%s12108_s9 + $0x18] sm:$0xff] %v12127_v46 }
 0x71f   : > { %v12133_v50 = vld [vmem:[%s15343_s12 + $0x30] sm:$0xff]  ;;  %v12135_v51 = vld [vmem:[%s15343_s12 + $0x38] sm:$0xff] }
 0x720   : > { %12134 = vst [vmem:[%s12108_s9 + $0x50] sm:$0xff] %v12133_v50  ;;  %12136 = vst [vmem:[%s12108_s9 + $0x58] sm:$0xff] %v12135_v51 }
 0x721 PF: > { %p10_p9 = scmp.ge.s32.totalorder %s14183_s16, 4   ;;  %s16002_s12 = smov %s14141_s13 }
 0x722   : > { %s16003_s13 = smov %s14191_s19  ;;  %s16004_s14 = smov %s14183_s16 }
 0x723   :  { %12 = sbr.rel (!%p10_p9) target bundleno = 2 (0x2), region = 88 }

</bundles_post_ra>
